<compile_context>
chip_gen: v5e
topology: v5e:2x2
jax: 0.10.0
libtpu: 0.0.40
codegen_flags: <defaults>
</compile_context>

<pallas_src>
import functools

import jax
import jax.numpy as jnp
from jax.experimental import pallas as pl
from jax.experimental.pallas import tpu as pltpu

C_LOCAL = 64
C_GLOBAL = 1024
C_IN = C_LOCAL + C_GLOBAL            # 1088, fixed by the module
HIDDEN = (512, 256, 128)


# ----------------------------------------------------------------------------
# Kernels (channels on sublanes, points on lanes; every layer is W @ X).
# ----------------------------------------------------------------------------
def _as_bf16(x):
    return x if x.dtype == jnp.bfloat16 else x.astype(jnp.bfloat16)


def _act(pre_f32, bf16_tanh):
    """Bias-folded tanh -> bf16 value ready to feed the next MXU op."""
    if bf16_tanh:
        # v6e/v7x: EUP/VPU have bf16 -> ~2x tanh rate, halves the temporaries.
        return jnp.tanh(pre_f32.astype(jnp.bfloat16))
    # v5e (and unknown chips): keep tanh in f32, cast only for the next dot.
    return jnp.tanh(pre_f32).astype(jnp.bfloat16)


def _decoder_stream_kernel(xl_ref, xg_ref,
                           w1l_ref, w1g_ref, b1_ref,
                           w2_ref, b2_ref, w3_ref, b3_ref, w4_ref, b4_ref,
                           o_ref, *, bf16_tanh):
    """General path: the 1024-ch global feature is streamed per point.

    xl_ref: (64, TN), xg_ref: (1024, TN); weights (C_out, C_in) bf16;
    biases (C_out, 1) f32; o_ref: (n_pde, TN).
    """
    xl = _as_bf16(xl_ref[...])
    xg = _as_bf16(xg_ref[...])
    # Layer 1: fused "concat" = sum of two partial matmuls, f32 accumulate.
    pre = (jnp.dot(w1l_ref[...], xl, preferred_element_type=jnp.float32)
           + jnp.dot(w1g_ref[...], xg, preferred_element_type=jnp.float32)
           + b1_ref[...])
    h = _act(pre, bf16_tanh)                                            # (512, TN)
    h = _act(jnp.dot(w2_ref[...], h, preferred_element_type=jnp.float32)
             + b2_ref[...], bf16_tanh)                                  # (256, TN)
    h = _act(jnp.dot(w3_ref[...], h, preferred_element_type=jnp.float32)
             + b3_ref[...], bf16_tanh)                                  # (128, TN)
    out = jnp.dot(w4_ref[...], h, preferred_element_type=jnp.float32) + b4_ref[...]
    o_ref[...] = out.astype(o_ref.dtype)                                # (n_pde, TN)


def _decoder_hoisted_kernel(xl_ref, g1_ref,
                            w1l_ref, w2_ref, b2_ref, w3_ref, b3_ref,
                            w4_ref, b4_ref, o_ref, *, bf16_tanh):
    """PIPN fast path: g1 = W1g @ g + b1 precomputed per batch, (512, 1) f32."""
    xl = _as_bf16(xl_ref[...])
    pre = jnp.dot(w1l_ref[...], xl, preferred_element_type=jnp.float32) + g1_ref[...]
    h = _act(pre, bf16_tanh)                                            # (512, TN)
    h = _act(jnp.dot(w2_ref[...], h, preferred_element_type=jnp.float32)
             + b2_ref[...], bf16_tanh)                                  # (256, TN)
    h = _act(jnp.dot(w3_ref[...], h, preferred_element_type=jnp.float32)
             + b3_ref[...], bf16_tanh)                                  # (128, TN)
    out = jnp.dot(w4_ref[...], h, preferred_element_type=jnp.float32) + b4_ref[...]
    o_ref[...] = out.astype(o_ref.dtype)


# ----------------------------------------------------------------------------
# Wrapper
# ----------------------------------------------------------------------------
def _chip_defaults():
    """(tile_n, vmem_limit_bytes, bf16_tanh) per TPU generation.

    v5e/v6e: 128 MiB physical VMEM -> big tiles + 96 MiB scoped limit.
    v7x (and unknown): only 64 MiB/TC -> tile capped at 1024, 48 MiB limit.
    bf16 tanh only where the EUP/VPU have a bf16 path (v6e/v7x).
    """
    tile_n, vmem_limit, bf16_tanh = 1024, 48 * 1024 * 1024, False  # safe anywhere
    try:
        kind = jax.devices()[0].device_kind.lower()
    except Exception:
        return tile_n, vmem_limit, bf16_tanh
    if "v5" in kind or "v6" in kind:
        tile_n, vmem_limit = 2048, 96 * 1024 * 1024
    if "v6" in kind or "v7" in kind:
        bf16_tanh = True
    return tile_n, vmem_limit, bf16_tanh


def decoder_forward(local_features, global_feature, params, *, tile_n=None):
    """local_features: (B, 64, N).

    global_feature: (B, 1024, N) -> faithful streaming path, or
                    (B, 1024) / (B, 1024, 1) -> PIPN point-invariant fast path
                    (W1g @ g hoisted out of the kernel).
    Returns (B, n_pde, N) float32 in the PyTorch NCW layout.
    """
    (w1l, w1g, b1), (w2, b2), (w3, b3), (w4, b4) = params
    n_pde = w4.shape[0]

    B, cl, N = local_features.shape
    assert cl == C_LOCAL

    default_tile, vmem_limit, bf16_tanh = _chip_defaults()
    if tile_n is None:
        tile_n = default_tile
    # Lane-multiple point tile, clamped to N rounded up to 128; the cdiv grid
    # handles a ragged tail (per-point math => masked store drops OOB columns).
    tile_n = max(128, min(tile_n, pl.cdiv(N, 128) * 128))
    grid = (B, pl.cdiv(N, tile_n))   # B >= 2 keeps both v7x TensorCores busy.

    # Constant index_map for weights/biases: Pallas keeps the same block
    # resident and does not re-DMA it per grid step (so no Buffered(1) needed).
    full = lambda b, n: (0, 0)
    nbytes = lambda a: a.size * a.dtype.itemsize

    compiler_params = pltpu.CompilerParams(
        dimension_semantics=("parallel", "parallel"),
        vmem_limit_bytes=vmem_limit)

    hoisted = (global_feature.ndim == 2) or (global_feature.shape[-1] == 1)

    if hoisted:
        g = global_feature.reshape(B, C_GLOBAL)
        # Once-per-batch tiny f32 matmul (B x 512 x 1024): removes the 1024-ch
        # HBM stream and ~73% of the per-point MXU FLOPs from the kernel.
        g1 = (jnp.einsum('oc,bc->bo', w1g.astype(jnp.float32),
                         g.astype(jnp.float32)) + b1[:, 0])[..., None]  # (B,512,1)
        g1 = g1.astype(jnp.float32)

        flops = 2 * B * N * (C_LOCAL * 512 + 512 * 256 + 256 * 128 + 128 * n_pde)
        bytes_accessed = (nbytes(local_features) + nbytes(g1)
                          + sum(nbytes(w) for w in (w1l, w2, w3, w4))
                          + sum(nbytes(v) for v in (b2, b3, b4))
                          + B * n_pde * N * 4)

        kernel = functools.partial(_decoder_hoisted_kernel, bf16_tanh=bf16_tanh)
        return pl.pallas_call(
            kernel,
            out_shape=jax.ShapeDtypeStruct((B, n_pde, N), jnp.float32),
            grid_spec=pltpu.PrefetchScalarGridSpec(
                num_scalar_prefetch=0,
                grid=grid,
                in_specs=[
                    pl.BlockSpec((None, C_LOCAL, tile_n), lambda b, n: (b, 0, n)),
                    pl.BlockSpec((None, HIDDEN[0], 1), lambda b, n: (b, 0, 0)),
                    pl.BlockSpec(w1l.shape, full),
                    pl.BlockSpec(w2.shape, full), pl.BlockSpec(b2.shape, full),
                    pl.BlockSpec(w3.shape, full), pl.BlockSpec(b3.shape, full),
                    pl.BlockSpec(w4.shape, full), pl.BlockSpec(b4.shape, full),
                ],
                out_specs=pl.BlockSpec((None, n_pde, tile_n), lambda b, n: (b, 0, n)),
            ),
            compiler_params=compiler_params,
            cost_estimate=pl.CostEstimate(
                flops=flops, transcendentals=B * N * sum(HIDDEN),
                bytes_accessed=bytes_accessed),
        )(local_features, g1, w1l, w2, b2, w3, b3, w4, b4)

    # --- faithful streaming path: global feature genuinely varies per point ---
    assert global_feature.shape == (B, C_GLOBAL, N)

    flops = 2 * B * N * (C_IN * 512 + 512 * 256 + 256 * 128 + 128 * n_pde)
    bytes_accessed = (nbytes(local_features) + nbytes(global_feature)
                      + sum(nbytes(w) for w in (w1l, w1g, w2, w3, w4))
                      + sum(nbytes(v) for v in (b1, b2, b3, b4))
                      + B * n_pde * N * 4)

    kernel = functools.partial(_decoder_stream_kernel, bf16_tanh=bf16_tanh)
    return pl.pallas_call(
        kernel,
        out_shape=jax.ShapeDtypeStruct((B, n_pde, N), jnp.float32),
        grid_spec=pltpu.PrefetchScalarGridSpec(
            num_scalar_prefetch=0,
            grid=grid,
            in_specs=[
                pl.BlockSpec((None, C_LOCAL, tile_n), lambda b, n: (b, 0, n)),
                pl.BlockSpec((None, C_GLOBAL, tile_n), lambda b, n: (b, 0, n)),
                pl.BlockSpec(w1l.shape, full), pl.BlockSpec(w1g.shape, full),
                pl.BlockSpec(b1.shape, full),
                pl.BlockSpec(w2.shape, full), pl.BlockSpec(b2.shape, full),
                pl.BlockSpec(w3.shape, full), pl.BlockSpec(b3.shape, full),
                pl.BlockSpec(w4.shape, full), pl.BlockSpec(b4.shape, full),
            ],
            out_specs=pl.BlockSpec((None, n_pde, tile_n), lambda b, n: (b, 0, n)),
        ),
        compiler_params=compiler_params,
        cost_estimate=pl.CostEstimate(
            flops=flops, transcendentals=B * N * sum(HIDDEN),
            bytes_accessed=bytes_accessed),
    )(local_features, global_feature,
      w1l, w1g, b1, w2, b2, w3, b3, w4, b4)


# ----------------------------------------------------------------------------
# Parameters & reference
# ----------------------------------------------------------------------------
def init_params(key, n_pde):
    """Deterministic synthetic weights.

    Stored as (C_out, C_in) in bf16 for `W @ X`; the first conv's weight is
    split into local (C_out, 64) and global (C_out, 1024) halves so the channel
    concat never has to be materialized. Biases are (C_out, 1) f32.
    """
    dims = (C_IN,) + HIDDEN + (n_pde,)
    params = []
    for i in range(len(dims) - 1):
        cin, cout = dims[i], dims[i + 1]
        key, kw, kb = jax.random.split(key, 3)
        bound = 1.0 / jnp.sqrt(cin)  # mimic PyTorch Conv1d default uniform bound
        w = jax.random.uniform(kw, (cout, cin), jnp.float32, -bound, bound)
        b = jax.random.uniform(kb, (cout, 1), jnp.float32, -bound, bound)
        w = w.astype(jnp.bfloat16)
        if i == 0:
            params.append((w[:, :C_LOCAL], w[:, C_LOCAL:], b))
        else:
            params.append((w, b))
    return params


def _reference(local_features, global_feature, params):
    """Pure-JAX f32 reference of the same forward pass (same bf16 weights)."""
    (w1l, w1g, b1), (w2, b2), (w3, b3), (w4, b4) = params
    f32 = lambda a: a.astype(jnp.float32)
    h = (jnp.einsum('oc,bcn->bon', f32(w1l), local_features)
         + jnp.einsum('oc,bcn->bon', f32(w1g), global_feature) + b1)
    h = jnp.tanh(h)
    h = jnp.tanh(jnp.einsum('oc,bcn->bon', f32(w2), h) + b2)
    h = jnp.tanh(jnp.einsum('oc,bcn->bon', f32(w3), h) + b3)
    return jnp.einsum('oc,bcn->bon', f32(w4), h) + b4


if __name__ == "__main__":
    key = jax.random.PRNGKey(0)
    B, N, n_pde = 2, 256, 4
    k1, k2, k3 = jax.random.split(key, 3)

    local_features = jax.random.normal(k1, (B, C_LOCAL, N), jnp.float32)
    # PIPN-style global feature: one 1024-vector per cloud, tiled along points.
    g_vec = jax.random.normal(k2, (B, C_GLOBAL), jnp.float32)
    global_feature = jnp.broadcast_to(g_vec[:, :, None], (B, C_GLOBAL, N))
    params = init_params(k3, n_pde)

    ref = _reference(local_features, global_feature, params)

    # 1) Faithful streaming path: exact module semantics for arbitrary inputs.
    out_stream = jax.block_until_ready(
        decoder_forward(local_features, global_feature, params))
    # 2) Hoisted fast path: same result when the global feature is per-cloud.
    out_hoisted = jax.block_until_ready(
        decoder_forward(local_features, g_vec, params))

    assert out_stream.shape == (B, n_pde, N)
    assert out_hoisted.shape == (B, n_pde, N)
    # bf16 matmul inputs (f32 accumulate) => looser tolerance than pure f32.
    assert jnp.allclose(out_stream, ref, atol=5e-2, rtol=5e-2), (
        float(jnp.max(jnp.abs(out_stream - ref))))
    assert jnp.allclose(out_hoisted, ref, atol=5e-2, rtol=5e-2), (
        float(jnp.max(jnp.abs(out_hoisted - ref))))

    print("KERNEL_OK")
</pallas_src>

<mosaic_0001>
module attributes {stable_mosaic.version = 11 : i64} {
  func.func @_decoder_stream_kernel(%arg0: i32, %arg1: i32, %arg2: memref<1x64x256xf32, #tpu.memory_space<vmem>>, %arg3: memref<1x1024x256xf32, #tpu.memory_space<vmem>>, %arg4: memref<512x64xbf16, #tpu.memory_space<vmem>>, %arg5: memref<512x1024xbf16, #tpu.memory_space<vmem>>, %arg6: memref<512x1xf32, #tpu.memory_space<vmem>>, %arg7: memref<256x512xbf16, #tpu.memory_space<vmem>>, %arg8: memref<256x1xf32, #tpu.memory_space<vmem>>, %arg9: memref<128x256xbf16, #tpu.memory_space<vmem>>, %arg10: memref<128x1xf32, #tpu.memory_space<vmem>>, %arg11: memref<4x128xbf16, #tpu.memory_space<vmem>>, %arg12: memref<4x1xf32, #tpu.memory_space<vmem>>, %arg13: memref<1x4x256xf32, #tpu.memory_space<vmem>>) attributes {dimension_semantics = [#tpu.dimension_semantics<parallel>, #tpu.dimension_semantics<parallel>], iteration_bounds = array<i64: 2, 1>, scalar_prefetch = 0 : i64, scratch_operands = 0 : i64, tpu.core_type = #tpu.core_type<tc>, window_params = [{transform_indices = @transform_0, window_bounds = array<i64: 1, 64, 256>}, {transform_indices = @transform_1, window_bounds = array<i64: 1, 1024, 256>}, {pipeline_mode = #tpu.pipeline_mode<synchronous>, transform_indices = @transform_2, window_bounds = array<i64: 512, 64>}, {pipeline_mode = #tpu.pipeline_mode<synchronous>, transform_indices = @transform_3, window_bounds = array<i64: 512, 1024>}, {pipeline_mode = #tpu.pipeline_mode<synchronous>, transform_indices = @transform_4, window_bounds = array<i64: 512, 1>}, {pipeline_mode = #tpu.pipeline_mode<synchronous>, transform_indices = @transform_5, window_bounds = array<i64: 256, 512>}, {pipeline_mode = #tpu.pipeline_mode<synchronous>, transform_indices = @transform_6, window_bounds = array<i64: 256, 1>}, {pipeline_mode = #tpu.pipeline_mode<synchronous>, transform_indices = @transform_7, window_bounds = array<i64: 128, 256>}, {pipeline_mode = #tpu.pipeline_mode<synchronous>, transform_indices = @transform_8, window_bounds = array<i64: 128, 1>}, {pipeline_mode = #tpu.pipeline_mode<synchronous>, transform_indices = @transform_9, window_bounds = array<i64: 4, 128>}, {pipeline_mode = #tpu.pipeline_mode<synchronous>, transform_indices = @transform_10, window_bounds = array<i64: 4, 1>}, {transform_indices = @transform_11, window_bounds = array<i64: 1, 4, 256>}]} {
    %c0 = arith.constant 0 : index
    %c0_0 = arith.constant 0 : index
    %c0_1 = arith.constant 0 : index
    %0 = vector.load %arg2[%c0, %c0_0, %c0_1] : memref<1x64x256xf32, #tpu.memory_space<vmem>>, vector<1x64x256xf32>
    %1 = vector.shape_cast %0 : vector<1x64x256xf32> to vector<64x256xf32>
    %2 = arith.truncf %1 : vector<64x256xf32> to vector<64x256xbf16>
    %c0_2 = arith.constant 0 : index
    %c0_3 = arith.constant 0 : index
    %c0_4 = arith.constant 0 : index
    %3 = vector.load %arg3[%c0_2, %c0_3, %c0_4] : memref<1x1024x256xf32, #tpu.memory_space<vmem>>, vector<1x1024x256xf32>
    %4 = vector.shape_cast %3 : vector<1x1024x256xf32> to vector<1024x256xf32>
    %5 = arith.truncf %4 : vector<1024x256xf32> to vector<1024x256xbf16>
    %c0_5 = arith.constant 0 : index
    %c0_6 = arith.constant 0 : index
    %6 = vector.load %arg4[%c0_5, %c0_6] : memref<512x64xbf16, #tpu.memory_space<vmem>>, vector<512x64xbf16>
    %cst = arith.constant dense<0.000000e+00> : vector<512x256xf32>
    %7 = tpu.matmul %6, %2, %cst {dimension_numbers = #tpu.dot_dimension_numbers<[1], [0], [0], [1], [0, 0, 1, 1], [], []>} : vector<512x64xbf16>, vector<64x256xbf16>, vector<512x256xf32> -> vector<512x256xf32>
    %c0_7 = arith.constant 0 : index
    %c0_8 = arith.constant 0 : index
    %8 = vector.load %arg5[%c0_7, %c0_8] : memref<512x1024xbf16, #tpu.memory_space<vmem>>, vector<512x1024xbf16>
    %cst_9 = arith.constant dense<0.000000e+00> : vector<512x256xf32>
    %9 = tpu.matmul %8, %5, %cst_9 {dimension_numbers = #tpu.dot_dimension_numbers<[1], [0], [0], [1], [0, 0, 1, 1], [], []>} : vector<512x1024xbf16>, vector<1024x256xbf16>, vector<512x256xf32> -> vector<512x256xf32>
    %10 = arith.addf %7, %9 : vector<512x256xf32>
    %c0_10 = arith.constant 0 : index
    %c0_11 = arith.constant 0 : index
    %11 = vector.load %arg6[%c0_10, %c0_11] : memref<512x1xf32, #tpu.memory_space<vmem>>, vector<512x1xf32>
    %12 = vector.broadcast %11 : vector<512x1xf32> to vector<512x256xf32>
    %13 = arith.addf %10, %12 : vector<512x256xf32>
    %14 = math.tanh %13 : vector<512x256xf32>
    %15 = arith.truncf %14 : vector<512x256xf32> to vector<512x256xbf16>
    %c0_12 = arith.constant 0 : index
    %c0_13 = arith.constant 0 : index
    %16 = vector.load %arg7[%c0_12, %c0_13] : memref<256x512xbf16, #tpu.memory_space<vmem>>, vector<256x512xbf16>
    %cst_14 = arith.constant dense<0.000000e+00> : vector<256x256xf32>
    %17 = tpu.matmul %16, %15, %cst_14 {dimension_numbers = #tpu.dot_dimension_numbers<[1], [0], [0], [1], [0, 0, 1, 1], [], []>} : vector<256x512xbf16>, vector<512x256xbf16>, vector<256x256xf32> -> vector<256x256xf32>
    %c0_15 = arith.constant 0 : index
    %c0_16 = arith.constant 0 : index
    %18 = vector.load %arg8[%c0_15, %c0_16] : memref<256x1xf32, #tpu.memory_space<vmem>>, vector<256x1xf32>
    %19 = vector.broadcast %18 : vector<256x1xf32> to vector<256x256xf32>
    %20 = arith.addf %17, %19 : vector<256x256xf32>
    %21 = math.tanh %20 : vector<256x256xf32>
    %22 = arith.truncf %21 : vector<256x256xf32> to vector<256x256xbf16>
    %c0_17 = arith.constant 0 : index
    %c0_18 = arith.constant 0 : index
    %23 = vector.load %arg9[%c0_17, %c0_18] : memref<128x256xbf16, #tpu.memory_space<vmem>>, vector<128x256xbf16>
    %cst_19 = arith.constant dense<0.000000e+00> : vector<128x256xf32>
    %24 = tpu.matmul %23, %22, %cst_19 {dimension_numbers = #tpu.dot_dimension_numbers<[1], [0], [0], [1], [0, 0, 1, 1], [], []>} : vector<128x256xbf16>, vector<256x256xbf16>, vector<128x256xf32> -> vector<128x256xf32>
    %c0_20 = arith.constant 0 : index
    %c0_21 = arith.constant 0 : index
    %25 = vector.load %arg10[%c0_20, %c0_21] : memref<128x1xf32, #tpu.memory_space<vmem>>, vector<128x1xf32>
    %26 = vector.broadcast %25 : vector<128x1xf32> to vector<128x256xf32>
    %27 = arith.addf %24, %26 : vector<128x256xf32>
    %28 = math.tanh %27 : vector<128x256xf32>
    %29 = arith.truncf %28 : vector<128x256xf32> to vector<128x256xbf16>
    %c0_22 = arith.constant 0 : index
    %c0_23 = arith.constant 0 : index
    %30 = vector.load %arg11[%c0_22, %c0_23] : memref<4x128xbf16, #tpu.memory_space<vmem>>, vector<4x128xbf16>
    %cst_24 = arith.constant dense<0.000000e+00> : vector<4x256xf32>
    %31 = tpu.matmul %30, %29, %cst_24 {dimension_numbers = #tpu.dot_dimension_numbers<[1], [0], [0], [1], [0, 0, 1, 1], [], []>} : vector<4x128xbf16>, vector<128x256xbf16>, vector<4x256xf32> -> vector<4x256xf32>
    %c0_25 = arith.constant 0 : index
    %c0_26 = arith.constant 0 : index
    %32 = vector.load %arg12[%c0_25, %c0_26] : memref<4x1xf32, #tpu.memory_space<vmem>>, vector<4x1xf32>
    %33 = vector.broadcast %32 : vector<4x1xf32> to vector<4x256xf32>
    %34 = arith.addf %31, %33 : vector<4x256xf32>
    %c0_27 = arith.constant 0 : index
    %c0_28 = arith.constant 0 : index
    %c0_29 = arith.constant 0 : index
    %35 = vector.load %arg13[%c0_27, %c0_28, %c0_29] : memref<1x4x256xf32, #tpu.memory_space<vmem>>, vector<1x4x256xf32>
    %36 = vector.shape_cast %35 : vector<1x4x256xf32> to vector<4x256xf32>
    %37 = vector.shape_cast %34 : vector<4x256xf32> to vector<1x4x256xf32>
    tpu.vector_store %arg13[%c0_27, %c0_28, %c0_29], %37 {strides = array<i32>} : memref<1x4x256xf32, #tpu.memory_space<vmem>>, vector<1x4x256xf32>,
    return
  }
  func.func @transform_0(%arg0: i32, %arg1: i32) -> (i32, i32, i32) {
    %c0_i32 = arith.constant 0 : i32
    %c0_i32_0 = arith.constant 0 : i32
    return %arg0, %c0_i32, %arg1 : i32, i32, i32
  }
  func.func @transform_1(%arg0: i32, %arg1: i32) -> (i32, i32, i32) {
    %c0_i32 = arith.constant 0 : i32
    %c0_i32_0 = arith.constant 0 : i32
    return %arg0, %c0_i32, %arg1 : i32, i32, i32
  }
  func.func @transform_2(%arg0: i32, %arg1: i32) -> (i32, i32) {
    %c0_i32 = arith.constant 0 : i32
    %c0_i32_0 = arith.constant 0 : i32
    %c0_i32_1 = arith.constant 0 : i32
    return %c0_i32, %c0_i32_0 : i32, i32
  }
  func.func @transform_3(%arg0: i32, %arg1: i32) -> (i32, i32) {
    %c0_i32 = arith.constant 0 : i32
    %c0_i32_0 = arith.constant 0 : i32
    %c0_i32_1 = arith.constant 0 : i32
    return %c0_i32, %c0_i32_0 : i32, i32
  }
  func.func @transform_4(%arg0: i32, %arg1: i32) -> (i32, i32) {
    %c0_i32 = arith.constant 0 : i32
    %c0_i32_0 = arith.constant 0 : i32
    %c0_i32_1 = arith.constant 0 : i32
    return %c0_i32, %c0_i32_0 : i32, i32
  }
  func.func @transform_5(%arg0: i32, %arg1: i32) -> (i32, i32) {
    %c0_i32 = arith.constant 0 : i32
    %c0_i32_0 = arith.constant 0 : i32
    %c0_i32_1 = arith.constant 0 : i32
    return %c0_i32, %c0_i32_0 : i32, i32
  }
  func.func @transform_6(%arg0: i32, %arg1: i32) -> (i32, i32) {
    %c0_i32 = arith.constant 0 : i32
    %c0_i32_0 = arith.constant 0 : i32
    %c0_i32_1 = arith.constant 0 : i32
    return %c0_i32, %c0_i32_0 : i32, i32
  }
  func.func @transform_7(%arg0: i32, %arg1: i32) -> (i32, i32) {
    %c0_i32 = arith.constant 0 : i32
    %c0_i32_0 = arith.constant 0 : i32
    %c0_i32_1 = arith.constant 0 : i32
    return %c0_i32, %c0_i32_0 : i32, i32
  }
  func.func @transform_8(%arg0: i32, %arg1: i32) -> (i32, i32) {
    %c0_i32 = arith.constant 0 : i32
    %c0_i32_0 = arith.constant 0 : i32
    %c0_i32_1 = arith.constant 0 : i32
    return %c0_i32, %c0_i32_0 : i32, i32
  }
  func.func @transform_9(%arg0: i32, %arg1: i32) -> (i32, i32) {
    %c0_i32 = arith.constant 0 : i32
    %c0_i32_0 = arith.constant 0 : i32
    %c0_i32_1 = arith.constant 0 : i32
    return %c0_i32, %c0_i32_0 : i32, i32
  }
  func.func @transform_10(%arg0: i32, %arg1: i32) -> (i32, i32) {
    %c0_i32 = arith.constant 0 : i32
    %c0_i32_0 = arith.constant 0 : i32
    %c0_i32_1 = arith.constant 0 : i32
    return %c0_i32, %c0_i32_0 : i32, i32
  }
  func.func @transform_11(%arg0: i32, %arg1: i32) -> (i32, i32, i32) {
    %c0_i32 = arith.constant 0 : i32
    %c0_i32_0 = arith.constant 0 : i32
    return %arg0, %c0_i32, %arg1 : i32, i32, i32
  }
}

</mosaic_0001>

<bundles_post_ra>
// kernel: tpu_custom_call.1
= control target key start
LH: loop header
LB: loop body
LE: loop exit
PB: predicated region body
PF: predicated region fallthrough
CT: control target
= control target key end

     0   :  { %s16225_s0 = inlined_call_operand.hbm [shape: f32[2,64,256], index: 0, kind: input, shape index: {}]   ;;  %s16226_s1 = inlined_call_operand.hbm [shape: f32[2,1024,256], index: 1, kind: input, shape index: {}]   ;;  %s16227_s2 = inlined_call_operand.vmem [shape: bf16[512,64], index: 2, kind: input, shape index: {}]   ;;  %s16228_s3 = inlined_call_operand.hbm [shape: bf16[512,1024], index: 3, kind: input, shape index: {}]   ;;  %s16229_s4 = inlined_call_operand.vmem [shape: f32[512,1], index: 4, kind: input, shape index: {}]   ;;  %s16230_s5 = inlined_call_operand.hbm [shape: bf16[256,512], index: 5, kind: input, shape index: {}]   ;;  %s16231_s6 = inlined_call_operand.vmem [shape: f32[256,1], index: 6, kind: input, shape index: {}]   ;;  %s16232_s7 = inlined_call_operand.hbm [shape: bf16[128,256], index: 7, kind: input, shape index: {}]   ;;  %s16233_s8 = inlined_call_operand.vmem [shape: f32[128,1], index: 8, kind: input, shape index: {}]   ;;  %s16234_s9 = inlined_call_operand.hbm [shape: bf16[4,128], index: 9, kind: input, shape index: {}]   ;;  %s16235_s10 = inlined_call_operand.vmem [shape: f32[4,1], index: 10, kind: input, shape index: {}]   ;;  %s16236_s11 = inlined_call_operand.hbm [shape: f32[2,4,256], index: 11, kind: output, shape index: {}]  }
   0x1   :  { %16580 = sst [smem:[#allocation321_spill]] %s16228_s3 }
   0x2   :  { %16581 = sst [smem:[#allocation322_spill]] %s16230_s5 }
   0x3   :  { %16582 = sst [smem:[#allocation323_spill]] %s16232_s7 }
   0x4   :  { %16583 = sst [smem:[#allocation324_spill]] %s16234_s9 }
   0x5   :  { %16584 = sst [smem:[#allocation325_spill]] %s16236_s11 }
   0x6   :  { %16 = vsyncpa [#allocation3], 0 }
   0x7   :  { %18 = vsyncpa [#allocation3 + $0x1], 0 }
   0x8   :  { %19 = vsyncpa [#allocation6], 0 }
   0x9   :  { %21 = vsyncpa [#allocation6 + $0x1], 0 }
   0xa   :  { %22 = vsyncpa [#allocation9], 0 }
   0xb   :  { %23 = vsyncpa [#allocation12], 0 }
   0xc   :  { %24 = vsyncpa [#allocation4], 0 }
   0xd   :  { %26 = vsyncpa [#allocation4 + $0x1], 0  ;;  %s11428_s17 = smov 0   ;;  %s11430_s18 = smov 0  }
   0xe   :  { %s11432_s19 = smov 0   ;;  %s11434_s20 = smov 0  }
   0xf   :  { %s11436_s21 = smov 0   ;;  %s11438_s22 = smov 0  }
  0x10 LB: > { %16585 = sst [smem:[#allocation20_spill]] %s11335_s17  ;;  %s11459_s23 = sadd.s32 4294967295, %s11355_s22   ;;  %s11355_s22 = sphi %s11438_s22, %s32_s22   ;;  %s11351_s21 = sphi %s11436_s21, %s17829_s21   ;;  %s11347_s20 = sphi %s11434_s20, %s17828_s20   ;;  %s11343_s19 = sphi %s11432_s19, %s17824_s19   ;;  %s11339_s18 = sphi %s11430_s18, %s17827_s18   ;;  %s11335_s17 = sphi %s11428_s17, %s17826_s17  }
  0x11   : > { %16586 = sst [smem:[#allocation21_spill]] %s11343_s19  ;;  %s8578_s24 = sadd.s32 4294967294, %s11355_s22  }
  0x12   : > { %16587 = sst [smem:[#allocation22_spill]] %s11347_s20  ;;  %p66_p0 = scmp.ne.s32.totalorder %s11339_s18, %s11335_s17 }
  0x13   : > { %p67_p1 = scmp.eq.s32.totalorder %s11459_s23, 0  ;;  %p309_p2 = scmp.eq.s32.totalorder %s11459_s23, 1 }
  0x14   : > { %p315_p3 = scmp.eq.s32.totalorder %s8578_s24, 1  ;;  %p8579_p5 = scmp.ge.s32.totalorder %s11355_s22, 1 }
  0x15   : > { %p11468_p4 = por %p67_p1, %p66_p0  ;;  %p322_p7 = scmp.lt.s32.totalorder %s11355_s22, 3 }
  0x16   : > { %p11473_p6 = por %p315_p3, %p66_p0  ;;  %s16591_s3 = sld [smem:[#allocation321_spill]] }
  0x17   : > { %p11481_p8 = pnand %p8579_p5, %p322_p7  ;;  %s11357_s12 = smov [#allocation7]  }
  0x18   : > { %s16589_s26 = scalar_select %p11473_p6, 1, 0 }
  0x19   : > { %p10533_p9 = pneg %p11481_p8  ;;  %s338_s13 = sshll.u32 %s11357_s12, 4  ;;  %s339_s13 = int_to_ptr.vmem [resolvable:$true] %s338_s13 }
  0x1a   : > { %16590 = sst [smem:[#allocation23_spill]] %s16589_s26  ;;  %p8584_p11 = scmp.ge.s32.totalorder %s11355_s22, 2 }
  0x1b   : > { %p11489_p10 = pnand %p10533_p9, %p67_p1  ;;  %s16594_s5 = sld [smem:[#allocation322_spill]] }
  0x1c   : > { %s336_s29 = sshll.u32 %s16591_s3, 4  ;;  %s11358_s27 = smov 512   ;;  %s337_s29 = int_to_ptr.hbm [resolvable:$true] %s336_s29 }
  0x1d   : > { %s11359_s28 = smov 32   ;;  %s11360_s12 = smov [#allocation8]  }
  0x1e   : > { %10536 = dma.hbm_to_vmem [thread:$0]  (!%p11489_p10), %s337_s29, 32768, %s339_s13, [#allocation6], %s11358_s27, %s11358_s27, %s11359_s28  }
  0x1f   : > { %s355_s3 = sshll.u32 %s11360_s12, 4  ;;  %s16240_s26 = smov 256   ;;  %s356_s3 = int_to_ptr.vmem [resolvable:$true] %s355_s3 }
  0x20   : > { %s16242_s17 = smov 16   ;;  %s16595_s7 = sld [smem:[#allocation323_spill]] }
  0x21   : > { %s353_s24 = sshll.u32 %s16594_s5, 4  ;;  %s11363_s29 = smov [#allocation10]   ;;  %s354_s24 = int_to_ptr.hbm [resolvable:$true] %s353_s24 }
  0x22   : > { %10539 = dma.hbm_to_vmem [thread:$0]  (!%p11489_p10), %s354_s24, 8192, %s356_s3, [#allocation9], %s16240_s26, %s16240_s26, %s16242_s17  }
  0x23   : > { %s372_s13 = sshll.u32 %s11363_s29, 4  ;;  %s16596_s9 = sld [smem:[#allocation324_spill]]  ;;  %s373_s13 = int_to_ptr.vmem [resolvable:$true] %s372_s13 }
  0x24   : > { %s11364_s11 = smov 128   ;;  %s11365_s3 = smov 8  }
  0x25   : > { %s11366_s24 = smov [#allocation11]   ;;  %s44_s16 = sadd.s32 1, %s11351_s21 }
  0x26   : > { %s370_s5 = sshll.u32 %s16595_s7, 4  ;;  %s390_s15 = sshll.u32 %s11366_s24, 4  ;;  %s371_s5 = int_to_ptr.hbm [resolvable:$true] %s370_s5  ;;  %s391_s15 = int_to_ptr.vmem [resolvable:$true] %s390_s15 }
  0x27   : > { %10542 = dma.hbm_to_vmem [thread:$0]  (!%p11489_p10), %s371_s5, 2048, %s373_s13, [#allocation9], %s11364_s11, %s11364_s11, %s11365_s3  }
  0x28   : > { %s53_s29 = sadd.s32 1, %s11343_s19  ;;  %p46_p12 = scmp.ge.s32.totalorder %s44_s16, 2 }
  0x29   : > { %s388_s12 = sshll.u32 %s16596_s9, 4  ;;  %p60_p13 = scmp.ne.s32.totalorder %s11343_s19, %s11339_s18  ;;  %s389_s12 = int_to_ptr.hbm [resolvable:$true] %s388_s12 }
  0x2a   : > { %10545 = dma.hbm_to_vmem [thread:$0]  (!%p11489_p10), %s389_s12, 32, %s391_s15, [#allocation12]  }
  0x2b   : > { %p61_p0 = scmp.eq.s32.totalorder %s11355_s22, 0  ;;  %p10561_p3 = scmp.lt.s32.totalorder %s11355_s22, 2 }
  0x2c   : > { %s17831_s16 = smov (%p46_p12, %s44_s16), 0  ;;  %p11528_p7 = por %p309_p2, %p60_p13 }
  0x2d   : > { %16597 = sst [smem:[#allocation24_spill]] %s17831_s16  ;;  %p11522_p5 = por %p61_p0, %p60_p13 }
  0x2e   : > { %s16599_s11 = scalar_select %p11528_p7, 1, 0 }
  0x2f   : > { %s48_s14 = ssub.s32 %s11351_s21, %s17831_s16  ;;  %s404_s13 = sand.u32 1, %s11343_s19  }
  0x30   : > { %16600 = sst [smem:[#allocation25_spill]] %s16599_s11  ;;  %p51_p9 = scmp.eq.s32.totalorder %s48_s14, 0 }
  0x31   : > { %s8585_s27 = sshll.u32 %s404_s13, 7  ;;  %s10140_s28 = sshll.u32 %s11351_s21, 7 }
  0x32   : > { %s11537_s12 = scalar_select %p51_p9, %s11343_s19, %s53_s29  }
  0x33   : > { %s415_s15 = scalar_lea.hbm %s16225_s0, %s10140_s28  ;;  %s408_s17 = scalar_lea.vmem [#allocation2], %s8585_s27 }
  0x34   : > { %16601 = sst [smem:[#allocation26_spill]] %s11537_s12  ;;  %s416_s26 = sshll.u32 %s415_s15, 4  ;;  %s417_s26 = int_to_ptr.hbm [resolvable:$true] %s416_s26 }
  0x35   : > { %s418_s7 = sshll.u32 %s408_s17, 4  ;;  %p10547_p2 = pnand %p10561_p3, %p11522_p5  ;;  %s419_s7 = int_to_ptr.vmem [resolvable:$true] %s418_s7 }
  0x36   : > { %s428_s9 = sand.u32 1, %s11355_s22   ;;  %s8588_s16 = sshll.u32 %s404_s13, 11 }
  0x37   : > { %s405_s11 = scalar_lea.sflag [#allocation3], %s404_s13  ;;  %s16602_s14 = smov 16  }
  0x38   : > { %s16603_s20 = smov 256   ;;  %s10141_s29 = sshll.u32 %s11351_s21, 11 }
  0x39   : > { %10549 = dma.hbm_to_vmem [thread:$0]  (!%p10547_p2), %s417_s26, 2048, %s419_s7, %s405_s11, %s16603_s20, %s16603_s20, %s16602_s14  }
  0x3a   : > { %s432_s12 = scalar_lea.vmem [#allocation5], %s8588_s16  ;;  %s439_s27 = scalar_lea.hbm %s16226_s1, %s10141_s29 }
  0x3b   : > { %s442_s19 = sshll.u32 %s432_s12, 4  ;;  %s440_s17 = sshll.u32 %s439_s27, 4  ;;  %s443_s19 = int_to_ptr.vmem [resolvable:$true] %s442_s19  ;;  %s441_s17 = int_to_ptr.hbm [resolvable:$true] %s440_s17 }
  0x3c   : > { %s429_s5 = scalar_lea.sflag [#allocation6], %s428_s9  ;;  %454 = sbr.rel (%p11481_p8) target bundleno = 3943 (0xf67), region = 64 }
  0x3d   : > { %10552 = dma.hbm_to_vmem [thread:$0]  (!%p10547_p2), %s441_s17, 32768, %s443_s19, %s429_s5, %s16603_s20, %s16603_s20, %s16602_s14  }
  0x41   : > { %s11560_s7 = sand.u32 1, %s11339_s18  }
  0x42   : > { %s8592_s26 = sshll.u32 %s11560_s7, 7  ;;  %s457_s16 = scalar_lea.sflag [#allocation3], %s11560_s7 }
  0x43   : > { %s11564_s11 = scalar_lea.vmem [#allocation2], %s8592_s26 }
  0x44   : > { %11310 = dma.done.wait (%p11468_p4), %s457_s16, 2048  }
  0x45   : > { %11312 = vsyncadd (%p11468_p4), %s457_s16, 4294965248  ;;  %s466_s9 = sand.u32 1, %s11459_s23   ;;  %s8593_s19 = sshll.u32 %s11560_s7, 11 }
  0x46   : > { %s467_s20 = scalar_lea.sflag [#allocation6], %s466_s9  ;;  %s11572_s30 = scalar_lea.vmem [#allocation5], %s8593_s19 }
  0x47   : > { %11314 = dma.done.wait (%p11468_p4), %s467_s20, 32768  }
  0x48   : > { %11316 = vsyncadd (%p11468_p4), %s467_s20, 4294934528 }
  0x49   : > { %11318 = dma.done.wait (%p67_p1), [#allocation6], 32768  }
  0x4a   : > { %11320 = vsyncadd (%p67_p1), [#allocation6], 4294934528 }
  0x4b   : > { %11322 = dma.done.wait (%p67_p1), [#allocation9], 10240  }
  0x4c   : > { %11324 = vsyncadd (%p67_p1), [#allocation9], 4294957056 }
  0x4d   : > { %11326 = dma.done.wait (%p67_p1), [#allocation12], 32  }
  0x4e   : > { %11328 = vsyncadd (%p67_p1), [#allocation12], 4294967264  ;;  %v591_v0 = vld [vmem:[%s11572_s30 + $0xe0] sm:$0xff]  ;;  %v593_v1 = vld [vmem:[%s11572_s30 + $0xf0] sm:$0xff]  ;;  %vm5411_vm0 = vcmask 523264   ;;  %s17817_s5 = sld [smem:[#allocation22_spill]] }
  0x4f   : > { %v623_v2 = vld [vmem:[%s11572_s30 + $0x1e0] sm:$0xff]  ;;  %v833_v3 = vpack.c.bf16 %v593_v1, %v591_v0  ;;  %v625_v4 = vld [vmem:[%s11572_s30 + $0x1f0] sm:$0xff]  ;;  %s8598_s26 = sshll.u32 %s11560_s7, 3  ;;  %s17818_s20 = sld [smem:[#allocation325_spill]]  ;;  %vm8406_vm1 = vcmask 1043456  }
  0x50   : > { %v655_v5 = vld [vmem:[%s11572_s30 + $0x2e0] sm:$0xff]  ;;  %v657_v6 = vld [vmem:[%s11572_s30 + $0x2f0] sm:$0xff]  ;;  %v849_v7 = vpack.c.bf16 %v625_v4, %v623_v2  ;;  %s534_s25 = scalar_lea.vmem [#allocation13], %s8598_s26  ;;  %s8411_s24 = scalar_lea.sflag [#allocation4], %s11560_s7 }
  0x51   : > { %v865_v8 = vpack.c.bf16 %v657_v6, %v655_v5  ;;  %v687_v9 = vld [vmem:[%s11572_s30 + $0x3e0] sm:$0xff]  ;;  %v689_v10 = vld [vmem:[%s11572_s30 + $0x3f0] sm:$0xff]  ;;  %2547 = vmatpush.bf16.msra.mxu0 %v833_v3  ;;  %s8426_s13 = sshll.u32 %s534_s25, 4  ;;  %s8427_s13 = int_to_ptr.vmem [resolvable:$true] %s8426_s13 }
  0x52   : > { %v587_v11 = vld [vmem:[%s11572_s30 + $0xc0] sm:$0xff]  ;;  %v881_v12 = vpack.c.bf16 %v689_v10, %v687_v9  ;;  %v589_v13 = vld [vmem:[%s11572_s30 + $0xd0] sm:$0xff]  ;;  %2716 = vmatpush.bf16.msra.mxu1 %v849_v7 }
  0x53   : > { %v619_v14 = vld [vmem:[%s11572_s30 + $0x1c0] sm:$0xff]  ;;  %v621_v15 = vld [vmem:[%s11572_s30 + $0x1d0] sm:$0xff]  ;;  %2885 = vmatpush.bf16.msra.mxu2 %v865_v8  ;;  %v831_v16 = vpack.c.bf16 %v589_v13, %v587_v11 }
  0x54   : > { %v847_v17 = vpack.c.bf16 %v621_v15, %v619_v14  ;;  %v651_v18 = vld [vmem:[%s11572_s30 + $0x2c0] sm:$0xff]  ;;  %v653_v19 = vld [vmem:[%s11572_s30 + $0x2d0] sm:$0xff]  ;;  %3054 = vmatpush.bf16.msra.mxu3 %v881_v12  ;;  %s10510_s16 = sshll.u32 %s17817_s5, 3 }
  0x55   : > { %v683_v20 = vld [vmem:[%s11572_s30 + $0x3c0] sm:$0xff]  ;;  %v863_v21 = vpack.c.bf16 %v653_v19, %v651_v18  ;;  %v685_v22 = vld [vmem:[%s11572_s30 + $0x3d0] sm:$0xff]  ;;  %2548 = vmatpush.bf16.msra.mxu0 %v831_v16  ;;  %s8424_s23 = scalar_lea.hbm %s17818_s20, %s10510_s16 }
  0x56   : > { %v583_v23 = vld [vmem:[%s11572_s30 + $0xa0] sm:$0xff]  ;;  %v585_v24 = vld [vmem:[%s11572_s30 + $0xb0] sm:$0xff]  ;;  %v879_v25 = vpack.c.bf16 %v685_v22, %v683_v20  ;;  %2717 = vmatpush.bf16.msra.mxu1 %v847_v17  ;;  %s8428_s12 = sshll.u32 %s8424_s23, 4  ;;  %s8429_s12 = int_to_ptr.hbm [resolvable:$true] %s8428_s12 }
  0x57   : > { %v615_v26 = vld [vmem:[%s11572_s30 + $0x1a0] sm:$0xff]  ;;  %v617_v27 = vld [vmem:[%s11572_s30 + $0x1b0] sm:$0xff]  ;;  %v829_v29 = vpack.c.bf16 %v585_v24, %v583_v23  ;;  %2886 = vmatpush.bf16.msra.mxu2 %v863_v21  ;;  %s11271_s15 = sshra.s32 %s8429_s12, 4  ;;  %s11272_s15 = int_to_ptr.hbm [resolvable:$true] %s11271_s15 }
  0x58   : > { %v647_v28 = vld [vmem:[%s11572_s30 + $0x2a0] sm:$0xff]  ;;  %v649_v30 = vld [vmem:[%s11572_s30 + $0x2b0] sm:$0xff]  ;;  %v845_v33 = vpack.c.bf16 %v617_v27, %v615_v26  ;;  %3055 = vmatpush.bf16.msra.mxu3 %v879_v25  ;;  %s11273_s14 = scalar_lea.hbm %s11272_s15, 8 }
  0x59   : > { %v679_v31 = vld [vmem:[%s11572_s30 + $0x3a0] sm:$0xff]  ;;  %v681_v32 = vld [vmem:[%s11572_s30 + $0x3b0] sm:$0xff]  ;;  %v861_v34 = vpack.c.bf16 %v649_v30, %v647_v28  ;;  %2549 = vmatpush.bf16.msra.mxu0 %v829_v29  ;;  %p11274_p1 = scmp.ne.s32.totalorder %s11272_s15, %s11273_s14 }
  0x5a   : > { %v579_v35 = vld [vmem:[%s11572_s30 + $0x80] sm:$0xff]  ;;  %v581_v36 = vld [vmem:[%s11572_s30 + $0x90] sm:$0xff]  ;;  %v877_v38 = vpack.c.bf16 %v681_v32, %v679_v31  ;;  %2718 = vmatpush.bf16.msra.mxu1 %v845_v33 }
  0x5b   : > { %v611_v37 = vld [vmem:[%s11572_s30 + $0x180] sm:$0xff]  ;;  %v613_v39 = vld [vmem:[%s11572_s30 + $0x190] sm:$0xff]  ;;  %v827_v44 = vpack.c.bf16 %v581_v36, %v579_v35  ;;  %2887 = vmatpush.bf16.msra.mxu2 %v861_v34  ;;  %v8609_v35 = vld [vmem:[#allocation7 + $0x8] sm:$0xf]  ;;  %p11275_p4 = pnand %p11274_p1, %p11528_p7 }
  0x5c   : > { %v643_v40 = vld [vmem:[%s11572_s30 + $0x280] sm:$0xff]  ;;  %v645_v41 = vld [vmem:[%s11572_s30 + $0x290] sm:$0xff]  ;;  %v843_v45 = vpack.c.bf16 %v613_v39, %v611_v37  ;;  %3056 = vmatpush.bf16.msra.mxu3 %v877_v38  ;;  %v10179_v36 = vld [vmem:[#allocation7 + $0x24] sm:$0xf0] }
  0x5d   : > { %v675_v42 = vld [vmem:[%s11572_s30 + $0x380] sm:$0xff]  ;;  %v677_v43 = vld [vmem:[%s11572_s30 + $0x390] sm:$0xff]  ;;  %v859_v46 = vpack.c.bf16 %v645_v41, %v643_v40  ;;  %2550 = vmatpush.bf16.msra.mxu0 %v827_v44  ;;  %v10175_v38 = vld [vmem:[#allocation7 + $0xc] sm:$0xf]  ;;  %p11276_p8 = pneg %p11275_p4 }
  0x5e   : > { %v575_v47 = vld [vmem:[%s11572_s30 + $0x60] sm:$0xff]  ;;  %v577_v48 = vld [vmem:[%s11572_s30 + $0x70] sm:$0xff]  ;;  %v875_v50 = vpack.c.bf16 %v677_v43, %v675_v42  ;;  %2719 = vmatpush.bf16.msra.mxu1 %v843_v45  ;;  %v8611_v39 = vld [vmem:[#allocation7 + $0x28] sm:$0xf0]  ;;  %v11658_v42 = vor.u32 %v10179_v36, %v8609_v35 }
  0x5f   : > { %v607_v49 = vld [vmem:[%s11572_s30 + $0x160] sm:$0xff]  ;;  %v609_v51 = vld [vmem:[%s11572_s30 + $0x170] sm:$0xff]  ;;  %v825_v56 = vpack.c.bf16 %v577_v48, %v575_v47  ;;  %2888 = vmatpush.bf16.msra.mxu2 %v859_v46  ;;  %v11660_v43 = vor.u32 %v10175_v38, %v8611_v39  ;;  %v8641_v48 = vld [vmem:[#allocation7 + $0x48] sm:$0xf] }
  0x60   : > { %v639_v52 = vld [vmem:[%s11572_s30 + $0x260] sm:$0xff]  ;;  %v641_v53 = vld [vmem:[%s11572_s30 + $0x270] sm:$0xff]  ;;  %v841_v57 = vpack.c.bf16 %v609_v51, %v607_v49  ;;  %3057 = vmatpush.bf16.msra.mxu3 %v875_v50  ;;  %16606 = vst [vmem:[#allocation29_spill] sm:$0xff] %v11658_v42  ;;  %v10187_v49 = vld [vmem:[#allocation7 + $0x64] sm:$0xf0] }
  0x61   : > { %v671_v54 = vld [vmem:[%s11572_s30 + $0x360] sm:$0xff]  ;;  %v673_v55 = vld [vmem:[%s11572_s30 + $0x370] sm:$0xff]  ;;  %v857_v58 = vpack.c.bf16 %v641_v53, %v639_v52  ;;  %2551 = vmatpush.bf16.msra.mxu0 %v825_v56  ;;  %16607 = vst [vmem:[#allocation30_spill] sm:$0xff] %v11660_v43  ;;  %v10183_v50 = vld [vmem:[#allocation7 + $0x4c] sm:$0xf] }
  0x62   : > { %v571_v59 = vld [vmem:[%s11572_s30 + $0x40] sm:$0xff]  ;;  %v573_v60 = vld [vmem:[%s11572_s30 + $0x50] sm:$0xff]  ;;  %v873_v62 = vpack.c.bf16 %v673_v55, %v671_v54  ;;  %2720 = vmatpush.bf16.msra.mxu1 %v841_v57  ;;  %v8643_v51 = vld [vmem:[#allocation7 + $0x68] sm:$0xf0]  ;;  %v11670_v54 = vor.u32 %v10187_v49, %v8641_v48 }
  0x63   : > { %v603_v61 = vld [vmem:[%s11572_s30 + $0x140] sm:$0xff]  ;;  %v605_v63 = vld [vmem:[%s11572_s30 + $0x150] sm:$0xff]  ;;  %v823_v4 = vpack.c.bf16 %v573_v60, %v571_v59  ;;  %2889 = vmatpush.bf16.msra.mxu2 %v857_v58  ;;  %v11672_v55 = vor.u32 %v10183_v50, %v8643_v51  ;;  %v8673_v60 = vld [vmem:[#allocation7 + $0x88] sm:$0xf] }
  0x64   : > { %v635_v0 = vld [vmem:[%s11572_s30 + $0x240] sm:$0xff]  ;;  %v637_v1 = vld [vmem:[%s11572_s30 + $0x250] sm:$0xff]  ;;  %v839_v5 = vpack.c.bf16 %v605_v63, %v603_v61  ;;  %3058 = vmatpush.bf16.msra.mxu3 %v873_v62  ;;  %16610 = vst [vmem:[#allocation33_spill] sm:$0xff] %v11670_v54  ;;  %v10195_v61 = vld [vmem:[#allocation7 + $0xa4] sm:$0xf0] }
  0x65   : > { %v667_v2 = vld [vmem:[%s11572_s30 + $0x340] sm:$0xff]  ;;  %v669_v3 = vld [vmem:[%s11572_s30 + $0x350] sm:$0xff]  ;;  %v855_v6 = vpack.c.bf16 %v637_v1, %v635_v0  ;;  %2552 = vmatpush.bf16.msra.mxu0 %v823_v4  ;;  %16611 = vst [vmem:[#allocation34_spill] sm:$0xff] %v11672_v55  ;;  %v10191_v62 = vld [vmem:[#allocation7 + $0x8c] sm:$0xf] }
  0x66   : > { %v567_v7 = vld [vmem:[%s11572_s30 + $0x20] sm:$0xff]  ;;  %v569_v8 = vld [vmem:[%s11572_s30 + $0x30] sm:$0xff]  ;;  %v871_v10 = vpack.c.bf16 %v669_v3, %v667_v2  ;;  %2721 = vmatpush.bf16.msra.mxu1 %v839_v5  ;;  %v8675_v63 = vld [vmem:[#allocation7 + $0xa8] sm:$0xf0]  ;;  %v11682_v2 = vor.u32 %v10195_v61, %v8673_v60 }
  0x67   : > { %v599_v9 = vld [vmem:[%s11572_s30 + $0x120] sm:$0xff]  ;;  %v601_v11 = vld [vmem:[%s11572_s30 + $0x130] sm:$0xff]  ;;  %v821_v16 = vpack.c.bf16 %v569_v8, %v567_v7  ;;  %2890 = vmatpush.bf16.msra.mxu2 %v855_v6  ;;  %v11684_v3 = vor.u32 %v10191_v62, %v8675_v63  ;;  %v8705_v8 = vld [vmem:[#allocation7 + $0xc8] sm:$0xf] }
  0x68   : > { %v631_v12 = vld [vmem:[%s11572_s30 + $0x220] sm:$0xff]  ;;  %v633_v13 = vld [vmem:[%s11572_s30 + $0x230] sm:$0xff]  ;;  %v837_v17 = vpack.c.bf16 %v601_v11, %v599_v9  ;;  %3059 = vmatpush.bf16.msra.mxu3 %v871_v10  ;;  %16614 = vst [vmem:[#allocation37_spill] sm:$0xff] %v11682_v2  ;;  %v10203_v9 = vld [vmem:[#allocation7 + $0xe4] sm:$0xf0] }
  0x69   : > { %v663_v14 = vld [vmem:[%s11572_s30 + $0x320] sm:$0xff]  ;;  %v665_v15 = vld [vmem:[%s11572_s30 + $0x330] sm:$0xff]  ;;  %v853_v18 = vpack.c.bf16 %v633_v13, %v631_v12  ;;  %2553 = vmatpush.bf16.msra.mxu0 %v821_v16  ;;  %16615 = vst [vmem:[#allocation38_spill] sm:$0xff] %v11684_v3  ;;  %v10199_v10 = vld [vmem:[#allocation7 + $0xcc] sm:$0xf] }
  0x6a   : > { %v563_v19 = vld [vmem:[%s11572_s30] sm:$0xff]  ;;  %v565_v20 = vld [vmem:[%s11572_s30 + $0x10] sm:$0xff]  ;;  %v869_v22 = vpack.c.bf16 %v665_v15, %v663_v14  ;;  %2722 = vmatpush.bf16.msra.mxu1 %v837_v17  ;;  %v8707_v11 = vld [vmem:[#allocation7 + $0xe8] sm:$0xf0]  ;;  %v11694_v14 = vor.u32 %v10203_v9, %v8705_v8 }
  0x6b   : > { %v595_v21 = vld [vmem:[%s11572_s30 + $0x100] sm:$0xff]  ;;  %v597_v23 = vld [vmem:[%s11572_s30 + $0x110] sm:$0xff]  ;;  %v819_v28 = vpack.c.bf16 %v565_v20, %v563_v19  ;;  %2891 = vmatpush.bf16.msra.mxu2 %v853_v18  ;;  %v11696_v15 = vor.u32 %v10199_v10, %v8707_v11  ;;  %v8737_v20 = vld [vmem:[#allocation7 + $0x108] sm:$0xf] }
  0x6c   : > { %v627_v24 = vld [vmem:[%s11572_s30 + $0x200] sm:$0xff]  ;;  %v629_v25 = vld [vmem:[%s11572_s30 + $0x210] sm:$0xff]  ;;  %v835_v32 = vpack.c.bf16 %v597_v23, %v595_v21  ;;  %3060 = vmatpush.bf16.msra.mxu3 %v869_v22  ;;  %16618 = vst [vmem:[#allocation41_spill] sm:$0xff] %v11694_v14  ;;  %v10211_v21 = vld [vmem:[#allocation7 + $0x124] sm:$0xf0] }
  0x6d   : > { %v659_v26 = vld [vmem:[%s11572_s30 + $0x300] sm:$0xff]  ;;  %v661_v27 = vld [vmem:[%s11572_s30 + $0x310] sm:$0xff]  ;;  %v851_v33 = vpack.c.bf16 %v629_v25, %v627_v24  ;;  %2554 = vmatpush.bf16.msra.mxu0 %v819_v28  ;;  %16619 = vst [vmem:[#allocation42_spill] sm:$0xff] %v11696_v15  ;;  %v10207_v22 = vld [vmem:[#allocation7 + $0x10c] sm:$0xf] }
  0x6e   : > { %v8601_v29 = vld [vmem:[#allocation7] sm:$0xf]  ;;  %v10174_v31 = vld [vmem:[#allocation7 + $0x4] sm:$0xf]  ;;  %v867_v37 = vpack.c.bf16 %v661_v27, %v659_v26  ;;  %2723 = vmatpush.bf16.msra.mxu1 %v835_v32  ;;  %v8739_v23 = vld [vmem:[#allocation7 + $0x128] sm:$0xf0]  ;;  %v11706_v26 = vor.u32 %v10211_v21, %v8737_v20 }
  0x6f   : > { %v10178_v30 = vld [vmem:[#allocation7 + $0x1c] sm:$0xf0]  ;;  %v8603_v34 = vld [vmem:[#allocation7 + $0x20] sm:$0xf0]  ;;  %2892 = vmatpush.bf16.msra.mxu2 %v851_v33  ;;  %v11708_v27 = vor.u32 %v10207_v22, %v8739_v23  ;;  %v8769_v32 = vld [vmem:[#allocation7 + $0x148] sm:$0xf] }
  0x70   : > { %v11654_v40 = vor.u32 %v10178_v30, %v8601_v29  ;;  %v11656_v41 = vor.u32 %v10174_v31, %v8603_v34  ;;  %3061 = vmatpush.bf16.msra.mxu3 %v867_v37  ;;  %v8633_v44 = vld [vmem:[#allocation7 + $0x40] sm:$0xf]  ;;  %v10182_v46 = vld [vmem:[#allocation7 + $0x44] sm:$0xf]  ;;  %16622 = vst [vmem:[#allocation45_spill] sm:$0xff] %v11706_v26 }
  0x71   : > { %v10186_v45 = vld [vmem:[#allocation7 + $0x5c] sm:$0xf0]  ;;  %v8635_v47 = vld [vmem:[#allocation7 + $0x60] sm:$0xf0]  ;;  %16623 = vst [vmem:[#allocation46_spill] sm:$0xff] %v11708_v27 }
  0x72   : > { %16604 = vst [vmem:[#allocation27_spill] sm:$0xff] %v11654_v40  ;;  %2555 = vmatmul.bf16.vlgmr.msra.gmra.mxu0 %v11654_v40  ;;  %2724 = vmatmul.bf16.vlgmr.msra.gmra.mxu1 %v11656_v41  ;;  %v11666_v52 = vor.u32 %v10186_v45, %v8633_v44  ;;  %v11668_v53 = vor.u32 %v10182_v46, %v8635_v47  ;;  %v8665_v56 = vld [vmem:[#allocation7 + $0x80] sm:$0xf]  ;;  %v10190_v58 = vld [vmem:[#allocation7 + $0x84] sm:$0xf] }
  0x73   : > { %16605 = vst [vmem:[#allocation28_spill] sm:$0xff] %v11656_v41  ;;  %2893 = vmatmul.bf16.vlgmr.msra.gmra.mxu2 %v11658_v42  ;;  %3062 = vmatmul.bf16.vlgmr.msra.gmra.mxu3 %v11660_v43  ;;  %v10194_v57 = vld [vmem:[#allocation7 + $0x9c] sm:$0xf0]  ;;  %v8667_v59 = vld [vmem:[#allocation7 + $0xa0] sm:$0xf0] }
  0x74   : > { %16608 = vst [vmem:[#allocation31_spill] sm:$0xff] %v11666_v52  ;;  %v11678_v0 = vor.u32 %v10194_v57, %v8665_v56  ;;  %v11680_v1 = vor.u32 %v10190_v58, %v8667_v59  ;;  %v8697_v4 = vld [vmem:[#allocation7 + $0xc0] sm:$0xf]  ;;  %v10198_v6 = vld [vmem:[#allocation7 + $0xc4] sm:$0xf] }
  0x75   : > { %16609 = vst [vmem:[#allocation32_spill] sm:$0xff] %v11668_v53  ;;  %v10202_v5 = vld [vmem:[#allocation7 + $0xdc] sm:$0xf0]  ;;  %v8699_v7 = vld [vmem:[#allocation7 + $0xe0] sm:$0xf0] }
  0x76   : > { %16612 = vst [vmem:[#allocation35_spill] sm:$0xff] %v11678_v0  ;;  %v11690_v12 = vor.u32 %v10202_v5, %v8697_v4  ;;  %v11692_v13 = vor.u32 %v10198_v6, %v8699_v7  ;;  %v8729_v16 = vld [vmem:[#allocation7 + $0x100] sm:$0xf]  ;;  %v10206_v18 = vld [vmem:[#allocation7 + $0x104] sm:$0xf] }
  0x77   : > { %16613 = vst [vmem:[#allocation36_spill] sm:$0xff] %v11680_v1  ;;  %v10210_v17 = vld [vmem:[#allocation7 + $0x11c] sm:$0xf0]  ;;  %v8731_v19 = vld [vmem:[#allocation7 + $0x120] sm:$0xf0] }
  0x78   : > { %16616 = vst [vmem:[#allocation39_spill] sm:$0xff] %v11690_v12  ;;  %v11702_v24 = vor.u32 %v10210_v17, %v8729_v16  ;;  %v11704_v25 = vor.u32 %v10206_v18, %v8731_v19  ;;  %v8761_v28 = vld [vmem:[#allocation7 + $0x140] sm:$0xf]  ;;  %v10214_v30 = vld [vmem:[#allocation7 + $0x144] sm:$0xf] }
  0x79   : > { %16617 = vst [vmem:[#allocation40_spill] sm:$0xff] %v11692_v13  ;;  %v10218_v29 = vld [vmem:[#allocation7 + $0x15c] sm:$0xf0]  ;;  %v8763_v31 = vld [vmem:[#allocation7 + $0x160] sm:$0xf0] }
  0x7a   : > { %16620 = vst [vmem:[#allocation43_spill] sm:$0xff] %v11702_v24  ;;  %v10219_v33 = vld [vmem:[#allocation7 + $0x164] sm:$0xf0]  ;;  %v10215_v34 = vld [vmem:[#allocation7 + $0x14c] sm:$0xf]  ;;  %v11714_v36 = vor.u32 %v10218_v29, %v8761_v28  ;;  %v11716_v37 = vor.u32 %v10214_v30, %v8763_v31 }
  0x7b   : > { %16621 = vst [vmem:[#allocation44_spill] sm:$0xff] %v11704_v25  ;;  %v8771_v35 = vld [vmem:[#allocation7 + $0x168] sm:$0xf0]  ;;  %v11718_v38 = vor.u32 %v10219_v33, %v8769_v32  ;;  %v8793_v44 = vld [vmem:[#allocation7 + $0x180] sm:$0xf] }
  0x7c   : > { %16624 = vst [vmem:[#allocation47_spill] sm:$0xff] %v11714_v36  ;;  %v11720_v39 = vor.u32 %v10215_v34, %v8771_v35  ;;  %v10226_v45 = vld [vmem:[#allocation7 + $0x19c] sm:$0xf0]  ;;  %v10222_v46 = vld [vmem:[#allocation7 + $0x184] sm:$0xf] }
  0x7d   : > { %16625 = vst [vmem:[#allocation48_spill] sm:$0xff] %v11716_v37  ;;  %v8795_v47 = vld [vmem:[#allocation7 + $0x1a0] sm:$0xf0]  ;;  %v8801_v48 = vld [vmem:[#allocation7 + $0x188] sm:$0xf]  ;;  %v11726_v56 = vor.u32 %v10226_v45, %v8793_v44 }
  0x7e   : > { %16626 = vst [vmem:[#allocation49_spill] sm:$0xff] %v11718_v38  ;;  %v10227_v49 = vld [vmem:[#allocation7 + $0x1a4] sm:$0xf0]  ;;  %v10223_v50 = vld [vmem:[#allocation7 + $0x18c] sm:$0xf]  ;;  %v11728_v57 = vor.u32 %v10222_v46, %v8795_v47 }
  0x7f   : > { %16627 = vst [vmem:[#allocation50_spill] sm:$0xff] %v11720_v39  ;;  %v8803_v51 = vld [vmem:[#allocation7 + $0x1a8] sm:$0xf0]  ;;  %v11730_v58 = vor.u32 %v10227_v49, %v8801_v48  ;;  %v8825_v60 = vld [vmem:[#allocation7 + $0x1c0] sm:$0xf] }
  0x80   : > { %16628 = vst [vmem:[#allocation51_spill] sm:$0xff] %v11726_v56  ;;  %v11732_v59 = vor.u32 %v10223_v50, %v8803_v51  ;;  %v10234_v61 = vld [vmem:[#allocation7 + $0x1dc] sm:$0xf0]  ;;  %v10230_v62 = vld [vmem:[#allocation7 + $0x1c4] sm:$0xf] }
  0x81   : > { %16629 = vst [vmem:[#allocation52_spill] sm:$0xff] %v11728_v57  ;;  %v8827_v63 = vld [vmem:[#allocation7 + $0x1e0] sm:$0xf0]  ;;  %v8833_v4 = vld [vmem:[#allocation7 + $0x1c8] sm:$0xf]  ;;  %v11738_v8 = vor.u32 %v10234_v61, %v8825_v60 }
  0x82   : > { %2560 = vmatmul.bf16.gmra.mxu0 %v11666_v52  ;;  %2729 = vmatmul.bf16.gmra.mxu1 %v11668_v53  ;;  %16630 = vst [vmem:[#allocation53_spill] sm:$0xff] %v11730_v58  ;;  %v10235_v5 = vld [vmem:[#allocation7 + $0x1e4] sm:$0xf0]  ;;  %v10231_v6 = vld [vmem:[#allocation7 + $0x1cc] sm:$0xf]  ;;  %v11740_v9 = vor.u32 %v10230_v62, %v8827_v63 }
  0x83   : > { %2898 = vmatmul.bf16.gmra.mxu2 %v11670_v54  ;;  %3067 = vmatmul.bf16.gmra.mxu3 %v11672_v55  ;;  %16631 = vst [vmem:[#allocation54_spill] sm:$0xff] %v11732_v59  ;;  %v8835_v7 = vld [vmem:[#allocation7 + $0x1e8] sm:$0xf0]  ;;  %v11742_v10 = vor.u32 %v10235_v5, %v8833_v4  ;;  %v8857_v16 = vld [vmem:[#allocation7 + $0x200] sm:$0xf] }
  0x84   : > { %16632 = vst [vmem:[#allocation55_spill] sm:$0xff] %v11738_v8  ;;  %v11744_v11 = vor.u32 %v10231_v6, %v8835_v7  ;;  %v10242_v17 = vld [vmem:[#allocation7 + $0x21c] sm:$0xf0]  ;;  %v10238_v18 = vld [vmem:[#allocation7 + $0x204] sm:$0xf] }
  0x85   : > { %16633 = vst [vmem:[#allocation56_spill] sm:$0xff] %v11740_v9  ;;  %v8859_v19 = vld [vmem:[#allocation7 + $0x220] sm:$0xf0]  ;;  %v8865_v20 = vld [vmem:[#allocation7 + $0x208] sm:$0xf]  ;;  %v11750_v28 = vor.u32 %v10242_v17, %v8857_v16 }
  0x86   : > { %16634 = vst [vmem:[#allocation57_spill] sm:$0xff] %v11742_v10  ;;  %v10243_v21 = vld [vmem:[#allocation7 + $0x224] sm:$0xf0]  ;;  %v10239_v22 = vld [vmem:[#allocation7 + $0x20c] sm:$0xf]  ;;  %v11752_v30 = vor.u32 %v10238_v18, %v8859_v19 }
  0x87   : > { %16635 = vst [vmem:[#allocation58_spill] sm:$0xff] %v11744_v11  ;;  %v8867_v23 = vld [vmem:[#allocation7 + $0x228] sm:$0xf0]  ;;  %v11754_v31 = vor.u32 %v10243_v21, %v8865_v20  ;;  %v8889_v50 = vld [vmem:[#allocation7 + $0x240] sm:$0xf] }
  0x88   : > { %16636 = vst [vmem:[#allocation59_spill] sm:$0xff] %v11750_v28  ;;  %v11756_v33 = vor.u32 %v10239_v22, %v8867_v23  ;;  %v10250_v51 = vld [vmem:[#allocation7 + $0x25c] sm:$0xf0]  ;;  %v10246_v60 = vld [vmem:[#allocation7 + $0x244] sm:$0xf] }
  0x89   : > { %16637 = vst [vmem:[#allocation60_spill] sm:$0xff] %v11752_v30  ;;  %v8891_v61 = vld [vmem:[#allocation7 + $0x260] sm:$0xf0]  ;;  %v8897_v62 = vld [vmem:[#allocation7 + $0x248] sm:$0xf]  ;;  %v11764_v7 = vor.u32 %v10250_v51, %v8889_v50 }
  0x8a   : > { %16638 = vst [vmem:[#allocation61_spill] sm:$0xff] %v11754_v31  ;;  %v10251_v63 = vld [vmem:[#allocation7 + $0x264] sm:$0xf0]  ;;  %v10247_v4 = vld [vmem:[#allocation7 + $0x24c] sm:$0xf]  ;;  %v11766_v19 = vor.u32 %v10246_v60, %v8891_v61 }
  0x8b   : > { %16639 = vst [vmem:[#allocation62_spill] sm:$0xff] %v11756_v33  ;;  %v8899_v5 = vld [vmem:[#allocation7 + $0x268] sm:$0xf0]  ;;  %v11768_v20 = vor.u32 %v10251_v63, %v8897_v62  ;;  %v10258_v50 = vld [vmem:[#allocation7 + $0x29c] sm:$0xf0] }
  0x8c   : > { %16640 = vst [vmem:[#allocation63_spill] sm:$0xff] %v11764_v7  ;;  %v11770_v22 = vor.u32 %v10247_v4, %v8899_v5  ;;  %v10254_v51 = vld [vmem:[#allocation7 + $0x284] sm:$0xf]  ;;  %v8929_v61 = vld [vmem:[#allocation7 + $0x288] sm:$0xf] }
  0x8d   : > { %16641 = vst [vmem:[#allocation64_spill] sm:$0xff] %v11766_v19  ;;  %v8923_v60 = vld [vmem:[#allocation7 + $0x2a0] sm:$0xf0]  ;;  %v10259_v62 = vld [vmem:[#allocation7 + $0x2a4] sm:$0xf0] }
  0x8e   : > { %16642 = vst [vmem:[#allocation65_spill] sm:$0xff] %v11768_v20  ;;  %v10255_v63 = vld [vmem:[#allocation7 + $0x28c] sm:$0xf]  ;;  %v9531_v42 = vld [vmem:[#allocation7 + $0x760] sm:$0xf0] }
  0x8f   : > { %16643 = vst [vmem:[#allocation66_spill] sm:$0xff] %v11770_v22  ;;  %v8931_v4 = vld [vmem:[#allocation7 + $0x2a8] sm:$0xf0] }
  0x90   : > { %v10407_v41 = vld [vmem:[#allocation7 + $0x74c] sm:$0xf] }
  0x91   : > { %v9539_v40 = vld [vmem:[#allocation7 + $0x768] sm:$0xf0] }
  0x92   : > { %2565 = vmatmul.bf16.gmra.mxu0 %v11678_v0  ;;  %2734 = vmatmul.bf16.gmra.mxu1 %v11680_v1 }
  0x93   : > { %2903 = vmatmul.bf16.gmra.mxu2 %v11682_v2  ;;  %3072 = vmatmul.bf16.gmra.mxu3 %v11684_v3 }
  0xa2   : > { %2570 = vmatmul.bf16.gmra.mxu0 %v11690_v12  ;;  %2739 = vmatmul.bf16.gmra.mxu1 %v11692_v13 }
  0xa3   : > { %2908 = vmatmul.bf16.gmra.mxu2 %v11694_v14  ;;  %3077 = vmatmul.bf16.gmra.mxu3 %v11696_v15 }
  0xb2   : > { %2575 = vmatmul.bf16.gmra.mxu0 %v11702_v24  ;;  %2744 = vmatmul.bf16.gmra.mxu1 %v11704_v25 }
  0xb3   : > { %2913 = vmatmul.bf16.gmra.mxu2 %v11706_v26  ;;  %3082 = vmatmul.bf16.gmra.mxu3 %v11708_v27 }
  0xc2   : > { %2580 = vmatmul.bf16.gmra.mxu0 %v11714_v36  ;;  %2749 = vmatmul.bf16.gmra.mxu1 %v11716_v37 }
  0xc3   : > { %2918 = vmatmul.bf16.gmra.mxu2 %v11718_v38  ;;  %3087 = vmatmul.bf16.gmra.mxu3 %v11720_v39 }
  0xd2   : > { %2585 = vmatmul.bf16.gmra.mxu0 %v11726_v56  ;;  %2754 = vmatmul.bf16.gmra.mxu1 %v11728_v57 }
  0xd3   : > { %2923 = vmatmul.bf16.gmra.mxu2 %v11730_v58  ;;  %3092 = vmatmul.bf16.gmra.mxu3 %v11732_v59 }
  0xe2   : > { %2590 = vmatmul.bf16.gmra.mxu0 %v11738_v8  ;;  %2759 = vmatmul.bf16.gmra.mxu1 %v11740_v9 }
  0xe3   : > { %2928 = vmatmul.bf16.gmra.mxu2 %v11742_v10  ;;  %3097 = vmatmul.bf16.gmra.mxu3 %v11744_v11 }
  0xef   : > { %v2556_v29 = vpop.f32.mrf.mxu0  ;;  %v2725_v32 = vpop.f32.mrf.mxu1 }
  0xf0   : > { %v2726_v34 = vadd.f32 %v2725_v32, %v2556_v29 }
  0xf2   : > { %2595 = vmatmul.bf16.gmra.mxu0 %v11750_v28  ;;  %2764 = vmatmul.bf16.gmra.mxu1 %v11752_v30 }
  0xf3   : > { %2933 = vmatmul.bf16.gmra.mxu2 %v11754_v31  ;;  %3102 = vmatmul.bf16.gmra.mxu3 %v11756_v33 }
  0xf6   : > { %v2894_v35 = vpop.f32.mrf.mxu2  ;;  %v3063_v46 = vpop.f32.mrf.mxu3 }
  0xf7   : > { %v2895_v44 = vadd.f32 %v2894_v35, %v2726_v34  ;;  %v2558_v45 = vpop.f32.mrf.mxu0  ;;  %v2727_v47 = vpop.f32.mrf.mxu1 }
  0xf8   : > { %v2728_v48 = vadd.f32 %v2727_v47, %v2558_v45 }
  0xf9   : > { %v11762_v49 = vadd.f32 %v3063_v46, %v2895_v44 }
  0xfe   : > { %v2896_v6 = vpop.f32.mrf.mxu2  ;;  %v3065_v18 = vpop.f32.mrf.mxu3 }
  0xff   : > { %v2897_v16 = vadd.f32 %v2896_v6, %v2728_v48  ;;  %v2561_v17 = vpop.f32.mrf.mxu0  ;;  %v2730_v21 = vpop.f32.mrf.mxu1  ;;  %v8921_v48 = vld [vmem:[#allocation7 + $0x280] sm:$0xf] }
 0x100   : > { %v2731_v23 = vadd.f32 %v2730_v21, %v2561_v17  ;;  %v11780_v6 = vor.u32 %v10258_v50, %v8921_v48  ;;  %v11782_v21 = vor.u32 %v10254_v51, %v8923_v60 }
 0x101   : > { %v11772_v29 = vadd.f32 %v3065_v18, %v2897_v16 }
 0x102   : > { %2600 = vmatmul.bf16.gmra.mxu0 %v11764_v7  ;;  %2769 = vmatmul.bf16.gmra.mxu1 %v11766_v19  ;;  %16644 = vst [vmem:[#allocation67_spill] sm:$0xff] %v11780_v6 }
 0x103   : > { %2938 = vmatmul.bf16.gmra.mxu2 %v11768_v20  ;;  %3107 = vmatmul.bf16.gmra.mxu3 %v11770_v22  ;;  %16645 = vst [vmem:[#allocation68_spill] sm:$0xff] %v11782_v21 }
 0x106   : > { %v2899_v32 = vpop.f32.mrf.mxu2  ;;  %v3068_v44 = vpop.f32.mrf.mxu3 }
 0x107   : > { %v2900_v34 = vadd.f32 %v2899_v32, %v2731_v23  ;;  %v2563_v35 = vpop.f32.mrf.mxu0  ;;  %v2732_v45 = vpop.f32.mrf.mxu1  ;;  %v11784_v23 = vor.u32 %v10259_v62, %v8929_v61  ;;  %v8953_v62 = vld [vmem:[#allocation7 + $0x2c0] sm:$0xf] }
 0x108   : > { %v2733_v46 = vadd.f32 %v2732_v45, %v2563_v35 }
 0x109   : > { %v11778_v47 = vadd.f32 %v3068_v44, %v2900_v34  ;;  %16646 = vst [vmem:[#allocation69_spill] sm:$0xff] %v11784_v23  ;;  %v11786_v34 = vor.u32 %v10255_v63, %v8931_v4  ;;  %v10266_v63 = vld [vmem:[#allocation7 + $0x2dc] sm:$0xf0]  ;;  %v10262_v4 = vld [vmem:[#allocation7 + $0x2c4] sm:$0xf] }
 0x10b   : > { %16647 = vst [vmem:[#allocation70_spill] sm:$0xff] %v11786_v34 }
 0x10e   : > { %v2901_v5 = vpop.f32.mrf.mxu2  ;;  %v3070_v18 = vpop.f32.mrf.mxu3 }
 0x10f   : > { %v2902_v16 = vadd.f32 %v2901_v5, %v2733_v46  ;;  %v2566_v17 = vpop.f32.mrf.mxu0  ;;  %v2735_v32 = vpop.f32.mrf.mxu1  ;;  %v8955_v5 = vld [vmem:[#allocation7 + $0x2e0] sm:$0xf0] }
 0x110   : > { %v2736_v35 = vadd.f32 %v2735_v32, %v2566_v17  ;;  %v10267_v17 = vld [vmem:[#allocation7 + $0x2e4] sm:$0xf0]  ;;  %v8963_v32 = vld [vmem:[#allocation7 + $0x2e8] sm:$0xf0] }
 0x111   : > { %v11788_v44 = vadd.f32 %v3070_v18, %v2902_v16  ;;  %v8961_v16 = vld [vmem:[#allocation7 + $0x2c8] sm:$0xf]  ;;  %v10263_v18 = vld [vmem:[#allocation7 + $0x2cc] sm:$0xf] }
 0x112   : > { %2605 = vmatmul.bf16.gmra.mxu0 %v11780_v6  ;;  %2774 = vmatmul.bf16.gmra.mxu1 %v11782_v21  ;;  %v11800_v22 = vor.u32 %v10267_v17, %v8961_v16  ;;  %v8985_v17 = vld [vmem:[#allocation7 + $0x300] sm:$0xf] }
 0x113   : > { %2943 = vmatmul.bf16.gmra.mxu2 %v11784_v23  ;;  %3112 = vmatmul.bf16.gmra.mxu3 %v11786_v34  ;;  %v11796_v23 = vor.u32 %v10266_v63, %v8953_v62 }
 0x114   : > { %16650 = vst [vmem:[#allocation73_spill] sm:$0xff] %v11800_v22 }
 0x115   : > { %16648 = vst [vmem:[#allocation71_spill] sm:$0xff] %v11796_v23 }
 0x116   : > { %v2904_v45 = vpop.f32.mrf.mxu2  ;;  %v3073_v50 = vpop.f32.mrf.mxu3 }
 0x117   : > { %v2905_v46 = vadd.f32 %v2904_v45, %v2736_v35  ;;  %v2568_v48 = vpop.f32.mrf.mxu0  ;;  %v2737_v51 = vpop.f32.mrf.mxu1  ;;  %v11798_v45 = vor.u32 %v10262_v4, %v8955_v5 }
 0x118   : > { %v2738_v60 = vadd.f32 %v2737_v51, %v2568_v48  ;;  %v11802_v48 = vor.u32 %v10263_v18, %v8963_v32  ;;  %v8987_v18 = vld [vmem:[#allocation7 + $0x320] sm:$0xf0]  ;;  %v8993_v32 = vld [vmem:[#allocation7 + $0x308] sm:$0xf] }
 0x119   : > { %v11794_v61 = vadd.f32 %v3073_v50, %v2905_v46  ;;  %16649 = vst [vmem:[#allocation72_spill] sm:$0xff] %v11798_v45 }
 0x11a   : > { %16651 = vst [vmem:[#allocation74_spill] sm:$0xff] %v11802_v48 }
 0x11e   : > { %v2906_v21 = vpop.f32.mrf.mxu2  ;;  %v3075_v35 = vpop.f32.mrf.mxu3 }
 0x11f   : > { %v2907_v34 = vadd.f32 %v2906_v21, %v2738_v60  ;;  %v2571_v6 = vpop.f32.mrf.mxu0  ;;  %v2740_v46 = vpop.f32.mrf.mxu1 }
 0x120   : > { %v2741_v50 = vadd.f32 %v2740_v46, %v2571_v6  ;;  %v10274_v6 = vld [vmem:[#allocation7 + $0x31c] sm:$0xf0]  ;;  %v10271_v46 = vld [vmem:[#allocation7 + $0x30c] sm:$0xf] }
 0x121   : > { %v11804_v51 = vadd.f32 %v3075_v35, %v2907_v34  ;;  %v10270_v34 = vld [vmem:[#allocation7 + $0x304] sm:$0xf]  ;;  %v10275_v35 = vld [vmem:[#allocation7 + $0x324] sm:$0xf0] }
 0x122   : > { %2610 = vmatmul.bf16.gmra.mxu0 %v11796_v23  ;;  %2779 = vmatmul.bf16.gmra.mxu1 %v11798_v45  ;;  %v8995_v45 = vld [vmem:[#allocation7 + $0x328] sm:$0xf0]  ;;  %v11816_v19 = vor.u32 %v10275_v35, %v8993_v32  ;;  %v9019_v35 = vld [vmem:[#allocation7 + $0x360] sm:$0xf0] }
 0x123   : > { %2948 = vmatmul.bf16.gmra.mxu2 %v11800_v22  ;;  %3117 = vmatmul.bf16.gmra.mxu3 %v11802_v48  ;;  %v11812_v22 = vor.u32 %v10274_v6, %v8985_v17 }
 0x124   : > { %16654 = vst [vmem:[#allocation77_spill] sm:$0xff] %v11816_v19 }
 0x125   : > { %16652 = vst [vmem:[#allocation75_spill] sm:$0xff] %v11812_v22 }
 0x126   : > { %v2909_v21 = vpop.f32.mrf.mxu2  ;;  %v3078_v63 = vpop.f32.mrf.mxu3 }
 0x127   : > { %v2910_v60 = vadd.f32 %v2909_v21, %v2741_v50  ;;  %v2573_v62 = vpop.f32.mrf.mxu0  ;;  %v2742_v4 = vpop.f32.mrf.mxu1  ;;  %v11814_v21 = vor.u32 %v10270_v34, %v8987_v18 }
 0x128   : > { %v2743_v5 = vadd.f32 %v2742_v4, %v2573_v62  ;;  %v11818_v62 = vor.u32 %v10271_v46, %v8995_v45  ;;  %v9017_v45 = vld [vmem:[#allocation7 + $0x340] sm:$0xf]  ;;  %v9025_v46 = vld [vmem:[#allocation7 + $0x348] sm:$0xf] }
 0x129   : > { %v11810_v16 = vadd.f32 %v3078_v63, %v2910_v60  ;;  %16653 = vst [vmem:[#allocation76_spill] sm:$0xff] %v11814_v21 }
 0x12a   : > { %16655 = vst [vmem:[#allocation78_spill] sm:$0xff] %v11818_v62 }
 0x12e   : > { %v2911_v23 = vpop.f32.mrf.mxu2  ;;  %v3080_v50 = vpop.f32.mrf.mxu3 }
 0x12f   : > { %v2912_v48 = vadd.f32 %v2911_v23, %v2743_v5  ;;  %v2576_v20 = vpop.f32.mrf.mxu0  ;;  %v2745_v60 = vpop.f32.mrf.mxu1 }
 0x130   : > { %v2746_v63 = vadd.f32 %v2745_v60, %v2576_v20  ;;  %v10282_v20 = vld [vmem:[#allocation7 + $0x35c] sm:$0xf0]  ;;  %v10279_v60 = vld [vmem:[#allocation7 + $0x34c] sm:$0xf] }
 0x131   : > { %v11820_v4 = vadd.f32 %v3080_v50, %v2912_v48  ;;  %v10278_v48 = vld [vmem:[#allocation7 + $0x344] sm:$0xf]  ;;  %v10283_v50 = vld [vmem:[#allocation7 + $0x364] sm:$0xf0] }
 0x132   : > { %2615 = vmatmul.bf16.gmra.mxu0 %v11812_v22  ;;  %2784 = vmatmul.bf16.gmra.mxu1 %v11814_v21  ;;  %v9027_v21 = vld [vmem:[#allocation7 + $0x368] sm:$0xf0]  ;;  %v11832_v33 = vor.u32 %v10283_v50, %v9025_v46  ;;  %v9051_v50 = vld [vmem:[#allocation7 + $0x3a0] sm:$0xf0] }
 0x133   : > { %2953 = vmatmul.bf16.gmra.mxu2 %v11816_v19  ;;  %3122 = vmatmul.bf16.gmra.mxu3 %v11818_v62  ;;  %v11828_v19 = vor.u32 %v10282_v20, %v9017_v45 }
 0x134   : > { %16658 = vst [vmem:[#allocation81_spill] sm:$0xff] %v11832_v33 }
 0x135   : > { %16656 = vst [vmem:[#allocation79_spill] sm:$0xff] %v11828_v19 }
 0x136   : > { %v2914_v23 = vpop.f32.mrf.mxu2  ;;  %v3083_v6 = vpop.f32.mrf.mxu3 }
 0x137   : > { %v2915_v5 = vadd.f32 %v2914_v23, %v2746_v63  ;;  %v2578_v17 = vpop.f32.mrf.mxu0  ;;  %v2747_v34 = vpop.f32.mrf.mxu1  ;;  %v11830_v23 = vor.u32 %v10278_v48, %v9019_v35 }
 0x138   : > { %v2748_v18 = vadd.f32 %v2747_v34, %v2578_v17  ;;  %v11834_v17 = vor.u32 %v10279_v60, %v9027_v21  ;;  %v9049_v21 = vld [vmem:[#allocation7 + $0x380] sm:$0xf]  ;;  %v9057_v60 = vld [vmem:[#allocation7 + $0x388] sm:$0xf] }
 0x139   : > { %v11826_v32 = vadd.f32 %v3083_v6, %v2915_v5  ;;  %16657 = vst [vmem:[#allocation80_spill] sm:$0xff] %v11830_v23 }
 0x13a   : > { %16659 = vst [vmem:[#allocation82_spill] sm:$0xff] %v11834_v17 }
 0x13e   : > { %v2916_v22 = vpop.f32.mrf.mxu2  ;;  %v3085_v63 = vpop.f32.mrf.mxu3 }
 0x13f   : > { %v2917_v62 = vadd.f32 %v2916_v22, %v2748_v18  ;;  %v2581_v7 = vpop.f32.mrf.mxu0  ;;  %v2750_v5 = vpop.f32.mrf.mxu1 }
 0x140   : > { %v2751_v6 = vadd.f32 %v2750_v5, %v2581_v7  ;;  %v10290_v7 = vld [vmem:[#allocation7 + $0x39c] sm:$0xf0]  ;;  %v10287_v5 = vld [vmem:[#allocation7 + $0x38c] sm:$0xf] }
 0x141   : > { %v11836_v34 = vadd.f32 %v3085_v63, %v2917_v62  ;;  %v10286_v62 = vld [vmem:[#allocation7 + $0x384] sm:$0xf]  ;;  %v10291_v63 = vld [vmem:[#allocation7 + $0x3a4] sm:$0xf0] }
 0x142   : > { %2620 = vmatmul.bf16.gmra.mxu0 %v11828_v19  ;;  %2789 = vmatmul.bf16.gmra.mxu1 %v11830_v23  ;;  %v9059_v23 = vld [vmem:[#allocation7 + $0x3a8] sm:$0xf0]  ;;  %v11848_v30 = vor.u32 %v10291_v63, %v9057_v60  ;;  %v9083_v63 = vld [vmem:[#allocation7 + $0x3e0] sm:$0xf0] }
 0x143   : > { %2958 = vmatmul.bf16.gmra.mxu2 %v11832_v33  ;;  %3127 = vmatmul.bf16.gmra.mxu3 %v11834_v17  ;;  %v11844_v33 = vor.u32 %v10290_v7, %v9049_v21 }
 0x144   : > { %16662 = vst [vmem:[#allocation85_spill] sm:$0xff] %v11848_v30 }
 0x145   : > { %16660 = vst [vmem:[#allocation83_spill] sm:$0xff] %v11844_v33 }
 0x146   : > { %v2919_v22 = vpop.f32.mrf.mxu2  ;;  %v3088_v20 = vpop.f32.mrf.mxu3 }
 0x147   : > { %v2920_v18 = vadd.f32 %v2919_v22, %v2751_v6  ;;  %v2583_v45 = vpop.f32.mrf.mxu0  ;;  %v2752_v48 = vpop.f32.mrf.mxu1  ;;  %v11846_v22 = vor.u32 %v10286_v62, %v9051_v50 }
 0x148   : > { %v2753_v35 = vadd.f32 %v2752_v48, %v2583_v45  ;;  %v11850_v45 = vor.u32 %v10287_v5, %v9059_v23  ;;  %v9081_v23 = vld [vmem:[#allocation7 + $0x3c0] sm:$0xf]  ;;  %v9089_v5 = vld [vmem:[#allocation7 + $0x3c8] sm:$0xf] }
 0x149   : > { %v11842_v46 = vadd.f32 %v3088_v20, %v2920_v18  ;;  %16661 = vst [vmem:[#allocation84_spill] sm:$0xff] %v11846_v22 }
 0x14a   : > { %16663 = vst [vmem:[#allocation86_spill] sm:$0xff] %v11850_v45 }
 0x14e   : > { %v2921_v19 = vpop.f32.mrf.mxu2  ;;  %v3090_v6 = vpop.f32.mrf.mxu3 }
 0x14f   : > { %v2922_v17 = vadd.f32 %v2921_v19, %v2753_v35  ;;  %v2586_v31 = vpop.f32.mrf.mxu0  ;;  %v2755_v18 = vpop.f32.mrf.mxu1 }
 0x150   : > { %v2756_v20 = vadd.f32 %v2755_v18, %v2586_v31  ;;  %v10298_v31 = vld [vmem:[#allocation7 + $0x3dc] sm:$0xf0]  ;;  %v10295_v18 = vld [vmem:[#allocation7 + $0x3cc] sm:$0xf] }
 0x151   : > { %v11852_v48 = vadd.f32 %v3090_v6, %v2922_v17  ;;  %v10294_v17 = vld [vmem:[#allocation7 + $0x3c4] sm:$0xf]  ;;  %v10299_v6 = vld [vmem:[#allocation7 + $0x3e4] sm:$0xf0] }
 0x152   : > { %2625 = vmatmul.bf16.gmra.mxu0 %v11844_v33  ;;  %2794 = vmatmul.bf16.gmra.mxu1 %v11846_v22  ;;  %v9091_v22 = vld [vmem:[#allocation7 + $0x3e8] sm:$0xf0]  ;;  %v11864_v11 = vor.u32 %v10299_v6, %v9089_v5  ;;  %v9115_v6 = vld [vmem:[#allocation7 + $0x420] sm:$0xf0] }
 0x153   : > { %2963 = vmatmul.bf16.gmra.mxu2 %v11848_v30  ;;  %3132 = vmatmul.bf16.gmra.mxu3 %v11850_v45  ;;  %v11860_v30 = vor.u32 %v10298_v31, %v9081_v23 }
 0x154   : > { %16666 = vst [vmem:[#allocation89_spill] sm:$0xff] %v11864_v11 }
 0x155   : > { %16664 = vst [vmem:[#allocation87_spill] sm:$0xff] %v11860_v30 }
 0x156   : > { %v2924_v19 = vpop.f32.mrf.mxu2  ;;  %v3093_v7 = vpop.f32.mrf.mxu3 }
 0x157   : > { %v2925_v35 = vadd.f32 %v2924_v19, %v2756_v20  ;;  %v2588_v21 = vpop.f32.mrf.mxu0  ;;  %v2757_v62 = vpop.f32.mrf.mxu1  ;;  %v11862_v19 = vor.u32 %v10294_v17, %v9083_v63 }
 0x158   : > { %v2758_v50 = vadd.f32 %v2757_v62, %v2588_v21  ;;  %v11866_v21 = vor.u32 %v10295_v18, %v9091_v22  ;;  %v9113_v22 = vld [vmem:[#allocation7 + $0x400] sm:$0xf]  ;;  %v9121_v18 = vld [vmem:[#allocation7 + $0x408] sm:$0xf] }
 0x159   : > { %v11858_v60 = vadd.f32 %v3093_v7, %v2925_v35  ;;  %16665 = vst [vmem:[#allocation88_spill] sm:$0xff] %v11862_v19 }
 0x15a   : > { %16667 = vst [vmem:[#allocation90_spill] sm:$0xff] %v11866_v21 }
 0x15e   : > { %v2926_v33 = vpop.f32.mrf.mxu2  ;;  %v3095_v20 = vpop.f32.mrf.mxu3 }
 0x15f   : > { %v2927_v45 = vadd.f32 %v2926_v33, %v2758_v50  ;;  %v2591_v28 = vpop.f32.mrf.mxu0  ;;  %v2760_v35 = vpop.f32.mrf.mxu1 }
 0x160   : > { %v2761_v7 = vadd.f32 %v2760_v35, %v2591_v28  ;;  %v10306_v28 = vld [vmem:[#allocation7 + $0x41c] sm:$0xf0]  ;;  %v10303_v35 = vld [vmem:[#allocation7 + $0x40c] sm:$0xf] }
 0x161   : > { %v11868_v62 = vadd.f32 %v3095_v20, %v2927_v45  ;;  %v10302_v45 = vld [vmem:[#allocation7 + $0x404] sm:$0xf]  ;;  %v10307_v20 = vld [vmem:[#allocation7 + $0x424] sm:$0xf0] }
 0x162   : > { %2630 = vmatmul.bf16.gmra.mxu0 %v11860_v30  ;;  %2799 = vmatmul.bf16.gmra.mxu1 %v11862_v19  ;;  %v9123_v19 = vld [vmem:[#allocation7 + $0x428] sm:$0xf0]  ;;  %v11880_v9 = vor.u32 %v10307_v20, %v9121_v18  ;;  %v9147_v20 = vld [vmem:[#allocation7 + $0x460] sm:$0xf0] }
 0x163   : > { %2968 = vmatmul.bf16.gmra.mxu2 %v11864_v11  ;;  %3137 = vmatmul.bf16.gmra.mxu3 %v11866_v21  ;;  %v11876_v11 = vor.u32 %v10306_v28, %v9113_v22 }
 0x164   : > { %16670 = vst [vmem:[#allocation93_spill] sm:$0xff] %v11880_v9 }
 0x165   : > { %16668 = vst [vmem:[#allocation91_spill] sm:$0xff] %v11876_v11 }
 0x166   : > { %v2929_v33 = vpop.f32.mrf.mxu2  ;;  %v3098_v31 = vpop.f32.mrf.mxu3 }
 0x167   : > { %v2930_v50 = vadd.f32 %v2929_v33, %v2761_v7  ;;  %v2593_v23 = vpop.f32.mrf.mxu0  ;;  %v2762_v17 = vpop.f32.mrf.mxu1  ;;  %v11878_v33 = vor.u32 %v10302_v45, %v9115_v6 }
 0x168   : > { %v2763_v63 = vadd.f32 %v2762_v17, %v2593_v23  ;;  %v11882_v23 = vor.u32 %v10303_v35, %v9123_v19  ;;  %v9145_v19 = vld [vmem:[#allocation7 + $0x440] sm:$0xf]  ;;  %v9153_v35 = vld [vmem:[#allocation7 + $0x448] sm:$0xf] }
 0x169   : > { %v11874_v5 = vadd.f32 %v3098_v31, %v2930_v50  ;;  %16669 = vst [vmem:[#allocation92_spill] sm:$0xff] %v11878_v33 }
 0x16a   : > { %16671 = vst [vmem:[#allocation94_spill] sm:$0xff] %v11882_v23 }
 0x16e   : > { %v2931_v30 = vpop.f32.mrf.mxu2  ;;  %v3100_v7 = vpop.f32.mrf.mxu3 }
 0x16f   : > { %v2932_v21 = vadd.f32 %v2931_v30, %v2763_v63  ;;  %v2596_v10 = vpop.f32.mrf.mxu0  ;;  %v2765_v50 = vpop.f32.mrf.mxu1 }
 0x170   : > { %v2766_v31 = vadd.f32 %v2765_v50, %v2596_v10  ;;  %v10314_v10 = vld [vmem:[#allocation7 + $0x45c] sm:$0xf0]  ;;  %v10311_v50 = vld [vmem:[#allocation7 + $0x44c] sm:$0xf] }
 0x171   : > { %v11884_v17 = vadd.f32 %v3100_v7, %v2932_v21  ;;  %v10310_v21 = vld [vmem:[#allocation7 + $0x444] sm:$0xf]  ;;  %v10315_v7 = vld [vmem:[#allocation7 + $0x464] sm:$0xf0] }
 0x172   : > { %2635 = vmatmul.bf16.gmra.mxu0 %v11876_v11  ;;  %2804 = vmatmul.bf16.gmra.mxu1 %v11878_v33  ;;  %v9155_v33 = vld [vmem:[#allocation7 + $0x468] sm:$0xf0]  ;;  %v11896_v59 = vor.u32 %v10315_v7, %v9153_v35  ;;  %v9179_v7 = vld [vmem:[#allocation7 + $0x4a0] sm:$0xf0] }
 0x173   : > { %2973 = vmatmul.bf16.gmra.mxu2 %v11880_v9  ;;  %3142 = vmatmul.bf16.gmra.mxu3 %v11882_v23  ;;  %v11892_v9 = vor.u32 %v10314_v10, %v9145_v19 }
 0x174   : > { %16674 = vst [vmem:[#allocation97_spill] sm:$0xff] %v11896_v59 }
 0x175   : > { %16672 = vst [vmem:[#allocation95_spill] sm:$0xff] %v11892_v9 }
 0x176   : > { %v2934_v30 = vpop.f32.mrf.mxu2  ;;  %v3103_v28 = vpop.f32.mrf.mxu3 }
 0x177   : > { %v2935_v63 = vadd.f32 %v2934_v30, %v2766_v31  ;;  %v2598_v22 = vpop.f32.mrf.mxu0  ;;  %v2767_v45 = vpop.f32.mrf.mxu1  ;;  %v11894_v30 = vor.u32 %v10310_v21, %v9147_v20 }
 0x178   : > { %v2768_v6 = vadd.f32 %v2767_v45, %v2598_v22  ;;  %v11898_v22 = vor.u32 %v10311_v50, %v9155_v33  ;;  %v9177_v33 = vld [vmem:[#allocation7 + $0x480] sm:$0xf]  ;;  %v9185_v50 = vld [vmem:[#allocation7 + $0x488] sm:$0xf] }
 0x179   : > { %v11890_v18 = vadd.f32 %v3103_v28, %v2935_v63  ;;  %16673 = vst [vmem:[#allocation96_spill] sm:$0xff] %v11894_v30 }
 0x17a   : > { %16675 = vst [vmem:[#allocation98_spill] sm:$0xff] %v11898_v22 }
 0x17e   : > { %v2936_v11 = vpop.f32.mrf.mxu2  ;;  %v3105_v31 = vpop.f32.mrf.mxu3 }
 0x17f   : > { %v2937_v23 = vadd.f32 %v2936_v11, %v2768_v6  ;;  %v2601_v8 = vpop.f32.mrf.mxu0  ;;  %v2770_v63 = vpop.f32.mrf.mxu1 }
 0x180   : > { %v2771_v28 = vadd.f32 %v2770_v63, %v2601_v8  ;;  %v10322_v8 = vld [vmem:[#allocation7 + $0x49c] sm:$0xf0]  ;;  %v10319_v63 = vld [vmem:[#allocation7 + $0x48c] sm:$0xf] }
 0x181   : > { %v11900_v45 = vadd.f32 %v3105_v31, %v2937_v23  ;;  %v10318_v23 = vld [vmem:[#allocation7 + $0x484] sm:$0xf]  ;;  %v10323_v31 = vld [vmem:[#allocation7 + $0x4a4] sm:$0xf0] }
 0x182   : > { %2640 = vmatmul.bf16.gmra.mxu0 %v11892_v9  ;;  %2809 = vmatmul.bf16.gmra.mxu1 %v11894_v30  ;;  %v9187_v30 = vld [vmem:[#allocation7 + $0x4a8] sm:$0xf0]  ;;  %v11912_v57 = vor.u32 %v10323_v31, %v9185_v50  ;;  %v9211_v31 = vld [vmem:[#allocation7 + $0x4e0] sm:$0xf0] }
 0x183   : > { %2978 = vmatmul.bf16.gmra.mxu2 %v11896_v59  ;;  %3147 = vmatmul.bf16.gmra.mxu3 %v11898_v22  ;;  %v11908_v59 = vor.u32 %v10322_v8, %v9177_v33 }
 0x184   : > { %16678 = vst [vmem:[#allocation101_spill] sm:$0xff] %v11912_v57 }
 0x185   : > { %16676 = vst [vmem:[#allocation99_spill] sm:$0xff] %v11908_v59 }
 0x186   : > { %v2939_v11 = vpop.f32.mrf.mxu2  ;;  %v3108_v10 = vpop.f32.mrf.mxu3 }
 0x187   : > { %v2940_v6 = vadd.f32 %v2939_v11, %v2771_v28  ;;  %v2603_v19 = vpop.f32.mrf.mxu0  ;;  %v2772_v21 = vpop.f32.mrf.mxu1  ;;  %v11910_v11 = vor.u32 %v10318_v23, %v9179_v7 }
 0x188   : > { %v2773_v20 = vadd.f32 %v2772_v21, %v2603_v19  ;;  %v11914_v19 = vor.u32 %v10319_v63, %v9187_v30  ;;  %v9209_v30 = vld [vmem:[#allocation7 + $0x4c0] sm:$0xf]  ;;  %v9217_v63 = vld [vmem:[#allocation7 + $0x4c8] sm:$0xf] }
 0x189   : > { %v11906_v35 = vadd.f32 %v3108_v10, %v2940_v6  ;;  %16677 = vst [vmem:[#allocation100_spill] sm:$0xff] %v11910_v11 }
 0x18a   : > { %16679 = vst [vmem:[#allocation102_spill] sm:$0xff] %v11914_v19 }
 0x18e   : > { %v2941_v9 = vpop.f32.mrf.mxu2  ;;  %v3110_v28 = vpop.f32.mrf.mxu3 }
 0x18f   : > { %v2942_v22 = vadd.f32 %v2941_v9, %v2773_v20  ;;  %v2606_v58 = vpop.f32.mrf.mxu0  ;;  %v2775_v6 = vpop.f32.mrf.mxu1 }
 0x190   : > { %v2776_v10 = vadd.f32 %v2775_v6, %v2606_v58  ;;  %v10330_v58 = vld [vmem:[#allocation7 + $0x4dc] sm:$0xf0]  ;;  %v10327_v6 = vld [vmem:[#allocation7 + $0x4cc] sm:$0xf] }
 0x191   : > { %v11916_v21 = vadd.f32 %v3110_v28, %v2942_v22  ;;  %v10326_v22 = vld [vmem:[#allocation7 + $0x4c4] sm:$0xf]  ;;  %v10331_v28 = vld [vmem:[#allocation7 + $0x4e4] sm:$0xf0] }
 0x192   : > { %2645 = vmatmul.bf16.gmra.mxu0 %v11908_v59  ;;  %2814 = vmatmul.bf16.gmra.mxu1 %v11910_v11  ;;  %v9219_v11 = vld [vmem:[#allocation7 + $0x4e8] sm:$0xf0]  ;;  %v11928_v39 = vor.u32 %v10331_v28, %v9217_v63  ;;  %v9243_v28 = vld [vmem:[#allocation7 + $0x520] sm:$0xf0] }
 0x193   : > { %2983 = vmatmul.bf16.gmra.mxu2 %v11912_v57  ;;  %3152 = vmatmul.bf16.gmra.mxu3 %v11914_v19  ;;  %v11924_v57 = vor.u32 %v10330_v58, %v9209_v30 }
 0x194   : > { %16682 = vst [vmem:[#allocation105_spill] sm:$0xff] %v11928_v39 }
 0x195   : > { %16680 = vst [vmem:[#allocation103_spill] sm:$0xff] %v11924_v57 }
 0x196   : > { %v2944_v9 = vpop.f32.mrf.mxu2  ;;  %v3113_v8 = vpop.f32.mrf.mxu3 }
 0x197   : > { %v2945_v20 = vadd.f32 %v2944_v9, %v2776_v10  ;;  %v2608_v33 = vpop.f32.mrf.mxu0  ;;  %v2777_v23 = vpop.f32.mrf.mxu1  ;;  %v11926_v9 = vor.u32 %v10326_v22, %v9211_v31 }
 0x198   : > { %v2778_v7 = vadd.f32 %v2777_v23, %v2608_v33  ;;  %v11930_v33 = vor.u32 %v10327_v6, %v9219_v11  ;;  %v9241_v11 = vld [vmem:[#allocation7 + $0x500] sm:$0xf]  ;;  %v9249_v6 = vld [vmem:[#allocation7 + $0x508] sm:$0xf] }
 0x199   : > { %v11922_v50 = vadd.f32 %v3113_v8, %v2945_v20  ;;  %16681 = vst [vmem:[#allocation104_spill] sm:$0xff] %v11926_v9 }
 0x19a   : > { %16683 = vst [vmem:[#allocation106_spill] sm:$0xff] %v11930_v33 }
 0x19e   : > { %v2946_v59 = vpop.f32.mrf.mxu2  ;;  %v3115_v10 = vpop.f32.mrf.mxu3 }
 0x19f   : > { %v2947_v19 = vadd.f32 %v2946_v59, %v2778_v7  ;;  %v2611_v56 = vpop.f32.mrf.mxu0  ;;  %v2780_v20 = vpop.f32.mrf.mxu1 }
 0x1a0   : > { %v2781_v8 = vadd.f32 %v2780_v20, %v2611_v56  ;;  %v10338_v56 = vld [vmem:[#allocation7 + $0x51c] sm:$0xf0]  ;;  %v10335_v20 = vld [vmem:[#allocation7 + $0x50c] sm:$0xf] }
 0x1a1   : > { %v11932_v23 = vadd.f32 %v3115_v10, %v2947_v19  ;;  %v10334_v19 = vld [vmem:[#allocation7 + $0x504] sm:$0xf]  ;;  %v10339_v10 = vld [vmem:[#allocation7 + $0x524] sm:$0xf0] }
 0x1a2   : > { %2650 = vmatmul.bf16.gmra.mxu0 %v11924_v57  ;;  %2819 = vmatmul.bf16.gmra.mxu1 %v11926_v9  ;;  %v9251_v9 = vld [vmem:[#allocation7 + $0x528] sm:$0xf0]  ;;  %v11944_v37 = vor.u32 %v10339_v10, %v9249_v6  ;;  %v9275_v10 = vld [vmem:[#allocation7 + $0x560] sm:$0xf0] }
 0x1a3   : > { %2988 = vmatmul.bf16.gmra.mxu2 %v11928_v39  ;;  %3157 = vmatmul.bf16.gmra.mxu3 %v11930_v33  ;;  %v11940_v39 = vor.u32 %v10338_v56, %v9241_v11 }
 0x1a4   : > { %16686 = vst [vmem:[#allocation109_spill] sm:$0xff] %v11944_v37 }
 0x1a5   : > { %16684 = vst [vmem:[#allocation107_spill] sm:$0xff] %v11940_v39 }
 0x1a6   : > { %v2949_v59 = vpop.f32.mrf.mxu2  ;;  %v3118_v58 = vpop.f32.mrf.mxu3 }
 0x1a7   : > { %v2950_v7 = vadd.f32 %v2949_v59, %v2781_v8  ;;  %v2613_v30 = vpop.f32.mrf.mxu0  ;;  %v2782_v22 = vpop.f32.mrf.mxu1  ;;  %v11942_v59 = vor.u32 %v10334_v19, %v9243_v28 }
 0x1a8   : > { %v2783_v31 = vadd.f32 %v2782_v22, %v2613_v30  ;;  %v11946_v30 = vor.u32 %v10335_v20, %v9251_v9  ;;  %v9273_v9 = vld [vmem:[#allocation7 + $0x540] sm:$0xf]  ;;  %v9281_v20 = vld [vmem:[#allocation7 + $0x548] sm:$0xf] }
 0x1a9   : > { %v11938_v63 = vadd.f32 %v3118_v58, %v2950_v7  ;;  %16685 = vst [vmem:[#allocation108_spill] sm:$0xff] %v11942_v59 }
 0x1aa   : > { %16687 = vst [vmem:[#allocation110_spill] sm:$0xff] %v11946_v30 }
 0x1ae   : > { %v2951_v57 = vpop.f32.mrf.mxu2  ;;  %v3120_v8 = vpop.f32.mrf.mxu3 }
 0x1af   : > { %v2952_v33 = vadd.f32 %v2951_v57, %v2783_v31  ;;  %v2616_v38 = vpop.f32.mrf.mxu0  ;;  %v2785_v7 = vpop.f32.mrf.mxu1 }
 0x1b0   : > { %v2786_v58 = vadd.f32 %v2785_v7, %v2616_v38  ;;  %v10346_v38 = vld [vmem:[#allocation7 + $0x55c] sm:$0xf0]  ;;  %v10343_v7 = vld [vmem:[#allocation7 + $0x54c] sm:$0xf] }
 0x1b1   : > { %v11948_v22 = vadd.f32 %v3120_v8, %v2952_v33  ;;  %v10342_v33 = vld [vmem:[#allocation7 + $0x544] sm:$0xf]  ;;  %v10347_v8 = vld [vmem:[#allocation7 + $0x564] sm:$0xf0] }
 0x1b2   : > { %2655 = vmatmul.bf16.gmra.mxu0 %v11940_v39  ;;  %2824 = vmatmul.bf16.gmra.mxu1 %v11942_v59  ;;  %v9283_v59 = vld [vmem:[#allocation7 + $0x568] sm:$0xf0]  ;;  %v11960_v27 = vor.u32 %v10347_v8, %v9281_v20  ;;  %v9307_v8 = vld [vmem:[#allocation7 + $0x5a0] sm:$0xf0] }
 0x1b3   : > { %2993 = vmatmul.bf16.gmra.mxu2 %v11944_v37  ;;  %3162 = vmatmul.bf16.gmra.mxu3 %v11946_v30  ;;  %v11956_v37 = vor.u32 %v10346_v38, %v9273_v9 }
 0x1b4   : > { %16690 = vst [vmem:[#allocation113_spill] sm:$0xff] %v11960_v27 }
 0x1b5   : > { %16688 = vst [vmem:[#allocation111_spill] sm:$0xff] %v11956_v37 }
 0x1b6   : > { %v2954_v57 = vpop.f32.mrf.mxu2  ;;  %v3123_v56 = vpop.f32.mrf.mxu3 }
 0x1b7   : > { %v2955_v31 = vadd.f32 %v2954_v57, %v2786_v58  ;;  %v2618_v11 = vpop.f32.mrf.mxu0  ;;  %v2787_v19 = vpop.f32.mrf.mxu1  ;;  %v11958_v57 = vor.u32 %v10342_v33, %v9275_v10 }
 0x1b8   : > { %v2788_v28 = vadd.f32 %v2787_v19, %v2618_v11  ;;  %v11962_v11 = vor.u32 %v10343_v7, %v9283_v59  ;;  %v9305_v59 = vld [vmem:[#allocation7 + $0x580] sm:$0xf]  ;;  %v9313_v7 = vld [vmem:[#allocation7 + $0x588] sm:$0xf] }
 0x1b9   : > { %v11954_v6 = vadd.f32 %v3123_v56, %v2955_v31  ;;  %16689 = vst [vmem:[#allocation112_spill] sm:$0xff] %v11958_v57 }
 0x1ba   : > { %16691 = vst [vmem:[#allocation114_spill] sm:$0xff] %v11962_v11 }
 0x1be   : > { %v2956_v39 = vpop.f32.mrf.mxu2  ;;  %v3125_v58 = vpop.f32.mrf.mxu3 }
 0x1bf   : > { %v2957_v30 = vadd.f32 %v2956_v39, %v2788_v28  ;;  %v2621_v36 = vpop.f32.mrf.mxu0  ;;  %v2790_v31 = vpop.f32.mrf.mxu1 }
 0x1c0   : > { %v2791_v56 = vadd.f32 %v2790_v31, %v2621_v36  ;;  %v10354_v36 = vld [vmem:[#allocation7 + $0x59c] sm:$0xf0]  ;;  %v10351_v31 = vld [vmem:[#allocation7 + $0x58c] sm:$0xf] }
 0x1c1   : > { %v11964_v19 = vadd.f32 %v3125_v58, %v2957_v30  ;;  %v10350_v30 = vld [vmem:[#allocation7 + $0x584] sm:$0xf]  ;;  %v10355_v58 = vld [vmem:[#allocation7 + $0x5a4] sm:$0xf0] }
 0x1c2   : > { %2660 = vmatmul.bf16.gmra.mxu0 %v11956_v37  ;;  %2829 = vmatmul.bf16.gmra.mxu1 %v11958_v57  ;;  %v9315_v57 = vld [vmem:[#allocation7 + $0x5a8] sm:$0xf0]  ;;  %v11976_v25 = vor.u32 %v10355_v58, %v9313_v7  ;;  %v9339_v58 = vld [vmem:[#allocation7 + $0x5e0] sm:$0xf0] }
 0x1c3   : > { %2998 = vmatmul.bf16.gmra.mxu2 %v11960_v27  ;;  %3167 = vmatmul.bf16.gmra.mxu3 %v11962_v11  ;;  %v11972_v27 = vor.u32 %v10354_v36, %v9305_v59 }
 0x1c4   : > { %16694 = vst [vmem:[#allocation117_spill] sm:$0xff] %v11976_v25 }
 0x1c5   : > { %16692 = vst [vmem:[#allocation115_spill] sm:$0xff] %v11972_v27 }
 0x1c6   : > { %v2959_v39 = vpop.f32.mrf.mxu2  ;;  %v3128_v38 = vpop.f32.mrf.mxu3 }
 0x1c7   : > { %v2960_v28 = vadd.f32 %v2959_v39, %v2791_v56  ;;  %v2623_v9 = vpop.f32.mrf.mxu0  ;;  %v2792_v33 = vpop.f32.mrf.mxu1  ;;  %v11974_v39 = vor.u32 %v10350_v30, %v9307_v8 }
 0x1c8   : > { %v2793_v10 = vadd.f32 %v2792_v33, %v2623_v9  ;;  %v11978_v9 = vor.u32 %v10351_v31, %v9315_v57  ;;  %v9337_v57 = vld [vmem:[#allocation7 + $0x5c0] sm:$0xf]  ;;  %v9345_v31 = vld [vmem:[#allocation7 + $0x5c8] sm:$0xf] }
 0x1c9   : > { %v11970_v20 = vadd.f32 %v3128_v38, %v2960_v28  ;;  %16693 = vst [vmem:[#allocation116_spill] sm:$0xff] %v11974_v39 }
 0x1ca   : > { %16695 = vst [vmem:[#allocation118_spill] sm:$0xff] %v11978_v9 }
 0x1ce   : > { %v2961_v37 = vpop.f32.mrf.mxu2  ;;  %v3130_v56 = vpop.f32.mrf.mxu3 }
 0x1cf   : > { %v2962_v11 = vadd.f32 %v2961_v37, %v2793_v10  ;;  %v2626_v26 = vpop.f32.mrf.mxu0  ;;  %v2795_v28 = vpop.f32.mrf.mxu1 }
 0x1d0   : > { %v2796_v38 = vadd.f32 %v2795_v28, %v2626_v26  ;;  %v10362_v26 = vld [vmem:[#allocation7 + $0x5dc] sm:$0xf0]  ;;  %v10359_v28 = vld [vmem:[#allocation7 + $0x5cc] sm:$0xf] }
 0x1d1   : > { %v11980_v33 = vadd.f32 %v3130_v56, %v2962_v11  ;;  %v10358_v11 = vld [vmem:[#allocation7 + $0x5c4] sm:$0xf]  ;;  %v10363_v56 = vld [vmem:[#allocation7 + $0x5e4] sm:$0xf0] }
 0x1d2   : > { %2665 = vmatmul.bf16.gmra.mxu0 %v11972_v27  ;;  %2834 = vmatmul.bf16.gmra.mxu1 %v11974_v39  ;;  %v9347_v39 = vld [vmem:[#allocation7 + $0x5e8] sm:$0xf0]  ;;  %v11992_v15 = vor.u32 %v10363_v56, %v9345_v31  ;;  %v9371_v56 = vld [vmem:[#allocation7 + $0x620] sm:$0xf0] }
 0x1d3   : > { %3003 = vmatmul.bf16.gmra.mxu2 %v11976_v25  ;;  %3172 = vmatmul.bf16.gmra.mxu3 %v11978_v9  ;;  %v11988_v25 = vor.u32 %v10362_v26, %v9337_v57 }
 0x1d4   : > { %16698 = vst [vmem:[#allocation121_spill] sm:$0xff] %v11992_v15 }
 0x1d5   : > { %16696 = vst [vmem:[#allocation119_spill] sm:$0xff] %v11988_v25 }
 0x1d6   : > { %v2964_v37 = vpop.f32.mrf.mxu2  ;;  %v3133_v36 = vpop.f32.mrf.mxu3 }
 0x1d7   : > { %v2965_v10 = vadd.f32 %v2964_v37, %v2796_v38  ;;  %v2628_v59 = vpop.f32.mrf.mxu0  ;;  %v2797_v30 = vpop.f32.mrf.mxu1  ;;  %v11990_v37 = vor.u32 %v10358_v11, %v9339_v58 }
 0x1d8   : > { %v2798_v8 = vadd.f32 %v2797_v30, %v2628_v59  ;;  %v11994_v59 = vor.u32 %v10359_v28, %v9347_v39  ;;  %v9369_v39 = vld [vmem:[#allocation7 + $0x600] sm:$0xf]  ;;  %v9377_v28 = vld [vmem:[#allocation7 + $0x608] sm:$0xf] }
 0x1d9   : > { %v11986_v7 = vadd.f32 %v3133_v36, %v2965_v10  ;;  %16697 = vst [vmem:[#allocation120_spill] sm:$0xff] %v11990_v37 }
 0x1da   : > { %16699 = vst [vmem:[#allocation122_spill] sm:$0xff] %v11994_v59 }
 0x1de   : > { %v2966_v27 = vpop.f32.mrf.mxu2  ;;  %v3135_v38 = vpop.f32.mrf.mxu3 }
 0x1df   : > { %v2967_v9 = vadd.f32 %v2966_v27, %v2798_v8  ;;  %v2631_v24 = vpop.f32.mrf.mxu0  ;;  %v2800_v10 = vpop.f32.mrf.mxu1 }
 0x1e0   : > { %v2801_v36 = vadd.f32 %v2800_v10, %v2631_v24  ;;  %v10370_v24 = vld [vmem:[#allocation7 + $0x61c] sm:$0xf0]  ;;  %v10367_v10 = vld [vmem:[#allocation7 + $0x60c] sm:$0xf] }
 0x1e1   : > { %v11996_v30 = vadd.f32 %v3135_v38, %v2967_v9  ;;  %v10366_v9 = vld [vmem:[#allocation7 + $0x604] sm:$0xf]  ;;  %v10371_v38 = vld [vmem:[#allocation7 + $0x624] sm:$0xf0] }
 0x1e2   : > { %2670 = vmatmul.bf16.gmra.mxu0 %v11988_v25  ;;  %2839 = vmatmul.bf16.gmra.mxu1 %v11990_v37  ;;  %v9379_v37 = vld [vmem:[#allocation7 + $0x628] sm:$0xf0]  ;;  %v12008_v13 = vor.u32 %v10371_v38, %v9377_v28  ;;  %v9403_v38 = vld [vmem:[#allocation7 + $0x660] sm:$0xf0] }
 0x1e3   : > { %3008 = vmatmul.bf16.gmra.mxu2 %v11992_v15  ;;  %3177 = vmatmul.bf16.gmra.mxu3 %v11994_v59  ;;  %v12004_v15 = vor.u32 %v10370_v24, %v9369_v39 }
 0x1e4   : > { %16702 = vst [vmem:[#allocation125_spill] sm:$0xff] %v12008_v13 }
 0x1e5   : > { %16700 = vst [vmem:[#allocation123_spill] sm:$0xff] %v12004_v15 }
 0x1e6   : > { %v2969_v27 = vpop.f32.mrf.mxu2  ;;  %v3138_v26 = vpop.f32.mrf.mxu3 }
 0x1e7   : > { %v2970_v8 = vadd.f32 %v2969_v27, %v2801_v36  ;;  %v2633_v57 = vpop.f32.mrf.mxu0  ;;  %v2802_v11 = vpop.f32.mrf.mxu1  ;;  %v12006_v27 = vor.u32 %v10366_v9, %v9371_v56 }
 0x1e8   : > { %v2803_v58 = vadd.f32 %v2802_v11, %v2633_v57  ;;  %v12010_v57 = vor.u32 %v10367_v10, %v9379_v37  ;;  %v9401_v37 = vld [vmem:[#allocation7 + $0x640] sm:$0xf]  ;;  %v9409_v10 = vld [vmem:[#allocation7 + $0x648] sm:$0xf] }
 0x1e9   : > { %v12002_v31 = vadd.f32 %v3138_v26, %v2970_v8  ;;  %16701 = vst [vmem:[#allocation124_spill] sm:$0xff] %v12006_v27 }
 0x1ea   : > { %16703 = vst [vmem:[#allocation126_spill] sm:$0xff] %v12010_v57 }
 0x1ee   : > { %v2971_v25 = vpop.f32.mrf.mxu2  ;;  %v3140_v36 = vpop.f32.mrf.mxu3 }
 0x1ef   : > { %v2972_v59 = vadd.f32 %v2971_v25, %v2803_v58  ;;  %v2636_v14 = vpop.f32.mrf.mxu0  ;;  %v2805_v8 = vpop.f32.mrf.mxu1 }
 0x1f0   : > { %v2806_v26 = vadd.f32 %v2805_v8, %v2636_v14  ;;  %v10378_v14 = vld [vmem:[#allocation7 + $0x65c] sm:$0xf0]  ;;  %v10375_v8 = vld [vmem:[#allocation7 + $0x64c] sm:$0xf] }
 0x1f1   : > { %v12012_v11 = vadd.f32 %v3140_v36, %v2972_v59  ;;  %v10374_v59 = vld [vmem:[#allocation7 + $0x644] sm:$0xf]  ;;  %v10379_v36 = vld [vmem:[#allocation7 + $0x664] sm:$0xf0] }
 0x1f2   : > { %2675 = vmatmul.bf16.gmra.mxu0 %v12004_v15  ;;  %2844 = vmatmul.bf16.gmra.mxu1 %v12006_v27  ;;  %v9411_v27 = vld [vmem:[#allocation7 + $0x668] sm:$0xf0]  ;;  %v12024_v3 = vor.u32 %v10379_v36, %v9409_v10  ;;  %v9435_v36 = vld [vmem:[#allocation7 + $0x6a0] sm:$0xf0] }
 0x1f3   : > { %3013 = vmatmul.bf16.gmra.mxu2 %v12008_v13  ;;  %3182 = vmatmul.bf16.gmra.mxu3 %v12010_v57  ;;  %v12020_v13 = vor.u32 %v10378_v14, %v9401_v37 }
 0x1f4   : > { %16706 = vst [vmem:[#allocation129_spill] sm:$0xff] %v12024_v3 }
 0x1f5   : > { %16704 = vst [vmem:[#allocation127_spill] sm:$0xff] %v12020_v13 }
 0x1f6   : > { %v2974_v25 = vpop.f32.mrf.mxu2  ;;  %v3143_v24 = vpop.f32.mrf.mxu3 }
 0x1f7   : > { %v2975_v58 = vadd.f32 %v2974_v25, %v2806_v26  ;;  %v2638_v39 = vpop.f32.mrf.mxu0  ;;  %v2807_v9 = vpop.f32.mrf.mxu1  ;;  %v12022_v25 = vor.u32 %v10374_v59, %v9403_v38 }
 0x1f8   : > { %v2808_v56 = vadd.f32 %v2807_v9, %v2638_v39  ;;  %v12026_v39 = vor.u32 %v10375_v8, %v9411_v27  ;;  %v9433_v27 = vld [vmem:[#allocation7 + $0x680] sm:$0xf]  ;;  %v9441_v8 = vld [vmem:[#allocation7 + $0x688] sm:$0xf] }
 0x1f9   : > { %v12018_v28 = vadd.f32 %v3143_v24, %v2975_v58  ;;  %16705 = vst [vmem:[#allocation128_spill] sm:$0xff] %v12022_v25 }
 0x1fa   : > { %16707 = vst [vmem:[#allocation130_spill] sm:$0xff] %v12026_v39 }
 0x1fe   : > { %v2976_v15 = vpop.f32.mrf.mxu2  ;;  %v3145_v26 = vpop.f32.mrf.mxu3 }
 0x1ff   : > { %v2977_v57 = vadd.f32 %v2976_v15, %v2808_v56  ;;  %v2641_v12 = vpop.f32.mrf.mxu0  ;;  %v2810_v58 = vpop.f32.mrf.mxu1 }
 0x200   : > { %v2811_v24 = vadd.f32 %v2810_v58, %v2641_v12  ;;  %v10386_v12 = vld [vmem:[#allocation7 + $0x69c] sm:$0xf0]  ;;  %v10383_v58 = vld [vmem:[#allocation7 + $0x68c] sm:$0xf] }
 0x201   : > { %v12028_v9 = vadd.f32 %v3145_v26, %v2977_v57  ;;  %v10382_v57 = vld [vmem:[#allocation7 + $0x684] sm:$0xf]  ;;  %v10387_v26 = vld [vmem:[#allocation7 + $0x6a4] sm:$0xf0] }
 0x202   : > { %2680 = vmatmul.bf16.gmra.mxu0 %v12020_v13  ;;  %2849 = vmatmul.bf16.gmra.mxu1 %v12022_v25  ;;  %v9443_v25 = vld [vmem:[#allocation7 + $0x6a8] sm:$0xf0]  ;;  %v12040_v1 = vor.u32 %v10387_v26, %v9441_v8  ;;  %v9467_v26 = vld [vmem:[#allocation7 + $0x6e0] sm:$0xf0] }
 0x203   : > { %16708 = vst [vmem:[#allocation131_spill] sm:$0xff] %v12028_v9  ;;  %3018 = vmatmul.bf16.gmra.mxu2 %v12024_v3  ;;  %3187 = vmatmul.bf16.gmra.mxu3 %v12026_v39  ;;  %v12036_v3 = vor.u32 %v10386_v12, %v9433_v27 }
 0x204   : > { %16712 = vst [vmem:[#allocation135_spill] sm:$0xff] %v12040_v1 }
 0x205   : > { %16710 = vst [vmem:[#allocation133_spill] sm:$0xff] %v12036_v3 }
 0x206   : > { %v2979_v15 = vpop.f32.mrf.mxu2  ;;  %v3148_v14 = vpop.f32.mrf.mxu3 }
 0x207   : > { %v2980_v56 = vadd.f32 %v2979_v15, %v2811_v24  ;;  %v2643_v37 = vpop.f32.mrf.mxu0  ;;  %v2812_v59 = vpop.f32.mrf.mxu1  ;;  %v12038_v15 = vor.u32 %v10382_v57, %v9435_v36 }
 0x208   : > { %v2813_v38 = vadd.f32 %v2812_v59, %v2643_v37  ;;  %v12042_v37 = vor.u32 %v10383_v58, %v9443_v25  ;;  %v9465_v25 = vld [vmem:[#allocation7 + $0x6c0] sm:$0xf]  ;;  %v9473_v58 = vld [vmem:[#allocation7 + $0x6c8] sm:$0xf] }
 0x209   : > { %v12034_v10 = vadd.f32 %v3148_v14, %v2980_v56  ;;  %16711 = vst [vmem:[#allocation134_spill] sm:$0xff] %v12038_v15 }
 0x20a   : > { %16713 = vst [vmem:[#allocation136_spill] sm:$0xff] %v12042_v37 }
 0x20b   : > { %16709 = vst [vmem:[#allocation132_spill] sm:$0xff] %v12034_v10 }
 0x20e   : > { %v2981_v13 = vpop.f32.mrf.mxu2  ;;  %v3150_v24 = vpop.f32.mrf.mxu3 }
 0x20f   : > { %v2982_v39 = vadd.f32 %v2981_v13, %v2813_v38  ;;  %v2646_v2 = vpop.f32.mrf.mxu0  ;;  %v2815_v56 = vpop.f32.mrf.mxu1 }
 0x210   : > { %v2816_v14 = vadd.f32 %v2815_v56, %v2646_v2  ;;  %v10394_v2 = vld [vmem:[#allocation7 + $0x6dc] sm:$0xf0]  ;;  %v10391_v56 = vld [vmem:[#allocation7 + $0x6cc] sm:$0xf] }
 0x211   : > { %v12044_v59 = vadd.f32 %v3150_v24, %v2982_v39  ;;  %v10390_v39 = vld [vmem:[#allocation7 + $0x6c4] sm:$0xf]  ;;  %v10395_v24 = vld [vmem:[#allocation7 + $0x6e4] sm:$0xf0] }
 0x212   : > { %2685 = vmatmul.bf16.gmra.mxu0 %v12036_v3  ;;  %2854 = vmatmul.bf16.gmra.mxu1 %v12038_v15  ;;  %v9475_v15 = vld [vmem:[#allocation7 + $0x6e8] sm:$0xf0]  ;;  %v12056_v55 = vor.u32 %v10395_v24, %v9473_v58  ;;  %v9499_v24 = vld [vmem:[#allocation7 + $0x720] sm:$0xf0] }
 0x213   : > { %16714 = vst [vmem:[#allocation137_spill] sm:$0xff] %v12044_v59  ;;  %3023 = vmatmul.bf16.gmra.mxu2 %v12040_v1  ;;  %3192 = vmatmul.bf16.gmra.mxu3 %v12042_v37  ;;  %v12052_v1 = vor.u32 %v10394_v2, %v9465_v25 }
 0x214   : > { %16718 = vst [vmem:[#allocation141_spill] sm:$0xff] %v12056_v55 }
 0x215   : > { %16716 = vst [vmem:[#allocation139_spill] sm:$0xff] %v12052_v1 }
 0x216   : > { %v2984_v13 = vpop.f32.mrf.mxu2  ;;  %v3153_v12 = vpop.f32.mrf.mxu3 }
 0x217   : > { %v2985_v38 = vadd.f32 %v2984_v13, %v2816_v14  ;;  %v2648_v27 = vpop.f32.mrf.mxu0  ;;  %v2817_v57 = vpop.f32.mrf.mxu1  ;;  %v12054_v13 = vor.u32 %v10390_v39, %v9467_v26 }
 0x218   : > { %v2818_v36 = vadd.f32 %v2817_v57, %v2648_v27  ;;  %v12058_v27 = vor.u32 %v10391_v56, %v9475_v15  ;;  %v9497_v15 = vld [vmem:[#allocation7 + $0x700] sm:$0xf]  ;;  %v9505_v56 = vld [vmem:[#allocation7 + $0x708] sm:$0xf] }
 0x219   : > { %v12050_v8 = vadd.f32 %v3153_v12, %v2985_v38  ;;  %16717 = vst [vmem:[#allocation140_spill] sm:$0xff] %v12054_v13 }
 0x21a   : > { %16719 = vst [vmem:[#allocation142_spill] sm:$0xff] %v12058_v27 }
 0x21b   : > { %16715 = vst [vmem:[#allocation138_spill] sm:$0xff] %v12050_v8 }
 0x21e   : > { %v2986_v3 = vpop.f32.mrf.mxu2  ;;  %v3155_v14 = vpop.f32.mrf.mxu3 }
 0x21f   : > { %v2987_v37 = vadd.f32 %v2986_v3, %v2818_v36  ;;  %v2651_v0 = vpop.f32.mrf.mxu0  ;;  %v2820_v38 = vpop.f32.mrf.mxu1 }
 0x220   : > { %v2821_v12 = vadd.f32 %v2820_v38, %v2651_v0  ;;  %v10402_v0 = vld [vmem:[#allocation7 + $0x71c] sm:$0xf0]  ;;  %v10399_v38 = vld [vmem:[#allocation7 + $0x70c] sm:$0xf] }
 0x221   : > { %v12060_v57 = vadd.f32 %v3155_v14, %v2987_v37  ;;  %v10398_v37 = vld [vmem:[#allocation7 + $0x704] sm:$0xf]  ;;  %v10403_v14 = vld [vmem:[#allocation7 + $0x724] sm:$0xf0] }
 0x222   : > { %2690 = vmatmul.bf16.gmra.mxu0 %v12052_v1  ;;  %2859 = vmatmul.bf16.gmra.mxu1 %v12054_v13  ;;  %v12068_v13 = vor.u32 %v10402_v0, %v9497_v15  ;;  %v751_v15 = vld [vmem:[%s11572_s30 + $0x5e0] sm:$0xff] }
 0x223   : > { %16720 = vst [vmem:[#allocation143_spill] sm:$0xff] %v12060_v57  ;;  %3028 = vmatmul.bf16.gmra.mxu2 %v12056_v55  ;;  %3197 = vmatmul.bf16.gmra.mxu3 %v12058_v27  ;;  %v9507_v55 = vld [vmem:[#allocation7 + $0x728] sm:$0xf0] }
 0x224   : > { %16722 = vst [vmem:[#allocation145_spill] sm:$0xff] %v12068_v13  ;;  %v12074_v1 = vor.u32 %v10399_v38, %v9507_v55  ;;  %v783_v55 = vld [vmem:[%s11572_s30 + $0x6e0] sm:$0xff] }
 0x225   : > { %v815_v38 = vld [vmem:[%s11572_s30 + $0x7e0] sm:$0xff] }
 0x226   : > { %v2989_v3 = vpop.f32.mrf.mxu2  ;;  %v3158_v2 = vpop.f32.mrf.mxu3  ;;  %16725 = vst [vmem:[#allocation148_spill] sm:$0xff] %v12074_v1 }
 0x227   : > { %v2990_v36 = vadd.f32 %v2989_v3, %v2821_v12  ;;  %v2653_v25 = vpop.f32.mrf.mxu0  ;;  %v2822_v39 = vpop.f32.mrf.mxu1 }
 0x228   : > { %v2823_v26 = vadd.f32 %v2822_v39, %v2653_v25  ;;  %v12070_v25 = vor.u32 %v10398_v37, %v9499_v24  ;;  %v753_v37 = vld [vmem:[%s11572_s30 + $0x5f0] sm:$0xff] }
 0x229   : > { %v12066_v58 = vadd.f32 %v3158_v2, %v2990_v36  ;;  %v12072_v2 = vor.u32 %v10403_v14, %v9505_v56  ;;  %v785_v24 = vld [vmem:[%s11572_s30 + $0x6f0] sm:$0xff]  ;;  %v913_v56 = vpack.c.bf16 %v753_v37, %v751_v15 }
 0x22a   : > { %16723 = vst [vmem:[#allocation146_spill] sm:$0xff] %v12070_v25  ;;  %v929_v14 = vpack.c.bf16 %v785_v24, %v783_v55  ;;  %v781_v55 = vld [vmem:[%s11572_s30 + $0x6d0] sm:$0xff]  ;;  %v811_v24 = vld [vmem:[%s11572_s30 + $0x7c0] sm:$0xff] }
 0x22b   : > { %16721 = vst [vmem:[#allocation144_spill] sm:$0xff] %v12066_v58  ;;  %3392 = vmatpush.bf16.msrb.mxu1 %v913_v56 }
 0x22c   : > { %16724 = vst [vmem:[#allocation147_spill] sm:$0xff] %v12072_v2  ;;  %3561 = vmatpush.bf16.msrb.mxu2 %v929_v14 }
 0x22e   : > { %v2991_v27 = vpop.f32.mrf.mxu2  ;;  %v3160_v36 = vpop.f32.mrf.mxu3 }
 0x22f   : > { %v2992_v12 = vadd.f32 %v2991_v27, %v2823_v26  ;;  %v2656_v3 = vpop.f32.mrf.mxu0  ;;  %v2825_v39 = vpop.f32.mrf.mxu1  ;;  %v719_v27 = vld [vmem:[%s11572_s30 + $0x4e0] sm:$0xff]  ;;  %v721_v26 = vld [vmem:[%s11572_s30 + $0x4f0] sm:$0xff] }
 0x230   : > { %v2826_v54 = vadd.f32 %v2825_v39, %v2656_v3  ;;  %v897_v0 = vpack.c.bf16 %v721_v26, %v719_v27  ;;  %v715_v3 = vld [vmem:[%s11572_s30 + $0x4c0] sm:$0xff] }
 0x231   : > { %v12076_v53 = vadd.f32 %v3160_v36, %v2992_v12  ;;  %v817_v12 = vld [vmem:[%s11572_s30 + $0x7f0] sm:$0xff] }
 0x232   : > { %2695 = vmatmul.bf16.gmra.mxu0 %v12068_v13  ;;  %2864 = vmatmul.bf16.gmra.mxu1 %v12070_v25  ;;  %v717_v36 = vld [vmem:[%s11572_s30 + $0x4d0] sm:$0xff]  ;;  %v945_v27 = vpack.c.bf16 %v817_v12, %v815_v38  ;;  %v779_v13 = vld [vmem:[%s11572_s30 + $0x6c0] sm:$0xff] }
 0x233   : > { %16726 = vst [vmem:[#allocation149_spill] sm:$0xff] %v12076_v53  ;;  %3033 = vmatmul.bf16.gmra.mxu2 %v12072_v2  ;;  %3202 = vmatmul.bf16.gmra.mxu3 %v12074_v1  ;;  %v895_v26 = vpack.c.bf16 %v717_v36, %v715_v3  ;;  %v747_v2 = vld [vmem:[%s11572_s30 + $0x5c0] sm:$0xff]  ;;  %v749_v25 = vld [vmem:[%s11572_s30 + $0x5d0] sm:$0xff]  ;;  %v927_v56 = vpack.c.bf16 %v781_v55, %v779_v13 }
 0x234   : > { %3223 = vmatpush.bf16.msrb.mxu0 %v897_v0  ;;  %v911_v0 = vpack.c.bf16 %v749_v25, %v747_v2  ;;  %v813_v1 = vld [vmem:[%s11572_s30 + $0x7d0] sm:$0xff]  ;;  %3730 = vmatpush.bf16.msrb.mxu3 %v945_v27  ;;  %v10410_v3 = vld [vmem:[#allocation7 + $0x75c] sm:$0xf0]  ;;  %v9537_v27 = vld [vmem:[#allocation7 + $0x748] sm:$0xf] }
 0x235   : > { %v943_v14 = vpack.c.bf16 %v813_v1, %v811_v24  ;;  %v711_v36 = vld [vmem:[%s11572_s30 + $0x4a0] sm:$0xff]  ;;  %v713_v25 = vld [vmem:[%s11572_s30 + $0x4b0] sm:$0xff]  ;;  %3562 = vmatpush.bf16.msrb.mxu2 %v927_v56  ;;  %v10411_v24 = vld [vmem:[#allocation7 + $0x764] sm:$0xf0] }
 0x236   : > { %v2994_v39 = vpop.f32.mrf.mxu2  ;;  %v3163_v37 = vpop.f32.mrf.mxu3  ;;  %v743_v2 = vld [vmem:[%s11572_s30 + $0x5a0] sm:$0xff]  ;;  %3393 = vmatpush.bf16.msrb.mxu1 %v911_v0  ;;  %v893_v13 = vpack.c.bf16 %v713_v25, %v711_v36  ;;  %v745_v1 = vld [vmem:[%s11572_s30 + $0x5b0] sm:$0xff] }
 0x237   : > { %v2995_v52 = vadd.f32 %v2994_v39, %v2826_v54  ;;  %v2658_v15 = vpop.f32.mrf.mxu0  ;;  %v2827_v43 = vpop.f32.mrf.mxu1  ;;  %v9529_v54 = vld [vmem:[#allocation7 + $0x740] sm:$0xf]  ;;  %v10406_v39 = vld [vmem:[#allocation7 + $0x744] sm:$0xf]  ;;  %v709_v36 = vld [vmem:[%s11572_s30 + $0x490] sm:$0xff] }
 0x238   : > { %v2828_v38 = vadd.f32 %v2827_v43, %v2658_v15  ;;  %3224 = vmatpush.bf16.msrb.mxu0 %v895_v26  ;;  %v775_v43 = vld [vmem:[%s11572_s30 + $0x6a0] sm:$0xff]  ;;  %v909_v15 = vpack.c.bf16 %v745_v1, %v743_v2  ;;  %v809_v26 = vld [vmem:[%s11572_s30 + $0x7b0] sm:$0xff]  ;;  %3731 = vmatpush.bf16.msrb.mxu3 %v943_v14  ;;  %v12111_v53 = vor.u32 %v10410_v3, %v9529_v54 }
 0x239   : > { %v12098_v12 = vadd.f32 %v3163_v37, %v2995_v52  ;;  %v777_v52 = vld [vmem:[%s11572_s30 + $0x6b0] sm:$0xff]  ;;  %v807_v55 = vld [vmem:[%s11572_s30 + $0x7a0] sm:$0xff]  ;;  %v12116_v14 = vor.u32 %v10406_v39, %v9531_v42 }
 0x23a   : > { %v925_v37 = vpack.c.bf16 %v777_v52, %v775_v43  ;;  %v941_v0 = vpack.c.bf16 %v809_v26, %v807_v55  ;;  %v707_v56 = vld [vmem:[%s11572_s30 + $0x480] sm:$0xff]  ;;  %16728 = vst [vmem:[#allocation151_spill] sm:$0xff] %v12111_v53  ;;  %3394 = vmatpush.bf16.msrb.mxu1 %v909_v15  ;;  %v741_v1 = vld [vmem:[%s11572_s30 + $0x590] sm:$0xff]  ;;  %v12122_v15 = vor.u32 %v10407_v41, %v9539_v40 }
 0x23b   : > { %16727 = vst [vmem:[#allocation150_spill] sm:$0xff] %v12098_v12  ;;  %v739_v25 = vld [vmem:[%s11572_s30 + $0x580] sm:$0xff]  ;;  %v891_v2 = vpack.c.bf16 %v709_v36, %v707_v56  ;;  %v773_v52 = vld [vmem:[%s11572_s30 + $0x690] sm:$0xff] }
 0x23c   : > { %3225 = vmatpush.bf16.msrb.mxu0 %v893_v13  ;;  %3563 = vmatpush.bf16.msrb.mxu2 %v925_v37  ;;  %v771_v43 = vld [vmem:[%s11572_s30 + $0x680] sm:$0xff]  ;;  %16729 = vst [vmem:[#allocation152_spill] sm:$0xff] %v12116_v14  ;;  %v12118_v13 = vor.u32 %v10411_v24, %v9537_v27  ;;  %v907_v55 = vpack.c.bf16 %v741_v1, %v739_v25  ;;  %v805_v54 = vld [vmem:[%s11572_s30 + $0x790] sm:$0xff] }
 0x23d   : > { %v803_v26 = vld [vmem:[%s11572_s30 + $0x780] sm:$0xff]  ;;  %16731 = vst [vmem:[#allocation154_spill] sm:$0xff] %v12122_v15  ;;  %3732 = vmatpush.bf16.msrb.mxu3 %v941_v0  ;;  %v705_v27 = vld [vmem:[%s11572_s30 + $0x470] sm:$0xff] }
 0x23e   : > { %v2996_v12 = vpop.f32.mrf.mxu2  ;;  %v3165_v8 = vpop.f32.mrf.mxu3  ;;  %16730 = vst [vmem:[#allocation153_spill] sm:$0xff] %v12118_v13  ;;  %v939_v42 = vpack.c.bf16 %v805_v54, %v803_v26  ;;  %3395 = vmatpush.bf16.msrb.mxu1 %v907_v55  ;;  %v703_v39 = vld [vmem:[%s11572_s30 + $0x460] sm:$0xff]  ;;  %v737_v41 = vld [vmem:[%s11572_s30 + $0x570] sm:$0xff] }
 0x23f   : > { %v2997_v58 = vadd.f32 %v2996_v12, %v2828_v38  ;;  %v2661_v57 = vpop.f32.mrf.mxu0  ;;  %v2830_v3 = vpop.f32.mrf.mxu1  ;;  %v923_v38 = vpack.c.bf16 %v773_v52, %v771_v43  ;;  %v735_v24 = vld [vmem:[%s11572_s30 + $0x560] sm:$0xff]  ;;  %v889_v40 = vpack.c.bf16 %v705_v27, %v703_v39  ;;  %v801_v36 = vld [vmem:[%s11572_s30 + $0x770] sm:$0xff] }
 0x240   : > { %v2831_v12 = vadd.f32 %v2830_v3, %v2661_v57  ;;  %3226 = vmatpush.bf16.msrb.mxu0 %v891_v2  ;;  %v769_v57 = vld [vmem:[%s11572_s30 + $0x670] sm:$0xff]  ;;  %v799_v56 = vld [vmem:[%s11572_s30 + $0x760] sm:$0xff] }
 0x241   : > { %v12124_v37 = vadd.f32 %v3165_v8, %v2997_v58  ;;  %v767_v8 = vld [vmem:[%s11572_s30 + $0x660] sm:$0xff]  ;;  %3564 = vmatpush.bf16.msrb.mxu2 %v923_v38  ;;  %v905_v58 = vpack.c.bf16 %v737_v41, %v735_v24  ;;  %3733 = vmatpush.bf16.msrb.mxu3 %v939_v42  ;;  %v701_v2 = vld [vmem:[%s11572_s30 + $0x450] sm:$0xff]  ;;  %v937_v43 = vpack.c.bf16 %v801_v36, %v799_v56 }
 0x242   : > { %2700 = vmatmul.bf16.gmra.mxu0 %v12111_v53  ;;  %2869 = vmatmul.bf16.gmra.mxu1 %v12116_v14  ;;  %v921_v0 = vpack.c.bf16 %v769_v57, %v767_v8  ;;  %v699_v25 = vld [vmem:[%s11572_s30 + $0x440] sm:$0xff]  ;;  %v733_v26 = vld [vmem:[%s11572_s30 + $0x550] sm:$0xff] }
 0x243   : > { %16732 = vst [vmem:[#allocation155_spill] sm:$0xff] %v12124_v37  ;;  %3038 = vmatmul.bf16.gmra.mxu2 %v12118_v13  ;;  %3207 = vmatmul.bf16.gmra.mxu3 %v12122_v15  ;;  %v887_v52 = vpack.c.bf16 %v701_v2, %v699_v25  ;;  %v731_v55 = vld [vmem:[%s11572_s30 + $0x540] sm:$0xff]  ;;  %v765_v27 = vld [vmem:[%s11572_s30 + $0x650] sm:$0xff] }
 0x244   : > { %3227 = vmatpush.bf16.msrb.mxu0 %v889_v40  ;;  %3396 = vmatpush.bf16.msrb.mxu1 %v905_v58  ;;  %v763_v54 = vld [vmem:[%s11572_s30 + $0x640] sm:$0xff]  ;;  %v903_v42 = vpack.c.bf16 %v733_v26, %v731_v55  ;;  %v797_v40 = vld [vmem:[%s11572_s30 + $0x750] sm:$0xff] }
 0x245   : > { %v795_v24 = vld [vmem:[%s11572_s30 + $0x740] sm:$0xff]  ;;  %3565 = vmatpush.bf16.msrb.mxu2 %v921_v0  ;;  %v919_v8 = vpack.c.bf16 %v765_v27, %v763_v54  ;;  %3734 = vmatpush.bf16.msrb.mxu3 %v937_v43  ;;  %v697_v2 = vld [vmem:[%s11572_s30 + $0x430] sm:$0xff] }
 0x246   : > { %v2999_v1 = vpop.f32.mrf.mxu2  ;;  %v3168_v39 = vpop.f32.mrf.mxu3  ;;  %v9561_v56 = vld [vmem:[#allocation7 + $0x780] sm:$0xf]  ;;  %v935_v36 = vpack.c.bf16 %v797_v40, %v795_v24  ;;  %v10414_v55 = vld [vmem:[#allocation7 + $0x784] sm:$0xf]  ;;  %v729_v54 = vld [vmem:[%s11572_s30 + $0x530] sm:$0xff] }
 0x247   : > { %v3000_v3 = vadd.f32 %v2999_v1, %v2831_v12  ;;  %v2663_v38 = vpop.f32.mrf.mxu0  ;;  %v2832_v41 = vpop.f32.mrf.mxu1  ;;  %v10418_v12 = vld [vmem:[#allocation7 + $0x79c] sm:$0xf0]  ;;  %v9563_v26 = vld [vmem:[#allocation7 + $0x7a0] sm:$0xf0]  ;;  %v793_v43 = vld [vmem:[%s11572_s30 + $0x730] sm:$0xff] }
 0x248   : > { %v2833_v57 = vadd.f32 %v2832_v41, %v2663_v38  ;;  %3228 = vmatpush.bf16.msrb.mxu0 %v887_v52  ;;  %v695_v25 = vld [vmem:[%s11572_s30 + $0x420] sm:$0xff]  ;;  %3397 = vmatpush.bf16.msrb.mxu1 %v903_v42  ;;  %v10419_v52 = vld [vmem:[#allocation7 + $0x7a4] sm:$0xf0]  ;;  %v10415_v24 = vld [vmem:[#allocation7 + $0x78c] sm:$0xf] }
 0x249   : > { %v12146_v58 = vadd.f32 %v3168_v39, %v3000_v3  ;;  %v727_v1 = vld [vmem:[%s11572_s30 + $0x520] sm:$0xff]  ;;  %v885_v0 = vpack.c.bf16 %v697_v2, %v695_v25  ;;  %v761_v3 = vld [vmem:[%s11572_s30 + $0x630] sm:$0xff]  ;;  %v9569_v39 = vld [vmem:[#allocation7 + $0x788] sm:$0xf]  ;;  %3566 = vmatpush.bf16.msrb.mxu2 %v919_v8  ;;  %3735 = vmatpush.bf16.msrb.mxu3 %v935_v36 }
 0x24a   : > { %v759_v38 = vld [vmem:[%s11572_s30 + $0x620] sm:$0xff]  ;;  %v901_v27 = vpack.c.bf16 %v729_v54, %v727_v1  ;;  %v9571_v40 = vld [vmem:[#allocation7 + $0x7a8] sm:$0xf0]  ;;  %v693_v2 = vld [vmem:[%s11572_s30 + $0x410] sm:$0xff]  ;;  %v12159_v1 = vor.u32 %v10418_v12, %v9561_v56  ;;  %v12166_v36 = vor.u32 %v10419_v52, %v9569_v39 }
 0x24b   : > { %16733 = vst [vmem:[#allocation156_spill] sm:$0xff] %v12146_v58  ;;  %v791_v41 = vld [vmem:[%s11572_s30 + $0x720] sm:$0xff]  ;;  %v917_v15 = vpack.c.bf16 %v761_v3, %v759_v38  ;;  %v725_v53 = vld [vmem:[%s11572_s30 + $0x510] sm:$0xff]  ;;  %v12164_v38 = vor.u32 %v10414_v55, %v9563_v26  ;;  %v12170_v9 = vor.u32 %v10415_v24, %v9571_v40  ;;  %v9601_v52 = vld [vmem:[#allocation7 + $0x7c8] sm:$0xf] }
 0x24c   : > { %3229 = vmatpush.bf16.msrb.mxu0 %v885_v0  ;;  %v933_v42 = vpack.c.bf16 %v793_v43, %v791_v41  ;;  %v691_v25 = vld [vmem:[%s11572_s30 + $0x400] sm:$0xff]  ;;  %16734 = vst [vmem:[#allocation157_spill] sm:$0xff] %v12159_v1  ;;  %3398 = vmatpush.bf16.msrb.mxu1 %v901_v27  ;;  %v757_v37 = vld [vmem:[%s11572_s30 + $0x610] sm:$0xff]  ;;  %v10427_v24 = vld [vmem:[#allocation7 + $0x7e4] sm:$0xf0] }
 0x24d   : > { %v723_v13 = vld [vmem:[%s11572_s30 + $0x500] sm:$0xff]  ;;  %v883_v54 = vpack.c.bf16 %v693_v2, %v691_v25  ;;  %16735 = vst [vmem:[#allocation158_spill] sm:$0xff] %v12164_v38  ;;  %v789_v41 = vld [vmem:[%s11572_s30 + $0x710] sm:$0xff]  ;;  %3567 = vmatpush.bf16.msrb.mxu2 %v917_v15  ;;  %v10423_v40 = vld [vmem:[#allocation7 + $0x7cc] sm:$0xf] }
 0x24e   : > { %v3001_v14 = vpop.f32.mrf.mxu2  ;;  %v755_v58 = vld [vmem:[%s11572_s30 + $0x600] sm:$0xff]  ;;  %v3170_v8 = vpop.f32.mrf.mxu3  ;;  %16736 = vst [vmem:[#allocation159_spill] sm:$0xff] %v12166_v36  ;;  %v899_v0 = vpack.c.bf16 %v725_v53, %v723_v13  ;;  %3736 = vmatpush.bf16.msrb.mxu3 %v933_v42  ;;  %v9603_v42 = vld [vmem:[#allocation7 + $0x7e8] sm:$0xf0] }
 0x24f   : > { %v3002_v59 = vadd.f32 %v3001_v14, %v2833_v57  ;;  %v2666_v10 = vpop.f32.mrf.mxu0  ;;  %v787_v3 = vld [vmem:[%s11572_s30 + $0x700] sm:$0xff]  ;;  %v2835_v43 = vpop.f32.mrf.mxu1  ;;  %16737 = vst [vmem:[#allocation160_spill] sm:$0xff] %v12170_v9  ;;  %v915_v56 = vpack.c.bf16 %v757_v37, %v755_v58 }
 0x250   : > { %v2836_v12 = vadd.f32 %v2835_v43, %v2666_v10  ;;  %3230 = vmatpush.bf16.msrb.mxu0 %v883_v54  ;;  %v931_v14 = vpack.c.bf16 %v789_v41, %v787_v3  ;;  %3399 = vmatpush.bf16.msrb.mxu1 %v899_v0  ;;  %v9593_v58 = vld [vmem:[#allocation7 + $0x7c0] sm:$0xf]  ;;  %v10422_v26 = vld [vmem:[#allocation7 + $0x7c4] sm:$0xf]  ;;  %v12184_v41 = vor.u32 %v10427_v24, %v9601_v52  ;;  %v8619_v52 = vld [vmem:[#allocation7 + $0x30] sm:$0xf0] }
 0x251   : > { %v12172_v27 = vadd.f32 %v3170_v8, %v3002_v59  ;;  %3568 = vmatpush.bf16.msrb.mxu2 %v915_v56  ;;  %v10426_v55 = vld [vmem:[#allocation7 + $0x7dc] sm:$0xf0]  ;;  %v9595_v39 = vld [vmem:[#allocation7 + $0x7e0] sm:$0xf0]  ;;  %v12186_v56 = vor.u32 %v10423_v40, %v9603_v42  ;;  %v8625_v24 = vld [vmem:[#allocation7 + $0x18] sm:$0xf] }
 0x252   : > { %2705 = vmatmul.bf16.gmra.mxu0 %v12159_v1  ;;  %2874 = vmatmul.bf16.gmra.mxu1 %v12164_v38  ;;  %v12180_v2 = vor.u32 %v10426_v55, %v9593_v58  ;;  %v12182_v3 = vor.u32 %v10422_v26, %v9595_v39  ;;  %16740 = vst [vmem:[#allocation163_spill] sm:$0xff] %v12184_v41  ;;  %v8617_v55 = vld [vmem:[#allocation7 + $0x10] sm:$0xf]  ;;  %v10176_v39 = vld [vmem:[#allocation7 + $0x14] sm:$0xf] }
 0x253   : > { %3043 = vmatmul.bf16.gmra.mxu2 %v12166_v36  ;;  %3212 = vmatmul.bf16.gmra.mxu3 %v12170_v9  ;;  %16741 = vst [vmem:[#allocation164_spill] sm:$0xff] %v12186_v56  ;;  %v10180_v26 = vld [vmem:[#allocation7 + $0x2c] sm:$0xf0]  ;;  %v10181_v40 = vld [vmem:[#allocation7 + $0x34] sm:$0xf0] }
 0x254   : > { %3737 = vmatpush.bf16.msrb.mxu3 %v931_v14  ;;  %16738 = vst [vmem:[#allocation161_spill] sm:$0xff] %v12180_v2  ;;  %v10177_v42 = vld [vmem:[#allocation7 + $0x1c] sm:$0xf] }
 0x255   : > { %16739 = vst [vmem:[#allocation162_spill] sm:$0xff] %v12182_v3 }
 0x256   : > { %v3004_v53 = vpop.f32.mrf.mxu2  ;;  %v3173_v10 = vpop.f32.mrf.mxu3 }
 0x257   : > { %v3005_v13 = vadd.f32 %v3004_v53, %v2836_v12  ;;  %v2668_v15 = vpop.f32.mrf.mxu0  ;;  %v2837_v59 = vpop.f32.mrf.mxu1 }
 0x258   : > { %v2838_v37 = vadd.f32 %v2837_v59, %v2668_v15 }
 0x259   : > { %v12178_v57 = vadd.f32 %v3173_v10, %v3005_v13 }
 0x25e   : > { %v3006_v25 = vpop.f32.mrf.mxu2  ;;  %v3175_v0 = vpop.f32.mrf.mxu3 }
 0x25f   : > { %v3007_v54 = vadd.f32 %v3006_v25, %v2838_v37  ;;  %v2671_v8 = vpop.f32.mrf.mxu0  ;;  %v2840_v43 = vpop.f32.mrf.mxu1  ;;  %v8627_v25 = vld [vmem:[#allocation7 + $0x38] sm:$0xf0] }
 0x260   : > { %v2841_v12 = vadd.f32 %v2840_v43, %v2671_v8  ;;  %v12196_v8 = vor.u32 %v10180_v26, %v8617_v55 }
 0x261   : > { %v12188_v14 = vadd.f32 %v3175_v0, %v3007_v54 }
 0x262   : > { %2710 = vmatmul.bf16.gmra.mxu0 %v12180_v2  ;;  %2879 = vmatmul.bf16.gmra.mxu1 %v12182_v3  ;;  %16742 = vst [vmem:[#allocation165_spill] sm:$0xff] %v12196_v8 }
 0x263   : > { %3048 = vmatmul.bf16.gmra.mxu2 %v12184_v41  ;;  %3217 = vmatmul.bf16.gmra.mxu3 %v12186_v56  ;;  %v12200_v56 = vor.u32 %v10181_v40, %v8625_v24 }
 0x265   : > { %16744 = vst [vmem:[#allocation167_spill] sm:$0xff] %v12200_v56 }
 0x266   : > { %v3009_v53 = vpop.f32.mrf.mxu2  ;;  %v3178_v10 = vpop.f32.mrf.mxu3 }
 0x267   : > { %v3010_v13 = vadd.f32 %v3009_v53, %v2841_v12  ;;  %v2673_v15 = vpop.f32.mrf.mxu0  ;;  %v2842_v59 = vpop.f32.mrf.mxu1  ;;  %v12198_v53 = vor.u32 %v10176_v39, %v8619_v52 }
 0x268   : > { %v2843_v37 = vadd.f32 %v2842_v59, %v2673_v15  ;;  %v12202_v15 = vor.u32 %v10177_v42, %v8627_v25  ;;  %v8649_v42 = vld [vmem:[#allocation7 + $0x50] sm:$0xf] }
 0x269   : > { %v12194_v58 = vadd.f32 %v3178_v10, %v3010_v13  ;;  %16743 = vst [vmem:[#allocation166_spill] sm:$0xff] %v12198_v53  ;;  %v10188_v25 = vld [vmem:[#allocation7 + $0x6c] sm:$0xf0] }
 0x26a   : > { %16745 = vst [vmem:[#allocation168_spill] sm:$0xff] %v12202_v15 }
 0x26e   : > { %v3011_v54 = vpop.f32.mrf.mxu2  ;;  %v3180_v12 = vpop.f32.mrf.mxu3 }
 0x26f   : > { %v3012_v0 = vadd.f32 %v3011_v54, %v2843_v37  ;;  %v2676_v43 = vpop.f32.mrf.mxu0  ;;  %v2845_v13 = vpop.f32.mrf.mxu1  ;;  %v10184_v54 = vld [vmem:[#allocation7 + $0x54] sm:$0xf] }
 0x270   : > { %v2846_v10 = vadd.f32 %v2845_v13, %v2676_v43  ;;  %v8657_v43 = vld [vmem:[#allocation7 + $0x58] sm:$0xf]  ;;  %v10185_v13 = vld [vmem:[#allocation7 + $0x5c] sm:$0xf] }
 0x271   : > { %v12204_v59 = vadd.f32 %v3180_v12, %v3012_v0  ;;  %v8651_v0 = vld [vmem:[#allocation7 + $0x70] sm:$0xf0]  ;;  %v10189_v12 = vld [vmem:[#allocation7 + $0x74] sm:$0xf0] }
 0x272   : > { %3231 = vmatmul.bf16.vlgmr.msrb.gmra.mxu0 %v12196_v8  ;;  %3400 = vmatmul.bf16.vlgmr.msrb.gmra.mxu1 %v12198_v53  ;;  %v8659_v53 = vld [vmem:[#allocation7 + $0x78] sm:$0xf0]  ;;  %v12216_v3 = vor.u32 %v10189_v12, %v8657_v43  ;;  %v8683_v12 = vld [vmem:[#allocation7 + $0xb0] sm:$0xf0] }
 0x273   : > { %3569 = vmatmul.bf16.vlgmr.msrb.gmra.mxu2 %v12200_v56  ;;  %3738 = vmatmul.bf16.vlgmr.msrb.gmra.mxu3 %v12202_v15  ;;  %v12212_v56 = vor.u32 %v10188_v25, %v8649_v42 }
 0x274   : > { %16748 = vst [vmem:[#allocation171_spill] sm:$0xff] %v12216_v3 }
 0x275   : > { %16746 = vst [vmem:[#allocation169_spill] sm:$0xff] %v12212_v56 }
 0x276   : > { %v3014_v37 = vpop.f32.mrf.mxu2  ;;  %v3183_v39 = vpop.f32.mrf.mxu3 }
 0x277   : > { %v3015_v55 = vadd.f32 %v3014_v37, %v2846_v10  ;;  %v2678_v26 = vpop.f32.mrf.mxu0  ;;  %v2847_v52 = vpop.f32.mrf.mxu1  ;;  %v12214_v37 = vor.u32 %v10184_v54, %v8651_v0 }
 0x278   : > { %v2848_v24 = vadd.f32 %v2847_v52, %v2678_v26  ;;  %v12218_v26 = vor.u32 %v10185_v13, %v8659_v53  ;;  %v8681_v53 = vld [vmem:[#allocation7 + $0x90] sm:$0xf]  ;;  %v8689_v13 = vld [vmem:[#allocation7 + $0x98] sm:$0xf] }
 0x279   : > { %v12210_v40 = vadd.f32 %v3183_v39, %v3015_v55  ;;  %16747 = vst [vmem:[#allocation170_spill] sm:$0xff] %v12214_v37 }
 0x27a   : > { %16749 = vst [vmem:[#allocation172_spill] sm:$0xff] %v12218_v26 }
 0x27e   : > { %v3016_v8 = vpop.f32.mrf.mxu2  ;;  %v3185_v10 = vpop.f32.mrf.mxu3 }
 0x27f   : > { %v3017_v15 = vadd.f32 %v3016_v8, %v2848_v24  ;;  %v2681_v41 = vpop.f32.mrf.mxu0  ;;  %v2850_v55 = vpop.f32.mrf.mxu1 }
 0x280   : > { %v2851_v39 = vadd.f32 %v2850_v55, %v2681_v41  ;;  %v10196_v41 = vld [vmem:[#allocation7 + $0xac] sm:$0xf0]  ;;  %v10193_v55 = vld [vmem:[#allocation7 + $0x9c] sm:$0xf] }
 0x281   : > { %v12220_v52 = vadd.f32 %v3185_v10, %v3017_v15  ;;  %v10192_v15 = vld [vmem:[#allocation7 + $0x94] sm:$0xf]  ;;  %v10197_v10 = vld [vmem:[#allocation7 + $0xb4] sm:$0xf0] }
 0x282   : > { %3236 = vmatmul.bf16.gmra.mxu0 %v12212_v56  ;;  %3405 = vmatmul.bf16.gmra.mxu1 %v12214_v37  ;;  %v8691_v37 = vld [vmem:[#allocation7 + $0xb8] sm:$0xf0]  ;;  %v12232_v9 = vor.u32 %v10197_v10, %v8689_v13  ;;  %v8715_v10 = vld [vmem:[#allocation7 + $0xf0] sm:$0xf0] }
 0x283   : > { %3574 = vmatmul.bf16.gmra.mxu2 %v12216_v3  ;;  %3743 = vmatmul.bf16.gmra.mxu3 %v12218_v26  ;;  %v12228_v3 = vor.u32 %v10196_v41, %v8681_v53 }
 0x284   : > { %16752 = vst [vmem:[#allocation175_spill] sm:$0xff] %v12232_v9 }
 0x285   : > { %16750 = vst [vmem:[#allocation173_spill] sm:$0xff] %v12228_v3 }
 0x286   : > { %v3019_v8 = vpop.f32.mrf.mxu2  ;;  %v3188_v25 = vpop.f32.mrf.mxu3 }
 0x287   : > { %v3020_v24 = vadd.f32 %v3019_v8, %v2851_v39  ;;  %v2683_v42 = vpop.f32.mrf.mxu0  ;;  %v2852_v54 = vpop.f32.mrf.mxu1  ;;  %v12230_v8 = vor.u32 %v10192_v15, %v8683_v12 }
 0x288   : > { %v2853_v0 = vadd.f32 %v2852_v54, %v2683_v42  ;;  %v12234_v42 = vor.u32 %v10193_v55, %v8691_v37  ;;  %v8713_v37 = vld [vmem:[#allocation7 + $0xd0] sm:$0xf]  ;;  %v8721_v55 = vld [vmem:[#allocation7 + $0xd8] sm:$0xf] }
 0x289   : > { %v12226_v43 = vadd.f32 %v3188_v25, %v3020_v24  ;;  %16751 = vst [vmem:[#allocation174_spill] sm:$0xff] %v12230_v8 }
 0x28a   : > { %16753 = vst [vmem:[#allocation176_spill] sm:$0xff] %v12234_v42 }
 0x28e   : > { %v3021_v56 = vpop.f32.mrf.mxu2  ;;  %v3190_v39 = vpop.f32.mrf.mxu3 }
 0x28f   : > { %v3022_v26 = vadd.f32 %v3021_v56, %v2853_v0  ;;  %v2686_v2 = vpop.f32.mrf.mxu0  ;;  %v2855_v24 = vpop.f32.mrf.mxu1 }
 0x290   : > { %v2856_v25 = vadd.f32 %v2855_v24, %v2686_v2  ;;  %v10204_v2 = vld [vmem:[#allocation7 + $0xec] sm:$0xf0]  ;;  %v10201_v24 = vld [vmem:[#allocation7 + $0xdc] sm:$0xf] }
 0x291   : > { %v12236_v54 = vadd.f32 %v3190_v39, %v3022_v26  ;;  %v10200_v26 = vld [vmem:[#allocation7 + $0xd4] sm:$0xf]  ;;  %v10205_v39 = vld [vmem:[#allocation7 + $0xf4] sm:$0xf0] }
 0x292   : > { %3241 = vmatmul.bf16.gmra.mxu0 %v12228_v3  ;;  %3410 = vmatmul.bf16.gmra.mxu1 %v12230_v8  ;;  %v8723_v8 = vld [vmem:[#allocation7 + $0xf8] sm:$0xf0]  ;;  %v12248_v38 = vor.u32 %v10205_v39, %v8721_v55  ;;  %v8747_v39 = vld [vmem:[#allocation7 + $0x130] sm:$0xf0] }
 0x293   : > { %3579 = vmatmul.bf16.gmra.mxu2 %v12232_v9  ;;  %3748 = vmatmul.bf16.gmra.mxu3 %v12234_v42  ;;  %v12244_v9 = vor.u32 %v10204_v2, %v8713_v37 }
 0x294   : > { %16756 = vst [vmem:[#allocation179_spill] sm:$0xff] %v12248_v38 }
 0x295   : > { %16754 = vst [vmem:[#allocation177_spill] sm:$0xff] %v12244_v9 }
 0x296   : > { %v3024_v56 = vpop.f32.mrf.mxu2  ;;  %v3193_v41 = vpop.f32.mrf.mxu3 }
 0x297   : > { %v3025_v0 = vadd.f32 %v3024_v56, %v2856_v25  ;;  %v2688_v53 = vpop.f32.mrf.mxu0  ;;  %v2857_v15 = vpop.f32.mrf.mxu1  ;;  %v12246_v56 = vor.u32 %v10200_v26, %v8715_v10 }
 0x298   : > { %v2858_v12 = vadd.f32 %v2857_v15, %v2688_v53  ;;  %v12250_v53 = vor.u32 %v10201_v24, %v8723_v8  ;;  %v8745_v8 = vld [vmem:[#allocation7 + $0x110] sm:$0xf]  ;;  %v8753_v24 = vld [vmem:[#allocation7 + $0x118] sm:$0xf] }
 0x299   : > { %v12242_v13 = vadd.f32 %v3193_v41, %v3025_v0  ;;  %16755 = vst [vmem:[#allocation178_spill] sm:$0xff] %v12246_v56 }
 0x29a   : > { %16757 = vst [vmem:[#allocation180_spill] sm:$0xff] %v12250_v53 }
 0x29e   : > { %v3026_v3 = vpop.f32.mrf.mxu2  ;;  %v3195_v25 = vpop.f32.mrf.mxu3 }
 0x29f   : > { %v3027_v42 = vadd.f32 %v3026_v3, %v2858_v12  ;;  %v2691_v36 = vpop.f32.mrf.mxu0  ;;  %v2860_v0 = vpop.f32.mrf.mxu1 }
 0x2a0   : > { %v2861_v41 = vadd.f32 %v2860_v0, %v2691_v36  ;;  %v10212_v36 = vld [vmem:[#allocation7 + $0x12c] sm:$0xf0]  ;;  %v10209_v0 = vld [vmem:[#allocation7 + $0x11c] sm:$0xf] }
 0x2a1   : > { %v12252_v15 = vadd.f32 %v3195_v25, %v3027_v42  ;;  %v10208_v42 = vld [vmem:[#allocation7 + $0x114] sm:$0xf]  ;;  %v10213_v25 = vld [vmem:[#allocation7 + $0x134] sm:$0xf0] }
 0x2a2   : > { %3246 = vmatmul.bf16.gmra.mxu0 %v12244_v9  ;;  %3415 = vmatmul.bf16.gmra.mxu1 %v12246_v56  ;;  %v8755_v56 = vld [vmem:[#allocation7 + $0x138] sm:$0xf0] }
 0x2a3   : > { %16758 = vst [vmem:[#allocation181_spill] sm:$0xff] %v12252_v15  ;;  %3584 = vmatmul.bf16.gmra.mxu2 %v12248_v38  ;;  %3753 = vmatmul.bf16.gmra.mxu3 %v12250_v53  ;;  %v12260_v38 = vor.u32 %v10212_v36, %v8745_v8  ;;  %v12264_v15 = vor.u32 %v10213_v25, %v8753_v24  ;;  %v8779_v25 = vld [vmem:[#allocation7 + $0x170] sm:$0xf0] }
 0x2a5   : > { %16760 = vst [vmem:[#allocation183_spill] sm:$0xff] %v12260_v38 }
 0x2a6   : > { %v3029_v3 = vpop.f32.mrf.mxu2  ;;  %v3198_v2 = vpop.f32.mrf.mxu3  ;;  %16762 = vst [vmem:[#allocation185_spill] sm:$0xff] %v12264_v15 }
 0x2a7   : > { %v3030_v12 = vadd.f32 %v3029_v3, %v2861_v41  ;;  %v2693_v37 = vpop.f32.mrf.mxu0  ;;  %v2862_v26 = vpop.f32.mrf.mxu1  ;;  %v12262_v3 = vor.u32 %v10208_v42, %v8747_v39 }
 0x2a8   : > { %v2863_v10 = vadd.f32 %v2862_v26, %v2693_v37  ;;  %v12266_v37 = vor.u32 %v10209_v0, %v8755_v56  ;;  %v8777_v56 = vld [vmem:[#allocation7 + $0x150] sm:$0xf]  ;;  %v8785_v0 = vld [vmem:[#allocation7 + $0x158] sm:$0xf] }
 0x2a9   : > { %v12258_v55 = vadd.f32 %v3198_v2, %v3030_v12  ;;  %16761 = vst [vmem:[#allocation184_spill] sm:$0xff] %v12262_v3 }
 0x2aa   : > { %16763 = vst [vmem:[#allocation186_spill] sm:$0xff] %v12266_v37 }
 0x2ab   : > { %16759 = vst [vmem:[#allocation182_spill] sm:$0xff] %v12258_v55 }
 0x2ae   : > { %v3031_v9 = vpop.f32.mrf.mxu2  ;;  %v3200_v41 = vpop.f32.mrf.mxu3 }
 0x2af   : > { %v3032_v53 = vadd.f32 %v3031_v9, %v2863_v10  ;;  %v2696_v1 = vpop.f32.mrf.mxu0  ;;  %v2865_v12 = vpop.f32.mrf.mxu1 }
 0x2b0   : > { %v2866_v2 = vadd.f32 %v2865_v12, %v2696_v1  ;;  %v10220_v1 = vld [vmem:[#allocation7 + $0x16c] sm:$0xf0]  ;;  %v10217_v12 = vld [vmem:[#allocation7 + $0x15c] sm:$0xf] }
 0x2b1   : > { %v12268_v26 = vadd.f32 %v3200_v41, %v3032_v53  ;;  %v10216_v53 = vld [vmem:[#allocation7 + $0x154] sm:$0xf]  ;;  %v10221_v41 = vld [vmem:[#allocation7 + $0x174] sm:$0xf0] }
 0x2b2   : > { %3251 = vmatmul.bf16.gmra.mxu0 %v12260_v38  ;;  %3420 = vmatmul.bf16.gmra.mxu1 %v12262_v3  ;;  %v8787_v3 = vld [vmem:[#allocation7 + $0x178] sm:$0xf0]  ;;  %v12280_v55 = vor.u32 %v10221_v41, %v8785_v0  ;;  %v8811_v41 = vld [vmem:[#allocation7 + $0x1b0] sm:$0xf0] }
 0x2b3   : > { %16764 = vst [vmem:[#allocation187_spill] sm:$0xff] %v12268_v26  ;;  %3589 = vmatmul.bf16.gmra.mxu2 %v12264_v15  ;;  %3758 = vmatmul.bf16.gmra.mxu3 %v12266_v37  ;;  %v12276_v15 = vor.u32 %v10220_v1, %v8777_v56 }
 0x2b4   : > { %16768 = vst [vmem:[#allocation191_spill] sm:$0xff] %v12280_v55 }
 0x2b5   : > { %16766 = vst [vmem:[#allocation189_spill] sm:$0xff] %v12276_v15 }
 0x2b6   : > { %v3034_v9 = vpop.f32.mrf.mxu2  ;;  %v3203_v36 = vpop.f32.mrf.mxu3 }
 0x2b7   : > { %v3035_v10 = vadd.f32 %v3034_v9, %v2866_v2  ;;  %v2698_v8 = vpop.f32.mrf.mxu0  ;;  %v2867_v42 = vpop.f32.mrf.mxu1  ;;  %v12278_v9 = vor.u32 %v10216_v53, %v8779_v25 }
 0x2b8   : > { %v2868_v39 = vadd.f32 %v2867_v42, %v2698_v8  ;;  %v12282_v8 = vor.u32 %v10217_v12, %v8787_v3  ;;  %v8809_v3 = vld [vmem:[#allocation7 + $0x190] sm:$0xf]  ;;  %v8817_v12 = vld [vmem:[#allocation7 + $0x198] sm:$0xf] }
 0x2b9   : > { %v12274_v24 = vadd.f32 %v3203_v36, %v3035_v10  ;;  %16767 = vst [vmem:[#allocation190_spill] sm:$0xff] %v12278_v9 }
 0x2ba   : > { %16769 = vst [vmem:[#allocation192_spill] sm:$0xff] %v12282_v8 }
 0x2bb   : > { %16765 = vst [vmem:[#allocation188_spill] sm:$0xff] %v12274_v24 }
 0x2be   : > { %v3036_v38 = vpop.f32.mrf.mxu2  ;;  %v3205_v2 = vpop.f32.mrf.mxu3 }
 0x2bf   : > { %v3037_v37 = vadd.f32 %v3036_v38, %v2868_v39  ;;  %v2701_v26 = vpop.f32.mrf.mxu0  ;;  %v2870_v10 = vpop.f32.mrf.mxu1 }
 0x2c0   : > { %v2871_v36 = vadd.f32 %v2870_v10, %v2701_v26  ;;  %v10228_v26 = vld [vmem:[#allocation7 + $0x1ac] sm:$0xf0]  ;;  %v10225_v10 = vld [vmem:[#allocation7 + $0x19c] sm:$0xf] }
 0x2c1   : > { %v12284_v42 = vadd.f32 %v3205_v2, %v3037_v37  ;;  %v10224_v37 = vld [vmem:[#allocation7 + $0x194] sm:$0xf]  ;;  %v10229_v2 = vld [vmem:[#allocation7 + $0x1b4] sm:$0xf0] }
 0x2c2   : > { %3256 = vmatmul.bf16.gmra.mxu0 %v12276_v15  ;;  %3425 = vmatmul.bf16.gmra.mxu1 %v12278_v9  ;;  %v8819_v9 = vld [vmem:[#allocation7 + $0x1b8] sm:$0xf0]  ;;  %v12296_v24 = vor.u32 %v10229_v2, %v8817_v12  ;;  %v8843_v2 = vld [vmem:[#allocation7 + $0x1f0] sm:$0xf0] }
 0x2c3   : > { %16770 = vst [vmem:[#allocation193_spill] sm:$0xff] %v12284_v42  ;;  %3594 = vmatmul.bf16.gmra.mxu2 %v12280_v55  ;;  %3763 = vmatmul.bf16.gmra.mxu3 %v12282_v8  ;;  %v12292_v55 = vor.u32 %v10228_v26, %v8809_v3 }
 0x2c4   : > { %16774 = vst [vmem:[#allocation197_spill] sm:$0xff] %v12296_v24 }
 0x2c5   : > { %16772 = vst [vmem:[#allocation195_spill] sm:$0xff] %v12292_v55 }
 0x2c6   : > { %v3039_v38 = vpop.f32.mrf.mxu2  ;;  %v3208_v1 = vpop.f32.mrf.mxu3 }
 0x2c7   : > { %v3040_v39 = vadd.f32 %v3039_v38, %v2871_v36  ;;  %v2703_v56 = vpop.f32.mrf.mxu0  ;;  %v2872_v53 = vpop.f32.mrf.mxu1  ;;  %v12294_v38 = vor.u32 %v10224_v37, %v8811_v41 }
 0x2c8   : > { %v2873_v25 = vadd.f32 %v2872_v53, %v2703_v56  ;;  %v12298_v56 = vor.u32 %v10225_v10, %v8819_v9  ;;  %v8841_v9 = vld [vmem:[#allocation7 + $0x1d0] sm:$0xf]  ;;  %v8849_v10 = vld [vmem:[#allocation7 + $0x1d8] sm:$0xf] }
 0x2c9   : > { %v12290_v0 = vadd.f32 %v3208_v1, %v3040_v39  ;;  %16773 = vst [vmem:[#allocation196_spill] sm:$0xff] %v12294_v38 }
 0x2ca   : > { %16775 = vst [vmem:[#allocation198_spill] sm:$0xff] %v12298_v56 }
 0x2cb   : > { %16771 = vst [vmem:[#allocation194_spill] sm:$0xff] %v12290_v0 }
 0x2ce   : > { %v3041_v15 = vpop.f32.mrf.mxu2  ;;  %v3210_v36 = vpop.f32.mrf.mxu3 }
 0x2cf   : > { %v3042_v8 = vadd.f32 %v3041_v15, %v2873_v25  ;;  %v2706_v42 = vpop.f32.mrf.mxu0  ;;  %v2875_v39 = vpop.f32.mrf.mxu1 }
 0x2d0   : > { %v2876_v1 = vadd.f32 %v2875_v39, %v2706_v42  ;;  %v10236_v42 = vld [vmem:[#allocation7 + $0x1ec] sm:$0xf0]  ;;  %v10233_v39 = vld [vmem:[#allocation7 + $0x1dc] sm:$0xf] }
 0x2d1   : > { %v12300_v53 = vadd.f32 %v3210_v36, %v3042_v8  ;;  %v10232_v8 = vld [vmem:[#allocation7 + $0x1d4] sm:$0xf]  ;;  %v10237_v36 = vld [vmem:[#allocation7 + $0x1f4] sm:$0xf0] }
 0x2d2   : > { %3261 = vmatmul.bf16.gmra.mxu0 %v12292_v55  ;;  %3430 = vmatmul.bf16.gmra.mxu1 %v12294_v38  ;;  %v8851_v38 = vld [vmem:[#allocation7 + $0x1f8] sm:$0xf0]  ;;  %v12312_v0 = vor.u32 %v10237_v36, %v8849_v10  ;;  %v8875_v36 = vld [vmem:[#allocation7 + $0x230] sm:$0xf0] }
 0x2d3   : > { %16776 = vst [vmem:[#allocation199_spill] sm:$0xff] %v12300_v53  ;;  %3599 = vmatmul.bf16.gmra.mxu2 %v12296_v24  ;;  %3768 = vmatmul.bf16.gmra.mxu3 %v12298_v56  ;;  %v12308_v24 = vor.u32 %v10236_v42, %v8841_v9 }
 0x2d4   : > { %16780 = vst [vmem:[#allocation203_spill] sm:$0xff] %v12312_v0 }
 0x2d5   : > { %16778 = vst [vmem:[#allocation201_spill] sm:$0xff] %v12308_v24 }
 0x2d6   : > { %v3044_v15 = vpop.f32.mrf.mxu2  ;;  %v3213_v26 = vpop.f32.mrf.mxu3 }
 0x2d7   : > { %v3045_v25 = vadd.f32 %v3044_v15, %v2876_v1  ;;  %v2708_v3 = vpop.f32.mrf.mxu0  ;;  %v2877_v37 = vpop.f32.mrf.mxu1  ;;  %v12310_v15 = vor.u32 %v10232_v8, %v8843_v2 }
 0x2d8   : > { %v2878_v41 = vadd.f32 %v2877_v37, %v2708_v3  ;;  %v12314_v3 = vor.u32 %v10233_v39, %v8851_v38  ;;  %v8873_v38 = vld [vmem:[#allocation7 + $0x210] sm:$0xf]  ;;  %v8881_v39 = vld [vmem:[#allocation7 + $0x218] sm:$0xf] }
 0x2d9   : > { %v12306_v12 = vadd.f32 %v3213_v26, %v3045_v25  ;;  %16779 = vst [vmem:[#allocation202_spill] sm:$0xff] %v12310_v15 }
 0x2da   : > { %16781 = vst [vmem:[#allocation204_spill] sm:$0xff] %v12314_v3 }
 0x2db   : > { %16777 = vst [vmem:[#allocation200_spill] sm:$0xff] %v12306_v12 }
 0x2de   : > { %v3046_v55 = vpop.f32.mrf.mxu2  ;;  %v3215_v1 = vpop.f32.mrf.mxu3 }
 0x2df   : > { %v3047_v56 = vadd.f32 %v3046_v55, %v2878_v41  ;;  %v2711_v53 = vpop.f32.mrf.mxu0  ;;  %v2880_v25 = vpop.f32.mrf.mxu1 }
 0x2e0   : > { %v2881_v26 = vadd.f32 %v2880_v25, %v2711_v53  ;;  %v10244_v53 = vld [vmem:[#allocation7 + $0x22c] sm:$0xf0]  ;;  %v10241_v25 = vld [vmem:[#allocation7 + $0x21c] sm:$0xf] }
 0x2e1   : > { %v12316_v37 = vadd.f32 %v3215_v1, %v3047_v56  ;;  %v10240_v56 = vld [vmem:[#allocation7 + $0x214] sm:$0xf]  ;;  %v10245_v1 = vld [vmem:[#allocation7 + $0x234] sm:$0xf0] }
 0x2e2   : > { %3266 = vmatmul.bf16.gmra.mxu0 %v12308_v24  ;;  %3435 = vmatmul.bf16.gmra.mxu1 %v12310_v15  ;;  %v8883_v15 = vld [vmem:[#allocation7 + $0x238] sm:$0xf0]  ;;  %v12328_v12 = vor.u32 %v10245_v1, %v8881_v39  ;;  %v10248_v39 = vld [vmem:[#allocation7 + $0x254] sm:$0xf] }
 0x2e3   : > { %16782 = vst [vmem:[#allocation205_spill] sm:$0xff] %v12316_v37  ;;  %3604 = vmatmul.bf16.gmra.mxu2 %v12312_v0  ;;  %3773 = vmatmul.bf16.gmra.mxu3 %v12314_v3  ;;  %v12324_v0 = vor.u32 %v10244_v53, %v8873_v38  ;;  %v8907_v1 = vld [vmem:[#allocation7 + $0x270] sm:$0xf0] }
 0x2e4   : > { %16786 = vst [vmem:[#allocation209_spill] sm:$0xff] %v12328_v12 }
 0x2e5   : > { %16784 = vst [vmem:[#allocation207_spill] sm:$0xff] %v12324_v0 }
 0x2e6   : > { %v3049_v55 = vpop.f32.mrf.mxu2  ;;  %v3218_v42 = vpop.f32.mrf.mxu3 }
 0x2e7   : > { %v3050_v41 = vadd.f32 %v3049_v55, %v2881_v26  ;;  %v2713_v9 = vpop.f32.mrf.mxu0  ;;  %v2882_v8 = vpop.f32.mrf.mxu1  ;;  %v12326_v55 = vor.u32 %v10240_v56, %v8875_v36  ;;  %v10252_v36 = vld [vmem:[#allocation7 + $0x26c] sm:$0xf0] }
 0x2e8   : > { %v2883_v2 = vadd.f32 %v2882_v8, %v2713_v9 }
 0x2e9   : > { %v12322_v10 = vadd.f32 %v3218_v42, %v3050_v41  ;;  %16785 = vst [vmem:[#allocation208_spill] sm:$0xff] %v12326_v55  ;;  %v12331_v42 = vor.u32 %v10241_v25, %v8883_v15  ;;  %v8913_v25 = vld [vmem:[#allocation7 + $0x258] sm:$0xf] }
 0x2eb   : > { %16783 = vst [vmem:[#allocation206_spill] sm:$0xff] %v12322_v10 }
 0x2ec   : > { %16787 = vst [vmem:[#allocation210_spill] sm:$0xff] %v12331_v42 }
 0x2ee   : > { %v3051_v24 = vpop.f32.mrf.mxu2  ;;  %v3220_v37 = vpop.f32.mrf.mxu3 }
 0x2ef   : > { %v3052_v3 = vadd.f32 %v3051_v24, %v2883_v2  ;;  %v3232_v26 = vpop.f32.mrf.mxu0  ;;  %v3401_v9 = vpop.f32.mrf.mxu1 }
 0x2f0   : > { %v3233_v41 = vadd.f32 %v3232_v26, %v11762_v49  ;;  %v10253_v26 = vld [vmem:[#allocation7 + $0x274] sm:$0xf0] }
 0x2f1   : > { %v12333_v8 = vadd.f32 %v3220_v37, %v3052_v3  ;;  %v8905_v37 = vld [vmem:[#allocation7 + $0x250] sm:$0xf] }
 0x2f2   : > { %v3402_v10 = vadd.f32 %v3401_v9, %v3233_v41  ;;  %3271 = vmatmul.bf16.gmra.mxu0 %v12324_v0  ;;  %3440 = vmatmul.bf16.gmra.mxu1 %v12326_v55  ;;  %v10249_v41 = vld [vmem:[#allocation7 + $0x25c] sm:$0xf]  ;;  %v12344_v0 = vor.u32 %v10248_v39, %v8907_v1 }
 0x2f3   : > { %3609 = vmatmul.bf16.gmra.mxu2 %v12328_v12  ;;  %3778 = vmatmul.bf16.gmra.mxu3 %v12331_v42  ;;  %v8915_v9 = vld [vmem:[#allocation7 + $0x278] sm:$0xf0]  ;;  %v12342_v42 = vor.u32 %v10252_v36, %v8905_v37 }
 0x2f6   : > { %v3570_v24 = vpop.f32.mrf.mxu2  ;;  %v3739_v53 = vpop.f32.mrf.mxu3 }
 0x2f7   : > { %v3571_v2 = vadd.f32 %v3570_v24, %v3402_v10  ;;  %v3234_v38 = vpop.f32.mrf.mxu0  ;;  %v3403_v56 = vpop.f32.mrf.mxu1 }
 0x2f8   : > { %v3235_v49 = vadd.f32 %v3234_v38, %v11772_v29  ;;  %v12346_v29 = vor.u32 %v10253_v26, %v8913_v25  ;;  %v8937_v25 = vld [vmem:[#allocation7 + $0x290] sm:$0xf] }
 0x2f9   : > { %v12340_v15 = vadd.f32 %v3739_v53, %v3571_v2  ;;  %v12349_v53 = vor.u32 %v10249_v41, %v8915_v9  ;;  %v10260_v26 = vld [vmem:[#allocation7 + $0x2ac] sm:$0xf0]  ;;  %v10256_v41 = vld [vmem:[#allocation7 + $0x294] sm:$0xf] }
 0x2fa   : > { %v3404_v3 = vadd.f32 %v3403_v56, %v3235_v49  ;;  %16789 = vst [vmem:[#allocation212_spill] sm:$0xff] %v12346_v29  ;;  %v8939_v9 = vld [vmem:[#allocation7 + $0x2b0] sm:$0xf0] }
 0x2fb   : > { %16788 = vst [vmem:[#allocation211_spill] sm:$0xff] %v12340_v15  ;;  %v12360_v15 = vor.u32 %v10260_v26, %v8937_v25 }
 0x2fc   : > { %16790 = vst [vmem:[#allocation213_spill] sm:$0xff] %v12349_v53 }
 0x2fe   : > { %v3572_v12 = vpop.f32.mrf.mxu2  ;;  %v3741_v55 = vpop.f32.mrf.mxu3 }
 0x2ff   : > { %v3573_v10 = vadd.f32 %v3572_v12, %v3404_v3  ;;  %v3237_v24 = vpop.f32.mrf.mxu0  ;;  %v3406_v38 = vpop.f32.mrf.mxu1 }
 0x300   : > { %v3238_v2 = vadd.f32 %v3237_v24, %v11778_v47  ;;  %v10261_v24 = vld [vmem:[#allocation7 + $0x2b4] sm:$0xf0] }
 0x301   : > { %v12351_v49 = vadd.f32 %v3741_v55, %v3573_v10  ;;  %v8945_v10 = vld [vmem:[#allocation7 + $0x298] sm:$0xf] }
 0x302   : > { %v3407_v56 = vadd.f32 %v3406_v38, %v3238_v2  ;;  %3276 = vmatmul.bf16.gmra.mxu0 %v12342_v42  ;;  %3445 = vmatmul.bf16.gmra.mxu1 %v12344_v0  ;;  %v10257_v2 = vld [vmem:[#allocation7 + $0x29c] sm:$0xf] }
 0x303   : > { %16791 = vst [vmem:[#allocation214_spill] sm:$0xff] %v12351_v49  ;;  %3614 = vmatmul.bf16.gmra.mxu2 %v12346_v29  ;;  %3783 = vmatmul.bf16.gmra.mxu3 %v12349_v53  ;;  %v8947_v38 = vld [vmem:[#allocation7 + $0x2b8] sm:$0xf0]  ;;  %v12362_v29 = vor.u32 %v10256_v41, %v8939_v9 }
 0x306   : > { %v3575_v12 = vpop.f32.mrf.mxu2  ;;  %v3744_v36 = vpop.f32.mrf.mxu3 }
 0x307   : > { %v3576_v3 = vadd.f32 %v3575_v12, %v3407_v56  ;;  %v3239_v37 = vpop.f32.mrf.mxu0  ;;  %v3408_v39 = vpop.f32.mrf.mxu1 }
 0x308   : > { %v3240_v47 = vadd.f32 %v3239_v37, %v11788_v44  ;;  %v12364_v44 = vor.u32 %v10261_v24, %v8945_v10  ;;  %v8969_v10 = vld [vmem:[#allocation7 + $0x2d0] sm:$0xf] }
 0x309   : > { %v12358_v1 = vadd.f32 %v3744_v36, %v3576_v3  ;;  %v12367_v36 = vor.u32 %v10257_v2, %v8947_v38  ;;  %v10268_v24 = vld [vmem:[#allocation7 + $0x2ec] sm:$0xf0]  ;;  %v10264_v2 = vld [vmem:[#allocation7 + $0x2d4] sm:$0xf] }
 0x30a   : > { %v3409_v55 = vadd.f32 %v3408_v39, %v3240_v47  ;;  %16793 = vst [vmem:[#allocation216_spill] sm:$0xff] %v12364_v44  ;;  %v8971_v38 = vld [vmem:[#allocation7 + $0x2f0] sm:$0xf0] }
 0x30b   : > { %16792 = vst [vmem:[#allocation215_spill] sm:$0xff] %v12358_v1  ;;  %v12378_v1 = vor.u32 %v10268_v24, %v8969_v10 }
 0x30c   : > { %16794 = vst [vmem:[#allocation217_spill] sm:$0xff] %v12367_v36 }
 0x30e   : > { %v3577_v49 = vpop.f32.mrf.mxu2  ;;  %v3746_v53 = vpop.f32.mrf.mxu3 }
 0x30f   : > { %v3578_v56 = vadd.f32 %v3577_v49, %v3409_v55  ;;  %v3242_v12 = vpop.f32.mrf.mxu0  ;;  %v3411_v37 = vpop.f32.mrf.mxu1 }
 0x310   : > { %v3243_v3 = vadd.f32 %v3242_v12, %v11794_v61  ;;  %v10269_v12 = vld [vmem:[#allocation7 + $0x2f4] sm:$0xf0] }
 0x311   : > { %v12369_v47 = vadd.f32 %v3746_v53, %v3578_v56  ;;  %v8977_v56 = vld [vmem:[#allocation7 + $0x2d8] sm:$0xf] }
 0x312   : > { %v3412_v39 = vadd.f32 %v3411_v37, %v3243_v3  ;;  %3281 = vmatmul.bf16.gmra.mxu0 %v12360_v15  ;;  %3450 = vmatmul.bf16.gmra.mxu1 %v12362_v29  ;;  %v10265_v3 = vld [vmem:[#allocation7 + $0x2dc] sm:$0xf] }
 0x313   : > { %16795 = vst [vmem:[#allocation218_spill] sm:$0xff] %v12369_v47  ;;  %3619 = vmatmul.bf16.gmra.mxu2 %v12364_v44  ;;  %3788 = vmatmul.bf16.gmra.mxu3 %v12367_v36  ;;  %v8979_v37 = vld [vmem:[#allocation7 + $0x2f8] sm:$0xf0]  ;;  %v12380_v44 = vor.u32 %v10264_v2, %v8971_v38 }
 0x316   : > { %v3580_v49 = vpop.f32.mrf.mxu2  ;;  %v3749_v26 = vpop.f32.mrf.mxu3 }
 0x317   : > { %v3581_v55 = vadd.f32 %v3580_v49, %v3412_v39  ;;  %v3244_v25 = vpop.f32.mrf.mxu0  ;;  %v3413_v41 = vpop.f32.mrf.mxu1 }
 0x318   : > { %v3245_v61 = vadd.f32 %v3244_v25, %v11804_v51  ;;  %v12382_v51 = vor.u32 %v10269_v12, %v8977_v56  ;;  %v9001_v56 = vld [vmem:[#allocation7 + $0x310] sm:$0xf] }
 0x319   : > { %v12376_v9 = vadd.f32 %v3749_v26, %v3581_v55  ;;  %v12385_v26 = vor.u32 %v10265_v3, %v8979_v37  ;;  %v10276_v12 = vld [vmem:[#allocation7 + $0x32c] sm:$0xf0]  ;;  %v10272_v3 = vld [vmem:[#allocation7 + $0x314] sm:$0xf] }
 0x31a   : > { %v3414_v53 = vadd.f32 %v3413_v41, %v3245_v61  ;;  %16797 = vst [vmem:[#allocation220_spill] sm:$0xff] %v12382_v51  ;;  %v9003_v37 = vld [vmem:[#allocation7 + $0x330] sm:$0xf0] }
 0x31b   : > { %16796 = vst [vmem:[#allocation219_spill] sm:$0xff] %v12376_v9  ;;  %v12396_v9 = vor.u32 %v10276_v12, %v9001_v56 }
 0x31c   : > { %16798 = vst [vmem:[#allocation221_spill] sm:$0xff] %v12385_v26 }
 0x31e   : > { %v3582_v47 = vpop.f32.mrf.mxu2  ;;  %v3751_v36 = vpop.f32.mrf.mxu3 }
 0x31f   : > { %v3583_v39 = vadd.f32 %v3582_v47, %v3414_v53  ;;  %v3247_v49 = vpop.f32.mrf.mxu0  ;;  %v3416_v25 = vpop.f32.mrf.mxu1 }
 0x320   : > { %v3248_v55 = vadd.f32 %v3247_v49, %v11810_v16  ;;  %v10277_v49 = vld [vmem:[#allocation7 + $0x334] sm:$0xf0] }
 0x321   : > { %v12387_v61 = vadd.f32 %v3751_v36, %v3583_v39  ;;  %v9009_v39 = vld [vmem:[#allocation7 + $0x318] sm:$0xf] }
 0x322   : > { %v3417_v41 = vadd.f32 %v3416_v25, %v3248_v55  ;;  %3286 = vmatmul.bf16.gmra.mxu0 %v12378_v1  ;;  %3455 = vmatmul.bf16.gmra.mxu1 %v12380_v44  ;;  %v10273_v55 = vld [vmem:[#allocation7 + $0x31c] sm:$0xf] }
 0x323   : > { %16799 = vst [vmem:[#allocation222_spill] sm:$0xff] %v12387_v61  ;;  %3624 = vmatmul.bf16.gmra.mxu2 %v12382_v51  ;;  %3793 = vmatmul.bf16.gmra.mxu3 %v12385_v26  ;;  %v9011_v25 = vld [vmem:[#allocation7 + $0x338] sm:$0xf0]  ;;  %v12398_v51 = vor.u32 %v10272_v3, %v9003_v37 }
 0x326   : > { %v3585_v47 = vpop.f32.mrf.mxu2  ;;  %v3754_v24 = vpop.f32.mrf.mxu3 }
 0x327   : > { %v3586_v53 = vadd.f32 %v3585_v47, %v3417_v41  ;;  %v3249_v10 = vpop.f32.mrf.mxu0  ;;  %v3418_v2 = vpop.f32.mrf.mxu1 }
 0x328   : > { %v3250_v16 = vadd.f32 %v3249_v10, %v11820_v4  ;;  %v12400_v4 = vor.u32 %v10277_v49, %v9009_v39  ;;  %v9033_v39 = vld [vmem:[#allocation7 + $0x350] sm:$0xf] }
 0x329   : > { %v12394_v38 = vadd.f32 %v3754_v24, %v3586_v53  ;;  %v12403_v24 = vor.u32 %v10273_v55, %v9011_v25  ;;  %v10284_v49 = vld [vmem:[#allocation7 + $0x36c] sm:$0xf0]  ;;  %v10280_v55 = vld [vmem:[#allocation7 + $0x354] sm:$0xf] }
 0x32a   : > { %v3419_v36 = vadd.f32 %v3418_v2, %v3250_v16  ;;  %16801 = vst [vmem:[#allocation224_spill] sm:$0xff] %v12400_v4  ;;  %v9035_v25 = vld [vmem:[#allocation7 + $0x370] sm:$0xf0] }
 0x32b   : > { %16800 = vst [vmem:[#allocation223_spill] sm:$0xff] %v12394_v38  ;;  %v12414_v38 = vor.u32 %v10284_v49, %v9033_v39 }
 0x32c   : > { %16802 = vst [vmem:[#allocation225_spill] sm:$0xff] %v12403_v24 }
 0x32e   : > { %v3587_v61 = vpop.f32.mrf.mxu2  ;;  %v3756_v26 = vpop.f32.mrf.mxu3 }
 0x32f   : > { %v3588_v41 = vadd.f32 %v3587_v61, %v3419_v36  ;;  %v3252_v47 = vpop.f32.mrf.mxu0  ;;  %v3421_v10 = vpop.f32.mrf.mxu1 }
 0x330   : > { %v3253_v53 = vadd.f32 %v3252_v47, %v11826_v32  ;;  %v10285_v47 = vld [vmem:[#allocation7 + $0x374] sm:$0xf0] }
 0x331   : > { %v12405_v16 = vadd.f32 %v3756_v26, %v3588_v41  ;;  %v9041_v41 = vld [vmem:[#allocation7 + $0x358] sm:$0xf] }
 0x332   : > { %v3422_v2 = vadd.f32 %v3421_v10, %v3253_v53  ;;  %3291 = vmatmul.bf16.gmra.mxu0 %v12396_v9  ;;  %3460 = vmatmul.bf16.gmra.mxu1 %v12398_v51  ;;  %v10281_v53 = vld [vmem:[#allocation7 + $0x35c] sm:$0xf] }
 0x333   : > { %16803 = vst [vmem:[#allocation226_spill] sm:$0xff] %v12405_v16  ;;  %3629 = vmatmul.bf16.gmra.mxu2 %v12400_v4  ;;  %3798 = vmatmul.bf16.gmra.mxu3 %v12403_v24  ;;  %v9043_v10 = vld [vmem:[#allocation7 + $0x378] sm:$0xf0]  ;;  %v12416_v4 = vor.u32 %v10280_v55, %v9035_v25 }
 0x336   : > { %v3590_v61 = vpop.f32.mrf.mxu2  ;;  %v3759_v12 = vpop.f32.mrf.mxu3 }
 0x337   : > { %v3591_v36 = vadd.f32 %v3590_v61, %v3422_v2  ;;  %v3254_v56 = vpop.f32.mrf.mxu0  ;;  %v3423_v3 = vpop.f32.mrf.mxu1 }
 0x338   : > { %v3255_v32 = vadd.f32 %v3254_v56, %v11836_v34  ;;  %v12418_v34 = vor.u32 %v10285_v47, %v9041_v41  ;;  %v9065_v41 = vld [vmem:[#allocation7 + $0x390] sm:$0xf] }
 0x339   : > { %v12412_v37 = vadd.f32 %v3759_v12, %v3591_v36  ;;  %v12421_v12 = vor.u32 %v10281_v53, %v9043_v10  ;;  %v10292_v47 = vld [vmem:[#allocation7 + $0x3ac] sm:$0xf0]  ;;  %v10288_v53 = vld [vmem:[#allocation7 + $0x394] sm:$0xf] }
 0x33a   : > { %v3424_v26 = vadd.f32 %v3423_v3, %v3255_v32  ;;  %16805 = vst [vmem:[#allocation228_spill] sm:$0xff] %v12418_v34  ;;  %v9067_v10 = vld [vmem:[#allocation7 + $0x3b0] sm:$0xf0] }
 0x33b   : > { %16804 = vst [vmem:[#allocation227_spill] sm:$0xff] %v12412_v37  ;;  %v12432_v37 = vor.u32 %v10292_v47, %v9065_v41 }
 0x33c   : > { %16806 = vst [vmem:[#allocation229_spill] sm:$0xff] %v12421_v12 }
 0x33e   : > { %v3592_v16 = vpop.f32.mrf.mxu2  ;;  %v3761_v24 = vpop.f32.mrf.mxu3 }
 0x33f   : > { %v3593_v2 = vadd.f32 %v3592_v16, %v3424_v26  ;;  %v3257_v61 = vpop.f32.mrf.mxu0  ;;  %v3426_v56 = vpop.f32.mrf.mxu1 }
 0x340   : > { %v3258_v36 = vadd.f32 %v3257_v61, %v11842_v46  ;;  %v10293_v61 = vld [vmem:[#allocation7 + $0x3b4] sm:$0xf0] }
 0x341   : > { %v12423_v32 = vadd.f32 %v3761_v24, %v3593_v2  ;;  %v9073_v2 = vld [vmem:[#allocation7 + $0x398] sm:$0xf] }
 0x342   : > { %v3427_v3 = vadd.f32 %v3426_v56, %v3258_v36  ;;  %3296 = vmatmul.bf16.gmra.mxu0 %v12414_v38  ;;  %3465 = vmatmul.bf16.gmra.mxu1 %v12416_v4  ;;  %v10289_v36 = vld [vmem:[#allocation7 + $0x39c] sm:$0xf] }
 0x343   : > { %16807 = vst [vmem:[#allocation230_spill] sm:$0xff] %v12423_v32  ;;  %3634 = vmatmul.bf16.gmra.mxu2 %v12418_v34  ;;  %3803 = vmatmul.bf16.gmra.mxu3 %v12421_v12  ;;  %v9075_v56 = vld [vmem:[#allocation7 + $0x3b8] sm:$0xf0]  ;;  %v12434_v34 = vor.u32 %v10288_v53, %v9067_v10 }
 0x346   : > { %v3595_v16 = vpop.f32.mrf.mxu2  ;;  %v3764_v49 = vpop.f32.mrf.mxu3 }
 0x347   : > { %v3596_v26 = vadd.f32 %v3595_v16, %v3427_v3  ;;  %v3259_v39 = vpop.f32.mrf.mxu0  ;;  %v3428_v55 = vpop.f32.mrf.mxu1 }
 0x348   : > { %v3260_v46 = vadd.f32 %v3259_v39, %v11852_v48  ;;  %v12436_v48 = vor.u32 %v10293_v61, %v9073_v2  ;;  %v9097_v2 = vld [vmem:[#allocation7 + $0x3d0] sm:$0xf] }
 0x349   : > { %v12430_v25 = vadd.f32 %v3764_v49, %v3596_v26  ;;  %v12439_v49 = vor.u32 %v10289_v36, %v9075_v56  ;;  %v10300_v61 = vld [vmem:[#allocation7 + $0x3ec] sm:$0xf0]  ;;  %v10296_v36 = vld [vmem:[#allocation7 + $0x3d4] sm:$0xf] }
 0x34a   : > { %v3429_v24 = vadd.f32 %v3428_v55, %v3260_v46  ;;  %16809 = vst [vmem:[#allocation232_spill] sm:$0xff] %v12436_v48  ;;  %v9099_v56 = vld [vmem:[#allocation7 + $0x3f0] sm:$0xf0] }
 0x34b   : > { %16808 = vst [vmem:[#allocation231_spill] sm:$0xff] %v12430_v25  ;;  %v12450_v25 = vor.u32 %v10300_v61, %v9097_v2 }
 0x34c   : > { %16810 = vst [vmem:[#allocation233_spill] sm:$0xff] %v12439_v49 }
 0x34e   : > { %v3597_v32 = vpop.f32.mrf.mxu2  ;;  %v3766_v12 = vpop.f32.mrf.mxu3 }
 0x34f   : > { %v3598_v3 = vadd.f32 %v3597_v32, %v3429_v24  ;;  %v3262_v16 = vpop.f32.mrf.mxu0  ;;  %v3431_v39 = vpop.f32.mrf.mxu1 }
 0x350   : > { %v3263_v26 = vadd.f32 %v3262_v16, %v11858_v60  ;;  %v10301_v16 = vld [vmem:[#allocation7 + $0x3f4] sm:$0xf0] }
 0x351   : > { %v12441_v46 = vadd.f32 %v3766_v12, %v3598_v3  ;;  %v9105_v3 = vld [vmem:[#allocation7 + $0x3d8] sm:$0xf] }
 0x352   : > { %v3432_v55 = vadd.f32 %v3431_v39, %v3263_v26  ;;  %3301 = vmatmul.bf16.gmra.mxu0 %v12432_v37  ;;  %3470 = vmatmul.bf16.gmra.mxu1 %v12434_v34  ;;  %v10297_v26 = vld [vmem:[#allocation7 + $0x3dc] sm:$0xf] }
 0x353   : > { %16811 = vst [vmem:[#allocation234_spill] sm:$0xff] %v12441_v46  ;;  %3639 = vmatmul.bf16.gmra.mxu2 %v12436_v48  ;;  %3808 = vmatmul.bf16.gmra.mxu3 %v12439_v49  ;;  %v9107_v39 = vld [vmem:[#allocation7 + $0x3f8] sm:$0xf0]  ;;  %v12452_v48 = vor.u32 %v10296_v36, %v9099_v56 }
 0x356   : > { %v3600_v32 = vpop.f32.mrf.mxu2  ;;  %v3769_v47 = vpop.f32.mrf.mxu3 }
 0x357   : > { %v3601_v24 = vadd.f32 %v3600_v32, %v3432_v55  ;;  %v3264_v41 = vpop.f32.mrf.mxu0  ;;  %v3433_v53 = vpop.f32.mrf.mxu1 }
 0x358   : > { %v3265_v60 = vadd.f32 %v3264_v41, %v11868_v62  ;;  %v12454_v62 = vor.u32 %v10301_v16, %v9105_v3  ;;  %v9129_v3 = vld [vmem:[#allocation7 + $0x410] sm:$0xf] }
 0x359   : > { %v12448_v10 = vadd.f32 %v3769_v47, %v3601_v24  ;;  %v12457_v47 = vor.u32 %v10297_v26, %v9107_v39  ;;  %v10308_v16 = vld [vmem:[#allocation7 + $0x42c] sm:$0xf0]  ;;  %v10304_v26 = vld [vmem:[#allocation7 + $0x414] sm:$0xf] }
 0x35a   : > { %v3434_v12 = vadd.f32 %v3433_v53, %v3265_v60  ;;  %16813 = vst [vmem:[#allocation236_spill] sm:$0xff] %v12454_v62  ;;  %v9131_v39 = vld [vmem:[#allocation7 + $0x430] sm:$0xf0] }
 0x35b   : > { %16812 = vst [vmem:[#allocation235_spill] sm:$0xff] %v12448_v10  ;;  %v12468_v10 = vor.u32 %v10308_v16, %v9129_v3 }
 0x35c   : > { %16814 = vst [vmem:[#allocation237_spill] sm:$0xff] %v12457_v47 }
 0x35e   : > { %v3602_v46 = vpop.f32.mrf.mxu2  ;;  %v3771_v49 = vpop.f32.mrf.mxu3 }
 0x35f   : > { %v3603_v55 = vadd.f32 %v3602_v46, %v3434_v12  ;;  %v3267_v32 = vpop.f32.mrf.mxu0  ;;  %v3436_v41 = vpop.f32.mrf.mxu1 }
 0x360   : > { %v3268_v24 = vadd.f32 %v3267_v32, %v11874_v5  ;;  %v10309_v32 = vld [vmem:[#allocation7 + $0x434] sm:$0xf0] }
 0x361   : > { %v12459_v60 = vadd.f32 %v3771_v49, %v3603_v55  ;;  %v9137_v55 = vld [vmem:[#allocation7 + $0x418] sm:$0xf] }
 0x362   : > { %v3437_v53 = vadd.f32 %v3436_v41, %v3268_v24  ;;  %3306 = vmatmul.bf16.gmra.mxu0 %v12450_v25  ;;  %3475 = vmatmul.bf16.gmra.mxu1 %v12452_v48  ;;  %v10305_v24 = vld [vmem:[#allocation7 + $0x41c] sm:$0xf] }
 0x363   : > { %16815 = vst [vmem:[#allocation238_spill] sm:$0xff] %v12459_v60  ;;  %3644 = vmatmul.bf16.gmra.mxu2 %v12454_v62  ;;  %3813 = vmatmul.bf16.gmra.mxu3 %v12457_v47  ;;  %v9139_v41 = vld [vmem:[#allocation7 + $0x438] sm:$0xf0]  ;;  %v12470_v62 = vor.u32 %v10304_v26, %v9131_v39 }
 0x366   : > { %v3605_v46 = vpop.f32.mrf.mxu2  ;;  %v3774_v61 = vpop.f32.mrf.mxu3 }
 0x367   : > { %v3606_v12 = vadd.f32 %v3605_v46, %v3437_v53  ;;  %v3269_v2 = vpop.f32.mrf.mxu0  ;;  %v3438_v36 = vpop.f32.mrf.mxu1 }
 0x368   : > { %v3270_v5 = vadd.f32 %v3269_v2, %v11884_v17  ;;  %v12472_v17 = vor.u32 %v10309_v32, %v9137_v55  ;;  %v9161_v55 = vld [vmem:[#allocation7 + $0x450] sm:$0xf] }
 0x369   : > { %v12466_v56 = vadd.f32 %v3774_v61, %v3606_v12  ;;  %v12475_v61 = vor.u32 %v10305_v24, %v9139_v41  ;;  %v10316_v32 = vld [vmem:[#allocation7 + $0x46c] sm:$0xf0]  ;;  %v10312_v24 = vld [vmem:[#allocation7 + $0x454] sm:$0xf] }
 0x36a   : > { %v3439_v49 = vadd.f32 %v3438_v36, %v3270_v5  ;;  %16817 = vst [vmem:[#allocation240_spill] sm:$0xff] %v12472_v17  ;;  %v9163_v41 = vld [vmem:[#allocation7 + $0x470] sm:$0xf0] }
 0x36b   : > { %16816 = vst [vmem:[#allocation239_spill] sm:$0xff] %v12466_v56  ;;  %v12486_v56 = vor.u32 %v10316_v32, %v9161_v55 }
 0x36c   : > { %16818 = vst [vmem:[#allocation241_spill] sm:$0xff] %v12475_v61 }
 0x36e   : > { %v3607_v60 = vpop.f32.mrf.mxu2  ;;  %v3776_v47 = vpop.f32.mrf.mxu3 }
 0x36f   : > { %v3608_v53 = vadd.f32 %v3607_v60, %v3439_v49  ;;  %v3272_v46 = vpop.f32.mrf.mxu0  ;;  %v3441_v2 = vpop.f32.mrf.mxu1 }
 0x370   : > { %v3273_v12 = vadd.f32 %v3272_v46, %v11890_v18  ;;  %v10317_v46 = vld [vmem:[#allocation7 + $0x474] sm:$0xf0] }
 0x371   : > { %v12477_v5 = vadd.f32 %v3776_v47, %v3608_v53  ;;  %v9169_v53 = vld [vmem:[#allocation7 + $0x458] sm:$0xf] }
 0x372   : > { %v3442_v36 = vadd.f32 %v3441_v2, %v3273_v12  ;;  %3311 = vmatmul.bf16.gmra.mxu0 %v12468_v10  ;;  %3480 = vmatmul.bf16.gmra.mxu1 %v12470_v62  ;;  %v10313_v12 = vld [vmem:[#allocation7 + $0x45c] sm:$0xf] }
 0x373   : > { %16819 = vst [vmem:[#allocation242_spill] sm:$0xff] %v12477_v5  ;;  %3649 = vmatmul.bf16.gmra.mxu2 %v12472_v17  ;;  %3818 = vmatmul.bf16.gmra.mxu3 %v12475_v61  ;;  %v9171_v2 = vld [vmem:[#allocation7 + $0x478] sm:$0xf0]  ;;  %v12488_v17 = vor.u32 %v10312_v24, %v9163_v41 }
 0x376   : > { %v3610_v60 = vpop.f32.mrf.mxu2  ;;  %v3779_v16 = vpop.f32.mrf.mxu3 }
 0x377   : > { %v3611_v49 = vadd.f32 %v3610_v60, %v3442_v36  ;;  %v3274_v3 = vpop.f32.mrf.mxu0  ;;  %v3443_v26 = vpop.f32.mrf.mxu1 }
 0x378   : > { %v3275_v18 = vadd.f32 %v3274_v3, %v11900_v45  ;;  %v12490_v45 = vor.u32 %v10317_v46, %v9169_v53  ;;  %v9193_v53 = vld [vmem:[#allocation7 + $0x490] sm:$0xf] }
 0x379   : > { %v12484_v39 = vadd.f32 %v3779_v16, %v3611_v49  ;;  %v12493_v16 = vor.u32 %v10313_v12, %v9171_v2  ;;  %v10324_v46 = vld [vmem:[#allocation7 + $0x4ac] sm:$0xf0]  ;;  %v10320_v12 = vld [vmem:[#allocation7 + $0x494] sm:$0xf] }
 0x37a   : > { %v3444_v47 = vadd.f32 %v3443_v26, %v3275_v18  ;;  %16821 = vst [vmem:[#allocation244_spill] sm:$0xff] %v12490_v45  ;;  %v9195_v2 = vld [vmem:[#allocation7 + $0x4b0] sm:$0xf0] }
 0x37b   : > { %16820 = vst [vmem:[#allocation243_spill] sm:$0xff] %v12484_v39  ;;  %v12504_v39 = vor.u32 %v10324_v46, %v9193_v53 }
 0x37c   : > { %16822 = vst [vmem:[#allocation245_spill] sm:$0xff] %v12493_v16 }
 0x37e   : > { %v3612_v5 = vpop.f32.mrf.mxu2  ;;  %v3781_v61 = vpop.f32.mrf.mxu3 }
 0x37f   : > { %v3613_v36 = vadd.f32 %v3612_v5, %v3444_v47  ;;  %v3277_v60 = vpop.f32.mrf.mxu0  ;;  %v3446_v3 = vpop.f32.mrf.mxu1 }
 0x380   : > { %v3278_v49 = vadd.f32 %v3277_v60, %v11906_v35  ;;  %v10325_v60 = vld [vmem:[#allocation7 + $0x4b4] sm:$0xf0] }
 0x381   : > { %v12495_v18 = vadd.f32 %v3781_v61, %v3613_v36  ;;  %v9201_v36 = vld [vmem:[#allocation7 + $0x498] sm:$0xf] }
 0x382   : > { %v3447_v26 = vadd.f32 %v3446_v3, %v3278_v49  ;;  %3316 = vmatmul.bf16.gmra.mxu0 %v12486_v56  ;;  %3485 = vmatmul.bf16.gmra.mxu1 %v12488_v17  ;;  %v10321_v49 = vld [vmem:[#allocation7 + $0x49c] sm:$0xf] }
 0x383   : > { %16823 = vst [vmem:[#allocation246_spill] sm:$0xff] %v12495_v18  ;;  %3654 = vmatmul.bf16.gmra.mxu2 %v12490_v45  ;;  %3823 = vmatmul.bf16.gmra.mxu3 %v12493_v16  ;;  %v9203_v3 = vld [vmem:[#allocation7 + $0x4b8] sm:$0xf0]  ;;  %v12506_v45 = vor.u32 %v10320_v12, %v9195_v2 }
 0x386   : > { %v3615_v5 = vpop.f32.mrf.mxu2  ;;  %v3784_v32 = vpop.f32.mrf.mxu3 }
 0x387   : > { %v3616_v47 = vadd.f32 %v3615_v5, %v3447_v26  ;;  %v3279_v55 = vpop.f32.mrf.mxu0  ;;  %v3448_v24 = vpop.f32.mrf.mxu1 }
 0x388   : > { %v3280_v35 = vadd.f32 %v3279_v55, %v11916_v21  ;;  %v12508_v21 = vor.u32 %v10325_v60, %v9201_v36  ;;  %v9225_v36 = vld [vmem:[#allocation7 + $0x4d0] sm:$0xf] }
 0x389   : > { %v12502_v41 = vadd.f32 %v3784_v32, %v3616_v47  ;;  %v12511_v32 = vor.u32 %v10321_v49, %v9203_v3  ;;  %v10332_v60 = vld [vmem:[#allocation7 + $0x4ec] sm:$0xf0]  ;;  %v10328_v49 = vld [vmem:[#allocation7 + $0x4d4] sm:$0xf] }
 0x38a   : > { %v3449_v61 = vadd.f32 %v3448_v24, %v3280_v35  ;;  %16825 = vst [vmem:[#allocation248_spill] sm:$0xff] %v12508_v21  ;;  %v9227_v3 = vld [vmem:[#allocation7 + $0x4f0] sm:$0xf0] }
 0x38b   : > { %16824 = vst [vmem:[#allocation247_spill] sm:$0xff] %v12502_v41  ;;  %v12522_v41 = vor.u32 %v10332_v60, %v9225_v36 }
 0x38c   : > { %16826 = vst [vmem:[#allocation249_spill] sm:$0xff] %v12511_v32 }
 0x38d   : > { %16829 = vst [vmem:[#allocation252_spill] sm:$0xff] %v12522_v41 }
 0x38e   : > { %v3617_v18 = vpop.f32.mrf.mxu2  ;;  %v3786_v16 = vpop.f32.mrf.mxu3 }
 0x38f   : > { %v3618_v26 = vadd.f32 %v3617_v18, %v3449_v61  ;;  %v3282_v5 = vpop.f32.mrf.mxu0  ;;  %v3451_v55 = vpop.f32.mrf.mxu1 }
 0x390   : > { %v3283_v47 = vadd.f32 %v3282_v5, %v11922_v50  ;;  %v10333_v5 = vld [vmem:[#allocation7 + $0x4f4] sm:$0xf0] }
 0x391   : > { %v12513_v35 = vadd.f32 %v3786_v16, %v3618_v26  ;;  %v9233_v26 = vld [vmem:[#allocation7 + $0x4d8] sm:$0xf] }
 0x392   : > { %v3452_v24 = vadd.f32 %v3451_v55, %v3283_v47  ;;  %3321 = vmatmul.bf16.gmra.mxu0 %v12504_v39  ;;  %3490 = vmatmul.bf16.gmra.mxu1 %v12506_v45  ;;  %v10329_v47 = vld [vmem:[#allocation7 + $0x4dc] sm:$0xf] }
 0x393   : > { %16827 = vst [vmem:[#allocation250_spill] sm:$0xff] %v12513_v35  ;;  %3659 = vmatmul.bf16.gmra.mxu2 %v12508_v21  ;;  %3828 = vmatmul.bf16.gmra.mxu3 %v12511_v32  ;;  %v9235_v55 = vld [vmem:[#allocation7 + $0x4f8] sm:$0xf0]  ;;  %v12524_v21 = vor.u32 %v10328_v49, %v9227_v3 }
 0x395   : > { %16830 = vst [vmem:[#allocation253_spill] sm:$0xff] %v12524_v21 }
 0x396   : > { %v3620_v18 = vpop.f32.mrf.mxu2  ;;  %v3789_v46 = vpop.f32.mrf.mxu3 }
 0x397   : > { %v3621_v61 = vadd.f32 %v3620_v18, %v3452_v24  ;;  %v3284_v53 = vpop.f32.mrf.mxu0  ;;  %v3453_v12 = vpop.f32.mrf.mxu1 }
 0x398   : > { %v3285_v50 = vadd.f32 %v3284_v53, %v11932_v23  ;;  %v12526_v23 = vor.u32 %v10333_v5, %v9233_v26  ;;  %v9257_v26 = vld [vmem:[#allocation7 + $0x510] sm:$0xf] }
 0x399   : > { %v12520_v2 = vadd.f32 %v3789_v46, %v3621_v61  ;;  %v12529_v46 = vor.u32 %v10329_v47, %v9235_v55  ;;  %v10340_v5 = vld [vmem:[#allocation7 + $0x52c] sm:$0xf0]  ;;  %v10336_v47 = vld [vmem:[#allocation7 + $0x514] sm:$0xf] }
 0x39a   : > { %v3454_v16 = vadd.f32 %v3453_v12, %v3285_v50  ;;  %16831 = vst [vmem:[#allocation254_spill] sm:$0xff] %v12526_v23  ;;  %v9259_v55 = vld [vmem:[#allocation7 + $0x530] sm:$0xf0] }
 0x39b   : > { %16828 = vst [vmem:[#allocation251_spill] sm:$0xff] %v12520_v2  ;;  %v12540_v2 = vor.u32 %v10340_v5, %v9257_v26 }
 0x39c   : > { %16832 = vst [vmem:[#allocation255_spill] sm:$0xff] %v12529_v46 }
 0x39d   : > { %16835 = vst [vmem:[#allocation258_spill] sm:$0xff] %v12540_v2 }
 0x39e   : > { %v3622_v35 = vpop.f32.mrf.mxu2  ;;  %v3791_v32 = vpop.f32.mrf.mxu3 }
 0x39f   : > { %v3623_v24 = vadd.f32 %v3622_v35, %v3454_v16  ;;  %v3287_v18 = vpop.f32.mrf.mxu0  ;;  %v3456_v53 = vpop.f32.mrf.mxu1 }
 0x3a0   : > { %v3288_v61 = vadd.f32 %v3287_v18, %v11938_v63  ;;  %v10341_v18 = vld [vmem:[#allocation7 + $0x534] sm:$0xf0] }
 0x3a1   : > { %v12531_v50 = vadd.f32 %v3791_v32, %v3623_v24  ;;  %v9265_v24 = vld [vmem:[#allocation7 + $0x518] sm:$0xf] }
 0x3a2   : > { %v3457_v12 = vadd.f32 %v3456_v53, %v3288_v61  ;;  %3326 = vmatmul.bf16.gmra.mxu0 %v12522_v41  ;;  %3495 = vmatmul.bf16.gmra.mxu1 %v12524_v21  ;;  %v10337_v61 = vld [vmem:[#allocation7 + $0x51c] sm:$0xf] }
 0x3a3   : > { %16833 = vst [vmem:[#allocation256_spill] sm:$0xff] %v12531_v50  ;;  %3664 = vmatmul.bf16.gmra.mxu2 %v12526_v23  ;;  %3833 = vmatmul.bf16.gmra.mxu3 %v12529_v46  ;;  %v9267_v53 = vld [vmem:[#allocation7 + $0x538] sm:$0xf0]  ;;  %v12542_v23 = vor.u32 %v10336_v47, %v9259_v55 }
 0x3a5   : > { %16836 = vst [vmem:[#allocation259_spill] sm:$0xff] %v12542_v23 }
 0x3a6   : > { %v3625_v35 = vpop.f32.mrf.mxu2  ;;  %v3794_v60 = vpop.f32.mrf.mxu3 }
 0x3a7   : > { %v3626_v16 = vadd.f32 %v3625_v35, %v3457_v12  ;;  %v3289_v36 = vpop.f32.mrf.mxu0  ;;  %v3458_v49 = vpop.f32.mrf.mxu1 }
 0x3a8   : > { %v3290_v63 = vadd.f32 %v3289_v36, %v11948_v22  ;;  %v12544_v22 = vor.u32 %v10341_v18, %v9265_v24  ;;  %v9289_v24 = vld [vmem:[#allocation7 + $0x550] sm:$0xf] }
 0x3a9   : > { %v12538_v3 = vadd.f32 %v3794_v60, %v3626_v16  ;;  %v12547_v60 = vor.u32 %v10337_v61, %v9267_v53  ;;  %v10348_v18 = vld [vmem:[#allocation7 + $0x56c] sm:$0xf0]  ;;  %v10344_v61 = vld [vmem:[#allocation7 + $0x554] sm:$0xf] }
 0x3aa   : > { %v3459_v32 = vadd.f32 %v3458_v49, %v3290_v63  ;;  %16837 = vst [vmem:[#allocation260_spill] sm:$0xff] %v12544_v22  ;;  %v9291_v53 = vld [vmem:[#allocation7 + $0x570] sm:$0xf0] }
 0x3ab   : > { %16834 = vst [vmem:[#allocation257_spill] sm:$0xff] %v12538_v3  ;;  %v12558_v3 = vor.u32 %v10348_v18, %v9289_v24 }
 0x3ac   : > { %16838 = vst [vmem:[#allocation261_spill] sm:$0xff] %v12547_v60 }
 0x3ad   : > { %16841 = vst [vmem:[#allocation264_spill] sm:$0xff] %v12558_v3 }
 0x3ae   : > { %v3627_v50 = vpop.f32.mrf.mxu2  ;;  %v3796_v46 = vpop.f32.mrf.mxu3 }
 0x3af   : > { %v3628_v12 = vadd.f32 %v3627_v50, %v3459_v32  ;;  %v3292_v35 = vpop.f32.mrf.mxu0  ;;  %v3461_v36 = vpop.f32.mrf.mxu1 }
 0x3b0   : > { %v3293_v16 = vadd.f32 %v3292_v35, %v11954_v6  ;;  %v10349_v35 = vld [vmem:[#allocation7 + $0x574] sm:$0xf0] }
 0x3b1   : > { %v12549_v63 = vadd.f32 %v3796_v46, %v3628_v12  ;;  %v9297_v12 = vld [vmem:[#allocation7 + $0x558] sm:$0xf] }
 0x3b2   : > { %v3462_v49 = vadd.f32 %v3461_v36, %v3293_v16  ;;  %3331 = vmatmul.bf16.gmra.mxu0 %v12540_v2  ;;  %3500 = vmatmul.bf16.gmra.mxu1 %v12542_v23  ;;  %v10345_v16 = vld [vmem:[#allocation7 + $0x55c] sm:$0xf] }
 0x3b3   : > { %16839 = vst [vmem:[#allocation262_spill] sm:$0xff] %v12549_v63  ;;  %3669 = vmatmul.bf16.gmra.mxu2 %v12544_v22  ;;  %3838 = vmatmul.bf16.gmra.mxu3 %v12547_v60  ;;  %v9299_v36 = vld [vmem:[#allocation7 + $0x578] sm:$0xf0]  ;;  %v12560_v22 = vor.u32 %v10344_v61, %v9291_v53 }
 0x3b5   : > { %16842 = vst [vmem:[#allocation265_spill] sm:$0xff] %v12560_v22 }
 0x3b6   : > { %v3630_v50 = vpop.f32.mrf.mxu2  ;;  %v3799_v5 = vpop.f32.mrf.mxu3 }
 0x3b7   : > { %v3631_v32 = vadd.f32 %v3630_v50, %v3462_v49  ;;  %v3294_v26 = vpop.f32.mrf.mxu0  ;;  %v3463_v47 = vpop.f32.mrf.mxu1 }
 0x3b8   : > { %v3295_v6 = vadd.f32 %v3294_v26, %v11964_v19  ;;  %v12562_v19 = vor.u32 %v10349_v35, %v9297_v12  ;;  %v9321_v12 = vld [vmem:[#allocation7 + $0x590] sm:$0xf] }
 0x3b9   : > { %v12556_v55 = vadd.f32 %v3799_v5, %v3631_v32  ;;  %v12565_v5 = vor.u32 %v10345_v16, %v9299_v36  ;;  %v10356_v35 = vld [vmem:[#allocation7 + $0x5ac] sm:$0xf0]  ;;  %v10352_v16 = vld [vmem:[#allocation7 + $0x594] sm:$0xf] }
 0x3ba   : > { %v3464_v46 = vadd.f32 %v3463_v47, %v3295_v6  ;;  %16843 = vst [vmem:[#allocation266_spill] sm:$0xff] %v12562_v19  ;;  %v9323_v36 = vld [vmem:[#allocation7 + $0x5b0] sm:$0xf0] }
 0x3bb   : > { %16840 = vst [vmem:[#allocation263_spill] sm:$0xff] %v12556_v55  ;;  %v12576_v55 = vor.u32 %v10356_v35, %v9321_v12 }
 0x3bc   : > { %16844 = vst [vmem:[#allocation267_spill] sm:$0xff] %v12565_v5 }
 0x3bd   : > { %16847 = vst [vmem:[#allocation270_spill] sm:$0xff] %v12576_v55 }
 0x3be   : > { %v3632_v63 = vpop.f32.mrf.mxu2  ;;  %v3801_v60 = vpop.f32.mrf.mxu3 }
 0x3bf   : > { %v3633_v49 = vadd.f32 %v3632_v63, %v3464_v46  ;;  %v3297_v50 = vpop.f32.mrf.mxu0  ;;  %v3466_v26 = vpop.f32.mrf.mxu1 }
 0x3c0   : > { %v3298_v32 = vadd.f32 %v3297_v50, %v11970_v20  ;;  %v10357_v50 = vld [vmem:[#allocation7 + $0x5b4] sm:$0xf0] }
 0x3c1   : > { %v12567_v6 = vadd.f32 %v3801_v60, %v3633_v49  ;;  %v9329_v49 = vld [vmem:[#allocation7 + $0x598] sm:$0xf] }
 0x3c2   : > { %v3467_v47 = vadd.f32 %v3466_v26, %v3298_v32  ;;  %3336 = vmatmul.bf16.gmra.mxu0 %v12558_v3  ;;  %3505 = vmatmul.bf16.gmra.mxu1 %v12560_v22  ;;  %v10353_v32 = vld [vmem:[#allocation7 + $0x59c] sm:$0xf] }
 0x3c3   : > { %16845 = vst [vmem:[#allocation268_spill] sm:$0xff] %v12567_v6  ;;  %3674 = vmatmul.bf16.gmra.mxu2 %v12562_v19  ;;  %3843 = vmatmul.bf16.gmra.mxu3 %v12565_v5  ;;  %v9331_v26 = vld [vmem:[#allocation7 + $0x5b8] sm:$0xf0]  ;;  %v12578_v19 = vor.u32 %v10352_v16, %v9323_v36 }
 0x3c5   : > { %16848 = vst [vmem:[#allocation271_spill] sm:$0xff] %v12578_v19 }
 0x3c6   : > { %v3635_v63 = vpop.f32.mrf.mxu2  ;;  %v3804_v18 = vpop.f32.mrf.mxu3 }
 0x3c7   : > { %v3636_v46 = vadd.f32 %v3635_v63, %v3467_v47  ;;  %v3299_v24 = vpop.f32.mrf.mxu0  ;;  %v3468_v61 = vpop.f32.mrf.mxu1 }
 0x3c8   : > { %v3300_v20 = vadd.f32 %v3299_v24, %v11980_v33  ;;  %v12580_v33 = vor.u32 %v10357_v50, %v9329_v49  ;;  %v9353_v49 = vld [vmem:[#allocation7 + $0x5d0] sm:$0xf] }
 0x3c9   : > { %v12574_v53 = vadd.f32 %v3804_v18, %v3636_v46  ;;  %v12583_v18 = vor.u32 %v10353_v32, %v9331_v26  ;;  %v10364_v50 = vld [vmem:[#allocation7 + $0x5ec] sm:$0xf0]  ;;  %v10360_v32 = vld [vmem:[#allocation7 + $0x5d4] sm:$0xf] }
 0x3ca   : > { %v3469_v60 = vadd.f32 %v3468_v61, %v3300_v20  ;;  %16849 = vst [vmem:[#allocation272_spill] sm:$0xff] %v12580_v33  ;;  %v9355_v26 = vld [vmem:[#allocation7 + $0x5f0] sm:$0xf0] }
 0x3cb   : > { %16846 = vst [vmem:[#allocation269_spill] sm:$0xff] %v12574_v53  ;;  %v12594_v53 = vor.u32 %v10364_v50, %v9353_v49 }
 0x3cc   : > { %16850 = vst [vmem:[#allocation273_spill] sm:$0xff] %v12583_v18 }
 0x3cd   : > { %16853 = vst [vmem:[#allocation276_spill] sm:$0xff] %v12594_v53 }
 0x3ce   : > { %v3637_v6 = vpop.f32.mrf.mxu2  ;;  %v3806_v5 = vpop.f32.mrf.mxu3 }
 0x3cf   : > { %v3638_v47 = vadd.f32 %v3637_v6, %v3469_v60  ;;  %v3302_v63 = vpop.f32.mrf.mxu0  ;;  %v3471_v24 = vpop.f32.mrf.mxu1 }
 0x3d0   : > { %v3303_v46 = vadd.f32 %v3302_v63, %v11986_v7  ;;  %v10365_v63 = vld [vmem:[#allocation7 + $0x5f4] sm:$0xf0] }
 0x3d1   : > { %v12585_v20 = vadd.f32 %v3806_v5, %v3638_v47  ;;  %v9361_v47 = vld [vmem:[#allocation7 + $0x5d8] sm:$0xf] }
 0x3d2   : > { %v3472_v61 = vadd.f32 %v3471_v24, %v3303_v46  ;;  %3341 = vmatmul.bf16.gmra.mxu0 %v12576_v55  ;;  %3510 = vmatmul.bf16.gmra.mxu1 %v12578_v19  ;;  %v10361_v46 = vld [vmem:[#allocation7 + $0x5dc] sm:$0xf] }
 0x3d3   : > { %16851 = vst [vmem:[#allocation274_spill] sm:$0xff] %v12585_v20  ;;  %3679 = vmatmul.bf16.gmra.mxu2 %v12580_v33  ;;  %3848 = vmatmul.bf16.gmra.mxu3 %v12583_v18  ;;  %v9363_v24 = vld [vmem:[#allocation7 + $0x5f8] sm:$0xf0]  ;;  %v12596_v33 = vor.u32 %v10360_v32, %v9355_v26 }
 0x3d5   : > { %16854 = vst [vmem:[#allocation277_spill] sm:$0xff] %v12596_v33 }
 0x3d6   : > { %v3640_v6 = vpop.f32.mrf.mxu2  ;;  %v3809_v35 = vpop.f32.mrf.mxu3 }
 0x3d7   : > { %v3641_v60 = vadd.f32 %v3640_v6, %v3472_v61  ;;  %v3304_v12 = vpop.f32.mrf.mxu0  ;;  %v3473_v16 = vpop.f32.mrf.mxu1 }
 0x3d8   : > { %v3305_v7 = vadd.f32 %v3304_v12, %v11996_v30  ;;  %v12598_v30 = vor.u32 %v10365_v63, %v9361_v47  ;;  %v9385_v47 = vld [vmem:[#allocation7 + $0x610] sm:$0xf] }
 0x3d9   : > { %v12592_v36 = vadd.f32 %v3809_v35, %v3641_v60  ;;  %v12601_v35 = vor.u32 %v10361_v46, %v9363_v24  ;;  %v10372_v63 = vld [vmem:[#allocation7 + $0x62c] sm:$0xf0]  ;;  %v10368_v46 = vld [vmem:[#allocation7 + $0x614] sm:$0xf] }
 0x3da   : > { %v3474_v5 = vadd.f32 %v3473_v16, %v3305_v7  ;;  %16855 = vst [vmem:[#allocation278_spill] sm:$0xff] %v12598_v30  ;;  %v9387_v24 = vld [vmem:[#allocation7 + $0x630] sm:$0xf0] }
 0x3db   : > { %16852 = vst [vmem:[#allocation275_spill] sm:$0xff] %v12592_v36  ;;  %v12612_v36 = vor.u32 %v10372_v63, %v9385_v47 }
 0x3dc   : > { %16856 = vst [vmem:[#allocation279_spill] sm:$0xff] %v12601_v35 }
 0x3dd   : > { %16859 = vst [vmem:[#allocation282_spill] sm:$0xff] %v12612_v36 }
 0x3de   : > { %v3642_v20 = vpop.f32.mrf.mxu2  ;;  %v3811_v18 = vpop.f32.mrf.mxu3 }
 0x3df   : > { %v3643_v61 = vadd.f32 %v3642_v20, %v3474_v5  ;;  %v3307_v6 = vpop.f32.mrf.mxu0  ;;  %v3476_v12 = vpop.f32.mrf.mxu1 }
 0x3e0   : > { %v3308_v60 = vadd.f32 %v3307_v6, %v12002_v31  ;;  %v10373_v6 = vld [vmem:[#allocation7 + $0x634] sm:$0xf0] }
 0x3e1   : > { %v12603_v7 = vadd.f32 %v3811_v18, %v3643_v61  ;;  %v9393_v61 = vld [vmem:[#allocation7 + $0x618] sm:$0xf] }
 0x3e2   : > { %v3477_v16 = vadd.f32 %v3476_v12, %v3308_v60  ;;  %3346 = vmatmul.bf16.gmra.mxu0 %v12594_v53  ;;  %3515 = vmatmul.bf16.gmra.mxu1 %v12596_v33  ;;  %v10369_v60 = vld [vmem:[#allocation7 + $0x61c] sm:$0xf] }
 0x3e3   : > { %16857 = vst [vmem:[#allocation280_spill] sm:$0xff] %v12603_v7  ;;  %3684 = vmatmul.bf16.gmra.mxu2 %v12598_v30  ;;  %3853 = vmatmul.bf16.gmra.mxu3 %v12601_v35  ;;  %v9395_v12 = vld [vmem:[#allocation7 + $0x638] sm:$0xf0]  ;;  %v12614_v30 = vor.u32 %v10368_v46, %v9387_v24  ;;  %v16864_v46 = vld [vmem:[#allocation131_spill] sm:$0xff] }
 0x3e5   : > { %16860 = vst [vmem:[#allocation283_spill] sm:$0xff] %v12614_v30 }
 0x3e6   : > { %v3645_v20 = vpop.f32.mrf.mxu2  ;;  %v3814_v50 = vpop.f32.mrf.mxu3 }
 0x3e7   : > { %v3646_v5 = vadd.f32 %v3645_v20, %v3477_v16  ;;  %v3309_v49 = vpop.f32.mrf.mxu0  ;;  %v3478_v32 = vpop.f32.mrf.mxu1 }
 0x3e8   : > { %v3310_v31 = vadd.f32 %v3309_v49, %v12012_v11  ;;  %v12616_v11 = vor.u32 %v10373_v6, %v9393_v61  ;;  %v9417_v6 = vld [vmem:[#allocation7 + $0x650] sm:$0xf] }
 0x3e9   : > { %v12610_v26 = vadd.f32 %v3814_v50, %v3646_v5  ;;  %v12619_v50 = vor.u32 %v10369_v60, %v9395_v12  ;;  %v10380_v60 = vld [vmem:[#allocation7 + $0x66c] sm:$0xf0]  ;;  %v10376_v12 = vld [vmem:[#allocation7 + $0x654] sm:$0xf] }
 0x3ea   : > { %v3479_v18 = vadd.f32 %v3478_v32, %v3310_v31  ;;  %16861 = vst [vmem:[#allocation284_spill] sm:$0xff] %v12616_v11 }
 0x3eb   : > { %16858 = vst [vmem:[#allocation281_spill] sm:$0xff] %v12610_v26 }
 0x3ec   : > { %16862 = vst [vmem:[#allocation285_spill] sm:$0xff] %v12619_v50 }
 0x3ee   : > { %v3647_v7 = vpop.f32.mrf.mxu2  ;;  %v3816_v35 = vpop.f32.mrf.mxu3 }
 0x3ef   : > { %v3648_v16 = vadd.f32 %v3647_v7, %v3479_v18  ;;  %v3312_v20 = vpop.f32.mrf.mxu0  ;;  %v3481_v49 = vpop.f32.mrf.mxu1 }
 0x3f0   : > { %v3313_v5 = vadd.f32 %v3312_v20, %v12018_v28  ;;  %v9425_v20 = vld [vmem:[#allocation7 + $0x658] sm:$0xf] }
 0x3f1   : > { %v12621_v31 = vadd.f32 %v3816_v35, %v3648_v16  ;;  %v9419_v16 = vld [vmem:[#allocation7 + $0x670] sm:$0xf0] }
 0x3f2   : > { %v3482_v32 = vadd.f32 %v3481_v49, %v3313_v5  ;;  %3351 = vmatmul.bf16.gmra.mxu0 %v12612_v36  ;;  %3520 = vmatmul.bf16.gmra.mxu1 %v12614_v30  ;;  %v10381_v5 = vld [vmem:[#allocation7 + $0x674] sm:$0xf0]  ;;  %v10377_v49 = vld [vmem:[#allocation7 + $0x65c] sm:$0xf]  ;;  %v12632_v30 = vor.u32 %v10376_v12, %v9419_v16  ;;  %v16872_v12 = vld [vmem:[#allocation137_spill] sm:$0xff] }
 0x3f3   : > { %16863 = vst [vmem:[#allocation286_spill] sm:$0xff] %v12621_v31  ;;  %3689 = vmatmul.bf16.gmra.mxu2 %v12616_v11  ;;  %3858 = vmatmul.bf16.gmra.mxu3 %v12619_v50  ;;  %v9427_v31 = vld [vmem:[#allocation7 + $0x678] sm:$0xf0]  ;;  %v12630_v50 = vor.u32 %v10380_v60, %v9417_v6 }
 0x3f4   : > { %16867 = vst [vmem:[#allocation288_spill] sm:$0xff] %v12632_v30 }
 0x3f5   : > { %16866 = vst [vmem:[#allocation287_spill] sm:$0xff] %v12630_v50 }
 0x3f6   : > { %v3650_v7 = vpop.f32.mrf.mxu2  ;;  %v3819_v63 = vpop.f32.mrf.mxu3 }
 0x3f7   : > { %v3651_v18 = vadd.f32 %v3650_v7, %v3482_v32  ;;  %v3314_v47 = vpop.f32.mrf.mxu0  ;;  %v3483_v24 = vpop.f32.mrf.mxu1 }
 0x3f8   : > { %v3315_v28 = vadd.f32 %v3314_v47, %v16864_v46  ;;  %v12634_v47 = vor.u32 %v10381_v5, %v9425_v20  ;;  %v9449_v5 = vld [vmem:[#allocation7 + $0x690] sm:$0xf] }
 0x3f9   : > { %v12628_v61 = vadd.f32 %v3819_v63, %v3651_v18  ;;  %v16869_v18 = vld [vmem:[#allocation132_spill] sm:$0xff] }
 0x3fa   : > { %v3484_v35 = vadd.f32 %v3483_v24, %v3315_v28  ;;  %16868 = vst [vmem:[#allocation289_spill] sm:$0xff] %v12634_v47  ;;  %v12637_v28 = vor.u32 %v10377_v49, %v9427_v31  ;;  %v10388_v49 = vld [vmem:[#allocation7 + $0x6ac] sm:$0xf0] }
 0x3fb   : > { %16865 = vst [vmem:[#allocation131_spill] sm:$0xff] %v12628_v61 }
 0x3fc   : > { %16870 = vst [vmem:[#allocation132_spill] sm:$0xff] %v12637_v28 }
 0x3fe   : > { %v3652_v26 = vpop.f32.mrf.mxu2  ;;  %v3821_v11 = vpop.f32.mrf.mxu3 }
 0x3ff   : > { %v3653_v32 = vadd.f32 %v3652_v26, %v3484_v35  ;;  %v3317_v7 = vpop.f32.mrf.mxu0  ;;  %v3486_v46 = vpop.f32.mrf.mxu1 }
 0x400   : > { %v3318_v63 = vadd.f32 %v3317_v7, %v16869_v18  ;;  %v9451_v7 = vld [vmem:[#allocation7 + $0x6b0] sm:$0xf0]  ;;  %v9457_v18 = vld [vmem:[#allocation7 + $0x698] sm:$0xf] }
 0x401   : > { %v12639_v24 = vadd.f32 %v3821_v11, %v3653_v32  ;;  %v10384_v32 = vld [vmem:[#allocation7 + $0x694] sm:$0xf] }
 0x402   : > { %v3487_v61 = vadd.f32 %v3486_v46, %v3318_v63  ;;  %3356 = vmatmul.bf16.gmra.mxu0 %v12630_v50  ;;  %3525 = vmatmul.bf16.gmra.mxu1 %v12632_v30  ;;  %v10389_v63 = vld [vmem:[#allocation7 + $0x6b4] sm:$0xf0]  ;;  %v10385_v46 = vld [vmem:[#allocation7 + $0x69c] sm:$0xf]  ;;  %v12650_v50 = vor.u32 %v10384_v32, %v9451_v7 }
 0x403   : > { %16871 = vst [vmem:[#allocation290_spill] sm:$0xff] %v12639_v24  ;;  %3694 = vmatmul.bf16.gmra.mxu2 %v12634_v47  ;;  %3863 = vmatmul.bf16.gmra.mxu3 %v12637_v28  ;;  %v9459_v24 = vld [vmem:[#allocation7 + $0x6b8] sm:$0xf0]  ;;  %v12648_v28 = vor.u32 %v10388_v49, %v9449_v5  ;;  %v16880_v32 = vld [vmem:[#allocation143_spill] sm:$0xff] }
 0x404   : > { %16875 = vst [vmem:[#allocation292_spill] sm:$0xff] %v12650_v50 }
 0x405   : > { %16874 = vst [vmem:[#allocation291_spill] sm:$0xff] %v12648_v28 }
 0x406   : > { %v3655_v26 = vpop.f32.mrf.mxu2  ;;  %v3824_v60 = vpop.f32.mrf.mxu3 }
 0x407   : > { %v3656_v35 = vadd.f32 %v3655_v26, %v3487_v61  ;;  %v3319_v6 = vpop.f32.mrf.mxu0  ;;  %v3488_v20 = vpop.f32.mrf.mxu1 }
 0x408   : > { %v3320_v16 = vadd.f32 %v3319_v6, %v16872_v12  ;;  %v12652_v6 = vor.u32 %v10389_v63, %v9457_v18  ;;  %v9481_v63 = vld [vmem:[#allocation7 + $0x6d0] sm:$0xf] }
 0x409   : > { %v12646_v31 = vadd.f32 %v3824_v60, %v3656_v35  ;;  %v16877_v35 = vld [vmem:[#allocation138_spill] sm:$0xff] }
 0x40a   : > { %v3489_v11 = vadd.f32 %v3488_v20, %v3320_v16  ;;  %16876 = vst [vmem:[#allocation293_spill] sm:$0xff] %v12652_v6  ;;  %v12655_v16 = vor.u32 %v10385_v46, %v9459_v24  ;;  %v10396_v46 = vld [vmem:[#allocation7 + $0x6ec] sm:$0xf0] }
 0x40b   : > { %16873 = vst [vmem:[#allocation137_spill] sm:$0xff] %v12646_v31 }
 0x40c   : > { %16878 = vst [vmem:[#allocation138_spill] sm:$0xff] %v12655_v16 }
 0x40e   : > { %v3657_v47 = vpop.f32.mrf.mxu2  ;;  %v3826_v30 = vpop.f32.mrf.mxu3 }
 0x40f   : > { %v3658_v61 = vadd.f32 %v3657_v47, %v3489_v11  ;;  %v3322_v26 = vpop.f32.mrf.mxu0  ;;  %v3491_v12 = vpop.f32.mrf.mxu1 }
 0x410   : > { %v3323_v60 = vadd.f32 %v3322_v26, %v16877_v35  ;;  %v9483_v26 = vld [vmem:[#allocation7 + $0x6f0] sm:$0xf0]  ;;  %v9489_v35 = vld [vmem:[#allocation7 + $0x6d8] sm:$0xf] }
 0x411   : > { %v12657_v20 = vadd.f32 %v3826_v30, %v3658_v61  ;;  %v10392_v61 = vld [vmem:[#allocation7 + $0x6d4] sm:$0xf] }
 0x412   : > { %v3492_v31 = vadd.f32 %v3491_v12, %v3323_v60  ;;  %3361 = vmatmul.bf16.gmra.mxu0 %v12648_v28  ;;  %3530 = vmatmul.bf16.gmra.mxu1 %v12650_v50  ;;  %v10397_v60 = vld [vmem:[#allocation7 + $0x6f4] sm:$0xf0]  ;;  %v10393_v12 = vld [vmem:[#allocation7 + $0x6dc] sm:$0xf]  ;;  %v12668_v28 = vor.u32 %v10392_v61, %v9483_v26  ;;  %v16888_v61 = vld [vmem:[#allocation149_spill] sm:$0xff] }
 0x413   : > { %16879 = vst [vmem:[#allocation294_spill] sm:$0xff] %v12657_v20  ;;  %3699 = vmatmul.bf16.gmra.mxu2 %v12652_v6  ;;  %3868 = vmatmul.bf16.gmra.mxu3 %v12655_v16  ;;  %v9491_v20 = vld [vmem:[#allocation7 + $0x6f8] sm:$0xf0]  ;;  %v12666_v16 = vor.u32 %v10396_v46, %v9481_v63 }
 0x414   : > { %16883 = vst [vmem:[#allocation296_spill] sm:$0xff] %v12668_v28 }
 0x415   : > { %16882 = vst [vmem:[#allocation295_spill] sm:$0xff] %v12666_v16 }
 0x416   : > { %v3660_v47 = vpop.f32.mrf.mxu2  ;;  %v3829_v49 = vpop.f32.mrf.mxu3 }
 0x417   : > { %v3661_v11 = vadd.f32 %v3660_v47, %v3492_v31  ;;  %v3324_v5 = vpop.f32.mrf.mxu0  ;;  %v3493_v18 = vpop.f32.mrf.mxu1 }
 0x418   : > { %v3325_v7 = vadd.f32 %v3324_v5, %v16880_v32  ;;  %v12670_v5 = vor.u32 %v10397_v60, %v9489_v35  ;;  %v9513_v60 = vld [vmem:[#allocation7 + $0x710] sm:$0xf] }
 0x419   : > { %v12664_v24 = vadd.f32 %v3829_v49, %v3661_v11  ;;  %v16885_v11 = vld [vmem:[#allocation144_spill] sm:$0xff] }
 0x41a   : > { %v3494_v30 = vadd.f32 %v3493_v18, %v3325_v7  ;;  %16884 = vst [vmem:[#allocation297_spill] sm:$0xff] %v12670_v5  ;;  %v12673_v7 = vor.u32 %v10393_v12, %v9491_v20  ;;  %v10404_v12 = vld [vmem:[#allocation7 + $0x72c] sm:$0xf0] }
 0x41b   : > { %16881 = vst [vmem:[#allocation143_spill] sm:$0xff] %v12664_v24 }
 0x41c   : > { %16886 = vst [vmem:[#allocation144_spill] sm:$0xff] %v12673_v7 }
 0x41e   : > { %v3662_v6 = vpop.f32.mrf.mxu2  ;;  %v3831_v50 = vpop.f32.mrf.mxu3 }
 0x41f   : > { %v3663_v31 = vadd.f32 %v3662_v6, %v3494_v30  ;;  %v3327_v47 = vpop.f32.mrf.mxu0  ;;  %v3496_v32 = vpop.f32.mrf.mxu1 }
 0x420   : > { %v3328_v49 = vadd.f32 %v3327_v47, %v16885_v11  ;;  %v9515_v47 = vld [vmem:[#allocation7 + $0x730] sm:$0xf0]  ;;  %v9521_v11 = vld [vmem:[#allocation7 + $0x718] sm:$0xf] }
 0x421   : > { %v12675_v18 = vadd.f32 %v3831_v50, %v3663_v31  ;;  %v10400_v31 = vld [vmem:[#allocation7 + $0x714] sm:$0xf] }
 0x422   : > { %v3497_v24 = vadd.f32 %v3496_v32, %v3328_v49  ;;  %3366 = vmatmul.bf16.gmra.mxu0 %v12666_v16  ;;  %3535 = vmatmul.bf16.gmra.mxu1 %v12668_v28  ;;  %v10405_v49 = vld [vmem:[#allocation7 + $0x734] sm:$0xf0]  ;;  %v10401_v32 = vld [vmem:[#allocation7 + $0x71c] sm:$0xf] }
 0x423   : > { %16887 = vst [vmem:[#allocation298_spill] sm:$0xff] %v12675_v18  ;;  %3704 = vmatmul.bf16.gmra.mxu2 %v12670_v5  ;;  %3873 = vmatmul.bf16.gmra.mxu3 %v12673_v7  ;;  %v9523_v18 = vld [vmem:[#allocation7 + $0x738] sm:$0xf0] }
 0x424   : > { %v12691_v5 = vor.u32 %v10401_v32, %v9523_v18  ;;  %v656_v18 = vld [vmem:[%s11572_s30 + $0x2e8] sm:$0xff] }
 0x425   : > { %v688_v32 = vld [vmem:[%s11572_s30 + $0x3e8] sm:$0xff] }
 0x426   : > { %v3665_v6 = vpop.f32.mrf.mxu2  ;;  %v3834_v46 = vpop.f32.mrf.mxu3 }
 0x427   : > { %v3666_v30 = vadd.f32 %v3665_v6, %v3497_v24  ;;  %v3329_v63 = vpop.f32.mrf.mxu0  ;;  %v3498_v35 = vpop.f32.mrf.mxu1  ;;  %v12684_v6 = vor.u32 %v10404_v12, %v9513_v60  ;;  %v594_v12 = vld [vmem:[%s11572_s30 + $0xf8] sm:$0xff] }
 0x428   : > { %v3330_v26 = vadd.f32 %v3329_v63, %v16888_v61  ;;  %v12688_v61 = vor.u32 %v10405_v49, %v9521_v11  ;;  %v626_v11 = vld [vmem:[%s11572_s30 + $0x1f8] sm:$0xff] }
 0x429   : > { %v12682_v20 = vadd.f32 %v3834_v46, %v3666_v30  ;;  %16890 = vst [vmem:[#allocation299_spill] sm:$0xff] %v12684_v6  ;;  %v12686_v46 = vor.u32 %v10400_v31, %v9515_v47  ;;  %v624_v31 = vld [vmem:[%s11572_s30 + $0x1e8] sm:$0xff] }
 0x42a   : > { %v3499_v50 = vadd.f32 %v3498_v35, %v3330_v26  ;;  %16892 = vst [vmem:[#allocation301_spill] sm:$0xff] %v12688_v61  ;;  %v16893_v26 = vld [vmem:[#allocation150_spill] sm:$0xff] }
 0x42b   : > { %16889 = vst [vmem:[#allocation149_spill] sm:$0xff] %v12682_v20 }
 0x42c   : > { %16891 = vst [vmem:[#allocation300_spill] sm:$0xff] %v12686_v46 }
 0x42d   : > { %16894 = vst [vmem:[#allocation150_spill] sm:$0xff] %v12691_v5 }
 0x42e   : > { %v3667_v24 = vpop.f32.mrf.mxu2  ;;  %v3836_v30 = vpop.f32.mrf.mxu3 }
 0x42f   : > { %v3668_v7 = vadd.f32 %v3667_v24, %v3499_v50  ;;  %v3332_v63 = vpop.f32.mrf.mxu0  ;;  %v3501_v20 = vpop.f32.mrf.mxu1  ;;  %v592_v50 = vld [vmem:[%s11572_s30 + $0xe8] sm:$0xff]  ;;  %v690_v24 = vld [vmem:[%s11572_s30 + $0x3f8] sm:$0xff] }
 0x430   : > { %v3333_v35 = vadd.f32 %v3332_v63, %v16893_v26  ;;  %v834_v47 = vpack.c.bf16 %v594_v12, %v592_v50  ;;  %v588_v63 = vld [vmem:[%s11572_s30 + $0xc8] sm:$0xff] }
 0x431   : > { %v12693_v28 = vadd.f32 %v3836_v30, %v3668_v7  ;;  %v658_v7 = vld [vmem:[%s11572_s30 + $0x2f8] sm:$0xff]  ;;  %v620_v12 = vld [vmem:[%s11572_s30 + $0x1c8] sm:$0xff] }
 0x432   : > { %v3502_v60 = vadd.f32 %v3501_v20, %v3333_v35  ;;  %3371 = vmatmul.bf16.gmra.mxu0 %v12684_v6  ;;  %3540 = vmatmul.bf16.gmra.mxu1 %v12686_v46  ;;  %v850_v20 = vpack.c.bf16 %v626_v11, %v624_v31  ;;  %v866_v49 = vpack.c.bf16 %v658_v7, %v656_v18  ;;  %v590_v30 = vld [vmem:[%s11572_s30 + $0xd8] sm:$0xff]  ;;  %v684_v7 = vld [vmem:[%s11572_s30 + $0x3c8] sm:$0xff] }
 0x433   : > { %16895 = vst [vmem:[#allocation302_spill] sm:$0xff] %v12693_v28  ;;  %3709 = vmatmul.bf16.gmra.mxu2 %v12688_v61  ;;  %3878 = vmatmul.bf16.gmra.mxu3 %v12691_v5  ;;  %v882_v35 = vpack.c.bf16 %v690_v24, %v688_v32  ;;  %v832_v50 = vpack.c.bf16 %v590_v30, %v588_v63  ;;  %v622_v28 = vld [vmem:[%s11572_s30 + $0x1d8] sm:$0xff]  ;;  %v652_v61 = vld [vmem:[%s11572_s30 + $0x2c8] sm:$0xff]  ;;  %v10412_v24 = vld [vmem:[#allocation7 + $0x76c] sm:$0xf0] }
 0x434   : > { %3899 = vmatpush.bf16.msra.mxu0 %v834_v47  ;;  %4068 = vmatpush.bf16.msra.mxu1 %v850_v20  ;;  %v848_v47 = vpack.c.bf16 %v622_v28, %v620_v12  ;;  %v654_v18 = vld [vmem:[%s11572_s30 + $0x2d8] sm:$0xff]  ;;  %v584_v63 = vld [vmem:[%s11572_s30 + $0xa8] sm:$0xff]  ;;  %v10408_v12 = vld [vmem:[#allocation7 + $0x754] sm:$0xf] }
 0x435   : > { %4237 = vmatpush.bf16.msra.mxu2 %v866_v49  ;;  %v686_v5 = vld [vmem:[%s11572_s30 + $0x3d8] sm:$0xff]  ;;  %4406 = vmatpush.bf16.msra.mxu3 %v882_v35  ;;  %v864_v20 = vpack.c.bf16 %v654_v18, %v652_v61  ;;  %v616_v30 = vld [vmem:[%s11572_s30 + $0x1a8] sm:$0xff] }
 0x436   : > { %v3670_v26 = vpop.f32.mrf.mxu2  ;;  %v3839_v11 = vpop.f32.mrf.mxu3  ;;  %v16896_v6 = vld [vmem:[#allocation155_spill] sm:$0xff]  ;;  %v880_v49 = vpack.c.bf16 %v686_v5, %v684_v7  ;;  %v680_v18 = vld [vmem:[%s11572_s30 + $0x3a8] sm:$0xff] }
 0x437   : > { %v3671_v46 = vadd.f32 %v3670_v26, %v3502_v60  ;;  %v3334_v31 = vpop.f32.mrf.mxu0  ;;  %v3503_v36 = vpop.f32.mrf.mxu1  ;;  %v9545_v60 = vld [vmem:[#allocation7 + $0x750] sm:$0xf]  ;;  %v586_v28 = vld [vmem:[%s11572_s30 + $0xb8] sm:$0xff] }
 0x438   : > { %v3335_v16 = vadd.f32 %v3334_v31, %v16896_v6  ;;  %3900 = vmatpush.bf16.msra.mxu0 %v832_v50  ;;  %v9547_v6 = vld [vmem:[#allocation7 + $0x770] sm:$0xf0]  ;;  %4069 = vmatpush.bf16.msra.mxu1 %v848_v47  ;;  %v830_v61 = vpack.c.bf16 %v586_v28, %v584_v63  ;;  %v618_v5 = vld [vmem:[%s11572_s30 + $0x1b8] sm:$0xff]  ;;  %v612_v28 = vld [vmem:[%s11572_s30 + $0x188] sm:$0xff]  ;;  %v12729_v53 = vor.u32 %v10412_v24, %v9545_v60 }
 0x439   : > { %v12716_v32 = vadd.f32 %v3839_v11, %v3671_v46  ;;  %4238 = vmatpush.bf16.msra.mxu2 %v864_v20  ;;  %v648_v46 = vld [vmem:[%s11572_s30 + $0x2a8] sm:$0xff]  ;;  %v650_v35 = vld [vmem:[%s11572_s30 + $0x2b8] sm:$0xff]  ;;  %v846_v11 = vpack.c.bf16 %v618_v5, %v616_v30  ;;  %4407 = vmatpush.bf16.msra.mxu3 %v880_v49  ;;  %v12734_v49 = vor.u32 %v10408_v12, %v9547_v6 }
 0x43a   : > { %v3504_v26 = vadd.f32 %v3503_v36, %v3335_v16  ;;  %v9553_v31 = vld [vmem:[#allocation7 + $0x758] sm:$0xf]  ;;  %v862_v50 = vpack.c.bf16 %v650_v35, %v648_v46  ;;  %v10409_v36 = vld [vmem:[#allocation7 + $0x75c] sm:$0xf]  ;;  %v580_v20 = vld [vmem:[%s11572_s30 + $0x88] sm:$0xff]  ;;  %16898 = vst [vmem:[#allocation303_spill] sm:$0xff] %v12729_v53 }
 0x43b   : > { %16897 = vst [vmem:[#allocation155_spill] sm:$0xff] %v12716_v32  ;;  %v682_v7 = vld [vmem:[%s11572_s30 + $0x3b8] sm:$0xff]  ;;  %v644_v46 = vld [vmem:[%s11572_s30 + $0x288] sm:$0xff] }
 0x43c   : > { %v10413_v32 = vld [vmem:[#allocation7 + $0x774] sm:$0xf0]  ;;  %v9555_v16 = vld [vmem:[#allocation7 + $0x778] sm:$0xf0]  ;;  %v878_v47 = vpack.c.bf16 %v682_v7, %v680_v18  ;;  %3901 = vmatpush.bf16.msra.mxu0 %v830_v61  ;;  %4070 = vmatpush.bf16.msra.mxu1 %v846_v11  ;;  %16899 = vst [vmem:[#allocation304_spill] sm:$0xff] %v12734_v49  ;;  %v676_v7 = vld [vmem:[%s11572_s30 + $0x388] sm:$0xff] }
 0x43d   : > { %v582_v63 = vld [vmem:[%s11572_s30 + $0x98] sm:$0xff]  ;;  %4239 = vmatpush.bf16.msra.mxu2 %v862_v50  ;;  %v12736_v61 = vor.u32 %v10413_v32, %v9553_v31  ;;  %v576_v6 = vld [vmem:[%s11572_s30 + $0x68] sm:$0xff] }
 0x43e   : > { %v3672_v33 = vpop.f32.mrf.mxu2  ;;  %v828_v30 = vpack.c.bf16 %v582_v63, %v580_v20  ;;  %v614_v5 = vld [vmem:[%s11572_s30 + $0x198] sm:$0xff]  ;;  %v3841_v22 = vpop.f32.mrf.mxu3  ;;  %v12741_v20 = vor.u32 %v10409_v36, %v9555_v16  ;;  %4408 = vmatpush.bf16.msra.mxu3 %v878_v47  ;;  %v608_v31 = vld [vmem:[%s11572_s30 + $0x168] sm:$0xff] }
 0x43f   : > { %v646_v35 = vld [vmem:[%s11572_s30 + $0x298] sm:$0xff]  ;;  %v3673_v19 = vadd.f32 %v3672_v33, %v3504_v26  ;;  %v3337_v55 = vpop.f32.mrf.mxu0  ;;  %16900 = vst [vmem:[#allocation305_spill] sm:$0xff] %v12736_v61  ;;  %v844_v18 = vpack.c.bf16 %v614_v5, %v612_v28  ;;  %v3506_v50 = vpop.f32.mrf.mxu1  ;;  %v672_v28 = vld [vmem:[%s11572_s30 + $0x368] sm:$0xff] }
 0x440   : > { %v678_v60 = vld [vmem:[%s11572_s30 + $0x398] sm:$0xff]  ;;  %v860_v33 = vpack.c.bf16 %v646_v35, %v644_v46  ;;  %3902 = vmatpush.bf16.msra.mxu0 %v828_v30  ;;  %v572_v5 = vld [vmem:[%s11572_s30 + $0x48] sm:$0xff] }
 0x441   : > { %v16901_v24 = vld [vmem:[#allocation156_spill] sm:$0xff]  ;;  %v12743_v26 = vadd.f32 %v3841_v22, %v3673_v19  ;;  %v876_v32 = vpack.c.bf16 %v678_v60, %v676_v7  ;;  %4071 = vmatpush.bf16.msra.mxu1 %v844_v18  ;;  %v640_v19 = vld [vmem:[%s11572_s30 + $0x268] sm:$0xff] }
 0x442   : > { %v3338_v11 = vadd.f32 %v3337_v55, %v16901_v24  ;;  %16902 = vst [vmem:[#allocation156_spill] sm:$0xff] %v12741_v20  ;;  %3376 = vmatmul.bf16.gmra.mxu0 %v12729_v53  ;;  %v578_v55 = vld [vmem:[%s11572_s30 + $0x78] sm:$0xff]  ;;  %3545 = vmatmul.bf16.gmra.mxu1 %v12734_v49  ;;  %v604_v60 = vld [vmem:[%s11572_s30 + $0x148] sm:$0xff] }
 0x443   : > { %16903 = vst [vmem:[#allocation306_spill] sm:$0xff] %v12743_v26  ;;  %3714 = vmatmul.bf16.gmra.mxu2 %v12736_v61  ;;  %v826_v36 = vpack.c.bf16 %v578_v55, %v576_v6  ;;  %v610_v22 = vld [vmem:[%s11572_s30 + $0x178] sm:$0xff]  ;;  %3883 = vmatmul.bf16.gmra.mxu3 %v12741_v20  ;;  %v628_v61 = vld [vmem:[%s11572_s30 + $0x208] sm:$0xff] }
 0x444   : > { %v3507_v12 = vadd.f32 %v3506_v50, %v3338_v11  ;;  %v642_v16 = vld [vmem:[%s11572_s30 + $0x278] sm:$0xff]  ;;  %4240 = vmatpush.bf16.msra.mxu2 %v860_v33  ;;  %v842_v47 = vpack.c.bf16 %v610_v22, %v608_v31  ;;  %4409 = vmatpush.bf16.msra.mxu3 %v876_v32  ;;  %v636_v11 = vld [vmem:[%s11572_s30 + $0x248] sm:$0xff] }
 0x445   : > { %v858_v63 = vpack.c.bf16 %v642_v16, %v640_v19  ;;  %3903 = vmatpush.bf16.msra.mxu0 %v826_v36  ;;  %v674_v30 = vld [vmem:[%s11572_s30 + $0x378] sm:$0xff]  ;;  %v668_v31 = vld [vmem:[%s11572_s30 + $0x348] sm:$0xff] }
 0x446   : > { %v574_v46 = vld [vmem:[%s11572_s30 + $0x58] sm:$0xff]  ;;  %v3675_v35 = vpop.f32.mrf.mxu2  ;;  %4072 = vmatpush.bf16.msra.mxu1 %v842_v47  ;;  %v874_v18 = vpack.c.bf16 %v674_v30, %v672_v28  ;;  %v3844_v6 = vpop.f32.mrf.mxu3  ;;  %v10420_v28 = vld [vmem:[#allocation7 + $0x7ac] sm:$0xf0] }
 0x447   : > { %v824_v7 = vpack.c.bf16 %v574_v46, %v572_v5  ;;  %v606_v24 = vld [vmem:[%s11572_s30 + $0x158] sm:$0xff]  ;;  %v3676_v50 = vadd.f32 %v3675_v35, %v3507_v12  ;;  %v3339_v33 = vpop.f32.mrf.mxu0  ;;  %v3508_v19 = vpop.f32.mrf.mxu1  ;;  %v9577_v12 = vld [vmem:[#allocation7 + $0x790] sm:$0xf]  ;;  %v568_v5 = vld [vmem:[%s11572_s30 + $0x28] sm:$0xff] }
 0x448   : > { %v840_v32 = vpack.c.bf16 %v606_v24, %v604_v60  ;;  %v638_v55 = vld [vmem:[%s11572_s30 + $0x258] sm:$0xff]  ;;  %v3340_v22 = vadd.f32 %v3339_v33, %v12172_v27  ;;  %4241 = vmatpush.bf16.msra.mxu2 %v858_v63  ;;  %4410 = vmatpush.bf16.msra.mxu3 %v874_v18  ;;  %v600_v35 = vld [vmem:[%s11572_s30 + $0x128] sm:$0xff]  ;;  %v10416_v27 = vld [vmem:[#allocation7 + $0x794] sm:$0xf] }
 0x449   : > { %v670_v36 = vld [vmem:[%s11572_s30 + $0x358] sm:$0xff]  ;;  %v856_v16 = vpack.c.bf16 %v638_v55, %v636_v11  ;;  %v12766_v47 = vadd.f32 %v3844_v6, %v3676_v50  ;;  %3904 = vmatpush.bf16.msra.mxu0 %v824_v7  ;;  %v9579_v24 = vld [vmem:[#allocation7 + $0x7b0] sm:$0xf0]  ;;  %v632_v50 = vld [vmem:[%s11572_s30 + $0x228] sm:$0xff] }
 0x44a   : > { %v872_v30 = vpack.c.bf16 %v670_v36, %v668_v31  ;;  %v570_v46 = vld [vmem:[%s11572_s30 + $0x38] sm:$0xff]  ;;  %v3509_v60 = vadd.f32 %v3508_v19, %v3340_v22  ;;  %4073 = vmatpush.bf16.msra.mxu1 %v840_v32  ;;  %v664_v55 = vld [vmem:[%s11572_s30 + $0x328] sm:$0xff] }
 0x44b   : > { %16904 = vst [vmem:[#allocation307_spill] sm:$0xff] %v12766_v47  ;;  %v822_v63 = vpack.c.bf16 %v570_v46, %v568_v5  ;;  %v602_v11 = vld [vmem:[%s11572_s30 + $0x138] sm:$0xff]  ;;  %v564_v5 = vld [vmem:[%s11572_s30 + $0x8] sm:$0xff] }
 0x44c   : > { %v634_v33 = vld [vmem:[%s11572_s30 + $0x238] sm:$0xff]  ;;  %v838_v18 = vpack.c.bf16 %v602_v11, %v600_v35  ;;  %4242 = vmatpush.bf16.msra.mxu2 %v856_v16  ;;  %4411 = vmatpush.bf16.msra.mxu3 %v872_v30  ;;  %v596_v47 = vld [vmem:[%s11572_s30 + $0x108] sm:$0xff]  ;;  %v12779_v35 = vor.u32 %v10420_v28, %v9577_v12 }
 0x44d   : > { %v9585_v6 = vld [vmem:[#allocation7 + $0x798] sm:$0xf]  ;;  %v10417_v36 = vld [vmem:[#allocation7 + $0x79c] sm:$0xf]  ;;  %v854_v19 = vpack.c.bf16 %v634_v33, %v632_v50  ;;  %3905 = vmatpush.bf16.msra.mxu0 %v822_v63  ;;  %v12784_v50 = vor.u32 %v10416_v27, %v9579_v24  ;;  %v660_v33 = vld [vmem:[%s11572_s30 + $0x308] sm:$0xff] }
 0x44e   : > { %v666_v7 = vld [vmem:[%s11572_s30 + $0x338] sm:$0xff]  ;;  %v3677_v26 = vpop.f32.mrf.mxu2  ;;  %16905 = vst [vmem:[#allocation308_spill] sm:$0xff] %v12779_v35  ;;  %4074 = vmatpush.bf16.msra.mxu1 %v838_v18  ;;  %v3846_v16 = vpop.f32.mrf.mxu3  ;;  %v9609_v27 = vld [vmem:[#allocation7 + $0x7d0] sm:$0xf] }
 0x44f   : > { %v10421_v31 = vld [vmem:[#allocation7 + $0x7b4] sm:$0xf0]  ;;  %v9587_v22 = vld [vmem:[#allocation7 + $0x7b8] sm:$0xf0]  ;;  %v870_v32 = vpack.c.bf16 %v666_v7, %v664_v55  ;;  %v3678_v53 = vadd.f32 %v3677_v26, %v3509_v60  ;;  %v3342_v3 = vpop.f32.mrf.mxu0  ;;  %16906 = vst [vmem:[#allocation309_spill] sm:$0xff] %v12784_v50  ;;  %v3511_v23 = vpop.f32.mrf.mxu1 }
 0x450   : > { %v566_v46 = vld [vmem:[%s11572_s30 + $0x18] sm:$0xff]  ;;  %v12786_v30 = vor.u32 %v10421_v31, %v9585_v6  ;;  %v3343_v7 = vadd.f32 %v3342_v3, %v12178_v57  ;;  %v12791_v12 = vor.u32 %v10417_v36, %v9587_v22  ;;  %4243 = vmatpush.bf16.msra.mxu2 %v854_v19  ;;  %v10428_v24 = vld [vmem:[#allocation7 + $0x7ec] sm:$0xf0]  ;;  %v10424_v6 = vld [vmem:[#allocation7 + $0x7d4] sm:$0xf] }
 0x451   : > { %v820_v11 = vpack.c.bf16 %v566_v46, %v564_v5  ;;  %v598_v20 = vld [vmem:[%s11572_s30 + $0x118] sm:$0xff]  ;;  %v12793_v18 = vadd.f32 %v3846_v16, %v3678_v53  ;;  %4412 = vmatpush.bf16.msra.mxu3 %v870_v32  ;;  %v9611_v31 = vld [vmem:[#allocation7 + $0x7f0] sm:$0xf0]  ;;  %v12802_v46 = vor.u32 %v10428_v24, %v9609_v27 }
 0x452   : > { %v630_v49 = vld [vmem:[%s11572_s30 + $0x218] sm:$0xff]  ;;  %16907 = vst [vmem:[#allocation310_spill] sm:$0xff] %v12786_v30  ;;  %v836_v63 = vpack.c.bf16 %v598_v20, %v596_v47  ;;  %v3512_v60 = vadd.f32 %v3511_v23, %v3343_v7  ;;  %3381 = vmatmul.bf16.gmra.mxu0 %v12779_v35  ;;  %3550 = vmatmul.bf16.gmra.mxu1 %v12784_v50 }
 0x453   : > { %v662_v55 = vld [vmem:[%s11572_s30 + $0x318] sm:$0xff]  ;;  %16908 = vst [vmem:[#allocation311_spill] sm:$0xff] %v12791_v12  ;;  %v852_v28 = vpack.c.bf16 %v630_v49, %v628_v61  ;;  %3906 = vmatpush.bf16.msra.mxu0 %v820_v11  ;;  %3719 = vmatmul.bf16.gmra.mxu2 %v12786_v30 }
 0x454   : > { %16909 = vst [vmem:[#allocation312_spill] sm:$0xff] %v12793_v18  ;;  %v868_v26 = vpack.c.bf16 %v662_v55, %v660_v33  ;;  %4075 = vmatpush.bf16.msra.mxu1 %v836_v63  ;;  %3888 = vmatmul.bf16.gmra.mxu3 %v12791_v12  ;;  %v9617_v36 = vld [vmem:[#allocation7 + $0x7d8] sm:$0xf]  ;;  %v10425_v19 = vld [vmem:[#allocation7 + $0x7dc] sm:$0xf]  ;;  %v12804_v33 = vor.u32 %v10424_v6, %v9611_v31 }
 0x455   : > { %4244 = vmatpush.bf16.msra.mxu2 %v852_v28  ;;  %v10429_v22 = vld [vmem:[#allocation7 + $0x7f4] sm:$0xf0]  ;;  %v9619_v32 = vld [vmem:[#allocation7 + $0x7f8] sm:$0xf0]  ;;  %16911 = vst [vmem:[#allocation314_spill] sm:$0xff] %v12802_v46 }
 0x456   : > { %4413 = vmatpush.bf16.msra.mxu3 %v868_v26  ;;  %v3680_v57 = vpop.f32.mrf.mxu2  ;;  %v3849_v53 = vpop.f32.mrf.mxu3  ;;  %16912 = vst [vmem:[#allocation315_spill] sm:$0xff] %v12804_v33  ;;  %v12809_v28 = vor.u32 %v10425_v19, %v9619_v32 }
 0x457   : > { %v3681_v3 = vadd.f32 %v3680_v57, %v3512_v60  ;;  %v3344_v49 = vpop.f32.mrf.mxu0  ;;  %v3513_v20 = vpop.f32.mrf.mxu1 }
 0x458   : > { %v3345_v61 = vadd.f32 %v3344_v49, %v12188_v14  ;;  %v12806_v14 = vor.u32 %v10429_v22, %v9617_v36  ;;  %16914 = vst [vmem:[#allocation317_spill] sm:$0xff] %v12809_v28 }
 0x459   : > { %v12800_v47 = vadd.f32 %v3849_v53, %v3681_v3 }
 0x45a   : > { %v3514_v23 = vadd.f32 %v3513_v20, %v3345_v61  ;;  %16913 = vst [vmem:[#allocation316_spill] sm:$0xff] %v12806_v14 }
 0x45b   : > { %16910 = vst [vmem:[#allocation313_spill] sm:$0xff] %v12800_v47 }
 0x45e   : > { %v3682_v5 = vpop.f32.mrf.mxu2  ;;  %v3851_v63 = vpop.f32.mrf.mxu3 }
 0x45f   : > { %v3683_v11 = vadd.f32 %v3682_v5, %v3514_v23  ;;  %v3347_v16 = vpop.f32.mrf.mxu0  ;;  %v3516_v7 = vpop.f32.mrf.mxu1  ;;  %v16918_v5 = vld [vmem:[#allocation27_spill] sm:$0xff] }
 0x460   : > { %v3348_v55 = vadd.f32 %v3347_v16, %v12194_v58  ;;  %v16920_v16 = vld [vmem:[#allocation29_spill] sm:$0xff] }
 0x461   : > { %v12811_v26 = vadd.f32 %v3851_v63, %v3683_v11  ;;  %v16919_v11 = vld [vmem:[#allocation28_spill] sm:$0xff] }
 0x462   : > { %v3517_v60 = vadd.f32 %v3516_v7, %v3348_v55  ;;  %3386 = vmatmul.bf16.gmra.mxu0 %v12802_v46  ;;  %3555 = vmatmul.bf16.gmra.mxu1 %v12804_v33 }
 0x463   : > { %16915 = vst [vmem:[#allocation318_spill] sm:$0xff] %v12811_v26  ;;  %3724 = vmatmul.bf16.gmra.mxu2 %v12806_v14 }
 0x464   : > { %3893 = vmatmul.bf16.gmra.mxu3 %v12809_v28 }
 0x466   : > { %v3685_v57 = vpop.f32.mrf.mxu2  ;;  %v3854_v53 = vpop.f32.mrf.mxu3 }
 0x467   : > { %v3686_v3 = vadd.f32 %v3685_v57, %v3517_v60  ;;  %v3349_v49 = vpop.f32.mrf.mxu0  ;;  %v3518_v61 = vpop.f32.mrf.mxu1 }
 0x468   : > { %v3350_v58 = vadd.f32 %v3349_v49, %v12204_v59  ;;  %v16921_v59 = vld [vmem:[#allocation30_spill] sm:$0xff] }
 0x469   : > { %v12818_v20 = vadd.f32 %v3854_v53, %v3686_v3 }
 0x46a   : > { %v3519_v23 = vadd.f32 %v3518_v61, %v3350_v58 }
 0x46b   : > { %16916 = vst [vmem:[#allocation319_spill] sm:$0xff] %v12818_v20 }
 0x46e   : > { %v3687_v27 = vpop.f32.mrf.mxu2  ;;  %v3856_v31 = vpop.f32.mrf.mxu3 }
 0x46f   : > { %v3688_v24 = vadd.f32 %v3687_v27, %v3519_v23  ;;  %v3352_v6 = vpop.f32.mrf.mxu0  ;;  %v3521_v22 = vpop.f32.mrf.mxu1 }
 0x470   : > { %v3353_v36 = vadd.f32 %v3352_v6, %v12210_v40 }
 0x471   : > { %v12821_v19 = vadd.f32 %v3856_v31, %v3688_v24 }
 0x472   : > { %v3522_v32 = vadd.f32 %v3521_v22, %v3353_v36  ;;  %3907 = vmatmul.bf16.vlgmr.msra.gmra.mxu0 %v16918_v5  ;;  %4076 = vmatmul.bf16.vlgmr.msra.gmra.mxu1 %v16919_v11  ;;  %v16924_v36 = vld [vmem:[#allocation31_spill] sm:$0xff]  ;;  %v16925_v22 = vld [vmem:[#allocation32_spill] sm:$0xff] }
 0x473   : > { %16917 = vst [vmem:[#allocation320_spill] sm:$0xff] %v12821_v19  ;;  %4245 = vmatmul.bf16.vlgmr.msra.gmra.mxu2 %v16920_v16 }
 0x474   : > { %4414 = vmatmul.bf16.vlgmr.msra.gmra.mxu3 %v16921_v59 }
 0x476   : > { %v3690_v63 = vpop.f32.mrf.mxu2  ;;  %v3859_v60 = vpop.f32.mrf.mxu3 }
 0x477   : > { %v3691_v55 = vadd.f32 %v3690_v63, %v3522_v32  ;;  %v3354_v7 = vpop.f32.mrf.mxu0  ;;  %v3523_v3 = vpop.f32.mrf.mxu1  ;;  %v16926_v32 = vld [vmem:[#allocation33_spill] sm:$0xff] }
 0x478   : > { %v3355_v57 = vadd.f32 %v3354_v7, %v12220_v52  ;;  %v16927_v52 = vld [vmem:[#allocation34_spill] sm:$0xff] }
 0x479   : > { %v12828_v40 = vadd.f32 %v3859_v60, %v3691_v55 }
 0x47a   : > { %v3524_v49 = vadd.f32 %v3523_v3, %v3355_v57 }
 0x47b   : > { %16922 = vst [vmem:[#allocation27_spill] sm:$0xff] %v12828_v40 }
 0x47e   : > { %v3692_v53 = vpop.f32.mrf.mxu2  ;;  %v3861_v23 = vpop.f32.mrf.mxu3 }
 0x47f   : > { %v3693_v58 = vadd.f32 %v3692_v53, %v3524_v49  ;;  %v3357_v61 = vpop.f32.mrf.mxu0  ;;  %v3526_v24 = vpop.f32.mrf.mxu1 }
 0x480   : > { %v3358_v27 = vadd.f32 %v3357_v61, %v12226_v43 }
 0x481   : > { %v12831_v6 = vadd.f32 %v3861_v23, %v3693_v58 }
 0x482   : > { %v3527_v31 = vadd.f32 %v3526_v24, %v3358_v27  ;;  %3912 = vmatmul.bf16.gmra.mxu0 %v16924_v36  ;;  %4081 = vmatmul.bf16.gmra.mxu1 %v16925_v22  ;;  %v16930_v27 = vld [vmem:[#allocation35_spill] sm:$0xff]  ;;  %v16931_v24 = vld [vmem:[#allocation36_spill] sm:$0xff] }
 0x483   : > { %16923 = vst [vmem:[#allocation28_spill] sm:$0xff] %v12831_v6  ;;  %4250 = vmatmul.bf16.gmra.mxu2 %v16926_v32 }
 0x484   : > { %4419 = vmatmul.bf16.gmra.mxu3 %v16927_v52 }
 0x486   : > { %v3695_v5 = vpop.f32.mrf.mxu2  ;;  %v3864_v59 = vpop.f32.mrf.mxu3 }
 0x487   : > { %v3696_v11 = vadd.f32 %v3695_v5, %v3527_v31  ;;  %v3359_v16 = vpop.f32.mrf.mxu0  ;;  %v3528_v55 = vpop.f32.mrf.mxu1  ;;  %v16932_v31 = vld [vmem:[#allocation37_spill] sm:$0xff] }
 0x488   : > { %v3360_v63 = vadd.f32 %v3359_v16, %v12236_v54  ;;  %v16933_v54 = vld [vmem:[#allocation38_spill] sm:$0xff]  ;;  %v16934_v5 = vld [vmem:[#allocation181_spill] sm:$0xff] }
 0x489   : > { %v12838_v43 = vadd.f32 %v3864_v59, %v3696_v11 }
 0x48a   : > { %v3529_v7 = vadd.f32 %v3528_v55, %v3360_v63 }
 0x48b   : > { %16928 = vst [vmem:[#allocation29_spill] sm:$0xff] %v12838_v43 }
 0x48e   : > { %v3697_v60 = vpop.f32.mrf.mxu2  ;;  %v3866_v49 = vpop.f32.mrf.mxu3 }
 0x48f   : > { %v3698_v57 = vadd.f32 %v3697_v60, %v3529_v7  ;;  %v3362_v3 = vpop.f32.mrf.mxu0  ;;  %v3531_v58 = vpop.f32.mrf.mxu1 }
 0x490   : > { %v3363_v53 = vadd.f32 %v3362_v3, %v12242_v13 }
 0x491   : > { %v12841_v61 = vadd.f32 %v3866_v49, %v3698_v57  ;;  %v16936_v57 = vld [vmem:[#allocation182_spill] sm:$0xff] }
 0x492   : > { %v3532_v23 = vadd.f32 %v3531_v58, %v3363_v53  ;;  %3917 = vmatmul.bf16.gmra.mxu0 %v16930_v27  ;;  %4086 = vmatmul.bf16.gmra.mxu1 %v16931_v24  ;;  %v16938_v27 = vld [vmem:[#allocation39_spill] sm:$0xff]  ;;  %v16940_v24 = vld [vmem:[#allocation41_spill] sm:$0xff] }
 0x493   : > { %16929 = vst [vmem:[#allocation30_spill] sm:$0xff] %v12841_v61  ;;  %4255 = vmatmul.bf16.gmra.mxu2 %v16932_v31  ;;  %v16941_v31 = vld [vmem:[#allocation42_spill] sm:$0xff] }
 0x494   : > { %4424 = vmatmul.bf16.gmra.mxu3 %v16933_v54 }
 0x496   : > { %v3700_v36 = vpop.f32.mrf.mxu2  ;;  %v3869_v52 = vpop.f32.mrf.mxu3 }
 0x497   : > { %v3701_v22 = vadd.f32 %v3700_v36, %v3532_v23  ;;  %v3364_v32 = vpop.f32.mrf.mxu0  ;;  %v3533_v16 = vpop.f32.mrf.mxu1  ;;  %v16939_v23 = vld [vmem:[#allocation40_spill] sm:$0xff] }
 0x498   : > { %v3365_v11 = vadd.f32 %v3364_v32, %v16934_v5 }
 0x499   : > { %v12848_v13 = vadd.f32 %v3869_v52, %v3701_v22  ;;  %v16942_v52 = vld [vmem:[#allocation187_spill] sm:$0xff] }
 0x49a   : > { %v3534_v59 = vadd.f32 %v3533_v16, %v3365_v11 }
 0x49b   : > { %16935 = vst [vmem:[#allocation31_spill] sm:$0xff] %v12848_v13 }
 0x49e   : > { %v3702_v63 = vpop.f32.mrf.mxu2  ;;  %v3871_v60 = vpop.f32.mrf.mxu3 }
 0x49f   : > { %v3703_v55 = vadd.f32 %v3702_v63, %v3534_v59  ;;  %v3367_v7 = vpop.f32.mrf.mxu0  ;;  %v3536_v49 = vpop.f32.mrf.mxu1 }
 0x4a0   : > { %v3368_v3 = vadd.f32 %v3367_v7, %v16936_v57  ;;  %v16944_v57 = vld [vmem:[#allocation188_spill] sm:$0xff] }
 0x4a1   : > { %v12851_v53 = vadd.f32 %v3871_v60, %v3703_v55 }
 0x4a2   : > { %v3537_v58 = vadd.f32 %v3536_v49, %v3368_v3  ;;  %3922 = vmatmul.bf16.gmra.mxu0 %v16938_v27  ;;  %4091 = vmatmul.bf16.gmra.mxu1 %v16939_v23 }
 0x4a3   : > { %16937 = vst [vmem:[#allocation32_spill] sm:$0xff] %v12851_v53  ;;  %4260 = vmatmul.bf16.gmra.mxu2 %v16940_v24  ;;  %v16946_v24 = vld [vmem:[#allocation43_spill] sm:$0xff] }
 0x4a4   : > { %4429 = vmatmul.bf16.gmra.mxu3 %v16941_v31  ;;  %v16948_v31 = vld [vmem:[#allocation45_spill] sm:$0xff] }
 0x4a6   : > { %v3705_v54 = vpop.f32.mrf.mxu2  ;;  %v3874_v32 = vpop.f32.mrf.mxu3 }
 0x4a7   : > { %v3706_v36 = vadd.f32 %v3705_v54, %v3537_v58  ;;  %v3369_v22 = vpop.f32.mrf.mxu0  ;;  %v3538_v11 = vpop.f32.mrf.mxu1  ;;  %v16947_v58 = vld [vmem:[#allocation44_spill] sm:$0xff]  ;;  %v16949_v54 = vld [vmem:[#allocation46_spill] sm:$0xff] }
 0x4a8   : > { %v3370_v5 = vadd.f32 %v3369_v22, %v16942_v52 }
 0x4a9   : > { %v12858_v16 = vadd.f32 %v3874_v32, %v3706_v36 }
 0x4aa   : > { %v3539_v59 = vadd.f32 %v3538_v11, %v3370_v5  ;;  %v16950_v5 = vld [vmem:[#allocation193_spill] sm:$0xff] }
 0x4ab   : > { %16943 = vst [vmem:[#allocation33_spill] sm:$0xff] %v12858_v16 }
 0x4ae   : > { %v3707_v63 = vpop.f32.mrf.mxu2  ;;  %v3876_v60 = vpop.f32.mrf.mxu3 }
 0x4af   : > { %v3708_v55 = vadd.f32 %v3707_v63, %v3539_v59  ;;  %v3372_v7 = vpop.f32.mrf.mxu0  ;;  %v3541_v49 = vpop.f32.mrf.mxu1 }
 0x4b0   : > { %v3373_v3 = vadd.f32 %v3372_v7, %v16944_v57 }
 0x4b1   : > { %v12861_v27 = vadd.f32 %v3876_v60, %v3708_v55 }
 0x4b2   : > { %v3542_v23 = vadd.f32 %v3541_v49, %v3373_v3  ;;  %3927 = vmatmul.bf16.gmra.mxu0 %v16946_v24  ;;  %4096 = vmatmul.bf16.gmra.mxu1 %v16947_v58  ;;  %v16952_v49 = vld [vmem:[#allocation194_spill] sm:$0xff] }
 0x4b3   : > { %16945 = vst [vmem:[#allocation34_spill] sm:$0xff] %v12861_v27  ;;  %4265 = vmatmul.bf16.gmra.mxu2 %v16948_v31  ;;  %v16954_v27 = vld [vmem:[#allocation47_spill] sm:$0xff] }
 0x4b4   : > { %4434 = vmatmul.bf16.gmra.mxu3 %v16949_v54 }
 0x4b6   : > { %v3710_v36 = vpop.f32.mrf.mxu2  ;;  %v3879_v52 = vpop.f32.mrf.mxu3 }
 0x4b7   : > { %v3711_v22 = vadd.f32 %v3710_v36, %v3542_v23  ;;  %v3374_v32 = vpop.f32.mrf.mxu0  ;;  %v3543_v59 = vpop.f32.mrf.mxu1  ;;  %v16955_v23 = vld [vmem:[#allocation48_spill] sm:$0xff]  ;;  %v16956_v36 = vld [vmem:[#allocation49_spill] sm:$0xff] }
 0x4b8   : > { %v3375_v11 = vadd.f32 %v3374_v32, %v16950_v5  ;;  %v16957_v32 = vld [vmem:[#allocation50_spill] sm:$0xff] }
 0x4b9   : > { %v12868_v63 = vadd.f32 %v3879_v52, %v3711_v22 }
 0x4ba   : > { %v3544_v55 = vadd.f32 %v3543_v59, %v3375_v11  ;;  %v16958_v59 = vld [vmem:[#allocation199_spill] sm:$0xff] }
 0x4bb   : > { %16951 = vst [vmem:[#allocation35_spill] sm:$0xff] %v12868_v63  ;;  %v16962_v63 = vld [vmem:[#allocation51_spill] sm:$0xff] }
 0x4be   : > { %v3712_v7 = vpop.f32.mrf.mxu2  ;;  %v3881_v3 = vpop.f32.mrf.mxu3 }
 0x4bf   : > { %v3713_v60 = vadd.f32 %v3712_v7, %v3544_v55  ;;  %v3377_v57 = vpop.f32.mrf.mxu0  ;;  %v3546_v58 = vpop.f32.mrf.mxu1 }
 0x4c0   : > { %v3378_v24 = vadd.f32 %v3377_v57, %v16952_v49 }
 0x4c1   : > { %v12871_v31 = vadd.f32 %v3881_v3, %v3713_v60 }
 0x4c2   : > { %v3547_v54 = vadd.f32 %v3546_v58, %v3378_v24  ;;  %3932 = vmatmul.bf16.gmra.mxu0 %v16954_v27  ;;  %4101 = vmatmul.bf16.gmra.mxu1 %v16955_v23  ;;  %v16960_v58 = vld [vmem:[#allocation200_spill] sm:$0xff] }
 0x4c3   : > { %16953 = vst [vmem:[#allocation36_spill] sm:$0xff] %v12871_v31  ;;  %4270 = vmatmul.bf16.gmra.mxu2 %v16956_v36 }
 0x4c4   : > { %4439 = vmatmul.bf16.gmra.mxu3 %v16957_v32 }
 0x4c6   : > { %v3715_v22 = vpop.f32.mrf.mxu2  ;;  %v3884_v11 = vpop.f32.mrf.mxu3 }
 0x4c7   : > { %v3716_v52 = vadd.f32 %v3715_v22, %v3547_v54  ;;  %v3379_v5 = vpop.f32.mrf.mxu0  ;;  %v3548_v7 = vpop.f32.mrf.mxu1  ;;  %v16963_v54 = vld [vmem:[#allocation52_spill] sm:$0xff]  ;;  %v16964_v22 = vld [vmem:[#allocation53_spill] sm:$0xff] }
 0x4c8   : > { %v3380_v55 = vadd.f32 %v3379_v5, %v16958_v59  ;;  %v16965_v5 = vld [vmem:[#allocation54_spill] sm:$0xff] }
 0x4c9   : > { %v12878_v57 = vadd.f32 %v3884_v11, %v3716_v52 }
 0x4ca   : > { %v3549_v60 = vadd.f32 %v3548_v7, %v3380_v55  ;;  %v16966_v7 = vld [vmem:[#allocation205_spill] sm:$0xff] }
 0x4cb   : > { %16959 = vst [vmem:[#allocation37_spill] sm:$0xff] %v12878_v57  ;;  %v16970_v57 = vld [vmem:[#allocation55_spill] sm:$0xff] }
 0x4ce   : > { %v3717_v3 = vpop.f32.mrf.mxu2  ;;  %v3886_v27 = vpop.f32.mrf.mxu3 }
 0x4cf   : > { %v3718_v49 = vadd.f32 %v3717_v3, %v3549_v60  ;;  %v3382_v24 = vpop.f32.mrf.mxu0  ;;  %v3551_v31 = vpop.f32.mrf.mxu1 }
 0x4d0   : > { %v3383_v23 = vadd.f32 %v3382_v24, %v16960_v58 }
 0x4d1   : > { %v12881_v36 = vadd.f32 %v3886_v27, %v3718_v49 }
 0x4d2   : > { %v3552_v32 = vadd.f32 %v3551_v31, %v3383_v23  ;;  %3937 = vmatmul.bf16.gmra.mxu0 %v16962_v63  ;;  %4106 = vmatmul.bf16.gmra.mxu1 %v16963_v54  ;;  %v16968_v23 = vld [vmem:[#allocation206_spill] sm:$0xff] }
 0x4d3   : > { %16961 = vst [vmem:[#allocation38_spill] sm:$0xff] %v12881_v36  ;;  %4275 = vmatmul.bf16.gmra.mxu2 %v16964_v22 }
 0x4d4   : > { %4444 = vmatmul.bf16.gmra.mxu3 %v16965_v5 }
 0x4d6   : > { %v3720_v52 = vpop.f32.mrf.mxu2 }
 0x4d7   : > { %v3721_v11 = vadd.f32 %v3720_v52, %v3552_v32  ;;  %v3384_v59 = vpop.f32.mrf.mxu0  ;;  %v3889_v55 = vpop.f32.mrf.mxu3  ;;  %v16971_v32 = vld [vmem:[#allocation56_spill] sm:$0xff]  ;;  %v16972_v52 = vld [vmem:[#allocation57_spill] sm:$0xff] }
 0x4d8   : > { %v3385_v60 = vadd.f32 %v3384_v59, %v16966_v7  ;;  %v3553_v3 = vpop.f32.mrf.mxu1  ;;  %v16973_v59 = vld [vmem:[#allocation58_spill] sm:$0xff] }
 0x4d9   : > { %v12888_v24 = vadd.f32 %v3889_v55, %v3721_v11 }
 0x4da   : > { %v3554_v49 = vadd.f32 %v3553_v3, %v3385_v60 }
 0x4db   : > { %16967 = vst [vmem:[#allocation181_spill] sm:$0xff] %v12888_v24 }
 0x4de   : > { %v3722_v27 = vpop.f32.mrf.mxu2 }
 0x4df   : > { %v3723_v31 = vadd.f32 %v3722_v27, %v3554_v49  ;;  %v3387_v58 = vpop.f32.mrf.mxu0  ;;  %v3891_v63 = vpop.f32.mrf.mxu3 }
 0x4e0   : > { %v3388_v54 = vadd.f32 %v3387_v58, %v16968_v23  ;;  %v3556_v36 = vpop.f32.mrf.mxu1 }
 0x4e1   : > { %v12891_v22 = vadd.f32 %v3891_v63, %v3723_v31 }
 0x4e2   : > { %v3557_v5 = vadd.f32 %v3556_v36, %v3388_v54  ;;  %3942 = vmatmul.bf16.gmra.mxu0 %v16970_v57  ;;  %4111 = vmatmul.bf16.gmra.mxu1 %v16971_v32 }
 0x4e3   : > { %16969 = vst [vmem:[#allocation182_spill] sm:$0xff] %v12891_v22  ;;  %4280 = vmatmul.bf16.gmra.mxu2 %v16972_v52  ;;  %v16976_v52 = vld [vmem:[#allocation59_spill] sm:$0xff] }
 0x4e4   : > { %4449 = vmatmul.bf16.gmra.mxu3 %v16973_v59  ;;  %v16977_v59 = vld [vmem:[#allocation60_spill] sm:$0xff] }
 0x4e6   : > { %v3725_v11 = vpop.f32.mrf.mxu2 }
 0x4e7   : > { %v3726_v55 = vadd.f32 %v3725_v11, %v3557_v5  ;;  %v3389_v7 = vpop.f32.mrf.mxu0  ;;  %v3894_v60 = vpop.f32.mrf.mxu3  ;;  %v16978_v5 = vld [vmem:[#allocation61_spill] sm:$0xff]  ;;  %v16979_v11 = vld [vmem:[#allocation62_spill] sm:$0xff] }
 0x4e8   : > { %v3390_v3 = vadd.f32 %v3389_v7, %v12333_v8  ;;  %v3558_v49 = vpop.f32.mrf.mxu1 }
 0x4e9   : > { %v12898_v27 = vadd.f32 %v3894_v60, %v3726_v55 }
 0x4ea   : > { %v3559_v31 = vadd.f32 %v3558_v49, %v3390_v3 }
 0x4eb   : > { %16974 = vst [vmem:[#allocation39_spill] sm:$0xff] %v12898_v27 }
 0x4ee   : > { %v3727_v58 = vpop.f32.mrf.mxu2 }
 0x4ef   : > { %v3728_v36 = vadd.f32 %v3727_v58, %v3559_v31  ;;  %v3896_v63 = vpop.f32.mrf.mxu3  ;;  %v3908_v57 = vpop.f32.mrf.mxu0 }
 0x4f0   : > { %v4077_v23 = vpop.f32.mrf.mxu1 }
 0x4f1   : > { %v12900_v54 = vadd.f32 %v3896_v63, %v3728_v36  ;;  %v4078_v32 = vadd.f32 %v4077_v23, %v3908_v57 }
 0x4f2   : > { %3947 = vmatmul.bf16.gmra.mxu0 %v16976_v52  ;;  %4116 = vmatmul.bf16.gmra.mxu1 %v16977_v59  ;;  %v16980_v59 = vld [vmem:[#allocation63_spill] sm:$0xff] }
 0x4f3   : > { %16975 = vst [vmem:[#allocation40_spill] sm:$0xff] %v12900_v54  ;;  %4285 = vmatmul.bf16.gmra.mxu2 %v16978_v5  ;;  %v16981_v5 = vld [vmem:[#allocation64_spill] sm:$0xff] }
 0x4f4   : > { %4454 = vmatmul.bf16.gmra.mxu3 %v16979_v11  ;;  %v16982_v11 = vld [vmem:[#allocation65_spill] sm:$0xff] }
 0x4f6   : > { %v4246_v8 = vpop.f32.mrf.mxu2 }
 0x4f7   : > { %v4247_v55 = vadd.f32 %v4246_v8, %v4078_v32  ;;  %v3910_v7 = vpop.f32.mrf.mxu0  ;;  %v4415_v60 = vpop.f32.mrf.mxu3  ;;  %v16983_v32 = vld [vmem:[#allocation66_spill] sm:$0xff] }
 0x4f8   : > { %v4079_v3 = vpop.f32.mrf.mxu1 }
 0x4f9   : > { %v4080_v49 = vadd.f32 %v4079_v3, %v3910_v7  ;;  %v12906_v31 = vadd.f32 %v4415_v60, %v4247_v55 }
 0x4fe   : > { %v4248_v58 = vpop.f32.mrf.mxu2 }
 0x4ff   : > { %v4249_v36 = vadd.f32 %v4248_v58, %v4080_v49  ;;  %v3913_v63 = vpop.f32.mrf.mxu0  ;;  %v4417_v57 = vpop.f32.mrf.mxu3 }
 0x500   : > { %v4082_v23 = vpop.f32.mrf.mxu1 }
 0x501   : > { %v4083_v52 = vadd.f32 %v4082_v23, %v3913_v63  ;;  %v12908_v54 = vadd.f32 %v4417_v57, %v4249_v36 }
 0x502   : > { %3952 = vmatmul.bf16.gmra.mxu0 %v16980_v59  ;;  %4121 = vmatmul.bf16.gmra.mxu1 %v16981_v5  ;;  %v16984_v5 = vld [vmem:[#allocation67_spill] sm:$0xff] }
 0x503   : > { %4290 = vmatmul.bf16.gmra.mxu2 %v16982_v11  ;;  %v16985_v11 = vld [vmem:[#allocation68_spill] sm:$0xff] }
 0x504   : > { %4459 = vmatmul.bf16.gmra.mxu3 %v16983_v32  ;;  %v16986_v32 = vld [vmem:[#allocation69_spill] sm:$0xff] }
 0x506   : > { %v4251_v8 = vpop.f32.mrf.mxu2 }
 0x507   : > { %v4252_v7 = vadd.f32 %v4251_v8, %v4083_v52  ;;  %v3915_v55 = vpop.f32.mrf.mxu0  ;;  %v4420_v60 = vpop.f32.mrf.mxu3  ;;  %v16987_v52 = vld [vmem:[#allocation70_spill] sm:$0xff] }
 0x508   : > { %v4084_v3 = vpop.f32.mrf.mxu1 }
 0x509   : > { %v4085_v49 = vadd.f32 %v4084_v3, %v3915_v55  ;;  %v12914_v58 = vadd.f32 %v4420_v60, %v4252_v7 }
 0x50e   : > { %v4253_v27 = vpop.f32.mrf.mxu2 }
 0x50f   : > { %v4254_v63 = vadd.f32 %v4253_v27, %v4085_v49  ;;  %v3918_v36 = vpop.f32.mrf.mxu0  ;;  %v4422_v57 = vpop.f32.mrf.mxu3 }
 0x510   : > { %v4087_v23 = vpop.f32.mrf.mxu1 }
 0x511   : > { %v4088_v59 = vadd.f32 %v4087_v23, %v3918_v36  ;;  %v12916_v22 = vadd.f32 %v4422_v57, %v4254_v63 }
 0x512   : > { %3957 = vmatmul.bf16.gmra.mxu0 %v16984_v5  ;;  %4126 = vmatmul.bf16.gmra.mxu1 %v16985_v11  ;;  %v16988_v11 = vld [vmem:[#allocation71_spill] sm:$0xff] }
 0x513   : > { %4295 = vmatmul.bf16.gmra.mxu2 %v16986_v32  ;;  %v16989_v32 = vld [vmem:[#allocation72_spill] sm:$0xff] }
 0x514   : > { %4464 = vmatmul.bf16.gmra.mxu3 %v16987_v52  ;;  %v16990_v52 = vld [vmem:[#allocation73_spill] sm:$0xff] }
 0x516   : > { %v4256_v8 = vpop.f32.mrf.mxu2 }
 0x517   : > { %v4257_v55 = vadd.f32 %v4256_v8, %v4088_v59  ;;  %v3920_v7 = vpop.f32.mrf.mxu0  ;;  %v4425_v60 = vpop.f32.mrf.mxu3  ;;  %v16991_v59 = vld [vmem:[#allocation74_spill] sm:$0xff] }
 0x518   : > { %v4089_v3 = vpop.f32.mrf.mxu1 }
 0x519   : > { %v4090_v27 = vadd.f32 %v4089_v3, %v3920_v7  ;;  %v12922_v49 = vadd.f32 %v4425_v60, %v4257_v55 }
 0x51e   : > { %v4258_v24 = vpop.f32.mrf.mxu2 }
 0x51f   : > { %v4259_v36 = vadd.f32 %v4258_v24, %v4090_v27  ;;  %v3923_v63 = vpop.f32.mrf.mxu0  ;;  %v4427_v57 = vpop.f32.mrf.mxu3 }
 0x520   : > { %v4092_v23 = vpop.f32.mrf.mxu1 }
 0x521   : > { %v4093_v5 = vadd.f32 %v4092_v23, %v3923_v63  ;;  %v12924_v16 = vadd.f32 %v4427_v57, %v4259_v36 }
 0x522   : > { %3962 = vmatmul.bf16.gmra.mxu0 %v16988_v11  ;;  %4131 = vmatmul.bf16.gmra.mxu1 %v16989_v32  ;;  %v16992_v32 = vld [vmem:[#allocation75_spill] sm:$0xff] }
 0x523   : > { %4300 = vmatmul.bf16.gmra.mxu2 %v16990_v52  ;;  %v16993_v52 = vld [vmem:[#allocation76_spill] sm:$0xff] }
 0x524   : > { %4469 = vmatmul.bf16.gmra.mxu3 %v16991_v59  ;;  %v16994_v59 = vld [vmem:[#allocation77_spill] sm:$0xff] }
 0x526   : > { %v4261_v8 = vpop.f32.mrf.mxu2 }
 0x527   : > { %v4262_v7 = vadd.f32 %v4261_v8, %v4093_v5  ;;  %v3925_v55 = vpop.f32.mrf.mxu0  ;;  %v4430_v60 = vpop.f32.mrf.mxu3  ;;  %v16995_v5 = vld [vmem:[#allocation78_spill] sm:$0xff] }
 0x528   : > { %v4094_v3 = vpop.f32.mrf.mxu1 }
 0x529   : > { %v4095_v24 = vadd.f32 %v4094_v3, %v3925_v55  ;;  %v12930_v27 = vadd.f32 %v4430_v60, %v4262_v7 }
 0x52e   : > { %v4263_v53 = vpop.f32.mrf.mxu2 }
 0x52f   : > { %v4264_v63 = vadd.f32 %v4263_v53, %v4095_v24  ;;  %v3928_v36 = vpop.f32.mrf.mxu0  ;;  %v4432_v57 = vpop.f32.mrf.mxu3 }
 0x530   : > { %v4097_v23 = vpop.f32.mrf.mxu1 }
 0x531   : > { %v4098_v11 = vadd.f32 %v4097_v23, %v3928_v36  ;;  %v12932_v13 = vadd.f32 %v4432_v57, %v4264_v63 }
 0x532   : > { %3967 = vmatmul.bf16.gmra.mxu0 %v16992_v32  ;;  %4136 = vmatmul.bf16.gmra.mxu1 %v16993_v52  ;;  %v16996_v52 = vld [vmem:[#allocation79_spill] sm:$0xff] }
 0x533   : > { %4305 = vmatmul.bf16.gmra.mxu2 %v16994_v59  ;;  %v16997_v59 = vld [vmem:[#allocation80_spill] sm:$0xff] }
 0x534   : > { %4474 = vmatmul.bf16.gmra.mxu3 %v16995_v5  ;;  %v16998_v5 = vld [vmem:[#allocation81_spill] sm:$0xff] }
 0x536   : > { %v4266_v8 = vpop.f32.mrf.mxu2 }
 0x537   : > { %v4267_v55 = vadd.f32 %v4266_v8, %v4098_v11  ;;  %v3930_v7 = vpop.f32.mrf.mxu0  ;;  %v4435_v60 = vpop.f32.mrf.mxu3  ;;  %v16999_v11 = vld [vmem:[#allocation82_spill] sm:$0xff] }
 0x538   : > { %v4099_v3 = vpop.f32.mrf.mxu1 }
 0x539   : > { %v4100_v53 = vadd.f32 %v4099_v3, %v3930_v7  ;;  %v12938_v24 = vadd.f32 %v4435_v60, %v4267_v55 }
 0x53e   : > { %v4268_v61 = vpop.f32.mrf.mxu2 }
 0x53f   : > { %v4269_v36 = vadd.f32 %v4268_v61, %v4100_v53  ;;  %v3933_v63 = vpop.f32.mrf.mxu0  ;;  %v4437_v57 = vpop.f32.mrf.mxu3 }
 0x540   : > { %v4102_v23 = vpop.f32.mrf.mxu1 }
 0x541   : > { %v4103_v32 = vadd.f32 %v4102_v23, %v3933_v63  ;;  %v12940_v43 = vadd.f32 %v4437_v57, %v4269_v36 }
 0x542   : > { %3972 = vmatmul.bf16.gmra.mxu0 %v16996_v52  ;;  %4141 = vmatmul.bf16.gmra.mxu1 %v16997_v59  ;;  %v17000_v59 = vld [vmem:[#allocation83_spill] sm:$0xff] }
 0x543   : > { %4310 = vmatmul.bf16.gmra.mxu2 %v16998_v5  ;;  %v17001_v5 = vld [vmem:[#allocation84_spill] sm:$0xff] }
 0x544   : > { %4479 = vmatmul.bf16.gmra.mxu3 %v16999_v11  ;;  %v17002_v11 = vld [vmem:[#allocation85_spill] sm:$0xff] }
 0x546   : > { %v4271_v8 = vpop.f32.mrf.mxu2 }
 0x547   : > { %v4272_v7 = vadd.f32 %v4271_v8, %v4103_v32  ;;  %v3935_v55 = vpop.f32.mrf.mxu0  ;;  %v4440_v60 = vpop.f32.mrf.mxu3  ;;  %v17003_v32 = vld [vmem:[#allocation86_spill] sm:$0xff] }
 0x548   : > { %v4104_v3 = vpop.f32.mrf.mxu1 }
 0x549   : > { %v4105_v61 = vadd.f32 %v4104_v3, %v3935_v55  ;;  %v12946_v53 = vadd.f32 %v4440_v60, %v4272_v7 }
 0x54e   : > { %v4273_v6 = vpop.f32.mrf.mxu2 }
 0x54f   : > { %v4274_v63 = vadd.f32 %v4273_v6, %v4105_v61  ;;  %v3938_v36 = vpop.f32.mrf.mxu0  ;;  %v4442_v57 = vpop.f32.mrf.mxu3 }
 0x550   : > { %v4107_v23 = vpop.f32.mrf.mxu1 }
 0x551   : > { %v4108_v52 = vadd.f32 %v4107_v23, %v3938_v36  ;;  %v12948_v40 = vadd.f32 %v4442_v57, %v4274_v63 }
 0x552   : > { %3977 = vmatmul.bf16.gmra.mxu0 %v17000_v59  ;;  %4146 = vmatmul.bf16.gmra.mxu1 %v17001_v5  ;;  %v17004_v5 = vld [vmem:[#allocation87_spill] sm:$0xff] }
 0x553   : > { %4315 = vmatmul.bf16.gmra.mxu2 %v17002_v11  ;;  %v17005_v11 = vld [vmem:[#allocation88_spill] sm:$0xff] }
 0x554   : > { %4484 = vmatmul.bf16.gmra.mxu3 %v17003_v32  ;;  %v17006_v32 = vld [vmem:[#allocation89_spill] sm:$0xff] }
 0x556   : > { %v4276_v8 = vpop.f32.mrf.mxu2 }
 0x557   : > { %v4277_v55 = vadd.f32 %v4276_v8, %v4108_v52  ;;  %v3940_v7 = vpop.f32.mrf.mxu0  ;;  %v4445_v60 = vpop.f32.mrf.mxu3  ;;  %v17007_v52 = vld [vmem:[#allocation90_spill] sm:$0xff] }
 0x558   : > { %v4109_v3 = vpop.f32.mrf.mxu1 }
 0x559   : > { %v4110_v6 = vadd.f32 %v4109_v3, %v3940_v7  ;;  %v12954_v61 = vadd.f32 %v4445_v60, %v4277_v55 }
 0x55e   : > { %v4278_v19 = vpop.f32.mrf.mxu2 }
 0x55f   : > { %v4279_v36 = vadd.f32 %v4278_v19, %v4110_v6  ;;  %v3943_v63 = vpop.f32.mrf.mxu0  ;;  %v4447_v57 = vpop.f32.mrf.mxu3 }
 0x560   : > { %v4112_v23 = vpop.f32.mrf.mxu1 }
 0x561   : > { %v4113_v59 = vadd.f32 %v4112_v23, %v3943_v63  ;;  %v12956_v20 = vadd.f32 %v4447_v57, %v4279_v36 }
 0x562   : > { %3982 = vmatmul.bf16.gmra.mxu0 %v17004_v5  ;;  %4151 = vmatmul.bf16.gmra.mxu1 %v17005_v11  ;;  %v17008_v11 = vld [vmem:[#allocation91_spill] sm:$0xff] }
 0x563   : > { %4320 = vmatmul.bf16.gmra.mxu2 %v17006_v32  ;;  %v17009_v32 = vld [vmem:[#allocation92_spill] sm:$0xff] }
 0x564   : > { %4489 = vmatmul.bf16.gmra.mxu3 %v17007_v52  ;;  %v17010_v52 = vld [vmem:[#allocation93_spill] sm:$0xff] }
 0x566   : > { %v4281_v8 = vpop.f32.mrf.mxu2 }
 0x567   : > { %v4282_v7 = vadd.f32 %v4281_v8, %v4113_v59  ;;  %v3945_v55 = vpop.f32.mrf.mxu0  ;;  %v4450_v60 = vpop.f32.mrf.mxu3  ;;  %v17011_v59 = vld [vmem:[#allocation94_spill] sm:$0xff] }
 0x568   : > { %v4114_v3 = vpop.f32.mrf.mxu1 }
 0x569   : > { %v4115_v19 = vadd.f32 %v4114_v3, %v3945_v55  ;;  %v12962_v6 = vadd.f32 %v4450_v60, %v4282_v7 }
 0x56e   : > { %v4283_v26 = vpop.f32.mrf.mxu2 }
 0x56f   : > { %v4284_v63 = vadd.f32 %v4283_v26, %v4115_v19  ;;  %v3948_v36 = vpop.f32.mrf.mxu0  ;;  %v4452_v57 = vpop.f32.mrf.mxu3 }
 0x570   : > { %v4117_v23 = vpop.f32.mrf.mxu1 }
 0x571   : > { %v4118_v5 = vadd.f32 %v4117_v23, %v3948_v36  ;;  %v12964_v47 = vadd.f32 %v4452_v57, %v4284_v63 }
 0x572   : > { %3987 = vmatmul.bf16.gmra.mxu0 %v17008_v11  ;;  %4156 = vmatmul.bf16.gmra.mxu1 %v17009_v32  ;;  %v17012_v32 = vld [vmem:[#allocation95_spill] sm:$0xff] }
 0x573   : > { %4325 = vmatmul.bf16.gmra.mxu2 %v17010_v52  ;;  %v17013_v52 = vld [vmem:[#allocation96_spill] sm:$0xff] }
 0x574   : > { %4494 = vmatmul.bf16.gmra.mxu3 %v17011_v59  ;;  %v17014_v59 = vld [vmem:[#allocation97_spill] sm:$0xff] }
 0x576   : > { %v4286_v8 = vpop.f32.mrf.mxu2 }
 0x577   : > { %v4287_v55 = vadd.f32 %v4286_v8, %v4118_v5  ;;  %v3950_v7 = vpop.f32.mrf.mxu0  ;;  %v4455_v60 = vpop.f32.mrf.mxu3  ;;  %v17015_v5 = vld [vmem:[#allocation98_spill] sm:$0xff] }
 0x578   : > { %v4119_v3 = vpop.f32.mrf.mxu1 }
 0x579   : > { %v4120_v26 = vadd.f32 %v4119_v3, %v3950_v7  ;;  %v12970_v19 = vadd.f32 %v4455_v60, %v4287_v55 }
 0x57e   : > { %v4288_v18 = vpop.f32.mrf.mxu2 }
 0x57f   : > { %v4289_v36 = vadd.f32 %v4288_v18, %v4120_v26  ;;  %v3953_v63 = vpop.f32.mrf.mxu0  ;;  %v4457_v57 = vpop.f32.mrf.mxu3 }
 0x580   : > { %v4122_v23 = vpop.f32.mrf.mxu1 }
 0x581   : > { %v4123_v11 = vadd.f32 %v4122_v23, %v3953_v63  ;;  %v12972_v28 = vadd.f32 %v4457_v57, %v4289_v36 }
 0x582   : > { %3992 = vmatmul.bf16.gmra.mxu0 %v17012_v32  ;;  %4161 = vmatmul.bf16.gmra.mxu1 %v17013_v52  ;;  %v17016_v52 = vld [vmem:[#allocation99_spill] sm:$0xff] }
 0x583   : > { %4330 = vmatmul.bf16.gmra.mxu2 %v17014_v59  ;;  %v17017_v59 = vld [vmem:[#allocation100_spill] sm:$0xff] }
 0x584   : > { %4499 = vmatmul.bf16.gmra.mxu3 %v17015_v5  ;;  %v17018_v5 = vld [vmem:[#allocation101_spill] sm:$0xff] }
 0x586   : > { %v4291_v8 = vpop.f32.mrf.mxu2 }
 0x587   : > { %v4292_v7 = vadd.f32 %v4291_v8, %v4123_v11  ;;  %v3955_v55 = vpop.f32.mrf.mxu0  ;;  %v4460_v60 = vpop.f32.mrf.mxu3  ;;  %v17019_v11 = vld [vmem:[#allocation102_spill] sm:$0xff] }
 0x588   : > { %v4124_v3 = vpop.f32.mrf.mxu1 }
 0x589   : > { %v4125_v18 = vadd.f32 %v4124_v3, %v3955_v55  ;;  %v12978_v26 = vadd.f32 %v4460_v60, %v4292_v7 }
 0x58e   : > { %v4293_v14 = vpop.f32.mrf.mxu2 }
 0x58f   : > { %v4294_v63 = vadd.f32 %v4293_v14, %v4125_v18  ;;  %v3958_v36 = vpop.f32.mrf.mxu0  ;;  %v4462_v57 = vpop.f32.mrf.mxu3 }
 0x590   : > { %v4127_v23 = vpop.f32.mrf.mxu1 }
 0x591   : > { %v4128_v32 = vadd.f32 %v4127_v23, %v3958_v36  ;;  %v12980_v33 = vadd.f32 %v4462_v57, %v4294_v63 }
 0x592   : > { %3997 = vmatmul.bf16.gmra.mxu0 %v17016_v52  ;;  %4166 = vmatmul.bf16.gmra.mxu1 %v17017_v59  ;;  %v17020_v59 = vld [vmem:[#allocation103_spill] sm:$0xff] }
 0x593   : > { %4335 = vmatmul.bf16.gmra.mxu2 %v17018_v5  ;;  %v17021_v5 = vld [vmem:[#allocation104_spill] sm:$0xff] }
 0x594   : > { %4504 = vmatmul.bf16.gmra.mxu3 %v17019_v11  ;;  %v17022_v11 = vld [vmem:[#allocation105_spill] sm:$0xff] }
 0x596   : > { %v4296_v8 = vpop.f32.mrf.mxu2 }
 0x597   : > { %v4297_v55 = vadd.f32 %v4296_v8, %v4128_v32  ;;  %v3960_v7 = vpop.f32.mrf.mxu0  ;;  %v4465_v60 = vpop.f32.mrf.mxu3  ;;  %v17023_v32 = vld [vmem:[#allocation106_spill] sm:$0xff] }
 0x598   : > { %v4129_v3 = vpop.f32.mrf.mxu1 }
 0x599   : > { %v4130_v14 = vadd.f32 %v4129_v3, %v3960_v7  ;;  %v12986_v18 = vadd.f32 %v4465_v60, %v4297_v55 }
 0x59e   : > { %v4298_v46 = vpop.f32.mrf.mxu2 }
 0x59f   : > { %v4299_v36 = vadd.f32 %v4298_v46, %v4130_v14  ;;  %v3963_v63 = vpop.f32.mrf.mxu0  ;;  %v4467_v57 = vpop.f32.mrf.mxu3 }
 0x5a0   : > { %v4132_v23 = vpop.f32.mrf.mxu1 }
 0x5a1   : > { %v4133_v52 = vadd.f32 %v4132_v23, %v3963_v63  ;;  %v12988_v12 = vadd.f32 %v4467_v57, %v4299_v36 }
 0x5a2   : > { %4002 = vmatmul.bf16.gmra.mxu0 %v17020_v59  ;;  %4171 = vmatmul.bf16.gmra.mxu1 %v17021_v5  ;;  %v17025_v5 = vld [vmem:[#allocation107_spill] sm:$0xff] }
 0x5a3   : > { %4340 = vmatmul.bf16.gmra.mxu2 %v17022_v11  ;;  %v17026_v11 = vld [vmem:[#allocation108_spill] sm:$0xff] }
 0x5a4   : > { %4509 = vmatmul.bf16.gmra.mxu3 %v17023_v32  ;;  %v17027_v32 = vld [vmem:[#allocation109_spill] sm:$0xff] }
 0x5a6   : > { %v4301_v8 = vpop.f32.mrf.mxu2 }
 0x5a7   : > { %v4302_v7 = vadd.f32 %v4301_v8, %v4133_v52  ;;  %v3965_v55 = vpop.f32.mrf.mxu0  ;;  %v4470_v60 = vpop.f32.mrf.mxu3  ;;  %v17028_v52 = vld [vmem:[#allocation110_spill] sm:$0xff] }
 0x5a8   : > { %v4134_v3 = vpop.f32.mrf.mxu1 }
 0x5a9   : > { %v4135_v46 = vadd.f32 %v4134_v3, %v3965_v55  ;;  %v12994_v14 = vadd.f32 %v4470_v60, %v4302_v7 }
 0x5ae   : > { %v4303_v30 = vpop.f32.mrf.mxu2 }
 0x5af   : > { %v4304_v63 = vadd.f32 %v4303_v30, %v4135_v46  ;;  %v3968_v36 = vpop.f32.mrf.mxu0  ;;  %v4472_v57 = vpop.f32.mrf.mxu3 }
 0x5b0   : > { %v4137_v23 = vpop.f32.mrf.mxu1 }
 0x5b1   : > { %v4138_v59 = vadd.f32 %v4137_v23, %v3968_v36  ;;  %v12996_v50 = vadd.f32 %v4472_v57, %v4304_v63 }
 0x5b2   : > { %4007 = vmatmul.bf16.gmra.mxu0 %v17025_v5  ;;  %4176 = vmatmul.bf16.gmra.mxu1 %v17026_v11  ;;  %v17031_v11 = vld [vmem:[#allocation111_spill] sm:$0xff] }
 0x5b3   : > { %17024 = vst [vmem:[#allocation41_spill] sm:$0xff] %v12996_v50  ;;  %4345 = vmatmul.bf16.gmra.mxu2 %v17027_v32  ;;  %v17032_v32 = vld [vmem:[#allocation112_spill] sm:$0xff]  ;;  %v736_v50 = vld [vmem:[%s11572_s30 + $0x568] sm:$0xff] }
 0x5b4   : > { %4514 = vmatmul.bf16.gmra.mxu3 %v17028_v52  ;;  %v17033_v52 = vld [vmem:[#allocation113_spill] sm:$0xff] }
 0x5b6   : > { %v4306_v8 = vpop.f32.mrf.mxu2 }
 0x5b7   : > { %v4307_v55 = vadd.f32 %v4306_v8, %v4138_v59  ;;  %v3970_v7 = vpop.f32.mrf.mxu0  ;;  %v4475_v60 = vpop.f32.mrf.mxu3  ;;  %v17034_v59 = vld [vmem:[#allocation114_spill] sm:$0xff] }
 0x5b8   : > { %v4139_v3 = vpop.f32.mrf.mxu1 }
 0x5b9   : > { %v4140_v30 = vadd.f32 %v4139_v3, %v3970_v7  ;;  %v13002_v46 = vadd.f32 %v4475_v60, %v4307_v55 }
 0x5bb   : > { %17029 = vst [vmem:[#allocation42_spill] sm:$0xff] %v13002_v46 }
 0x5be   : > { %v4308_v35 = vpop.f32.mrf.mxu2 }
 0x5bf   : > { %v4309_v36 = vadd.f32 %v4308_v35, %v4140_v30  ;;  %v3973_v63 = vpop.f32.mrf.mxu0  ;;  %v4477_v57 = vpop.f32.mrf.mxu3 }
 0x5c0   : > { %v4142_v23 = vpop.f32.mrf.mxu1 }
 0x5c1   : > { %v4143_v5 = vadd.f32 %v4142_v23, %v3973_v63  ;;  %v13004_v2 = vadd.f32 %v4477_v57, %v4309_v36 }
 0x5c2   : > { %4012 = vmatmul.bf16.gmra.mxu0 %v17031_v11  ;;  %4181 = vmatmul.bf16.gmra.mxu1 %v17032_v32  ;;  %v17037_v32 = vld [vmem:[#allocation115_spill] sm:$0xff] }
 0x5c3   : > { %17030 = vst [vmem:[#allocation187_spill] sm:$0xff] %v13004_v2  ;;  %4350 = vmatmul.bf16.gmra.mxu2 %v17033_v52  ;;  %v17038_v52 = vld [vmem:[#allocation116_spill] sm:$0xff] }
 0x5c4   : > { %4519 = vmatmul.bf16.gmra.mxu3 %v17034_v59  ;;  %v17039_v59 = vld [vmem:[#allocation117_spill] sm:$0xff] }
 0x5c6   : > { %v4311_v8 = vpop.f32.mrf.mxu2 }
 0x5c7   : > { %v4312_v7 = vadd.f32 %v4311_v8, %v4143_v5  ;;  %v3975_v55 = vpop.f32.mrf.mxu0  ;;  %v4480_v60 = vpop.f32.mrf.mxu3  ;;  %v17040_v5 = vld [vmem:[#allocation118_spill] sm:$0xff] }
 0x5c8   : > { %v4144_v3 = vpop.f32.mrf.mxu1 }
 0x5c9   : > { %v4145_v35 = vadd.f32 %v4144_v3, %v3975_v55  ;;  %v13010_v30 = vadd.f32 %v4480_v60, %v4312_v7 }
 0x5cb   : > { %17035 = vst [vmem:[#allocation188_spill] sm:$0xff] %v13010_v30 }
 0x5ce   : > { %v4313_v46 = vpop.f32.mrf.mxu2 }
 0x5cf   : > { %v4314_v63 = vadd.f32 %v4313_v46, %v4145_v35  ;;  %v3978_v36 = vpop.f32.mrf.mxu0  ;;  %v4482_v57 = vpop.f32.mrf.mxu3 }
 0x5d0   : > { %v4147_v23 = vpop.f32.mrf.mxu1 }
 0x5d1   : > { %v4148_v11 = vadd.f32 %v4147_v23, %v3978_v36  ;;  %v13012_v2 = vadd.f32 %v4482_v57, %v4314_v63 }
 0x5d2   : > { %4017 = vmatmul.bf16.gmra.mxu0 %v17037_v32  ;;  %4186 = vmatmul.bf16.gmra.mxu1 %v17038_v52  ;;  %v17043_v52 = vld [vmem:[#allocation119_spill] sm:$0xff] }
 0x5d3   : > { %17036 = vst [vmem:[#allocation43_spill] sm:$0xff] %v13012_v2  ;;  %4355 = vmatmul.bf16.gmra.mxu2 %v17039_v59  ;;  %v17044_v59 = vld [vmem:[#allocation120_spill] sm:$0xff] }
 0x5d4   : > { %4524 = vmatmul.bf16.gmra.mxu3 %v17040_v5  ;;  %v17045_v5 = vld [vmem:[#allocation121_spill] sm:$0xff] }
 0x5d6   : > { %v4316_v8 = vpop.f32.mrf.mxu2 }
 0x5d7   : > { %v4317_v55 = vadd.f32 %v4316_v8, %v4148_v11  ;;  %v3980_v7 = vpop.f32.mrf.mxu0  ;;  %v4485_v60 = vpop.f32.mrf.mxu3  ;;  %v17046_v11 = vld [vmem:[#allocation122_spill] sm:$0xff] }
 0x5d8   : > { %v4149_v3 = vpop.f32.mrf.mxu1 }
 0x5d9   : > { %v4150_v46 = vadd.f32 %v4149_v3, %v3980_v7  ;;  %v13018_v35 = vadd.f32 %v4485_v60, %v4317_v55 }
 0x5db   : > { %17041 = vst [vmem:[#allocation44_spill] sm:$0xff] %v13018_v35 }
 0x5de   : > { %v4318_v30 = vpop.f32.mrf.mxu2 }
 0x5df   : > { %v4319_v36 = vadd.f32 %v4318_v30, %v4150_v46  ;;  %v3983_v63 = vpop.f32.mrf.mxu0  ;;  %v4487_v57 = vpop.f32.mrf.mxu3 }
 0x5e0   : > { %v4152_v23 = vpop.f32.mrf.mxu1 }
 0x5e1   : > { %v4153_v32 = vadd.f32 %v4152_v23, %v3983_v63  ;;  %v13020_v2 = vadd.f32 %v4487_v57, %v4319_v36 }
 0x5e2   : > { %4022 = vmatmul.bf16.gmra.mxu0 %v17043_v52  ;;  %4191 = vmatmul.bf16.gmra.mxu1 %v17044_v59  ;;  %v17049_v59 = vld [vmem:[#allocation123_spill] sm:$0xff] }
 0x5e3   : > { %17042 = vst [vmem:[#allocation45_spill] sm:$0xff] %v13020_v2  ;;  %4360 = vmatmul.bf16.gmra.mxu2 %v17045_v5  ;;  %v17050_v5 = vld [vmem:[#allocation124_spill] sm:$0xff] }
 0x5e4   : > { %4529 = vmatmul.bf16.gmra.mxu3 %v17046_v11  ;;  %v17051_v11 = vld [vmem:[#allocation125_spill] sm:$0xff] }
 0x5e6   : > { %v4321_v8 = vpop.f32.mrf.mxu2 }
 0x5e7   : > { %v4322_v7 = vadd.f32 %v4321_v8, %v4153_v32  ;;  %v3985_v55 = vpop.f32.mrf.mxu0  ;;  %v4490_v60 = vpop.f32.mrf.mxu3  ;;  %v17052_v32 = vld [vmem:[#allocation126_spill] sm:$0xff] }
 0x5e8   : > { %v4154_v3 = vpop.f32.mrf.mxu1 }
 0x5e9   : > { %v4155_v30 = vadd.f32 %v4154_v3, %v3985_v55  ;;  %v13026_v46 = vadd.f32 %v4490_v60, %v4322_v7 }
 0x5eb   : > { %17047 = vst [vmem:[#allocation46_spill] sm:$0xff] %v13026_v46 }
 0x5ee   : > { %v4323_v35 = vpop.f32.mrf.mxu2 }
 0x5ef   : > { %v4324_v63 = vadd.f32 %v4323_v35, %v4155_v30  ;;  %v3988_v36 = vpop.f32.mrf.mxu0  ;;  %v4492_v57 = vpop.f32.mrf.mxu3 }
 0x5f0   : > { %v4157_v23 = vpop.f32.mrf.mxu1 }
 0x5f1   : > { %v4158_v52 = vadd.f32 %v4157_v23, %v3988_v36  ;;  %v13028_v2 = vadd.f32 %v4492_v57, %v4324_v63 }
 0x5f2   : > { %4027 = vmatmul.bf16.gmra.mxu0 %v17049_v59  ;;  %4196 = vmatmul.bf16.gmra.mxu1 %v17050_v5  ;;  %v17055_v5 = vld [vmem:[#allocation127_spill] sm:$0xff] }
 0x5f3   : > { %17048 = vst [vmem:[#allocation193_spill] sm:$0xff] %v13028_v2  ;;  %4365 = vmatmul.bf16.gmra.mxu2 %v17051_v11  ;;  %v17056_v11 = vld [vmem:[#allocation128_spill] sm:$0xff] }
 0x5f4   : > { %4534 = vmatmul.bf16.gmra.mxu3 %v17052_v32  ;;  %v17057_v32 = vld [vmem:[#allocation129_spill] sm:$0xff] }
 0x5f6   : > { %v4326_v8 = vpop.f32.mrf.mxu2 }
 0x5f7   : > { %v4327_v55 = vadd.f32 %v4326_v8, %v4158_v52  ;;  %v3990_v7 = vpop.f32.mrf.mxu0  ;;  %v4495_v60 = vpop.f32.mrf.mxu3  ;;  %v17058_v52 = vld [vmem:[#allocation130_spill] sm:$0xff] }
 0x5f8   : > { %v4159_v3 = vpop.f32.mrf.mxu1 }
 0x5f9   : > { %v4160_v35 = vadd.f32 %v4159_v3, %v3990_v7  ;;  %v13034_v30 = vadd.f32 %v4495_v60, %v4327_v55 }
 0x5fb   : > { %17053 = vst [vmem:[#allocation194_spill] sm:$0xff] %v13034_v30 }
 0x5fe   : > { %v4328_v46 = vpop.f32.mrf.mxu2 }
 0x5ff   : > { %v4329_v36 = vadd.f32 %v4328_v46, %v4160_v35  ;;  %v3993_v63 = vpop.f32.mrf.mxu0  ;;  %v4497_v57 = vpop.f32.mrf.mxu3 }
 0x600   : > { %v4162_v23 = vpop.f32.mrf.mxu1 }
 0x601   : > { %v4163_v59 = vadd.f32 %v4162_v23, %v3993_v63  ;;  %v13036_v2 = vadd.f32 %v4497_v57, %v4329_v36 }
 0x602   : > { %4032 = vmatmul.bf16.gmra.mxu0 %v17055_v5  ;;  %4201 = vmatmul.bf16.gmra.mxu1 %v17056_v11  ;;  %v17061_v11 = vld [vmem:[#allocation133_spill] sm:$0xff] }
 0x603   : > { %17054 = vst [vmem:[#allocation47_spill] sm:$0xff] %v13036_v2  ;;  %4370 = vmatmul.bf16.gmra.mxu2 %v17057_v32  ;;  %v17062_v32 = vld [vmem:[#allocation134_spill] sm:$0xff] }
 0x604   : > { %4539 = vmatmul.bf16.gmra.mxu3 %v17058_v52  ;;  %v17063_v52 = vld [vmem:[#allocation135_spill] sm:$0xff] }
 0x606   : > { %v4331_v8 = vpop.f32.mrf.mxu2 }
 0x607   : > { %v4332_v7 = vadd.f32 %v4331_v8, %v4163_v59  ;;  %v3995_v55 = vpop.f32.mrf.mxu0  ;;  %v4500_v60 = vpop.f32.mrf.mxu3  ;;  %v17064_v59 = vld [vmem:[#allocation136_spill] sm:$0xff] }
 0x608   : > { %v4164_v3 = vpop.f32.mrf.mxu1 }
 0x609   : > { %v4165_v46 = vadd.f32 %v4164_v3, %v3995_v55  ;;  %v13042_v35 = vadd.f32 %v4500_v60, %v4332_v7 }
 0x60b   : > { %17059 = vst [vmem:[#allocation48_spill] sm:$0xff] %v13042_v35 }
 0x60e   : > { %v4333_v30 = vpop.f32.mrf.mxu2 }
 0x60f   : > { %v4334_v63 = vadd.f32 %v4333_v30, %v4165_v46  ;;  %v3998_v36 = vpop.f32.mrf.mxu0  ;;  %v4502_v57 = vpop.f32.mrf.mxu3 }
 0x610   : > { %v4167_v23 = vpop.f32.mrf.mxu1 }
 0x611   : > { %v4168_v5 = vadd.f32 %v4167_v23, %v3998_v36  ;;  %v13044_v2 = vadd.f32 %v4502_v57, %v4334_v63 }
 0x612   : > { %4037 = vmatmul.bf16.gmra.mxu0 %v17061_v11  ;;  %4206 = vmatmul.bf16.gmra.mxu1 %v17062_v32  ;;  %v17067_v32 = vld [vmem:[#allocation139_spill] sm:$0xff] }
 0x613   : > { %17060 = vst [vmem:[#allocation49_spill] sm:$0xff] %v13044_v2  ;;  %4375 = vmatmul.bf16.gmra.mxu2 %v17063_v52  ;;  %v17068_v52 = vld [vmem:[#allocation140_spill] sm:$0xff] }
 0x614   : > { %4544 = vmatmul.bf16.gmra.mxu3 %v17064_v59  ;;  %v17069_v59 = vld [vmem:[#allocation141_spill] sm:$0xff] }
 0x616   : > { %v4336_v8 = vpop.f32.mrf.mxu2 }
 0x617   : > { %v4337_v55 = vadd.f32 %v4336_v8, %v4168_v5  ;;  %v4000_v7 = vpop.f32.mrf.mxu0  ;;  %v4505_v60 = vpop.f32.mrf.mxu3  ;;  %v17070_v5 = vld [vmem:[#allocation142_spill] sm:$0xff] }
 0x618   : > { %v4169_v3 = vpop.f32.mrf.mxu1 }
 0x619   : > { %v4170_v30 = vadd.f32 %v4169_v3, %v4000_v7  ;;  %v13050_v46 = vadd.f32 %v4505_v60, %v4337_v55 }
 0x61b   : > { %17065 = vst [vmem:[#allocation50_spill] sm:$0xff] %v13050_v46 }
 0x61e   : > { %v4338_v35 = vpop.f32.mrf.mxu2 }
 0x61f   : > { %v4339_v36 = vadd.f32 %v4338_v35, %v4170_v30  ;;  %v4003_v63 = vpop.f32.mrf.mxu0  ;;  %v4507_v57 = vpop.f32.mrf.mxu3 }
 0x620   : > { %v4172_v23 = vpop.f32.mrf.mxu1 }
 0x621   : > { %v4173_v11 = vadd.f32 %v4172_v23, %v4003_v63  ;;  %v13052_v2 = vadd.f32 %v4507_v57, %v4339_v36 }
 0x622   : > { %4042 = vmatmul.bf16.gmra.mxu0 %v17067_v32  ;;  %4211 = vmatmul.bf16.gmra.mxu1 %v17068_v52 }
 0x623   : > { %17066 = vst [vmem:[#allocation199_spill] sm:$0xff] %v13052_v2  ;;  %4380 = vmatmul.bf16.gmra.mxu2 %v17069_v59  ;;  %v17073_v2 = vld [vmem:[#allocation145_spill] sm:$0xff] }
 0x624   : > { %4549 = vmatmul.bf16.gmra.mxu3 %v17070_v5  ;;  %v722_v5 = vld [vmem:[%s11572_s30 + $0x4f8] sm:$0xff] }
 0x626   : > { %v4341_v8 = vpop.f32.mrf.mxu2 }
 0x627   : > { %v4342_v55 = vadd.f32 %v4341_v8, %v4173_v11  ;;  %v4005_v35 = vpop.f32.mrf.mxu0  ;;  %v4510_v7 = vpop.f32.mrf.mxu3  ;;  %v720_v11 = vld [vmem:[%s11572_s30 + $0x4e8] sm:$0xff] }
 0x628   : > { %v4174_v60 = vpop.f32.mrf.mxu1  ;;  %v752_v8 = vld [vmem:[%s11572_s30 + $0x5e8] sm:$0xff] }
 0x629   : > { %v4175_v3 = vadd.f32 %v4174_v60, %v4005_v35  ;;  %v13058_v30 = vadd.f32 %v4510_v7, %v4342_v55  ;;  %v898_v35 = vpack.c.bf16 %v722_v5, %v720_v11  ;;  %v754_v55 = vld [vmem:[%s11572_s30 + $0x5f8] sm:$0xff]  ;;  %v784_v7 = vld [vmem:[%s11572_s30 + $0x6e8] sm:$0xff] }
 0x62a   : > { %v786_v60 = vld [vmem:[%s11572_s30 + $0x6f8] sm:$0xff]  ;;  %v716_v11 = vld [vmem:[%s11572_s30 + $0x4c8] sm:$0xff] }
 0x62b   : > { %17071 = vst [vmem:[#allocation200_spill] sm:$0xff] %v13058_v30  ;;  %4575 = vmatpush.bf16.msrb.mxu0 %v898_v35  ;;  %v718_v5 = vld [vmem:[%s11572_s30 + $0x4d8] sm:$0xff] }
 0x62e   : > { %v4343_v36 = vpop.f32.mrf.mxu2 }
 0x62f   : > { %v4344_v63 = vadd.f32 %v4343_v36, %v4175_v3  ;;  %v4008_v57 = vpop.f32.mrf.mxu0  ;;  %v4512_v23 = vpop.f32.mrf.mxu3  ;;  %v17074_v3 = vld [vmem:[#allocation146_spill] sm:$0xff]  ;;  %v17075_v36 = vld [vmem:[#allocation147_spill] sm:$0xff] }
 0x630   : > { %v4177_v32 = vpop.f32.mrf.mxu1 }
 0x631   : > { %v4178_v52 = vadd.f32 %v4177_v32, %v4008_v57  ;;  %v13060_v59 = vadd.f32 %v4512_v23, %v4344_v63  ;;  %v914_v57 = vpack.c.bf16 %v754_v55, %v752_v8  ;;  %v930_v63 = vpack.c.bf16 %v786_v60, %v784_v7  ;;  %v816_v23 = vld [vmem:[%s11572_s30 + $0x7e8] sm:$0xff]  ;;  %v818_v32 = vld [vmem:[%s11572_s30 + $0x7f8] sm:$0xff] }
 0x632   : > { %4047 = vmatmul.bf16.gmra.mxu0 %v17073_v2  ;;  %4216 = vmatmul.bf16.gmra.mxu1 %v17074_v3  ;;  %v946_v2 = vpack.c.bf16 %v818_v32, %v816_v23  ;;  %v748_v3 = vld [vmem:[%s11572_s30 + $0x5c8] sm:$0xff]  ;;  %v750_v8 = vld [vmem:[%s11572_s30 + $0x5d8] sm:$0xff] }
 0x633   : > { %17072 = vst [vmem:[#allocation51_spill] sm:$0xff] %v13060_v59  ;;  %4385 = vmatmul.bf16.gmra.mxu2 %v17075_v36  ;;  %v17076_v59 = vld [vmem:[#allocation148_spill] sm:$0xff]  ;;  %4744 = vmatpush.bf16.msrb.mxu1 %v914_v57  ;;  %v896_v36 = vpack.c.bf16 %v718_v5, %v716_v11  ;;  %v780_v55 = vld [vmem:[%s11572_s30 + $0x6c8] sm:$0xff]  ;;  %v912_v23 = vpack.c.bf16 %v750_v8, %v748_v3 }
 0x634   : > { %4554 = vmatmul.bf16.gmra.mxu3 %v17076_v59  ;;  %4913 = vmatpush.bf16.msrb.mxu2 %v930_v63  ;;  %v782_v7 = vld [vmem:[%s11572_s30 + $0x6d8] sm:$0xff]  ;;  %v812_v63 = vld [vmem:[%s11572_s30 + $0x7c8] sm:$0xff] }
 0x635   : > { %5082 = vmatpush.bf16.msrb.mxu3 %v946_v2  ;;  %v928_v57 = vpack.c.bf16 %v782_v7, %v780_v55  ;;  %v814_v32 = vld [vmem:[%s11572_s30 + $0x7d8] sm:$0xff]  ;;  %4576 = vmatpush.bf16.msrb.mxu0 %v896_v36  ;;  %v744_v3 = vld [vmem:[%s11572_s30 + $0x5a8] sm:$0xff] }
 0x636   : > { %v4346_v30 = vpop.f32.mrf.mxu2  ;;  %v944_v2 = vpack.c.bf16 %v814_v32, %v812_v63  ;;  %v746_v55 = vld [vmem:[%s11572_s30 + $0x5b8] sm:$0xff]  ;;  %v776_v7 = vld [vmem:[%s11572_s30 + $0x6a8] sm:$0xff] }
 0x637   : > { %v4347_v60 = vadd.f32 %v4346_v30, %v4178_v52  ;;  %v4010_v59 = vpop.f32.mrf.mxu0  ;;  %v4515_v35 = vpop.f32.mrf.mxu3  ;;  %4745 = vmatpush.bf16.msrb.mxu1 %v912_v23  ;;  %v712_v30 = vld [vmem:[%s11572_s30 + $0x4a8] sm:$0xff]  ;;  %v714_v52 = vld [vmem:[%s11572_s30 + $0x4b8] sm:$0xff]  ;;  %v910_v63 = vpack.c.bf16 %v746_v55, %v744_v3 }
 0x638   : > { %v4179_v46 = vpop.f32.mrf.mxu1  ;;  %4914 = vmatpush.bf16.msrb.mxu2 %v928_v57  ;;  %v894_v8 = vpack.c.bf16 %v714_v52, %v712_v30  ;;  %v778_v36 = vld [vmem:[%s11572_s30 + $0x6b8] sm:$0xff]  ;;  %v708_v23 = vld [vmem:[%s11572_s30 + $0x488] sm:$0xff] }
 0x639   : > { %v4180_v11 = vadd.f32 %v4179_v46, %v4010_v59  ;;  %v13082_v5 = vadd.f32 %v4515_v35, %v4347_v60  ;;  %5083 = vmatpush.bf16.msrb.mxu3 %v944_v2  ;;  %v926_v46 = vpack.c.bf16 %v778_v36, %v776_v7  ;;  %v808_v60 = vld [vmem:[%s11572_s30 + $0x7a8] sm:$0xff]  ;;  %v810_v59 = vld [vmem:[%s11572_s30 + $0x7b8] sm:$0xff] }
 0x63a   : > { %4577 = vmatpush.bf16.msrb.mxu0 %v894_v8  ;;  %v942_v35 = vpack.c.bf16 %v810_v59, %v808_v60  ;;  %v710_v57 = vld [vmem:[%s11572_s30 + $0x498] sm:$0xff]  ;;  %v740_v32 = vld [vmem:[%s11572_s30 + $0x588] sm:$0xff] }
 0x63b   : > { %17077 = vst [vmem:[#allocation52_spill] sm:$0xff] %v13082_v5  ;;  %4746 = vmatpush.bf16.msrb.mxu1 %v910_v63  ;;  %v892_v30 = vpack.c.bf16 %v710_v57, %v708_v23  ;;  %v742_v52 = vld [vmem:[%s11572_s30 + $0x598] sm:$0xff]  ;;  %v772_v5 = vld [vmem:[%s11572_s30 + $0x688] sm:$0xff] }
 0x63c   : > { %4915 = vmatpush.bf16.msrb.mxu2 %v926_v46  ;;  %v774_v3 = vld [vmem:[%s11572_s30 + $0x698] sm:$0xff]  ;;  %v908_v36 = vpack.c.bf16 %v742_v52, %v740_v32  ;;  %v804_v46 = vld [vmem:[%s11572_s30 + $0x788] sm:$0xff] }
 0x63d   : > { %5084 = vmatpush.bf16.msrb.mxu3 %v942_v35  ;;  %v924_v63 = vpack.c.bf16 %v774_v3, %v772_v5  ;;  %v806_v60 = vld [vmem:[%s11572_s30 + $0x798] sm:$0xff] }
 0x63e   : > { %v4348_v2 = vpop.f32.mrf.mxu2  ;;  %4578 = vmatpush.bf16.msrb.mxu0 %v892_v30  ;;  %v940_v35 = vpack.c.bf16 %v806_v60, %v804_v46  ;;  %v17079_v32 = vld [vmem:[#allocation151_spill] sm:$0xff]  ;;  %v768_v30 = vld [vmem:[%s11572_s30 + $0x668] sm:$0xff] }
 0x63f   : > { %v4349_v55 = vadd.f32 %v4348_v2, %v4180_v11  ;;  %v4013_v7 = vpop.f32.mrf.mxu0  ;;  %v4517_v8 = vpop.f32.mrf.mxu3  ;;  %4747 = vmatpush.bf16.msrb.mxu1 %v908_v36  ;;  %v704_v11 = vld [vmem:[%s11572_s30 + $0x468] sm:$0xff]  ;;  %v706_v2 = vld [vmem:[%s11572_s30 + $0x478] sm:$0xff] }
 0x640   : > { %v4182_v59 = vpop.f32.mrf.mxu1  ;;  %4916 = vmatpush.bf16.msrb.mxu2 %v924_v63  ;;  %v890_v5 = vpack.c.bf16 %v706_v2, %v704_v11  ;;  %v738_v52 = vld [vmem:[%s11572_s30 + $0x578] sm:$0xff]  ;;  %v800_v63 = vld [vmem:[%s11572_s30 + $0x768] sm:$0xff] }
 0x641   : > { %v4183_v23 = vadd.f32 %v4182_v59, %v4013_v7  ;;  %v13100_v57 = vadd.f32 %v4517_v8, %v4349_v55  ;;  %5085 = vmatpush.bf16.msrb.mxu3 %v940_v35  ;;  %v770_v3 = vld [vmem:[%s11572_s30 + $0x678] sm:$0xff]  ;;  %v17081_v55 = vld [vmem:[#allocation153_spill] sm:$0xff]  ;;  %v906_v8 = vpack.c.bf16 %v738_v52, %v736_v50  ;;  %v17082_v60 = vld [vmem:[#allocation154_spill] sm:$0xff] }
 0x642   : > { %4052 = vmatmul.bf16.gmra.mxu0 %v17079_v32  ;;  %v17080_v7 = vld [vmem:[#allocation152_spill] sm:$0xff]  ;;  %v922_v36 = vpack.c.bf16 %v770_v3, %v768_v30  ;;  %v700_v35 = vld [vmem:[%s11572_s30 + $0x448] sm:$0xff] }
 0x643   : > { %17078 = vst [vmem:[#allocation53_spill] sm:$0xff] %v13100_v57  ;;  %4221 = vmatmul.bf16.gmra.mxu1 %v17080_v7  ;;  %4390 = vmatmul.bf16.gmra.mxu2 %v17081_v55  ;;  %v802_v46 = vld [vmem:[%s11572_s30 + $0x778] sm:$0xff]  ;;  %v732_v2 = vld [vmem:[%s11572_s30 + $0x548] sm:$0xff] }
 0x644   : > { %4559 = vmatmul.bf16.gmra.mxu3 %v17082_v60  ;;  %4579 = vmatpush.bf16.msrb.mxu0 %v890_v5  ;;  %v938_v59 = vpack.c.bf16 %v802_v46, %v800_v63  ;;  %v702_v11 = vld [vmem:[%s11572_s30 + $0x458] sm:$0xff]  ;;  %v764_v52 = vld [vmem:[%s11572_s30 + $0x648] sm:$0xff] }
 0x645   : > { %4748 = vmatpush.bf16.msrb.mxu1 %v906_v8  ;;  %4917 = vmatpush.bf16.msrb.mxu2 %v922_v36  ;;  %v888_v7 = vpack.c.bf16 %v702_v11, %v700_v35  ;;  %v734_v50 = vld [vmem:[%s11572_s30 + $0x558] sm:$0xff]  ;;  %v796_v36 = vld [vmem:[%s11572_s30 + $0x748] sm:$0xff] }
 0x646   : > { %v4351_v32 = vpop.f32.mrf.mxu2  ;;  %5086 = vmatpush.bf16.msrb.mxu3 %v938_v59  ;;  %v766_v30 = vld [vmem:[%s11572_s30 + $0x658] sm:$0xff]  ;;  %v904_v63 = vpack.c.bf16 %v734_v50, %v732_v2  ;;  %v728_v2 = vld [vmem:[%s11572_s30 + $0x528] sm:$0xff] }
 0x647   : > { %v4352_v3 = vadd.f32 %v4351_v32, %v4183_v23  ;;  %v4015_v55 = vpop.f32.mrf.mxu0  ;;  %v4520_v5 = vpop.f32.mrf.mxu3  ;;  %v920_v8 = vpack.c.bf16 %v766_v30, %v764_v52  ;;  %v798_v46 = vld [vmem:[%s11572_s30 + $0x758] sm:$0xff]  ;;  %v696_v23 = vld [vmem:[%s11572_s30 + $0x428] sm:$0xff] }
 0x648   : > { %v4184_v60 = vpop.f32.mrf.mxu1  ;;  %4580 = vmatpush.bf16.msrb.mxu0 %v888_v7  ;;  %v936_v59 = vpack.c.bf16 %v798_v46, %v796_v36  ;;  %v698_v32 = vld [vmem:[%s11572_s30 + $0x438] sm:$0xff]  ;;  %v760_v30 = vld [vmem:[%s11572_s30 + $0x628] sm:$0xff] }
 0x649   : > { %v4185_v35 = vadd.f32 %v4184_v60, %v4015_v55  ;;  %v13122_v11 = vadd.f32 %v4520_v5, %v4352_v3  ;;  %4749 = vmatpush.bf16.msrb.mxu1 %v904_v63  ;;  %4918 = vmatpush.bf16.msrb.mxu2 %v920_v8  ;;  %v886_v50 = vpack.c.bf16 %v698_v32, %v696_v23  ;;  %v730_v52 = vld [vmem:[%s11572_s30 + $0x538] sm:$0xff]  ;;  %v792_v3 = vld [vmem:[%s11572_s30 + $0x728] sm:$0xff] }
 0x64a   : > { %5087 = vmatpush.bf16.msrb.mxu3 %v936_v59  ;;  %v762_v7 = vld [vmem:[%s11572_s30 + $0x638] sm:$0xff]  ;;  %v902_v36 = vpack.c.bf16 %v730_v52, %v728_v2  ;;  %v692_v8 = vld [vmem:[%s11572_s30 + $0x408] sm:$0xff] }
 0x64b   : > { %17083 = vst [vmem:[#allocation54_spill] sm:$0xff] %v13122_v11  ;;  %v918_v55 = vpack.c.bf16 %v762_v7, %v760_v30  ;;  %v794_v5 = vld [vmem:[%s11572_s30 + $0x738] sm:$0xff]  ;;  %v724_v60 = vld [vmem:[%s11572_s30 + $0x508] sm:$0xff] }
 0x64c   : > { %4581 = vmatpush.bf16.msrb.mxu0 %v886_v50  ;;  %v934_v63 = vpack.c.bf16 %v794_v5, %v792_v3  ;;  %v694_v46 = vld [vmem:[%s11572_s30 + $0x418] sm:$0xff]  ;;  %v756_v11 = vld [vmem:[%s11572_s30 + $0x608] sm:$0xff] }
 0x64d   : > { %4750 = vmatpush.bf16.msrb.mxu1 %v902_v36  ;;  %4919 = vmatpush.bf16.msrb.mxu2 %v918_v55  ;;  %v884_v23 = vpack.c.bf16 %v694_v46, %v692_v8  ;;  %v726_v32 = vld [vmem:[%s11572_s30 + $0x518] sm:$0xff]  ;;  %v788_v50 = vld [vmem:[%s11572_s30 + $0x708] sm:$0xff] }
 0x64e   : > { %v4353_v59 = vpop.f32.mrf.mxu2  ;;  %5088 = vmatpush.bf16.msrb.mxu3 %v934_v63  ;;  %v758_v57 = vld [vmem:[%s11572_s30 + $0x618] sm:$0xff]  ;;  %v900_v7 = vpack.c.bf16 %v726_v32, %v724_v60  ;;  %v17084_v63 = vld [vmem:[#allocation157_spill] sm:$0xff]  ;;  %v17085_v8 = vld [vmem:[#allocation158_spill] sm:$0xff] }
 0x64f   : > { %v4354_v2 = vadd.f32 %v4353_v59, %v4185_v35  ;;  %v4018_v52 = vpop.f32.mrf.mxu0  ;;  %v4522_v30 = vpop.f32.mrf.mxu3  ;;  %v916_v21 = vpack.c.bf16 %v758_v57, %v756_v11  ;;  %v790_v3 = vld [vmem:[%s11572_s30 + $0x718] sm:$0xff]  ;;  %s17819_s30 = smov %s17818_s20 }
 0x650   : > { %v4187_v36 = vpop.f32.mrf.mxu1  ;;  %4582 = vmatpush.bf16.msrb.mxu0 %v884_v23  ;;  %v932_v55 = vpack.c.bf16 %v790_v3, %v788_v50  ;;  %v17086_v35 = vld [vmem:[#allocation159_spill] sm:$0xff]  ;;  %v17087_v46 = vld [vmem:[#allocation160_spill] sm:$0xff]  ;;  %s11277_s28 = scalar_lea.hbm %s17819_s30, 16  ;;  %p11278_p10 = scmp.lt.s32.totalorder %s11272_s15, %s17819_s30 }
 0x651   : > { %v4188_v5 = vadd.f32 %v4187_v36, %v4018_v52  ;;  %v13140_v41 = vadd.f32 %v4522_v30, %v4354_v2  ;;  %4751 = vmatpush.bf16.msrb.mxu1 %v900_v7  ;;  %4920 = vmatpush.bf16.msrb.mxu2 %v916_v21  ;;  %p11279_p12 = scmp.lt.s32.totalorder %s11277_s28, %s11273_s14 }
 0x652   : > { %4057 = vmatmul.bf16.gmra.mxu0 %v17084_v63  ;;  %5089 = vmatpush.bf16.msrb.mxu3 %v932_v55  ;;  %v17088_v55 = vld [vmem:[#allocation161_spill] sm:$0xff]  ;;  %v17089_v63 = vld [vmem:[#allocation162_spill] sm:$0xff] }
 0x653   : > { %4226 = vmatmul.bf16.gmra.mxu1 %v17085_v8  ;;  %4395 = vmatmul.bf16.gmra.mxu2 %v17086_v35  ;;  %v17090_v8 = vld [vmem:[#allocation163_spill] sm:$0xff]  ;;  %p11280_p13 = por %p11279_p12, %p11278_p10 }
 0x654   : > { %4564 = vmatmul.bf16.gmra.mxu3 %v17087_v46 }
 0x655   : > { %p11281_p0 = pnand %p11280_p13, %p11276_p8 }
 0x656   : > { %v4356_v57 = vpop.f32.mrf.mxu2 }
 0x657   : > { %v4357_v11 = vadd.f32 %v4356_v57, %v4188_v5  ;;  %v4020_v60 = vpop.f32.mrf.mxu0  ;;  %v4525_v59 = vpop.f32.mrf.mxu3  ;;  %v17091_v5 = vld [vmem:[#allocation164_spill] sm:$0xff] }
 0x658   : > { %v4189_v23 = vpop.f32.mrf.mxu1 }
 0x659   : > { %v4190_v32 = vadd.f32 %v4189_v23, %v4020_v60  ;;  %v13146_v52 = vadd.f32 %v4525_v59, %v4357_v11 }
 0x65e   : > { %v4358_v2 = vpop.f32.mrf.mxu2 }
 0x65f   : > { %v4359_v30 = vadd.f32 %v4358_v2, %v4190_v32  ;;  %v4023_v21 = vpop.f32.mrf.mxu0  ;;  %v4527_v7 = vpop.f32.mrf.mxu3 }
 0x660   : > { %v4192_v50 = vpop.f32.mrf.mxu1 }
 0x661   : > { %v4193_v3 = vadd.f32 %v4192_v50, %v4023_v21  ;;  %v13148_v36 = vadd.f32 %v4527_v7, %v4359_v30 }
 0x662   : > { %4062 = vmatmul.bf16.gmra.mxu0 %v17088_v55 }
 0x663   : > { %4231 = vmatmul.bf16.gmra.mxu1 %v17089_v63  ;;  %4400 = vmatmul.bf16.gmra.mxu2 %v17090_v8  ;;  %v17094_v63 = vld [vmem:[#allocation165_spill] sm:$0xff]  ;;  %v17095_v8 = vld [vmem:[#allocation166_spill] sm:$0xff] }
 0x664   : > { %4569 = vmatmul.bf16.gmra.mxu3 %v17091_v5  ;;  %v17096_v5 = vld [vmem:[#allocation167_spill] sm:$0xff] }
 0x666   : > { %v4361_v35 = vpop.f32.mrf.mxu2 }
 0x667   : > { %v4362_v46 = vadd.f32 %v4361_v35, %v4193_v3  ;;  %v4025_v57 = vpop.f32.mrf.mxu0  ;;  %v4530_v11 = vpop.f32.mrf.mxu3  ;;  %v17097_v3 = vld [vmem:[#allocation168_spill] sm:$0xff] }
 0x668   : > { %v4194_v60 = vpop.f32.mrf.mxu1 }
 0x669   : > { %v4195_v59 = vadd.f32 %v4194_v60, %v4025_v57  ;;  %v13154_v23 = vadd.f32 %v4530_v11, %v4362_v46 }
 0x66b   : > { %17092 = vst [vmem:[#allocation205_spill] sm:$0xff] %v13154_v23 }
 0x66e   : > { %v4363_v32 = vpop.f32.mrf.mxu2 }
 0x66f   : > { %v4364_v2 = vadd.f32 %v4363_v32, %v4195_v59  ;;  %v4028_v30 = vpop.f32.mrf.mxu0  ;;  %v4532_v21 = vpop.f32.mrf.mxu3 }
 0x670   : > { %v4197_v7 = vpop.f32.mrf.mxu1 }
 0x671   : > { %v4198_v50 = vadd.f32 %v4197_v7, %v4028_v30  ;;  %v13156_v55 = vadd.f32 %v4532_v21, %v4364_v2 }
 0x672   : > { %4583 = vmatmul.bf16.vlgmr.msrb.gmra.mxu0 %v17094_v63 }
 0x673   : > { %17093 = vst [vmem:[#allocation206_spill] sm:$0xff] %v13156_v55  ;;  %4752 = vmatmul.bf16.vlgmr.msrb.gmra.mxu1 %v17095_v8  ;;  %4921 = vmatmul.bf16.vlgmr.msrb.gmra.mxu2 %v17096_v5  ;;  %v17100_v8 = vld [vmem:[#allocation169_spill] sm:$0xff]  ;;  %v17101_v5 = vld [vmem:[#allocation170_spill] sm:$0xff] }
 0x674   : > { %5090 = vmatmul.bf16.vlgmr.msrb.gmra.mxu3 %v17097_v3  ;;  %v17102_v3 = vld [vmem:[#allocation171_spill] sm:$0xff] }
 0x676   : > { %v4366_v35 = vpop.f32.mrf.mxu2 }
 0x677   : > { %v4367_v57 = vadd.f32 %v4366_v35, %v4198_v50  ;;  %v4030_v46 = vpop.f32.mrf.mxu0  ;;  %v4535_v11 = vpop.f32.mrf.mxu3  ;;  %v17103_v50 = vld [vmem:[#allocation172_spill] sm:$0xff] }
 0x678   : > { %v4199_v60 = vpop.f32.mrf.mxu1 }
 0x679   : > { %v4200_v59 = vadd.f32 %v4199_v60, %v4030_v46  ;;  %v13162_v32 = vadd.f32 %v4535_v11, %v4367_v57 }
 0x67b   : > { %17098 = vst [vmem:[#allocation55_spill] sm:$0xff] %v13162_v32 }
 0x67e   : > { %v4368_v23 = vpop.f32.mrf.mxu2 }
 0x67f   : > { %v4369_v30 = vadd.f32 %v4368_v23, %v4200_v59  ;;  %v4033_v2 = vpop.f32.mrf.mxu0  ;;  %v4537_v21 = vpop.f32.mrf.mxu3 }
 0x680   : > { %v4202_v7 = vpop.f32.mrf.mxu1 }
 0x681   : > { %v4203_v63 = vadd.f32 %v4202_v7, %v4033_v2  ;;  %v13164_v55 = vadd.f32 %v4537_v21, %v4369_v30 }
 0x682   : > { %4588 = vmatmul.bf16.gmra.mxu0 %v17100_v8 }
 0x683   : > { %17099 = vst [vmem:[#allocation56_spill] sm:$0xff] %v13164_v55  ;;  %4757 = vmatmul.bf16.gmra.mxu1 %v17101_v5  ;;  %4926 = vmatmul.bf16.gmra.mxu2 %v17102_v3  ;;  %v17106_v5 = vld [vmem:[#allocation173_spill] sm:$0xff]  ;;  %v17107_v3 = vld [vmem:[#allocation174_spill] sm:$0xff] }
 0x684   : > { %5095 = vmatmul.bf16.gmra.mxu3 %v17103_v50  ;;  %v17108_v50 = vld [vmem:[#allocation175_spill] sm:$0xff] }
 0x686   : > { %v4371_v35 = vpop.f32.mrf.mxu2 }
 0x687   : > { %v4372_v46 = vadd.f32 %v4371_v35, %v4203_v63  ;;  %v4035_v57 = vpop.f32.mrf.mxu0  ;;  %v4540_v11 = vpop.f32.mrf.mxu3  ;;  %v17109_v63 = vld [vmem:[#allocation176_spill] sm:$0xff] }
 0x688   : > { %v4204_v60 = vpop.f32.mrf.mxu1 }
 0x689   : > { %v4205_v23 = vadd.f32 %v4204_v60, %v4035_v57  ;;  %v13170_v59 = vadd.f32 %v4540_v11, %v4372_v46 }
 0x68b   : > { %17104 = vst [vmem:[#allocation57_spill] sm:$0xff] %v13170_v59 }
 0x68e   : > { %v4373_v32 = vpop.f32.mrf.mxu2 }
 0x68f   : > { %v4374_v2 = vadd.f32 %v4373_v32, %v4205_v23  ;;  %v4038_v30 = vpop.f32.mrf.mxu0  ;;  %v4542_v21 = vpop.f32.mrf.mxu3 }
 0x690   : > { %v4207_v7 = vpop.f32.mrf.mxu1 }
 0x691   : > { %v4208_v8 = vadd.f32 %v4207_v7, %v4038_v30  ;;  %v13172_v55 = vadd.f32 %v4542_v21, %v4374_v2 }
 0x692   : > { %4593 = vmatmul.bf16.gmra.mxu0 %v17106_v5 }
 0x693   : > { %17105 = vst [vmem:[#allocation58_spill] sm:$0xff] %v13172_v55  ;;  %4762 = vmatmul.bf16.gmra.mxu1 %v17107_v3  ;;  %4931 = vmatmul.bf16.gmra.mxu2 %v17108_v50  ;;  %v17112_v3 = vld [vmem:[#allocation177_spill] sm:$0xff]  ;;  %v17113_v50 = vld [vmem:[#allocation178_spill] sm:$0xff] }
 0x694   : > { %5100 = vmatmul.bf16.gmra.mxu3 %v17109_v63  ;;  %v17114_v63 = vld [vmem:[#allocation179_spill] sm:$0xff] }
 0x696   : > { %v4376_v35 = vpop.f32.mrf.mxu2 }
 0x697   : > { %v4377_v57 = vadd.f32 %v4376_v35, %v4208_v8  ;;  %v4040_v46 = vpop.f32.mrf.mxu0  ;;  %v4545_v11 = vpop.f32.mrf.mxu3  ;;  %v17115_v8 = vld [vmem:[#allocation180_spill] sm:$0xff] }
 0x698   : > { %v4209_v60 = vpop.f32.mrf.mxu1 }
 0x699   : > { %v4210_v32 = vadd.f32 %v4209_v60, %v4040_v46  ;;  %v13178_v23 = vadd.f32 %v4545_v11, %v4377_v57 }
 0x69b   : > { %17110 = vst [vmem:[#allocation59_spill] sm:$0xff] %v13178_v23 }
 0x69e   : > { %v4378_v59 = vpop.f32.mrf.mxu2 }
 0x69f   : > { %v4379_v30 = vadd.f32 %v4378_v59, %v4210_v32  ;;  %v4043_v2 = vpop.f32.mrf.mxu0  ;;  %v4547_v21 = vpop.f32.mrf.mxu3 }
 0x6a0   : > { %v4212_v7 = vpop.f32.mrf.mxu1 }
 0x6a1   : > { %v4213_v5 = vadd.f32 %v4212_v7, %v4043_v2  ;;  %v13180_v55 = vadd.f32 %v4547_v21, %v4379_v30 }
 0x6a2   : > { %4598 = vmatmul.bf16.gmra.mxu0 %v17112_v3 }
 0x6a3   : > { %17111 = vst [vmem:[#allocation60_spill] sm:$0xff] %v13180_v55  ;;  %4767 = vmatmul.bf16.gmra.mxu1 %v17113_v50  ;;  %4936 = vmatmul.bf16.gmra.mxu2 %v17114_v63  ;;  %v17118_v50 = vld [vmem:[#allocation183_spill] sm:$0xff]  ;;  %v17119_v63 = vld [vmem:[#allocation184_spill] sm:$0xff] }
 0x6a4   : > { %5105 = vmatmul.bf16.gmra.mxu3 %v17115_v8  ;;  %v17120_v8 = vld [vmem:[#allocation185_spill] sm:$0xff] }
 0x6a6   : > { %v4381_v35 = vpop.f32.mrf.mxu2 }
 0x6a7   : > { %v4382_v46 = vadd.f32 %v4381_v35, %v4213_v5  ;;  %v4045_v57 = vpop.f32.mrf.mxu0  ;;  %v4550_v11 = vpop.f32.mrf.mxu3  ;;  %v17121_v5 = vld [vmem:[#allocation186_spill] sm:$0xff] }
 0x6a8   : > { %v4214_v60 = vpop.f32.mrf.mxu1 }
 0x6a9   : > { %v4215_v59 = vadd.f32 %v4214_v60, %v4045_v57  ;;  %v13186_v32 = vadd.f32 %v4550_v11, %v4382_v46 }
 0x6ab   : > { %17116 = vst [vmem:[#allocation61_spill] sm:$0xff] %v13186_v32 }
 0x6ae   : > { %v4383_v23 = vpop.f32.mrf.mxu2 }
 0x6af   : > { %v4384_v2 = vadd.f32 %v4383_v23, %v4215_v59  ;;  %v4048_v30 = vpop.f32.mrf.mxu0  ;;  %v4552_v21 = vpop.f32.mrf.mxu3 }
 0x6b0   : > { %v4217_v7 = vpop.f32.mrf.mxu1 }
 0x6b1   : > { %v4218_v3 = vadd.f32 %v4217_v7, %v4048_v30  ;;  %v13188_v55 = vadd.f32 %v4552_v21, %v4384_v2 }
 0x6b2   : > { %4603 = vmatmul.bf16.gmra.mxu0 %v17118_v50 }
 0x6b3   : > { %17117 = vst [vmem:[#allocation62_spill] sm:$0xff] %v13188_v55  ;;  %4772 = vmatmul.bf16.gmra.mxu1 %v17119_v63  ;;  %4941 = vmatmul.bf16.gmra.mxu2 %v17120_v8  ;;  %v17124_v63 = vld [vmem:[#allocation189_spill] sm:$0xff]  ;;  %v17125_v8 = vld [vmem:[#allocation190_spill] sm:$0xff] }
 0x6b4   : > { %5110 = vmatmul.bf16.gmra.mxu3 %v17121_v5  ;;  %v17126_v5 = vld [vmem:[#allocation191_spill] sm:$0xff] }
 0x6b6   : > { %v4386_v35 = vpop.f32.mrf.mxu2 }
 0x6b7   : > { %v4387_v57 = vadd.f32 %v4386_v35, %v4218_v3  ;;  %v4050_v46 = vpop.f32.mrf.mxu0  ;;  %v4555_v11 = vpop.f32.mrf.mxu3  ;;  %v17127_v3 = vld [vmem:[#allocation192_spill] sm:$0xff] }
 0x6b8   : > { %v4219_v60 = vpop.f32.mrf.mxu1 }
 0x6b9   : > { %v4220_v23 = vadd.f32 %v4219_v60, %v4050_v46  ;;  %v13194_v59 = vadd.f32 %v4555_v11, %v4387_v57 }
 0x6bb   : > { %17122 = vst [vmem:[#allocation63_spill] sm:$0xff] %v13194_v59 }
 0x6be   : > { %v4388_v32 = vpop.f32.mrf.mxu2 }
 0x6bf   : > { %v4389_v30 = vadd.f32 %v4388_v32, %v4220_v23  ;;  %v4053_v2 = vpop.f32.mrf.mxu0  ;;  %v4557_v21 = vpop.f32.mrf.mxu3 }
 0x6c0   : > { %v4222_v7 = vpop.f32.mrf.mxu1 }
 0x6c1   : > { %v4223_v50 = vadd.f32 %v4222_v7, %v4053_v2  ;;  %v13196_v55 = vadd.f32 %v4557_v21, %v4389_v30 }
 0x6c2   : > { %4608 = vmatmul.bf16.gmra.mxu0 %v17124_v63 }
 0x6c3   : > { %17123 = vst [vmem:[#allocation64_spill] sm:$0xff] %v13196_v55  ;;  %4777 = vmatmul.bf16.gmra.mxu1 %v17125_v8  ;;  %4946 = vmatmul.bf16.gmra.mxu2 %v17126_v5  ;;  %v17130_v8 = vld [vmem:[#allocation195_spill] sm:$0xff]  ;;  %v17131_v5 = vld [vmem:[#allocation196_spill] sm:$0xff] }
 0x6c4   : > { %5115 = vmatmul.bf16.gmra.mxu3 %v17127_v3  ;;  %v17132_v3 = vld [vmem:[#allocation197_spill] sm:$0xff] }
 0x6c6   : > { %v4391_v35 = vpop.f32.mrf.mxu2 }
 0x6c7   : > { %v4392_v46 = vadd.f32 %v4391_v35, %v4223_v50  ;;  %v4055_v57 = vpop.f32.mrf.mxu0  ;;  %v4560_v11 = vpop.f32.mrf.mxu3  ;;  %v17133_v50 = vld [vmem:[#allocation198_spill] sm:$0xff] }
 0x6c8   : > { %v4224_v60 = vpop.f32.mrf.mxu1 }
 0x6c9   : > { %v4225_v32 = vadd.f32 %v4224_v60, %v4055_v57  ;;  %v13202_v23 = vadd.f32 %v4560_v11, %v4392_v46 }
 0x6cb   : > { %17128 = vst [vmem:[#allocation65_spill] sm:$0xff] %v13202_v23 }
 0x6ce   : > { %v4393_v59 = vpop.f32.mrf.mxu2 }
 0x6cf   : > { %v4394_v2 = vadd.f32 %v4393_v59, %v4225_v32  ;;  %v4058_v30 = vpop.f32.mrf.mxu0  ;;  %v4562_v21 = vpop.f32.mrf.mxu3 }
 0x6d0   : > { %v4227_v7 = vpop.f32.mrf.mxu1 }
 0x6d1   : > { %v4228_v63 = vadd.f32 %v4227_v7, %v4058_v30  ;;  %v13204_v55 = vadd.f32 %v4562_v21, %v4394_v2 }
 0x6d2   : > { %4613 = vmatmul.bf16.gmra.mxu0 %v17130_v8 }
 0x6d3   : > { %17129 = vst [vmem:[#allocation66_spill] sm:$0xff] %v13204_v55  ;;  %4782 = vmatmul.bf16.gmra.mxu1 %v17131_v5  ;;  %4951 = vmatmul.bf16.gmra.mxu2 %v17132_v3  ;;  %v17136_v5 = vld [vmem:[#allocation201_spill] sm:$0xff]  ;;  %v17137_v3 = vld [vmem:[#allocation202_spill] sm:$0xff] }
 0x6d4   : > { %5120 = vmatmul.bf16.gmra.mxu3 %v17133_v50  ;;  %v17138_v50 = vld [vmem:[#allocation203_spill] sm:$0xff] }
 0x6d6   : > { %v4396_v35 = vpop.f32.mrf.mxu2 }
 0x6d7   : > { %v4397_v57 = vadd.f32 %v4396_v35, %v4228_v63  ;;  %v4060_v46 = vpop.f32.mrf.mxu0  ;;  %v4565_v11 = vpop.f32.mrf.mxu3  ;;  %v17139_v63 = vld [vmem:[#allocation204_spill] sm:$0xff] }
 0x6d8   : > { %v4229_v60 = vpop.f32.mrf.mxu1 }
 0x6d9   : > { %v4230_v59 = vadd.f32 %v4229_v60, %v4060_v46  ;;  %v13210_v32 = vadd.f32 %v4565_v11, %v4397_v57 }
 0x6db   : > { %17134 = vst [vmem:[#allocation67_spill] sm:$0xff] %v13210_v32 }
 0x6de   : > { %v4398_v23 = vpop.f32.mrf.mxu2 }
 0x6df   : > { %v4399_v30 = vadd.f32 %v4398_v23, %v4230_v59  ;;  %v4063_v2 = vpop.f32.mrf.mxu0  ;;  %v4567_v21 = vpop.f32.mrf.mxu3 }
 0x6e0   : > { %v4232_v7 = vpop.f32.mrf.mxu1 }
 0x6e1   : > { %v4233_v8 = vadd.f32 %v4232_v7, %v4063_v2  ;;  %v13212_v55 = vadd.f32 %v4567_v21, %v4399_v30 }
 0x6e2   : > { %4618 = vmatmul.bf16.gmra.mxu0 %v17136_v5 }
 0x6e3   : > { %17135 = vst [vmem:[#allocation68_spill] sm:$0xff] %v13212_v55  ;;  %4787 = vmatmul.bf16.gmra.mxu1 %v17137_v3  ;;  %4956 = vmatmul.bf16.gmra.mxu2 %v17138_v50  ;;  %v17140_v55 = vld [vmem:[#allocation207_spill] sm:$0xff] }
 0x6e4   : > { %5125 = vmatmul.bf16.gmra.mxu3 %v17139_v63  ;;  %v17141_v63 = vld [vmem:[#allocation208_spill] sm:$0xff] }
 0x6e6   : > { %v4401_v35 = vpop.f32.mrf.mxu2 }
 0x6e7   : > { %v4402_v46 = vadd.f32 %v4401_v35, %v4233_v8  ;;  %v4065_v57 = vpop.f32.mrf.mxu0  ;;  %v4570_v11 = vpop.f32.mrf.mxu3  ;;  %v17142_v8 = vld [vmem:[#allocation209_spill] sm:$0xff]  ;;  %v17143_v35 = vld [vmem:[#allocation210_spill] sm:$0xff] }
 0x6e8   : > { %v4234_v60 = vpop.f32.mrf.mxu1 }
 0x6e9   : > { %v4235_v23 = vadd.f32 %v4234_v60, %v4065_v57  ;;  %v13218_v59 = vadd.f32 %v4570_v11, %v4402_v46 }
 0x6ee   : > { %v4403_v32 = vpop.f32.mrf.mxu2 }
 0x6ef   : > { %v4404_v2 = vadd.f32 %v4403_v32, %v4235_v23  ;;  %v4572_v30 = vpop.f32.mrf.mxu3  ;;  %v4584_v21 = vpop.f32.mrf.mxu0 }
 0x6f0   : > { %v4585_v7 = vadd.f32 %v4584_v21, %v12906_v31  ;;  %v4753_v5 = vpop.f32.mrf.mxu1 }
 0x6f1   : > { %v13221_v3 = vadd.f32 %v4572_v30, %v4404_v2 }
 0x6f2   : > { %v4754_v50 = vadd.f32 %v4753_v5, %v4585_v7  ;;  %4623 = vmatmul.bf16.gmra.mxu0 %v17140_v55 }
 0x6f3   : > { %4792 = vmatmul.bf16.gmra.mxu1 %v17141_v63  ;;  %4961 = vmatmul.bf16.gmra.mxu2 %v17142_v8 }
 0x6f4   : > { %5130 = vmatmul.bf16.gmra.mxu3 %v17143_v35 }
 0x6f6   : > { %v4922_v46 = vpop.f32.mrf.mxu2 }
 0x6f7   : > { %v4923_v57 = vadd.f32 %v4922_v46, %v4754_v50  ;;  %v4586_v11 = vpop.f32.mrf.mxu0  ;;  %v5091_v32 = vpop.f32.mrf.mxu3  ;;  %v17144_v50 = vld [vmem:[#allocation212_spill] sm:$0xff] }
 0x6f8   : > { %v4587_v60 = vadd.f32 %v4586_v11, %v12908_v54  ;;  %v4755_v23 = vpop.f32.mrf.mxu1  ;;  %v17145_v54 = vld [vmem:[#allocation213_spill] sm:$0xff] }
 0x6f9   : > { %v13228_v31 = vadd.f32 %v5091_v32, %v4923_v57 }
 0x6fa   : > { %v4756_v2 = vadd.f32 %v4755_v23, %v4587_v60 }
 0x6fe   : > { %v4924_v30 = vpop.f32.mrf.mxu2 }
 0x6ff   : > { %v4925_v21 = vadd.f32 %v4924_v30, %v4756_v2  ;;  %v4589_v7 = vpop.f32.mrf.mxu0  ;;  %v5093_v55 = vpop.f32.mrf.mxu3 }
 0x700   : > { %v4590_v5 = vadd.f32 %v4589_v7, %v12914_v58  ;;  %v4758_v63 = vpop.f32.mrf.mxu1 }
 0x701   : > { %v13231_v8 = vadd.f32 %v5093_v55, %v4925_v21 }
 0x702   : > { %v4759_v35 = vadd.f32 %v4758_v63, %v4590_v5  ;;  %4628 = vmatmul.bf16.gmra.mxu0 %v12342_v42 }
 0x703   : > { %4797 = vmatmul.bf16.gmra.mxu1 %v12344_v0  ;;  %4966 = vmatmul.bf16.gmra.mxu2 %v17144_v50 }
 0x704   : > { %5135 = vmatmul.bf16.gmra.mxu3 %v17145_v54 }
 0x706   : > { %v4927_v46 = vpop.f32.mrf.mxu2 }
 0x707   : > { %v4928_v57 = vadd.f32 %v4927_v46, %v4759_v35  ;;  %v4591_v11 = vpop.f32.mrf.mxu0  ;;  %v5096_v32 = vpop.f32.mrf.mxu3  ;;  %v17146_v35 = vld [vmem:[#allocation216_spill] sm:$0xff] }
 0x708   : > { %v4592_v60 = vadd.f32 %v4591_v11, %v12916_v22  ;;  %v4760_v23 = vpop.f32.mrf.mxu1  ;;  %v17147_v22 = vld [vmem:[#allocation217_spill] sm:$0xff] }
 0x709   : > { %v13238_v58 = vadd.f32 %v5096_v32, %v4928_v57 }
 0x70a   : > { %v4761_v2 = vadd.f32 %v4760_v23, %v4592_v60 }
 0x70e   : > { %v4929_v30 = vpop.f32.mrf.mxu2 }
 0x70f   : > { %v4930_v21 = vadd.f32 %v4929_v30, %v4761_v2  ;;  %v4594_v7 = vpop.f32.mrf.mxu0  ;;  %v5098_v42 = vpop.f32.mrf.mxu3 }
 0x710   : > { %v4595_v0 = vadd.f32 %v4594_v7, %v12922_v49  ;;  %v4763_v55 = vpop.f32.mrf.mxu1 }
 0x711   : > { %v13241_v5 = vadd.f32 %v5098_v42, %v4930_v21 }
 0x712   : > { %v4764_v63 = vadd.f32 %v4763_v55, %v4595_v0  ;;  %4633 = vmatmul.bf16.gmra.mxu0 %v12360_v15  ;;  %v17148_v0 = vld [vmem:[#allocation220_spill] sm:$0xff] }
 0x713   : > { %4802 = vmatmul.bf16.gmra.mxu1 %v12362_v29  ;;  %4971 = vmatmul.bf16.gmra.mxu2 %v17146_v35 }
 0x714   : > { %5140 = vmatmul.bf16.gmra.mxu3 %v17147_v22 }
 0x716   : > { %v4932_v50 = vpop.f32.mrf.mxu2 }
 0x717   : > { %v4933_v54 = vadd.f32 %v4932_v50, %v4764_v63  ;;  %v4596_v46 = vpop.f32.mrf.mxu0  ;;  %v5101_v57 = vpop.f32.mrf.mxu3 }
 0x718   : > { %v4597_v11 = vadd.f32 %v4596_v46, %v12924_v16  ;;  %v4765_v32 = vpop.f32.mrf.mxu1  ;;  %v17149_v16 = vld [vmem:[#allocation221_spill] sm:$0xff] }
 0x719   : > { %v13248_v49 = vadd.f32 %v5101_v57, %v4933_v54 }
 0x71a   : > { %v4766_v60 = vadd.f32 %v4765_v32, %v4597_v11 }
 0x71e   : > { %v4934_v23 = vpop.f32.mrf.mxu2 }
 0x71f   : > { %v4935_v2 = vadd.f32 %v4934_v23, %v4766_v60  ;;  %v4599_v30 = vpop.f32.mrf.mxu0  ;;  %v5103_v15 = vpop.f32.mrf.mxu3 }
 0x720   : > { %v4600_v29 = vadd.f32 %v4599_v30, %v12930_v27  ;;  %v4768_v21 = vpop.f32.mrf.mxu1  ;;  %v17150_v30 = vld [vmem:[#allocation224_spill] sm:$0xff] }
 0x721   : > { %v13251_v7 = vadd.f32 %v5103_v15, %v4935_v2 }
 0x722   : > { %v4769_v42 = vadd.f32 %v4768_v21, %v4600_v29  ;;  %4638 = vmatmul.bf16.gmra.mxu0 %v12378_v1 }
 0x723   : > { %4807 = vmatmul.bf16.gmra.mxu1 %v12380_v44  ;;  %4976 = vmatmul.bf16.gmra.mxu2 %v17148_v0 }
 0x724   : > { %5145 = vmatmul.bf16.gmra.mxu3 %v17149_v16 }
 0x726   : > { %v4937_v55 = vpop.f32.mrf.mxu2 }
 0x727   : > { %v4938_v63 = vadd.f32 %v4937_v55, %v4769_v42  ;;  %v4601_v35 = vpop.f32.mrf.mxu0  ;;  %v5106_v22 = vpop.f32.mrf.mxu3 }
 0x728   : > { %v4602_v50 = vadd.f32 %v4601_v35, %v12932_v13  ;;  %v4770_v54 = vpop.f32.mrf.mxu1  ;;  %v17151_v13 = vld [vmem:[#allocation225_spill] sm:$0xff] }
 0x729   : > { %v13258_v27 = vadd.f32 %v5106_v22, %v4938_v63 }
 0x72a   : > { %v4771_v46 = vadd.f32 %v4770_v54, %v4602_v50 }
 0x72e   : > { %v4939_v57 = vpop.f32.mrf.mxu2 }
 0x72f   : > { %v4940_v11 = vadd.f32 %v4939_v57, %v4771_v46  ;;  %v4604_v32 = vpop.f32.mrf.mxu0  ;;  %v5108_v1 = vpop.f32.mrf.mxu3  ;;  %v17152_v57 = vld [vmem:[#allocation228_spill] sm:$0xff] }
 0x730   : > { %v4605_v44 = vadd.f32 %v4604_v32, %v12938_v24  ;;  %v4773_v60 = vpop.f32.mrf.mxu1 }
 0x731   : > { %v13261_v23 = vadd.f32 %v5108_v1, %v4940_v11 }
 0x732   : > { %v4774_v2 = vadd.f32 %v4773_v60, %v4605_v44  ;;  %4643 = vmatmul.bf16.gmra.mxu0 %v12396_v9 }
 0x733   : > { %4812 = vmatmul.bf16.gmra.mxu1 %v12398_v51  ;;  %4981 = vmatmul.bf16.gmra.mxu2 %v17150_v30 }
 0x734   : > { %5150 = vmatmul.bf16.gmra.mxu3 %v17151_v13 }
 0x736   : > { %v4942_v15 = vpop.f32.mrf.mxu2 }
 0x737   : > { %v4943_v29 = vadd.f32 %v4942_v15, %v4774_v2  ;;  %v4606_v21 = vpop.f32.mrf.mxu0  ;;  %v5111_v42 = vpop.f32.mrf.mxu3 }
 0x738   : > { %v4607_v0 = vadd.f32 %v4606_v21, %v12940_v43  ;;  %v4775_v16 = vpop.f32.mrf.mxu1  ;;  %v17153_v43 = vld [vmem:[#allocation229_spill] sm:$0xff] }
 0x739   : > { %v13268_v24 = vadd.f32 %v5111_v42, %v4943_v29 }
 0x73a   : > { %v4776_v55 = vadd.f32 %v4775_v16, %v4607_v0  ;;  %v17154_v16 = vld [vmem:[#allocation232_spill] sm:$0xff] }
 0x73e   : > { %v4944_v63 = vpop.f32.mrf.mxu2 }
 0x73f   : > { %v4945_v35 = vadd.f32 %v4944_v63, %v4776_v55  ;;  %v4609_v22 = vpop.f32.mrf.mxu0  ;;  %v5113_v9 = vpop.f32.mrf.mxu3 }
 0x740   : > { %v4610_v51 = vadd.f32 %v4609_v22, %v12946_v53  ;;  %v4778_v50 = vpop.f32.mrf.mxu1 }
 0x741   : > { %v13271_v54 = vadd.f32 %v5113_v9, %v4945_v35 }
 0x742   : > { %v4779_v46 = vadd.f32 %v4778_v50, %v4610_v51  ;;  %4648 = vmatmul.bf16.gmra.mxu0 %v12414_v38 }
 0x743   : > { %4817 = vmatmul.bf16.gmra.mxu1 %v12416_v4  ;;  %4986 = vmatmul.bf16.gmra.mxu2 %v17152_v57 }
 0x744   : > { %5155 = vmatmul.bf16.gmra.mxu3 %v17153_v43 }
 0x746   : > { %v4947_v11 = vpop.f32.mrf.mxu2 }
 0x747   : > { %v4948_v32 = vadd.f32 %v4947_v11, %v4779_v46  ;;  %v4611_v1 = vpop.f32.mrf.mxu0  ;;  %v5116_v44 = vpop.f32.mrf.mxu3 }
 0x748   : > { %v4612_v60 = vadd.f32 %v4611_v1, %v12948_v40  ;;  %v4780_v2 = vpop.f32.mrf.mxu1  ;;  %v17155_v40 = vld [vmem:[#allocation233_spill] sm:$0xff] }
 0x749   : > { %v13278_v53 = vadd.f32 %v5116_v44, %v4948_v32  ;;  %v17156_v44 = vld [vmem:[#allocation236_spill] sm:$0xff] }
 0x74a   : > { %v4781_v30 = vadd.f32 %v4780_v2, %v4612_v60 }
 0x74e   : > { %v4949_v13 = vpop.f32.mrf.mxu2 }
 0x74f   : > { %v4950_v15 = vadd.f32 %v4949_v13, %v4781_v30  ;;  %v4614_v29 = vpop.f32.mrf.mxu0  ;;  %v5118_v38 = vpop.f32.mrf.mxu3 }
 0x750   : > { %v4615_v4 = vadd.f32 %v4614_v29, %v12954_v61  ;;  %v4783_v21 = vpop.f32.mrf.mxu1 }
 0x751   : > { %v13281_v42 = vadd.f32 %v5118_v38, %v4950_v15 }
 0x752   : > { %v4784_v0 = vadd.f32 %v4783_v21, %v4615_v4  ;;  %4653 = vmatmul.bf16.gmra.mxu0 %v12432_v37 }
 0x753   : > { %4822 = vmatmul.bf16.gmra.mxu1 %v12434_v34  ;;  %4991 = vmatmul.bf16.gmra.mxu2 %v17154_v16 }
 0x754   : > { %5160 = vmatmul.bf16.gmra.mxu3 %v17155_v40 }
 0x756   : > { %v4952_v55 = vpop.f32.mrf.mxu2 }
 0x757   : > { %v4953_v63 = vadd.f32 %v4952_v55, %v4784_v0  ;;  %v4616_v35 = vpop.f32.mrf.mxu0  ;;  %v5121_v22 = vpop.f32.mrf.mxu3 }
 0x758   : > { %v4617_v9 = vadd.f32 %v4616_v35, %v12956_v20  ;;  %v4785_v51 = vpop.f32.mrf.mxu1  ;;  %v17157_v20 = vld [vmem:[#allocation237_spill] sm:$0xff] }
 0x759   : > { %v13288_v61 = vadd.f32 %v5121_v22, %v4953_v63  ;;  %v17158_v63 = vld [vmem:[#allocation240_spill] sm:$0xff] }
 0x75a   : > { %v4786_v50 = vadd.f32 %v4785_v51, %v4617_v9 }
 0x75e   : > { %v4954_v46 = vpop.f32.mrf.mxu2 }
 0x75f   : > { %v4955_v57 = vadd.f32 %v4954_v46, %v4786_v50  ;;  %v4619_v43 = vpop.f32.mrf.mxu0  ;;  %v5123_v37 = vpop.f32.mrf.mxu3 }
 0x760   : > { %v4620_v34 = vadd.f32 %v4619_v43, %v12962_v6  ;;  %v4788_v11 = vpop.f32.mrf.mxu1 }
 0x761   : > { %v13291_v32 = vadd.f32 %v5123_v37, %v4955_v57 }
 0x762   : > { %v4789_v1 = vadd.f32 %v4788_v11, %v4620_v34  ;;  %4658 = vmatmul.bf16.gmra.mxu0 %v12450_v25 }
 0x763   : > { %4827 = vmatmul.bf16.gmra.mxu1 %v12452_v48  ;;  %4996 = vmatmul.bf16.gmra.mxu2 %v17156_v44 }
 0x764   : > { %5165 = vmatmul.bf16.gmra.mxu3 %v17157_v20  ;;  %v17160_v20 = vld [vmem:[#allocation244_spill] sm:$0xff] }
 0x766   : > { %v4957_v60 = vpop.f32.mrf.mxu2 }
 0x767   : > { %v4958_v2 = vadd.f32 %v4957_v60, %v4789_v1  ;;  %v4621_v30 = vpop.f32.mrf.mxu0  ;;  %v5126_v13 = vpop.f32.mrf.mxu3 }
 0x768   : > { %v4622_v15 = vadd.f32 %v4621_v30, %v12964_v47  ;;  %v4790_v29 = vpop.f32.mrf.mxu1  ;;  %v17159_v47 = vld [vmem:[#allocation241_spill] sm:$0xff] }
 0x769   : > { %v13298_v6 = vadd.f32 %v5126_v13, %v4958_v2 }
 0x76a   : > { %v4791_v38 = vadd.f32 %v4790_v29, %v4622_v15 }
 0x76e   : > { %v4959_v4 = vpop.f32.mrf.mxu2 }
 0x76f   : > { %v4960_v21 = vadd.f32 %v4959_v4, %v4791_v38  ;;  %v4624_v0 = vpop.f32.mrf.mxu0  ;;  %v5128_v25 = vpop.f32.mrf.mxu3 }
 0x770   : > { %v4625_v48 = vadd.f32 %v4624_v0, %v12970_v19  ;;  %v4793_v16 = vpop.f32.mrf.mxu1 }
 0x771   : > { %v13301_v40 = vadd.f32 %v5128_v25, %v4960_v21 }
 0x772   : > { %v4794_v55 = vadd.f32 %v4793_v16, %v4625_v48  ;;  %4663 = vmatmul.bf16.gmra.mxu0 %v12468_v10 }
 0x773   : > { %4832 = vmatmul.bf16.gmra.mxu1 %v12470_v62  ;;  %5001 = vmatmul.bf16.gmra.mxu2 %v17158_v63 }
 0x774   : > { %5170 = vmatmul.bf16.gmra.mxu3 %v17159_v47 }
 0x776   : > { %v4962_v35 = vpop.f32.mrf.mxu2 }
 0x777   : > { %v4963_v22 = vadd.f32 %v4962_v35, %v4794_v55  ;;  %v4626_v9 = vpop.f32.mrf.mxu0  ;;  %v5131_v51 = vpop.f32.mrf.mxu3  ;;  %v17162_v55 = vld [vmem:[#allocation248_spill] sm:$0xff] }
 0x778   : > { %v4627_v50 = vadd.f32 %v4626_v9, %v12972_v28  ;;  %v4795_v46 = vpop.f32.mrf.mxu1  ;;  %v17161_v28 = vld [vmem:[#allocation245_spill] sm:$0xff] }
 0x779   : > { %v13308_v19 = vadd.f32 %v5131_v51, %v4963_v22 }
 0x77a   : > { %v4796_v57 = vadd.f32 %v4795_v46, %v4627_v50 }
 0x77e   : > { %v4964_v43 = vpop.f32.mrf.mxu2 }
 0x77f   : > { %v4965_v37 = vadd.f32 %v4964_v43, %v4796_v57  ;;  %v4629_v34 = vpop.f32.mrf.mxu0  ;;  %v5133_v10 = vpop.f32.mrf.mxu3 }
 0x780   : > { %v4630_v62 = vadd.f32 %v4629_v34, %v12978_v26  ;;  %v4798_v11 = vpop.f32.mrf.mxu1 }
 0x781   : > { %v13311_v1 = vadd.f32 %v5133_v10, %v4965_v37 }
 0x782   : > { %v4799_v44 = vadd.f32 %v4798_v11, %v4630_v62  ;;  %4668 = vmatmul.bf16.gmra.mxu0 %v12486_v56  ;;  %v17164_v62 = vld [vmem:[#allocation252_spill] sm:$0xff]  ;;  %v17165_v11 = vld [vmem:[#allocation253_spill] sm:$0xff] }
 0x783   : > { %4837 = vmatmul.bf16.gmra.mxu1 %v12488_v17  ;;  %5006 = vmatmul.bf16.gmra.mxu2 %v17160_v20 }
 0x784   : > { %5175 = vmatmul.bf16.gmra.mxu3 %v17161_v28 }
 0x786   : > { %v4967_v60 = vpop.f32.mrf.mxu2 }
 0x787   : > { %v4968_v2 = vadd.f32 %v4967_v60, %v4799_v44  ;;  %v4631_v30 = vpop.f32.mrf.mxu0  ;;  %v5136_v13 = vpop.f32.mrf.mxu3  ;;  %v17166_v44 = vld [vmem:[#allocation254_spill] sm:$0xff] }
 0x788   : > { %v4632_v15 = vadd.f32 %v4631_v30, %v12980_v33  ;;  %v4800_v29 = vpop.f32.mrf.mxu1  ;;  %v17163_v33 = vld [vmem:[#allocation249_spill] sm:$0xff] }
 0x789   : > { %v13318_v26 = vadd.f32 %v5136_v13, %v4968_v2  ;;  %v17168_v30 = vld [vmem:[#allocation41_spill] sm:$0xff] }
 0x78a   : > { %v4801_v38 = vadd.f32 %v4800_v29, %v4632_v15 }
 0x78e   : > { %v4969_v4 = vpop.f32.mrf.mxu2 }
 0x78f   : > { %v4970_v21 = vadd.f32 %v4969_v4, %v4801_v38  ;;  %v4634_v0 = vpop.f32.mrf.mxu0  ;;  %v5138_v56 = vpop.f32.mrf.mxu3 }
 0x790   : > { %v4635_v17 = vadd.f32 %v4634_v0, %v12986_v18  ;;  %v4803_v25 = vpop.f32.mrf.mxu1 }
 0x791   : > { %v13321_v48 = vadd.f32 %v5138_v56, %v4970_v21  ;;  %v17169_v56 = vld [vmem:[#allocation42_spill] sm:$0xff] }
 0x792   : > { %v4804_v16 = vadd.f32 %v4803_v25, %v4635_v17  ;;  %4673 = vmatmul.bf16.gmra.mxu0 %v12504_v39 }
 0x793   : > { %4842 = vmatmul.bf16.gmra.mxu1 %v12506_v45  ;;  %5011 = vmatmul.bf16.gmra.mxu2 %v17162_v55 }
 0x794   : > { %5180 = vmatmul.bf16.gmra.mxu3 %v17163_v33  ;;  %v17170_v33 = vld [vmem:[#allocation258_spill] sm:$0xff] }
 0x796   : > { %v4972_v63 = vpop.f32.mrf.mxu2 }
 0x797   : > { %v4973_v47 = vadd.f32 %v4972_v63, %v4804_v16  ;;  %v4636_v35 = vpop.f32.mrf.mxu0  ;;  %v5141_v22 = vpop.f32.mrf.mxu3  ;;  %v17171_v63 = vld [vmem:[#allocation259_spill] sm:$0xff] }
 0x798   : > { %v4637_v9 = vadd.f32 %v4636_v35, %v12988_v12  ;;  %v4805_v51 = vpop.f32.mrf.mxu1  ;;  %v17167_v12 = vld [vmem:[#allocation255_spill] sm:$0xff]  ;;  %v17173_v35 = vld [vmem:[#allocation261_spill] sm:$0xff] }
 0x799   : > { %v13328_v18 = vadd.f32 %v5141_v22, %v4973_v47  ;;  %v17172_v47 = vld [vmem:[#allocation260_spill] sm:$0xff] }
 0x79a   : > { %v4806_v50 = vadd.f32 %v4805_v51, %v4637_v9 }
 0x79e   : > { %v4974_v46 = vpop.f32.mrf.mxu2 }
 0x79f   : > { %v4975_v57 = vadd.f32 %v4974_v46, %v4806_v50  ;;  %v4639_v43 = vpop.f32.mrf.mxu0  ;;  %v5143_v39 = vpop.f32.mrf.mxu3  ;;  %v17174_v46 = vld [vmem:[#allocation187_spill] sm:$0xff] }
 0x7a0   : > { %v4640_v45 = vadd.f32 %v4639_v43, %v12994_v14  ;;  %v4808_v37 = vpop.f32.mrf.mxu1 }
 0x7a1   : > { %v13331_v34 = vadd.f32 %v5143_v39, %v4975_v57 }
 0x7a2   : > { %v4809_v10 = vadd.f32 %v4808_v37, %v4640_v45  ;;  %4678 = vmatmul.bf16.gmra.mxu0 %v17164_v62 }
 0x7a3   : > { %4847 = vmatmul.bf16.gmra.mxu1 %v17165_v11  ;;  %5016 = vmatmul.bf16.gmra.mxu2 %v17166_v44  ;;  %v17175_v44 = vld [vmem:[#allocation188_spill] sm:$0xff] }
 0x7a4   : > { %5185 = vmatmul.bf16.gmra.mxu3 %v17167_v12 }
 0x7a6   : > { %v4977_v20 = vpop.f32.mrf.mxu2 }
 0x7a7   : > { %v4978_v28 = vadd.f32 %v4977_v20, %v4809_v10  ;;  %v4641_v60 = vpop.f32.mrf.mxu0  ;;  %v5146_v2 = vpop.f32.mrf.mxu3 }
 0x7a8   : > { %v4642_v13 = vadd.f32 %v4641_v60, %v17168_v30  ;;  %v4810_v15 = vpop.f32.mrf.mxu1  ;;  %v17177_v30 = vld [vmem:[#allocation265_spill] sm:$0xff] }
 0x7a9   : > { %v13338_v14 = vadd.f32 %v5146_v2, %v4978_v28  ;;  %v17176_v2 = vld [vmem:[#allocation264_spill] sm:$0xff] }
 0x7aa   : > { %v4811_v29 = vadd.f32 %v4810_v15, %v4642_v13  ;;  %v17178_v13 = vld [vmem:[#allocation266_spill] sm:$0xff]  ;;  %v17179_v15 = vld [vmem:[#allocation267_spill] sm:$0xff] }
 0x7ae   : > { %v4979_v38 = vpop.f32.mrf.mxu2 }
 0x7af   : > { %v4980_v4 = vadd.f32 %v4979_v38, %v4811_v29  ;;  %v4644_v21 = vpop.f32.mrf.mxu0  ;;  %v5148_v0 = vpop.f32.mrf.mxu3 }
 0x7b0   : > { %v4645_v17 = vadd.f32 %v4644_v21, %v17169_v56  ;;  %v4813_v25 = vpop.f32.mrf.mxu1 }
 0x7b1   : > { %v13341_v16 = vadd.f32 %v5148_v0, %v4980_v4  ;;  %v17180_v0 = vld [vmem:[#allocation43_spill] sm:$0xff] }
 0x7b2   : > { %v4814_v55 = vadd.f32 %v4813_v25, %v4645_v17  ;;  %4683 = vmatmul.bf16.gmra.mxu0 %v17170_v33 }
 0x7b3   : > { %4852 = vmatmul.bf16.gmra.mxu1 %v17171_v63  ;;  %5021 = vmatmul.bf16.gmra.mxu2 %v17172_v47 }
 0x7b4   : > { %5190 = vmatmul.bf16.gmra.mxu3 %v17173_v35 }
 0x7b6   : > { %v4982_v22 = vpop.f32.mrf.mxu2 }
 0x7b7   : > { %v4983_v9 = vadd.f32 %v4982_v22, %v4814_v55  ;;  %v4646_v51 = vpop.f32.mrf.mxu0  ;;  %v5151_v50 = vpop.f32.mrf.mxu3  ;;  %v17182_v22 = vld [vmem:[#allocation44_spill] sm:$0xff] }
 0x7b8   : > { %v4647_v57 = vadd.f32 %v4646_v51, %v17174_v46  ;;  %v4815_v43 = vpop.f32.mrf.mxu1 }
 0x7b9   : > { %v13348_v39 = vadd.f32 %v5151_v50, %v4983_v9 }
 0x7ba   : > { %v4816_v45 = vadd.f32 %v4815_v43, %v4647_v57  ;;  %v17184_v57 = vld [vmem:[#allocation270_spill] sm:$0xff]  ;;  %v17185_v43 = vld [vmem:[#allocation271_spill] sm:$0xff] }
 0x7be   : > { %v4984_v37 = vpop.f32.mrf.mxu2 }
 0x7bf   : > { %v4985_v10 = vadd.f32 %v4984_v37, %v4816_v45  ;;  %v4649_v62 = vpop.f32.mrf.mxu0  ;;  %v5153_v11 = vpop.f32.mrf.mxu3  ;;  %v17186_v45 = vld [vmem:[#allocation272_spill] sm:$0xff]  ;;  %v17187_v37 = vld [vmem:[#allocation273_spill] sm:$0xff] }
 0x7c0   : > { %v4650_v12 = vadd.f32 %v4649_v62, %v17175_v44  ;;  %v4818_v20 = vpop.f32.mrf.mxu1 }
 0x7c1   : > { %v13351_v28 = vadd.f32 %v5153_v11, %v4985_v10 }
 0x7c2   : > { %v4819_v60 = vadd.f32 %v4818_v20, %v4650_v12  ;;  %4688 = vmatmul.bf16.gmra.mxu0 %v17176_v2  ;;  %v17188_v12 = vld [vmem:[#allocation45_spill] sm:$0xff] }
 0x7c3   : > { %4857 = vmatmul.bf16.gmra.mxu1 %v17177_v30  ;;  %5026 = vmatmul.bf16.gmra.mxu2 %v17178_v13 }
 0x7c4   : > { %5195 = vmatmul.bf16.gmra.mxu3 %v17179_v15 }
 0x7c6   : > { %v4987_v29 = vpop.f32.mrf.mxu2 }
 0x7c7   : > { %v4988_v38 = vadd.f32 %v4987_v29, %v4819_v60  ;;  %v4651_v4 = vpop.f32.mrf.mxu0  ;;  %v5156_v21 = vpop.f32.mrf.mxu3 }
 0x7c8   : > { %v4652_v56 = vadd.f32 %v4651_v4, %v17180_v0  ;;  %v4820_v17 = vpop.f32.mrf.mxu1  ;;  %v17190_v4 = vld [vmem:[#allocation46_spill] sm:$0xff] }
 0x7c9   : > { %v13358_v25 = vadd.f32 %v5156_v21, %v4988_v38 }
 0x7ca   : > { %v4821_v55 = vadd.f32 %v4820_v17, %v4652_v56 }
 0x7cb   : > { %17181 = vst [vmem:[#allocation69_spill] sm:$0xff] %v13358_v25 }
 0x7ce   : > { %v4989_v33 = vpop.f32.mrf.mxu2 }
 0x7cf   : > { %v4990_v63 = vadd.f32 %v4989_v33, %v4821_v55  ;;  %v4654_v47 = vpop.f32.mrf.mxu0  ;;  %v5158_v35 = vpop.f32.mrf.mxu3  ;;  %v17192_v55 = vld [vmem:[#allocation276_spill] sm:$0xff]  ;;  %v17193_v33 = vld [vmem:[#allocation277_spill] sm:$0xff] }
 0x7d0   : > { %v4655_v9 = vadd.f32 %v4654_v47, %v17182_v22  ;;  %v4823_v51 = vpop.f32.mrf.mxu1  ;;  %v17195_v47 = vld [vmem:[#allocation279_spill] sm:$0xff] }
 0x7d1   : > { %v13361_v50 = vadd.f32 %v5158_v35, %v4990_v63  ;;  %v17194_v63 = vld [vmem:[#allocation278_spill] sm:$0xff] }
 0x7d2   : > { %v4824_v46 = vadd.f32 %v4823_v51, %v4655_v9  ;;  %4693 = vmatmul.bf16.gmra.mxu0 %v17184_v57 }
 0x7d3   : > { %17183 = vst [vmem:[#allocation70_spill] sm:$0xff] %v13361_v50  ;;  %4862 = vmatmul.bf16.gmra.mxu1 %v17185_v43  ;;  %5031 = vmatmul.bf16.gmra.mxu2 %v17186_v45 }
 0x7d4   : > { %5200 = vmatmul.bf16.gmra.mxu3 %v17187_v37 }
 0x7d6   : > { %v4992_v10 = vpop.f32.mrf.mxu2 }
 0x7d7   : > { %v4993_v62 = vadd.f32 %v4992_v10, %v4824_v46  ;;  %v4656_v11 = vpop.f32.mrf.mxu0  ;;  %v5161_v44 = vpop.f32.mrf.mxu3  ;;  %v17196_v46 = vld [vmem:[#allocation193_spill] sm:$0xff] }
 0x7d8   : > { %v4657_v20 = vadd.f32 %v4656_v11, %v17188_v12  ;;  %v4825_v60 = vpop.f32.mrf.mxu1  ;;  %v17198_v12 = vld [vmem:[#allocation194_spill] sm:$0xff] }
 0x7d9   : > { %v13368_v2 = vadd.f32 %v5161_v44, %v4993_v62 }
 0x7da   : > { %v4826_v30 = vadd.f32 %v4825_v60, %v4657_v20 }
 0x7db   : > { %17189 = vst [vmem:[#allocation71_spill] sm:$0xff] %v13368_v2 }
 0x7de   : > { %v4994_v13 = vpop.f32.mrf.mxu2 }
 0x7df   : > { %v4995_v15 = vadd.f32 %v4994_v13, %v4826_v30  ;;  %v4659_v29 = vpop.f32.mrf.mxu0  ;;  %v5163_v38 = vpop.f32.mrf.mxu3 }
 0x7e0   : > { %v4660_v21 = vadd.f32 %v4659_v29, %v17190_v4  ;;  %v4828_v0 = vpop.f32.mrf.mxu1  ;;  %v17201_v29 = vld [vmem:[#allocation283_spill] sm:$0xff]  ;;  %v17203_v4 = vld [vmem:[#allocation285_spill] sm:$0xff] }
 0x7e1   : > { %v13371_v56 = vadd.f32 %v5163_v38, %v4995_v15  ;;  %v17200_v15 = vld [vmem:[#allocation282_spill] sm:$0xff]  ;;  %v17202_v38 = vld [vmem:[#allocation284_spill] sm:$0xff] }
 0x7e2   : > { %v4829_v17 = vadd.f32 %v4828_v0, %v4660_v21  ;;  %4698 = vmatmul.bf16.gmra.mxu0 %v17192_v55 }
 0x7e3   : > { %17191 = vst [vmem:[#allocation72_spill] sm:$0xff] %v13371_v56  ;;  %4867 = vmatmul.bf16.gmra.mxu1 %v17193_v33  ;;  %5036 = vmatmul.bf16.gmra.mxu2 %v17194_v63  ;;  %v17204_v33 = vld [vmem:[#allocation47_spill] sm:$0xff] }
 0x7e4   : > { %5205 = vmatmul.bf16.gmra.mxu3 %v17195_v47 }
 0x7e6   : > { %v4997_v35 = vpop.f32.mrf.mxu2 }
 0x7e7   : > { %v4998_v22 = vadd.f32 %v4997_v35, %v4829_v17  ;;  %v4661_v9 = vpop.f32.mrf.mxu0  ;;  %v5166_v51 = vpop.f32.mrf.mxu3 }
 0x7e8   : > { %v4662_v57 = vadd.f32 %v4661_v9, %v17196_v46  ;;  %v4830_v43 = vpop.f32.mrf.mxu1  ;;  %v11367_v9 = vmov 0   ;;  %v5860_v46 = vld [vmem:[%s16229_s4 + $0x70] sm:$0xff] }
 0x7e9   : > { %v13378_v45 = vadd.f32 %v5166_v51, %v4998_v22  ;;  %10627 = vset.pattern.permute.xlu1 %v11367_v9  ;;  %v5876_v51 = vld [vmem:[%s16229_s4 + $0xf0] sm:$0xff]  ;;  %10626 = vset.pattern.permute.xlu0 %v11367_v9 }
 0x7ea   : > { %v4831_v37 = vadd.f32 %v4830_v43, %v4662_v57  ;;  %6062 = vperm.xlu1 %10627, %v5876_v51   ;;  %5982 = vperm.xlu0 %10626, %v5860_v46   ;;  %v5875_v51 = vld [vmem:[%s16229_s4 + $0xe8] sm:$0xff]  ;;  %v5874_v46 = vld [vmem:[%s16229_s4 + $0xe0] sm:$0xff] }
 0x7eb   : > { %17197 = vst [vmem:[#allocation73_spill] sm:$0xff] %v13378_v45  ;;  %10628 = vset.pattern.permute.xlu2 %v11367_v9 }
 0x7ee   : > { %v4999_v10 = vpop.f32.mrf.mxu2 }
 0x7ef   : > { %v5000_v62 = vadd.f32 %v4999_v10, %v4831_v37  ;;  %v4664_v11 = vpop.f32.mrf.mxu0  ;;  %v5168_v44 = vpop.f32.mrf.mxu3 }
 0x7f0   : > { %v4665_v20 = vadd.f32 %v4664_v11, %v17198_v12  ;;  %v4833_v60 = vpop.f32.mrf.mxu1 }
 0x7f1   : > { %v13381_v30 = vadd.f32 %v5168_v44, %v5000_v62  ;;  %v17206_v62 = vld [vmem:[#allocation48_spill] sm:$0xff] }
 0x7f2   : > { %v4834_v13 = vadd.f32 %v4833_v60, %v4665_v20  ;;  %4703 = vmatmul.bf16.gmra.mxu0 %v17200_v15  ;;  %v17208_v60 = vld [vmem:[#allocation287_spill] sm:$0xff]  ;;  %v17210_v15 = vld [vmem:[#allocation289_spill] sm:$0xff] }
 0x7f3   : > { %17199 = vst [vmem:[#allocation74_spill] sm:$0xff] %v13381_v30  ;;  %4872 = vmatmul.bf16.gmra.mxu1 %v17201_v29  ;;  %5041 = vmatmul.bf16.gmra.mxu2 %v17202_v38  ;;  %v5877_v29 = vld [vmem:[%s16229_s4 + $0xf8] sm:$0xff] }
 0x7f4   : > { %5210 = vmatmul.bf16.gmra.mxu3 %v17203_v4  ;;  %v5861_v38 = vld [vmem:[%s16229_s4 + $0x78] sm:$0xff]  ;;  %6067 = vperm.xlu1 %10627, %v5877_v29   ;;  %v17218_v29 = vld [vmem:[#allocation293_spill] sm:$0xff] }
 0x7f5   : > { %v17211_v4 = vld [vmem:[#allocation132_spill] sm:$0xff]  ;;  %5987 = vperm.xlu0 %10626, %v5861_v38   ;;  %v5872_v38 = vld [vmem:[%s16229_s4 + $0xd0] sm:$0xff] }
 0x7f6   : > { %v5002_v21 = vpop.f32.mrf.mxu2 }
 0x7f7   : > { %v5003_v0 = vadd.f32 %v5002_v21, %v4834_v13  ;;  %v4666_v17 = vpop.f32.mrf.mxu0  ;;  %v5171_v55 = vpop.f32.mrf.mxu3  ;;  %v17209_v13 = vld [vmem:[#allocation288_spill] sm:$0xff] }
 0x7f8   : > { %v4667_v63 = vadd.f32 %v4666_v17, %v17204_v33  ;;  %v4835_v47 = vpop.f32.mrf.mxu1  ;;  %v17212_v33 = vld [vmem:[#allocation49_spill] sm:$0xff] }
 0x7f9   : > { %v13388_v35 = vadd.f32 %v5171_v55, %v5003_v0 }
 0x7fa   : > { %v4836_v22 = vadd.f32 %v4835_v47, %v4667_v63 }
 0x7fb   : > { %17205 = vst [vmem:[#allocation75_spill] sm:$0xff] %v13388_v35  ;;  %v6643_v35 = vld [vmem:[%s16231_s6 + $0xe8] sm:$0xff] }
 0x7fc   : > { %6057 = vperm.xlu1 %10627, %v5875_v51  }
 0x7fd   : > { %6052 = vperm.xlu0 %10626, %v5874_v46  }
 0x7fe   : > { %v5004_v57 = vpop.f32.mrf.mxu2 }
 0x7ff   : > { %v5005_v43 = vadd.f32 %v5004_v57, %v4836_v22  ;;  %v4669_v37 = vpop.f32.mrf.mxu0  ;;  %v5173_v10 = vpop.f32.mrf.mxu3 }
 0x800   : > { %v4670_v11 = vadd.f32 %v4669_v37, %v17206_v62  ;;  %v4838_v44 = vpop.f32.mrf.mxu1  ;;  %v17214_v62 = vld [vmem:[#allocation50_spill] sm:$0xff] }
 0x801   : > { %v13397_v12 = vadd.f32 %v5173_v10, %v5005_v43 }
 0x802   : > { %v4839_v20 = vadd.f32 %v4838_v44, %v4670_v11  ;;  %4708 = vmatmul.bf16.gmra.mxu0 %v17208_v60 }
 0x803   : > { %17207 = vst [vmem:[#allocation76_spill] sm:$0xff] %v13397_v12  ;;  %4877 = vmatmul.bf16.gmra.mxu1 %v17209_v13  ;;  %5046 = vmatmul.bf16.gmra.mxu2 %v17210_v15  ;;  %v17216_v13 = vld [vmem:[#allocation291_spill] sm:$0xff]  ;;  %v17217_v15 = vld [vmem:[#allocation292_spill] sm:$0xff] }
 0x804   : > { %5215 = vmatmul.bf16.gmra.mxu3 %v17211_v4  ;;  %v5857_v4 = vld [vmem:[%s16229_s4 + $0x58] sm:$0xff]  ;;  %6042 = vperm.xlu1 %10627, %v5872_v38  }
 0x805   : > { %5967 = vperm.xlu0 %10626, %v5857_v4   ;;  %v17224_v4 = vld [vmem:[#allocation295_spill] sm:$0xff] }
 0x806   : > { %v5007_v21 = vpop.f32.mrf.mxu2 }
 0x807   : > { %v5008_v0 = vadd.f32 %v5007_v21, %v4839_v20  ;;  %v4671_v17 = vpop.f32.mrf.mxu0  ;;  %v5176_v55 = vpop.f32.mrf.mxu3  ;;  %v17219_v21 = vld [vmem:[#allocation138_spill] sm:$0xff] }
 0x808   : > { %v4672_v63 = vadd.f32 %v4671_v17, %v17212_v33  ;;  %v4840_v47 = vpop.f32.mrf.mxu1 }
 0x809   : > { %v13410_v22 = vadd.f32 %v5176_v55, %v5008_v0 }
 0x80a   : > { %v4841_v9 = vadd.f32 %v4840_v47, %v4672_v63  ;;  %v17220_v63 = vld [vmem:[#allocation199_spill] sm:$0xff] }
 0x80b   : > { %17213 = vst [vmem:[#allocation77_spill] sm:$0xff] %v13410_v22 }
 0x80e   : > { %v5009_v57 = vpop.f32.mrf.mxu2 }
 0x80f   : > { %v5010_v43 = vadd.f32 %v5009_v57, %v4841_v9  ;;  %v4674_v37 = vpop.f32.mrf.mxu0  ;;  %v5178_v10 = vpop.f32.mrf.mxu3  ;;  %v5855_v57 = vld [vmem:[%s16229_s4 + $0x48] sm:$0xff] }
 0x810   : > { %v4675_v11 = vadd.f32 %v4674_v37, %v17214_v62  ;;  %v4843_v44 = vpop.f32.mrf.mxu1  ;;  %5957 = vperm.xlu1 %10627, %v5855_v57   ;;  %v17228_v57 = vld [vmem:[#allocation51_spill] sm:$0xff] }
 0x811   : > { %v13419_v20 = vadd.f32 %v5178_v10, %v5010_v43  ;;  %v5854_v43 = vld [vmem:[%s16229_s4 + $0x40] sm:$0xff] }
 0x812   : > { %v4844_v60 = vadd.f32 %v4843_v44, %v4675_v11  ;;  %4713 = vmatmul.bf16.gmra.mxu0 %v17216_v13  ;;  %5952 = vperm.xlu0 %10626, %v5854_v43   ;;  %v17222_v44 = vld [vmem:[#allocation200_spill] sm:$0xff] }
 0x813   : > { %17215 = vst [vmem:[#allocation78_spill] sm:$0xff] %v13419_v20  ;;  %4882 = vmatmul.bf16.gmra.mxu1 %v17217_v15  ;;  %5051 = vmatmul.bf16.gmra.mxu2 %v17218_v29  ;;  %v5858_v29 = vld [vmem:[%s16229_s4 + $0x60] sm:$0xff] }
 0x814   : > { %5220 = vmatmul.bf16.gmra.mxu3 %v17219_v21  ;;  %5972 = vperm.xlu2 %10628, %v5858_v29   ;;  %v17225_v21 = vld [vmem:[#allocation296_spill] sm:$0xff] }
 0x815   : > { %v17311_v20 = vld [vmem:[#allocation68_spill] sm:$0xff] }
 0x816   : > { %v5012_v0 = vpop.f32.mrf.mxu2 }
 0x817   : > { %v5013_v17 = vadd.f32 %v5012_v0, %v4844_v60  ;;  %v4676_v55 = vpop.f32.mrf.mxu0  ;;  %v5181_v33 = vpop.f32.mrf.mxu3  ;;  %v17226_v0 = vld [vmem:[#allocation297_spill] sm:$0xff] }
 0x818   : > { %v4677_v47 = vadd.f32 %v4676_v55, %v17220_v63  ;;  %v4845_v9 = vpop.f32.mrf.mxu1  ;;  %v5871_v55 = vld [vmem:[%s16229_s4 + $0xc8] sm:$0xff] }
 0x819   : > { %v13432_v51 = vadd.f32 %v5181_v33, %v5013_v17  ;;  %v5852_v17 = vld [vmem:[%s16229_s4 + $0x30] sm:$0xff]  ;;  %v17227_v33 = vld [vmem:[#allocation144_spill] sm:$0xff] }
 0x81a   : > { %v4846_v46 = vadd.f32 %v4845_v9, %v4677_v47  ;;  %5942 = vperm.xlu1 %10627, %v5852_v17   ;;  %6037 = vperm.xlu0 %10626, %v5871_v55  }
 0x81b   : > { %17221 = vst [vmem:[#allocation79_spill] sm:$0xff] %v13432_v51  ;;  %v6629_v51 = vld [vmem:[%s16231_s6 + $0x78] sm:$0xff] }
 0x81e   : > { %v5014_v37 = vpop.f32.mrf.mxu2 }
 0x81f   : > { %v5015_v10 = vadd.f32 %v5014_v37, %v4846_v46  ;;  %v4679_v62 = vpop.f32.mrf.mxu0  ;;  %v5183_v11 = vpop.f32.mrf.mxu3 }
 0x820   : > { %v4680_v60 = vadd.f32 %v4679_v62, %v17222_v44  ;;  %v4848_v13 = vpop.f32.mrf.mxu1  ;;  %v5859_v62 = vld [vmem:[%s16229_s4 + $0x68] sm:$0xff]  ;;  %v5869_v44 = vld [vmem:[%s16229_s4 + $0xb8] sm:$0xff] }
 0x821   : > { %v13441_v15 = vadd.f32 %v5183_v11, %v5015_v10  ;;  %5977 = vperm.xlu2 %10628, %v5859_v62   ;;  %v17235_v62 = vld [vmem:[#allocation150_spill] sm:$0xff] }
 0x822   : > { %v4849_v38 = vadd.f32 %v4848_v13, %v4680_v60  ;;  %4718 = vmatmul.bf16.gmra.mxu0 %v17224_v4  ;;  %v5868_v60 = vld [vmem:[%s16229_s4 + $0xb0] sm:$0xff]  ;;  %6027 = vperm.xlu1 %10627, %v5869_v44   ;;  %v5851_v44 = vld [vmem:[%s16229_s4 + $0x28] sm:$0xff] }
 0x823   : > { %17223 = vst [vmem:[#allocation80_spill] sm:$0xff] %v13441_v15  ;;  %4887 = vmatmul.bf16.gmra.mxu1 %v17225_v21  ;;  %5056 = vmatmul.bf16.gmra.mxu2 %v17226_v0  ;;  %v17230_v21 = vld [vmem:[#allocation52_spill] sm:$0xff] }
 0x824   : > { %5225 = vmatmul.bf16.gmra.mxu3 %v17227_v33  ;;  %6022 = vperm.xlu0 %10626, %v5868_v60   ;;  %v5856_v33 = vld [vmem:[%s16229_s4 + $0x50] sm:$0xff] }
 0x826   : > { %v5017_v63 = vpop.f32.mrf.mxu2 }
 0x827   : > { %v5018_v47 = vadd.f32 %v5017_v63, %v4849_v38  ;;  %v4681_v9 = vpop.f32.mrf.mxu0  ;;  %v5186_v46 = vpop.f32.mrf.mxu3 }
 0x828   : > { %v4682_v43 = vadd.f32 %v4681_v9, %v17228_v57  ;;  %v4850_v37 = vpop.f32.mrf.mxu1  ;;  %v17233_v9 = vld [vmem:[#allocation300_spill] sm:$0xff] }
 0x829   : > { %v13457_v10 = vadd.f32 %v5186_v46, %v5018_v47  ;;  %v17232_v47 = vld [vmem:[#allocation299_spill] sm:$0xff]  ;;  %5962 = vperm.xlu2 %10628, %v5856_v33   ;;  %v17234_v46 = vld [vmem:[#allocation301_spill] sm:$0xff] }
 0x82a   : > { %v4851_v11 = vadd.f32 %v4850_v37, %v4682_v43  ;;  %v551_v57 = vld [vmem:[%s11564_s11 + $0x60] sm:$0xff]  ;;  %v553_v43 = vld [vmem:[%s11564_s11 + $0x70] sm:$0xff]  ;;  %v5873_v33 = vld [vmem:[%s16229_s4 + $0xd8] sm:$0xff] }
 0x82b   : > { %17229 = vst [vmem:[#allocation81_spill] sm:$0xff] %v13457_v10  ;;  %v5866_v37 = vld [vmem:[%s16229_s4 + $0xa0] sm:$0xff] }
 0x82c   : > { %6012 = vperm.xlu1 %10627, %v5866_v37   ;;  %5937 = vperm.xlu0 %10626, %v5851_v44   ;;  %v17241_v37 = vld [vmem:[#allocation54_spill] sm:$0xff] }
 0x82d   : > { %v552_v44 = vld [vmem:[%s11564_s11 + $0x68] sm:$0xff] }
 0x82e   : > { %v5019_v13 = vpop.f32.mrf.mxu2 }
 0x82f   : > { %v5020_v29 = vadd.f32 %v5019_v13, %v4851_v11  ;;  %v4684_v38 = vpop.f32.mrf.mxu0  ;;  %v5188_v4 = vpop.f32.mrf.mxu3  ;;  %v561_v11 = vpack.c.bf16 %v553_v43, %v551_v57 }
 0x830   : > { %v4685_v0 = vadd.f32 %v4684_v38, %v17230_v21  ;;  %v4853_v17 = vpop.f32.mrf.mxu1 }
 0x831   : > { %v13469_v55 = vadd.f32 %v5188_v4, %v5020_v29  ;;  %5512 = vmatpush.bf16.msra.mxu0 %v561_v11  ;;  %v17236_v4 = vld [vmem:[#allocation53_spill] sm:$0xff]  ;;  %6047 = vperm.xlu2 %10628, %v5873_v33  }
 0x832   : > { %v4854_v63 = vadd.f32 %v4853_v17, %v4685_v0  ;;  %4723 = vmatmul.bf16.gmra.mxu0 %v17232_v47  ;;  %v5846_v33 = vld [vmem:[%s16229_s4] sm:$0xff] }
 0x833   : > { %17231 = vst [vmem:[#allocation82_spill] sm:$0xff] %v13469_v55  ;;  %4892 = vmatmul.bf16.gmra.mxu1 %v17233_v9  ;;  %5061 = vmatmul.bf16.gmra.mxu2 %v17234_v46  ;;  %v5848_v9 = vld [vmem:[%s16229_s4 + $0x10] sm:$0xff] }
 0x834   : > { %5230 = vmatmul.bf16.gmra.mxu3 %v17235_v62  ;;  %5922 = vperm.xlu0 %10626, %v5848_v9   ;;  %v17245_v9 = vld [vmem:[#allocation156_spill] sm:$0xff] }
 0x836   : > { %v5022_v60 = vpop.f32.mrf.mxu2 }
 0x837   : > { %v5023_v13 = vadd.f32 %v5022_v60, %v4854_v63  ;;  %v4686_v29 = vpop.f32.mrf.mxu0  ;;  %v5191_v38 = vpop.f32.mrf.mxu3  ;;  %v5849_v63 = vld [vmem:[%s16229_s4 + $0x18] sm:$0xff] }
 0x838   : > { %v4687_v21 = vadd.f32 %v4686_v29, %v17236_v4  ;;  %v4855_v0 = vpop.f32.mrf.mxu1  ;;  %5927 = vperm.xlu1 %10627, %v5849_v63   ;;  %v554_v60 = vld [vmem:[%s11564_s11 + $0x78] sm:$0xff] }
 0x839   : > { %v13487_v17 = vadd.f32 %v5191_v38, %v5023_v13  ;;  %v5870_v13 = vld [vmem:[%s16229_s4 + $0xc0] sm:$0xff]  ;;  %v17242_v38 = vld [vmem:[#allocation303_spill] sm:$0xff]  ;;  %v562_v4 = vpack.c.bf16 %v554_v60, %v552_v44 }
 0x83a   : > { %v13492_v47 = vadd.f32 %v4855_v0, %v4687_v21  ;;  %6032 = vperm.xlu2 %10628, %v5870_v13   ;;  %v17243_v21 = vld [vmem:[#allocation304_spill] sm:$0xff]  ;;  %v17244_v0 = vld [vmem:[#allocation305_spill] sm:$0xff] }
 0x83b   : > { %17237 = vst [vmem:[#allocation83_spill] sm:$0xff] %v13487_v17  ;;  %v5865_v63 = vld [vmem:[%s16229_s4 + $0x98] sm:$0xff]  ;;  %5681 = vmatpush.bf16.msra.mxu1 %v562_v4 }
 0x83c   : > { %17238 = vst [vmem:[#allocation84_spill] sm:$0xff] %v13492_v47  ;;  %6007 = vperm.xlu0 %10626, %v5865_v63   ;;  %v550_v60 = vld [vmem:[%s11564_s11 + $0x58] sm:$0xff]  ;;  %v545_v63 = vld [vmem:[%s11564_s11 + $0x30] sm:$0xff] }
 0x83d   : > { %v5897_v47 = vld [vmem:[%s16229_s4 + $0x198] sm:$0xff] }
 0x83e   : > { %v13500_v46 = vpop.f32.mrf.mxu2 }
 0x83f   : > { %17239 = vst [vmem:[#allocation85_spill] sm:$0xff] %v13500_v46  ;;  %v4689_v57 = vpop.f32.mrf.mxu0  ;;  %v13502_v43 = vpop.f32.mrf.mxu3  ;;  %v544_v46 = vld [vmem:[%s11564_s11 + $0x28] sm:$0xff] }
 0x840   : > { %17240 = vst [vmem:[#allocation86_spill] sm:$0xff] %v13502_v43  ;;  %v4690_v62 = vadd.f32 %v4689_v57, %v17241_v37  ;;  %v4858_v11 = vpop.f32.mrf.mxu1  ;;  %v547_v57 = vld [vmem:[%s11564_s11 + $0x40] sm:$0xff]  ;;  %v549_v37 = vld [vmem:[%s11564_s11 + $0x50] sm:$0xff]  ;;  %5912 = vperm.xlu1 %10627, %v5846_v33  }
 0x841   : > { %v559_v44 = vpack.c.bf16 %v549_v37, %v547_v57  ;;  %v543_v33 = vld [vmem:[%s11564_s11 + $0x20] sm:$0xff]  ;;  %v546_v37 = vld [vmem:[%s11564_s11 + $0x38] sm:$0xff] }
 0x842   : > { %v4859_v29 = vadd.f32 %v4858_v11, %v4690_v62  ;;  %4728 = vmatmul.bf16.gmra.mxu0 %v17242_v38  ;;  %v548_v62 = vld [vmem:[%s11564_s11 + $0x48] sm:$0xff] }
 0x843   : > { %4897 = vmatmul.bf16.gmra.mxu1 %v17243_v21  ;;  %5066 = vmatmul.bf16.gmra.mxu2 %v17244_v0  ;;  %v560_v0 = vpack.c.bf16 %v550_v60, %v548_v62  ;;  %v558_v62 = vpack.c.bf16 %v546_v37, %v544_v46  ;;  %v541_v60 = vld [vmem:[%s11564_s11 + $0x10] sm:$0xff] }
 0x844   : > { %5235 = vmatmul.bf16.gmra.mxu3 %v17245_v9  ;;  %5513 = vmatpush.bf16.msra.mxu0 %v559_v44  ;;  %v5863_v44 = vld [vmem:[%s16229_s4 + $0x88] sm:$0xff] }
 0x845   : > { %5682 = vmatpush.bf16.msra.mxu1 %v560_v0  ;;  %v542_v0 = vld [vmem:[%s11564_s11 + $0x18] sm:$0xff] }
 0x846   : > { %v5027_v11 = vpop.f32.mrf.mxu2 }
 0x847   : > { %v5028_v13 = vadd.f32 %v5027_v11, %v4859_v29  ;;  %v4691_v38 = vpop.f32.mrf.mxu0  ;;  %v5196_v21 = vpop.f32.mrf.mxu3  ;;  %v557_v29 = vpack.c.bf16 %v545_v63, %v543_v33  ;;  %v5862_v11 = vld [vmem:[%s16229_s4 + $0x80] sm:$0xff] }
 0x848   : > { %v4692_v43 = vadd.f32 %v4691_v38, %v13140_v41  ;;  %v4860_v9 = vpop.f32.mrf.mxu1  ;;  %v5853_v41 = vld [vmem:[%s16229_s4 + $0x38] sm:$0xff]  ;;  %5992 = vperm.xlu0 %10626, %v5862_v11   ;;  %5997 = vperm.xlu1 %10627, %v5863_v44   ;;  %v17251_v11 = vld [vmem:[#allocation309_spill] sm:$0xff] }
 0x849   : > { %v13525_v4 = vadd.f32 %v5196_v21, %v5028_v13  ;;  %5947 = vperm.xlu2 %10628, %v5853_v41   ;;  %5514 = vmatpush.bf16.msra.mxu0 %v557_v29  ;;  %v540_v13 = vld [vmem:[%s11564_s11 + $0x8] sm:$0xff]  ;;  %v5850_v29 = vld [vmem:[%s16229_s4 + $0x20] sm:$0xff]  ;;  %v5893_v44 = vld [vmem:[%s16229_s4 + $0x178] sm:$0xff] }
 0x84a   : > { %v13530_v57 = vadd.f32 %v4860_v9, %v4692_v43  ;;  %5683 = vmatpush.bf16.msra.mxu1 %v558_v62  ;;  %v539_v43 = vld [vmem:[%s11564_s11] sm:$0xff]  ;;  %v556_v33 = vpack.c.bf16 %v542_v0, %v540_v13 }
 0x84b   : > { %17246 = vst [vmem:[#allocation87_spill] sm:$0xff] %v13525_v4  ;;  %v555_v21 = vpack.c.bf16 %v541_v60, %v539_v43  ;;  %v17250_v62 = vld [vmem:[#allocation308_spill] sm:$0xff]  ;;  %v17252_v43 = vld [vmem:[#allocation310_spill] sm:$0xff]  ;;  %v17253_v60 = vld [vmem:[#allocation311_spill] sm:$0xff] }
 0x84c   : > { %17247 = vst [vmem:[#allocation88_spill] sm:$0xff] %v13530_v57 }
 0x84d   : > { %5515 = vmatpush.bf16.msra.mxu0 %v555_v21 }
 0x84e   : > { %v13545_v38 = vpop.f32.mrf.mxu2  ;;  %5684 = vmatpush.bf16.msra.mxu1 %v556_v33 }
 0x84f   : > { %17248 = vst [vmem:[#allocation89_spill] sm:$0xff] %v13545_v38  ;;  %v4694_v46 = vpop.f32.mrf.mxu0  ;;  %v13548_v9 = vpop.f32.mrf.mxu3 }
 0x850   : > { %17249 = vst [vmem:[#allocation90_spill] sm:$0xff] %v13548_v9  ;;  %v4695_v63 = vadd.f32 %v4694_v46, %v13146_v52  ;;  %v4863_v37 = vpop.f32.mrf.mxu1  ;;  %v5908_v52 = vld [vmem:[%s16229_s4 + $0x1f0] sm:$0xff]  ;;  %6147 = vperm.xlu0 %10626, %v5893_v44   ;;  %v5883_v9 = vld [vmem:[%s16229_s4 + $0x128] sm:$0xff] }
 0x851   : > { %5932 = vperm.xlu2 %10628, %v5850_v29   ;;  %6222 = vperm.xlu1 %10627, %v5908_v52   ;;  %v5890_v29 = vld [vmem:[%s16229_s4 + $0x160] sm:$0xff] }
 0x852   : > { %v4864_v41 = vadd.f32 %v4863_v37, %v4695_v63  ;;  %4733 = vmatmul.bf16.gmra.mxu0 %v17250_v62  ;;  %v5867_v62 = vld [vmem:[%s16229_s4 + $0xa8] sm:$0xff] }
 0x853   : > { %4902 = vmatmul.bf16.gmra.mxu1 %v17251_v11  ;;  %5071 = vmatmul.bf16.gmra.mxu2 %v17252_v43  ;;  %v17258_v52 = vld [vmem:[#allocation205_spill] sm:$0xff] }
 0x854   : > { %5240 = vmatmul.bf16.gmra.mxu3 %v17253_v60 }
 0x856   : > { %v5032_v13 = vpop.f32.mrf.mxu2 }
 0x857   : > { %v5033_v21 = vadd.f32 %v5032_v13, %v4864_v41  ;;  %v4696_v0 = vpop.f32.mrf.mxu0  ;;  %v5201_v46 = vpop.f32.mrf.mxu3  ;;  %v5891_v41 = vld [vmem:[%s16229_s4 + $0x168] sm:$0xff] }
 0x858   : > { %v4697_v33 = vadd.f32 %v4696_v0, %v13148_v36  ;;  %v4865_v63 = vpop.f32.mrf.mxu1  ;;  %6132 = vperm.xlu0 %10626, %v5890_v29   ;;  %v5888_v29 = vld [vmem:[%s16229_s4 + $0x150] sm:$0xff] }
 0x859   : > { %v13565_v37 = vadd.f32 %v5201_v46, %v5033_v21  ;;  %6017 = vperm.xlu2 %10628, %v5867_v62   ;;  %6137 = vperm.xlu1 %10627, %v5891_v41   ;;  %v5864_v21 = vld [vmem:[%s16229_s4 + $0x90] sm:$0xff]  ;;  %v5907_v62 = vld [vmem:[%s16229_s4 + $0x1e8] sm:$0xff] }
 0x85a   : > { %v13570_v11 = vadd.f32 %v4865_v63, %v4697_v33  ;;  %v17259_v46 = vld [vmem:[#allocation314_spill] sm:$0xff]  ;;  %v17260_v33 = vld [vmem:[#allocation315_spill] sm:$0xff]  ;;  %v17261_v63 = vld [vmem:[#allocation316_spill] sm:$0xff] }
 0x85b   : > { %17254 = vst [vmem:[#allocation91_spill] sm:$0xff] %v13565_v37  ;;  %v17262_v41 = vld [vmem:[#allocation317_spill] sm:$0xff] }
 0x85c   : > { %17255 = vst [vmem:[#allocation92_spill] sm:$0xff] %v13570_v11 }
 0x85e   : > { %v13578_v36 = vpop.f32.mrf.mxu2 }
 0x85f   : > { %17256 = vst [vmem:[#allocation93_spill] sm:$0xff] %v13578_v36  ;;  %v4699_v43 = vpop.f32.mrf.mxu0  ;;  %v13580_v44 = vpop.f32.mrf.mxu3  ;;  %v5847_v36 = vld [vmem:[%s16229_s4 + $0x8] sm:$0xff] }
 0x860   : > { %17257 = vst [vmem:[#allocation94_spill] sm:$0xff] %v13580_v44  ;;  %v4700_v60 = vadd.f32 %v4699_v43, %v17258_v52  ;;  %v4868_v13 = vpop.f32.mrf.mxu1  ;;  %6217 = vperm.xlu0 %10626, %v5907_v62  }
 0x861   : > { %6002 = vperm.xlu2 %10628, %v5864_v21   ;;  %6122 = vperm.xlu1 %10627, %v5888_v29   ;;  %v5904_v21 = vld [vmem:[%s16229_s4 + $0x1d0] sm:$0xff]  ;;  %v10142_v29 = vld [vmem:[%s16227_s2] sm:$0xff] }
 0x862   : > { %v4869_v0 = vadd.f32 %v4868_v13, %v4700_v60  ;;  %4738 = vmatmul.bf16.gmra.mxu0 %v17259_v46  ;;  %v17263_v46 = vld [vmem:[#allocation206_spill] sm:$0xff] }
 0x863   : > { %4907 = vmatmul.bf16.gmra.mxu1 %v17260_v33  ;;  %5076 = vmatmul.bf16.gmra.mxu2 %v17261_v63 }
 0x864   : > { %5245 = vmatmul.bf16.gmra.mxu3 %v17262_v41 }
 0x866   : > { %v5037_v43 = vpop.f32.mrf.mxu2 }
 0x867   : > { %v5038_v52 = vadd.f32 %v5037_v43, %v4869_v0  ;;  %v4701_v60 = vpop.f32.mrf.mxu0  ;;  %v5206_v13 = vpop.f32.mrf.mxu3  ;;  %v5905_v0 = vld [vmem:[%s16229_s4 + $0x1d8] sm:$0xff] }
 0x868   : > { %v4702_v33 = vadd.f32 %v4701_v60, %v17263_v46  ;;  %v4870_v63 = vpop.f32.mrf.mxu1  ;;  %6202 = vperm.xlu0 %10626, %v5904_v21   ;;  %v5892_v46 = vld [vmem:[%s16229_s4 + $0x170] sm:$0xff] }
 0x869   : > { %v13597_v44 = vadd.f32 %v5206_v13, %v5038_v52  ;;  %5917 = vperm.xlu2 %10628, %v5847_v36   ;;  %6207 = vperm.xlu1 %10627, %v5905_v0   ;;  %v17268_v52 = vld [vmem:[#allocation55_spill] sm:$0xff] }
 0x86a   : > { %v13602_v11 = vadd.f32 %v4870_v63, %v4702_v33  ;;  %v5887_v33 = vld [vmem:[%s16229_s4 + $0x148] sm:$0xff]  ;;  %v5902_v63 = vld [vmem:[%s16229_s4 + $0x1c0] sm:$0xff] }
 0x86b   : > { %17264 = vst [vmem:[#allocation95_spill] sm:$0xff] %v13597_v44  ;;  %v13703_v44 = vpop.permute.xlu1 %6062 }
 0x86c   : > { %17265 = vst [vmem:[#allocation96_spill] sm:$0xff] %v13602_v11 }
 0x86d   : > { %17284 = vst [vmem:[#allocation109_spill] sm:$0xff] %v13703_v44  ;;  %v6623_v44 = vld [vmem:[%s16231_s6 + $0x48] sm:$0xff] }
 0x86e   : > { %v13610_v62 = vpop.f32.mrf.mxu2 }
 0x86f   : > { %17266 = vst [vmem:[#allocation97_spill] sm:$0xff] %v13610_v62  ;;  %v4704_v41 = vpop.f32.mrf.mxu0  ;;  %v13615_v43 = vpop.f32.mrf.mxu3 }
 0x870   : > { %17267 = vst [vmem:[#allocation98_spill] sm:$0xff] %v13615_v43  ;;  %v4705_v60 = vadd.f32 %v4704_v41, %v17268_v52  ;;  %v4873_v13 = vpop.f32.mrf.mxu1  ;;  %6117 = vperm.xlu0 %10626, %v5887_v33  }
 0x871   : > { %6142 = vperm.xlu2 %10628, %v5892_v46   ;;  %6192 = vperm.xlu1 %10627, %v5902_v63   ;;  %v5884_v46 = vld [vmem:[%s16229_s4 + $0x130] sm:$0xff]  ;;  %v10143_v63 = vld [vmem:[%s16227_s2 + $0x8] sm:$0xff] }
 0x872   : > { %v4874_v36 = vadd.f32 %v4873_v13, %v4705_v60  ;;  %9751 = vmatmul.msk.bf16.vlgmr.msra.gmra.mxu0 %vm5411_vm0, %v10142_v29  ;;  %v17269_v60 = vld [vmem:[#allocation56_spill] sm:$0xff] }
 0x873   : > { %9783 = vmatmul.msk.bf16.vlgmr.msra.gmra.mxu1 %vm5411_vm0, %v10142_v29  ;;  %v5909_v29 = vld [vmem:[%s16229_s4 + $0x1f8] sm:$0xff] }
 0x876   : > { %v5042_v21 = vpop.f32.mrf.mxu2 }
 0x877   : > { %v5043_v0 = vadd.f32 %v5042_v21, %v4874_v36  ;;  %v4706_v41 = vpop.f32.mrf.mxu0  ;;  %v5211_v52 = vpop.f32.mrf.mxu3  ;;  %v5885_v36 = vld [vmem:[%s16229_s4 + $0x138] sm:$0xff] }
 0x878   : > { %v4707_v13 = vadd.f32 %v4706_v41, %v17269_v60  ;;  %v4875_v43 = vpop.f32.mrf.mxu1  ;;  %6102 = vperm.xlu0 %10626, %v5884_v46   ;;  %v5906_v60 = vld [vmem:[%s16229_s4 + $0x1e0] sm:$0xff] }
 0x879   : > { %v13630_v62 = vadd.f32 %v5211_v52, %v5043_v0  ;;  %6227 = vperm.xlu2 %10628, %v5909_v29   ;;  %6107 = vperm.xlu1 %10627, %v5885_v36   ;;  %v17274_v0 = vld [vmem:[#allocation57_spill] sm:$0xff]  ;;  %v5901_v29 = vld [vmem:[%s16229_s4 + $0x1b8] sm:$0xff] }
 0x87a   : > { %v13635_v11 = vadd.f32 %v4875_v43, %v4707_v13  ;;  %v5882_v46 = vld [vmem:[%s16229_s4 + $0x120] sm:$0xff] }
 0x87b   : > { %17270 = vst [vmem:[#allocation99_spill] sm:$0xff] %v13630_v62 }
 0x87c   : > { %17271 = vst [vmem:[#allocation100_spill] sm:$0xff] %v13635_v11 }
 0x87e   : > { %v13643_v33 = vpop.f32.mrf.mxu2 }
 0x87f   : > { %17272 = vst [vmem:[#allocation101_spill] sm:$0xff] %v13643_v33  ;;  %v4709_v21 = vpop.f32.mrf.mxu0  ;;  %v13648_v43 = vpop.f32.mrf.mxu3 }
 0x880   : > { %17273 = vst [vmem:[#allocation102_spill] sm:$0xff] %v13648_v43  ;;  %v4710_v41 = vadd.f32 %v4709_v21, %v17274_v0  ;;  %v4878_v52 = vpop.f32.mrf.mxu1  ;;  %6187 = vperm.xlu0 %10626, %v5901_v29  }
 0x881   : > { %6212 = vperm.xlu2 %10628, %v5906_v60   ;;  %6092 = vperm.xlu1 %10627, %v5882_v46   ;;  %v5898_v60 = vld [vmem:[%s16229_s4 + $0x1a0] sm:$0xff] }
 0x882   : > { %v4879_v13 = vadd.f32 %v4878_v52, %v4710_v41  ;;  %9752 = vmatmul.msk.bf16.gmra.mxu0 %vm5411_vm0, %v10143_v63  ;;  %v17275_v41 = vld [vmem:[#allocation58_spill] sm:$0xff] }
 0x883   : > { %9784 = vmatmul.msk.bf16.gmra.mxu1 %vm5411_vm0, %v10143_v63  ;;  %v5889_v63 = vld [vmem:[%s16229_s4 + $0x158] sm:$0xff] }
 0x886   : > { %v5047_v36 = vpop.f32.mrf.mxu2 }
 0x887   : > { %v5048_v21 = vadd.f32 %v5047_v36, %v4879_v13  ;;  %v4711_v0 = vpop.f32.mrf.mxu0  ;;  %v5216_v43 = vpop.f32.mrf.mxu3  ;;  %v5899_v13 = vld [vmem:[%s16229_s4 + $0x1a8] sm:$0xff]  ;;  %v17280_v36 = vld [vmem:[#allocation59_spill] sm:$0xff] }
 0x888   : > { %v4712_v52 = vadd.f32 %v4711_v0, %v17275_v41  ;;  %v4880_v33 = vpop.f32.mrf.mxu1  ;;  %6172 = vperm.xlu0 %10626, %v5898_v60   ;;  %v5886_v41 = vld [vmem:[%s16229_s4 + $0x140] sm:$0xff]  ;;  %v5896_v60 = vld [vmem:[%s16229_s4 + $0x190] sm:$0xff] }
 0x889   : > { %v13663_v11 = vadd.f32 %v5216_v43, %v5048_v21  ;;  %6127 = vperm.xlu2 %10628, %v5889_v63   ;;  %v10144_v43 = vld [vmem:[%s16227_s2 + $0x10] sm:$0xff]  ;;  %6177 = vperm.xlu1 %10627, %v5899_v13   ;;  %v5881_v63 = vld [vmem:[%s16229_s4 + $0x118] sm:$0xff] }
 0x88a   : > { %v13668_v62 = vadd.f32 %v4880_v33, %v4712_v52 }
 0x88b   : > { %17276 = vst [vmem:[#allocation103_spill] sm:$0xff] %v13663_v11 }
 0x88c   : > { %17277 = vst [vmem:[#allocation104_spill] sm:$0xff] %v13668_v62 }
 0x88e   : > { %v13676_v29 = vpop.f32.mrf.mxu2 }
 0x88f   : > { %17278 = vst [vmem:[#allocation105_spill] sm:$0xff] %v13676_v29  ;;  %v4714_v46 = vpop.f32.mrf.mxu0  ;;  %v13681_v33 = vpop.f32.mrf.mxu3 }
 0x890   : > { %17279 = vst [vmem:[#allocation106_spill] sm:$0xff] %v13681_v33  ;;  %v4715_v21 = vadd.f32 %v4714_v46, %v17280_v36  ;;  %v4883_v0 = vpop.f32.mrf.mxu1  ;;  %6087 = vperm.xlu0 %10626, %v5881_v63   ;;  %v10145_v63 = vld [vmem:[%s16227_s2 + $0x18] sm:$0xff] }
 0x891   : > { %6112 = vperm.xlu2 %10628, %v5886_v41   ;;  %6162 = vperm.xlu1 %10627, %v5896_v60   ;;  %v5878_v41 = vld [vmem:[%s16229_s4 + $0x100] sm:$0xff] }
 0x892   : > { %v4884_v52 = vadd.f32 %v4883_v0, %v4715_v21  ;;  %9753 = vmatmul.msk.bf16.gmra.mxu0 %vm5411_vm0, %v10144_v43  ;;  %v17281_v21 = vld [vmem:[#allocation60_spill] sm:$0xff] }
 0x893   : > { %9785 = vmatmul.msk.bf16.gmra.mxu1 %vm5411_vm0, %v10144_v43  ;;  %v5903_v43 = vld [vmem:[%s16229_s4 + $0x1c8] sm:$0xff] }
 0x896   : > { %v5052_v13 = vpop.f32.mrf.mxu2 }
 0x897   : > { %v5053_v46 = vadd.f32 %v5052_v13, %v4884_v52  ;;  %v4716_v36 = vpop.f32.mrf.mxu0  ;;  %v5221_v33 = vpop.f32.mrf.mxu3  ;;  %v5879_v52 = vld [vmem:[%s16229_s4 + $0x108] sm:$0xff] }
 0x898   : > { %v4717_v0 = vadd.f32 %v4716_v36, %v17281_v21  ;;  %v4885_v29 = vpop.f32.mrf.mxu1  ;;  %6072 = vperm.xlu0 %10626, %v5878_v41   ;;  %v5895_v41 = vld [vmem:[%s16229_s4 + $0x188] sm:$0xff] }
 0x899   : > { %v13696_v62 = vadd.f32 %v5221_v33, %v5053_v46  ;;  %6197 = vperm.xlu2 %10628, %v5903_v43   ;;  %6077 = vperm.xlu1 %10627, %v5879_v52   ;;  %v17287_v46 = vld [vmem:[#allocation61_spill] sm:$0xff]  ;;  %v6628_v52 = vld [vmem:[%s16231_s6 + $0x70] sm:$0xff] }
 0x89a   : > { %v13701_v11 = vadd.f32 %v4885_v29, %v4717_v0  ;;  %v13716_v29 = vpop.permute.xlu2 %5972  ;;  %v5900_v0 = vld [vmem:[%s16229_s4 + $0x1b0] sm:$0xff] }
 0x89b   : > { %17282 = vst [vmem:[#allocation107_spill] sm:$0xff] %v13696_v62 }
 0x89c   : > { %17283 = vst [vmem:[#allocation108_spill] sm:$0xff] %v13701_v11 }
 0x89e   : > { %v13711_v33 = vpop.f32.mrf.mxu2 }
 0x89f   : > { %17285 = vst [vmem:[#allocation110_spill] sm:$0xff] %v13711_v33  ;;  %v4719_v60 = vpop.f32.mrf.mxu0  ;;  %v13718_v13 = vpop.f32.mrf.mxu3  ;;  %v17289_v33 = vld [vmem:[#allocation62_spill] sm:$0xff] }
 0x8a0   : > { %17286 = vst [vmem:[#allocation111_spill] sm:$0xff] %v13718_v13  ;;  %v4720_v36 = vadd.f32 %v4719_v60, %v17287_v46  ;;  %v4888_v21 = vpop.f32.mrf.mxu1  ;;  %v13732_v13 = vpop.permute.xlu1 %6067  ;;  %6157 = vperm.xlu0 %10626, %v5895_v41   ;;  %v10146_v41 = vld [vmem:[%s16227_s2 + $0x20] sm:$0xff] }
 0x8a1   : > { %17288 = vst [vmem:[#allocation112_spill] sm:$0xff] %v13732_v13  ;;  %6182 = vperm.xlu2 %10628, %v5900_v0   ;;  %6718 = vperm.xlu1 %10627, %v6628_v52   ;;  %v6644_v0 = vld [vmem:[%s16231_s6 + $0xf0] sm:$0xff] }
 0x8a2   : > { %v4889_v43 = vadd.f32 %v4888_v21, %v4720_v36  ;;  %9754 = vmatmul.msk.bf16.gmra.mxu0 %vm5411_vm0, %v10145_v63  ;;  %v13735_v62 = vpop.permute.xlu2 %5977 }
 0x8a3   : > { %9786 = vmatmul.msk.bf16.gmra.mxu1 %vm5411_vm0, %v10145_v63 }
 0x8a6   : > { %v5057_v60 = vpop.f32.mrf.mxu2 }
 0x8a7   : > { %v5058_v46 = vadd.f32 %v5057_v60, %v4889_v43  ;;  %v4721_v36 = vpop.f32.mrf.mxu0  ;;  %v5226_v21 = vpop.f32.mrf.mxu3  ;;  %v6645_v43 = vld [vmem:[%s16231_s6 + $0xf8] sm:$0xff] }
 0x8a8   : > { %v4722_v11 = vadd.f32 %v4721_v36, %v17289_v33  ;;  %v4890_v63 = vpop.f32.mrf.mxu1  ;;  %6798 = vperm.xlu0 %10626, %v6644_v0   ;;  %v13755_v52 = vpop.permute.xlu1 %6057 }
 0x8a9   : > { %v13737_v37 = vadd.f32 %v5226_v21, %v5058_v46  ;;  %6097 = vperm.xlu2 %10628, %v5883_v9   ;;  %17293 = vst [vmem:[#allocation116_spill] sm:$0xff] %v13755_v52  ;;  %6803 = vperm.xlu1 %10627, %v6645_v43   ;;  %v17295_v46 = vld [vmem:[#allocation63_spill] sm:$0xff]  ;;  %v6627_v43 = vld [vmem:[%s16231_s6 + $0x68] sm:$0xff] }
 0x8aa   : > { %v13742_v38 = vadd.f32 %v4890_v63, %v4722_v11  ;;  %v5880_v9 = vld [vmem:[%s16229_s4 + $0x110] sm:$0xff]  ;;  %v13764_v0 = vpop.permute.xlu2 %5962 }
 0x8ab   : > { %17290 = vst [vmem:[#allocation113_spill] sm:$0xff] %v13737_v37 }
 0x8ac   : > { %17291 = vst [vmem:[#allocation114_spill] sm:$0xff] %v13742_v38  ;;  %v17296_v38 = vld [vmem:[#allocation64_spill] sm:$0xff] }
 0x8ae   : > { %v13750_v33 = vpop.f32.mrf.mxu2 }
 0x8af   : > { %17292 = vst [vmem:[#allocation115_spill] sm:$0xff] %v13750_v33  ;;  %v4724_v11 = vpop.f32.mrf.mxu0  ;;  %v13757_v60 = vpop.f32.mrf.mxu3 }
 0x8b0   : > { %17294 = vst [vmem:[#allocation117_spill] sm:$0xff] %v13757_v60  ;;  %v4725_v36 = vadd.f32 %v4724_v11, %v17295_v46  ;;  %v4893_v21 = vpop.f32.mrf.mxu1  ;;  %v6642_v11 = vld [vmem:[%s16231_s6 + $0xe0] sm:$0xff]  ;;  %v13773_v46 = vpop.permute.xlu0 %5982  ;;  %6713 = vperm.xlu0 %10626, %v6627_v43  }
 0x8b1   : > { %6082 = vperm.xlu2 %10628, %v5880_v9   ;;  %6788 = vperm.xlu1 %10627, %v6642_v11   ;;  %v13776_v57 = vpop.permute.xlu1 %6042  ;;  %v6624_v9 = vld [vmem:[%s16231_s6 + $0x50] sm:$0xff] }
 0x8b2   : > { %v4894_v63 = vadd.f32 %v4893_v21, %v4725_v36  ;;  %9755 = vmatmul.msk.bf16.gmra.mxu0 %vm5411_vm0, %v10146_v41  ;;  %17297 = vst [vmem:[#allocation118_spill] sm:$0xff] %v13776_v57  ;;  %v6617_v57 = vld [vmem:[%s16231_s6 + $0x18] sm:$0xff] }
 0x8b3   : > { %9787 = vmatmul.msk.bf16.gmra.mxu1 %vm5411_vm0, %v10146_v41 }
 0x8b6   : > { %v5062_v60 = vpop.f32.mrf.mxu2 }
 0x8b7   : > { %v5063_v36 = vadd.f32 %v5062_v60, %v4894_v63  ;;  %v4726_v21 = vpop.f32.mrf.mxu0  ;;  %v5231_v33 = vpop.f32.mrf.mxu3  ;;  %v6625_v60 = vld [vmem:[%s16231_s6 + $0x58] sm:$0xff] }
 0x8b8   : > { %v4727_v37 = vadd.f32 %v4726_v21, %v17296_v38  ;;  %v4895_v41 = vpop.f32.mrf.mxu1  ;;  %v13791_v38 = vpop.permute.xlu2 %6047  ;;  %6698 = vperm.xlu0 %10626, %v6624_v9  }
 0x8b9   : > { %v13778_v4 = vadd.f32 %v5231_v33, %v5063_v36  ;;  %17300 = vst [vmem:[#allocation121_spill] sm:$0xff] %v13791_v38  ;;  %6167 = vperm.xlu2 %10628, %v5897_v47   ;;  %v13795_v63 = vpop.permute.xlu0 %5987  ;;  %6703 = vperm.xlu1 %10627, %v6625_v60   ;;  %v17303_v36 = vld [vmem:[#allocation65_spill] sm:$0xff]  ;;  %v6641_v60 = vld [vmem:[%s16231_s6 + $0xd8] sm:$0xff] }
 0x8ba   : > { %v13783_v17 = vadd.f32 %v4895_v41, %v4727_v37  ;;  %v10147_v37 = vld [vmem:[%s16227_s2 + $0x28] sm:$0xff]  ;;  %v5894_v47 = vld [vmem:[%s16229_s4 + $0x180] sm:$0xff] }
 0x8bb   : > { %17298 = vst [vmem:[#allocation119_spill] sm:$0xff] %v13778_v4 }
 0x8bc   : > { %17299 = vst [vmem:[#allocation120_spill] sm:$0xff] %v13783_v17 }
 0x8be   : > { %v13793_v33 = vpop.f32.mrf.mxu2 }
 0x8bf   : > { %17301 = vst [vmem:[#allocation122_spill] sm:$0xff] %v13793_v33  ;;  %v4729_v43 = vpop.f32.mrf.mxu0  ;;  %v13800_v11 = vpop.f32.mrf.mxu3 }
 0x8c0   : > { %17302 = vst [vmem:[#allocation123_spill] sm:$0xff] %v13800_v11  ;;  %v4730_v21 = vadd.f32 %v4729_v43, %v17303_v36  ;;  %v4898_v41 = vpop.f32.mrf.mxu1  ;;  %v13807_v33 = vpop.permute.xlu1 %5957  ;;  %v6622_v43 = vld [vmem:[%s16231_s6 + $0x40] sm:$0xff]  ;;  %6783 = vperm.xlu0 %10626, %v6641_v60  }
 0x8c1   : > { %6152 = vperm.xlu2 %10628, %v5894_v47   ;;  %v13816_v11 = vpop.permute.xlu2 %6032  ;;  %6688 = vperm.xlu1 %10627, %v6622_v43   ;;  %v13818_v4 = vpop.permute.xlu0 %6052  ;;  %v6638_v60 = vld [vmem:[%s16231_s6 + $0xc0] sm:$0xff] }
 0x8c2   : > { %v4899_v9 = vadd.f32 %v4898_v41, %v4730_v21  ;;  %9756 = vmatmul.msk.bf16.gmra.mxu0 %vm5411_vm0, %v10147_v37  ;;  %17304 = vst [vmem:[#allocation124_spill] sm:$0xff] %v13818_v4  ;;  %v6637_v4 = vld [vmem:[%s16231_s6 + $0xb8] sm:$0xff] }
 0x8c3   : > { %9788 = vmatmul.msk.bf16.gmra.mxu1 %vm5411_vm0, %v10147_v37  ;;  %v17305_v37 = vld [vmem:[#allocation66_spill] sm:$0xff] }
 0x8c6   : > { %v5067_v36 = vpop.f32.mrf.mxu2 }
 0x8c7   : > { %v5068_v21 = vadd.f32 %v5067_v36, %v4899_v9  ;;  %v4731_v41 = vpop.f32.mrf.mxu0  ;;  %v5236_v17 = vpop.f32.mrf.mxu3  ;;  %v6639_v9 = vld [vmem:[%s16231_s6 + $0xc8] sm:$0xff]  ;;  %v10148_v36 = vld [vmem:[%s16227_s2 + $0x30] sm:$0xff] }
 0x8c8   : > { %v4732_v55 = vadd.f32 %v4731_v41, %v17305_v37  ;;  %v4900_v10 = vpop.f32.mrf.mxu1  ;;  %v13834_v43 = vpop.permute.xlu1 %5942  ;;  %6768 = vperm.xlu0 %10626, %v6638_v60  }
 0x8c9   : > { %v13821_v15 = vadd.f32 %v5236_v17, %v5068_v21  ;;  %6723 = vperm.xlu2 %10628, %v6629_v51   ;;  %6773 = vperm.xlu1 %10627, %v6639_v9   ;;  %v17310_v21 = vld [vmem:[#allocation67_spill] sm:$0xff]  ;;  %v6626_v51 = vld [vmem:[%s16231_s6 + $0x60] sm:$0xff]  ;;  %v13849_v60 = vpop.permute.xlu0 %5967 }
 0x8ca   : > { %v13826_v47 = vadd.f32 %v4900_v10, %v4732_v55  ;;  %v6621_v9 = vld [vmem:[%s16231_s6 + $0x38] sm:$0xff] }
 0x8cb   : > { %17306 = vst [vmem:[#allocation125_spill] sm:$0xff] %v13821_v15  ;;  %v13844_v15 = vpop.permute.xlu2 %5947 }
 0x8cc   : > { %17307 = vst [vmem:[#allocation126_spill] sm:$0xff] %v13826_v47 }
 0x8ce   : > { %v13836_v17 = vpop.f32.mrf.mxu2 }
 0x8cf   : > { %17308 = vst [vmem:[#allocation127_spill] sm:$0xff] %v13836_v17  ;;  %v4734_v10 = vpop.f32.mrf.mxu0  ;;  %v13841_v55 = vpop.f32.mrf.mxu3 }
 0x8d0   : > { %17309 = vst [vmem:[#allocation128_spill] sm:$0xff] %v13841_v55  ;;  %v4735_v41 = vadd.f32 %v4734_v10, %v17310_v21  ;;  %v4903_v37 = vpop.f32.mrf.mxu1  ;;  %v6636_v10 = vld [vmem:[%s16231_s6 + $0xb0] sm:$0xff]  ;;  %6683 = vperm.xlu0 %10626, %v6621_v9   ;;  %v13859_v55 = vpop.permute.xlu1 %6027  ;;  %v6618_v9 = vld [vmem:[%s16231_s6 + $0x20] sm:$0xff] }
 0x8d1   : > { %6708 = vperm.xlu2 %10628, %v6626_v51   ;;  %6758 = vperm.xlu1 %10627, %v6636_v10  }
 0x8d2   : > { %v4904_v17 = vadd.f32 %v4903_v37, %v4735_v41  ;;  %9757 = vmatmul.msk.bf16.gmra.mxu0 %vm5411_vm0, %v10148_v36 }
 0x8d3   : > { %9789 = vmatmul.msk.bf16.gmra.mxu1 %vm5411_vm0, %v10148_v36  ;;  %v13869_v51 = vpop.permute.xlu2 %5932 }
 0x8d6   : > { %v5072_v21 = vpop.f32.mrf.mxu2 }
 0x8d7   : > { %v5073_v47 = vadd.f32 %v5072_v21, %v4904_v17  ;;  %v4736_v41 = vpop.f32.mrf.mxu0  ;;  %v5241_v37 = vpop.f32.mrf.mxu3  ;;  %v6619_v17 = vld [vmem:[%s16231_s6 + $0x28] sm:$0xff] }
 0x8d8   : > { %v4737_v22 = vadd.f32 %v4736_v41, %v17311_v20  ;;  %v4905_v36 = vpop.f32.mrf.mxu1  ;;  %v13877_v20 = vpop.permute.xlu0 %5952  ;;  %6668 = vperm.xlu0 %10626, %v6618_v9  }
 0x8d9   : > { %v13862_v12 = vadd.f32 %v5241_v37, %v5073_v47  ;;  %6793 = vperm.xlu2 %10628, %v6643_v35   ;;  %6673 = vperm.xlu1 %10627, %v6619_v17   ;;  %v6640_v35 = vld [vmem:[%s16231_s6 + $0xd0] sm:$0xff]  ;;  %v6635_v17 = vld [vmem:[%s16231_s6 + $0xa8] sm:$0xff] }
 0x8da   : > { %v13867_v13 = vadd.f32 %v4905_v36, %v4737_v22  ;;  %v10149_v22 = vld [vmem:[%s16227_s2 + $0x38] sm:$0xff]  ;;  %v13887_v36 = vpop.permute.xlu1 %6012 }
 0x8db   : > { %17312 = vst [vmem:[#allocation129_spill] sm:$0xff] %v13862_v12 }
 0x8dc   : > { %17313 = vst [vmem:[#allocation130_spill] sm:$0xff] %v13867_v13 }
 0x8de   : > { %v13879_v47 = vpop.f32.mrf.mxu2 }
 0x8df   : > { %17314 = vst [vmem:[#allocation133_spill] sm:$0xff] %v13879_v47  ;;  %v4739_v10 = vpop.f32.mrf.mxu0  ;;  %v13884_v21 = vpop.f32.mrf.mxu3 }
 0x8e0   : > { %17315 = vst [vmem:[#allocation134_spill] sm:$0xff] %v13884_v21  ;;  %v4740_v41 = vadd.f32 %v4739_v10, %v13218_v59  ;;  %v4908_v37 = vpop.f32.mrf.mxu1  ;;  %v6616_v59 = vld [vmem:[%s16231_s6 + $0x10] sm:$0xff]  ;;  %v13900_v10 = vpop.permute.xlu2 %6017  ;;  %6753 = vperm.xlu0 %10626, %v6635_v17  }
 0x8e1   : > { %6778 = vperm.xlu2 %10628, %v6640_v35   ;;  %v13902_v21 = vpop.permute.xlu0 %6037  ;;  %6658 = vperm.xlu1 %10627, %v6616_v59   ;;  %v6632_v17 = vld [vmem:[%s16231_s6 + $0x90] sm:$0xff] }
 0x8e2   : > { %v4909_v9 = vadd.f32 %v4908_v37, %v4740_v41  ;;  %9758 = vmatmul.msk.bf16.gmra.mxu0 %vm5411_vm0, %v10149_v22  ;;  %v13912_v45 = vpop.permute.xlu1 %5927 }
 0x8e3   : > { %9790 = vmatmul.msk.bf16.gmra.mxu1 %vm5411_vm0, %v10149_v22 }
 0x8e6   : > { %v5077_v12 = vpop.f32.mrf.mxu2 }
 0x8e7   : > { %v5078_v41 = vadd.f32 %v5077_v12, %v4909_v9  ;;  %v4741_v37 = vpop.f32.mrf.mxu0  ;;  %v5246_v47 = vpop.f32.mrf.mxu3  ;;  %v6633_v12 = vld [vmem:[%s16231_s6 + $0x98] sm:$0xff] }
 0x8e8   : > { %v4742_v22 = vadd.f32 %v4741_v37, %v13221_v3  ;;  %v4910_v13 = vpop.f32.mrf.mxu1  ;;  %6738 = vperm.xlu0 %10626, %v6632_v17   ;;  %v10150_v3 = vld [vmem:[%s16227_s2 + $0x40] sm:$0xff]  ;;  %v17318_v9 = vld [vmem:[#allocation211_spill] sm:$0xff]  ;;  %v6615_v17 = vld [vmem:[%s16231_s6 + $0x8] sm:$0xff] }
 0x8e9   : > { %v13905_v30 = vadd.f32 %v5246_v47, %v5078_v41  ;;  %6693 = vperm.xlu2 %10628, %v6623_v44   ;;  %6743 = vperm.xlu1 %10627, %v6633_v12   ;;  %v13926_v37 = vpop.permute.xlu0 %6022  ;;  %v6620_v44 = vld [vmem:[%s16231_s6 + $0x30] sm:$0xff]  ;;  %v6630_v12 = vld [vmem:[%s16231_s6 + $0x80] sm:$0xff] }
 0x8ea   : > { %v13910_v35 = vadd.f32 %v4910_v13, %v4742_v22  ;;  %v13923_v13 = vpop.permute.xlu2 %6002 }
 0x8eb   : > { %17316 = vst [vmem:[#allocation135_spill] sm:$0xff] %v13905_v30  ;;  %v17319_v30 = vld [vmem:[#allocation214_spill] sm:$0xff] }
 0x8ec   : > { %17317 = vst [vmem:[#allocation136_spill] sm:$0xff] %v13910_v35 }
 0x8ef   : > { %v5517_v47 = vpop.f32.mrf.mxu0 }
 0x8f0   : > { %v5518_v59 = vadd.f32 %v5517_v47, %v17318_v9  ;;  %v5686_v41 = vpop.f32.mrf.mxu1  ;;  %v5913_v47 = vpop.permute.xlu1 %5912  ;;  %6653 = vperm.xlu0 %10626, %v6615_v17  }
 0x8f1   : > { %v5687_v22 = vadd.f32 %v5686_v41, %v13228_v31  ;;  %6678 = vperm.xlu2 %10628, %v6620_v44   ;;  %6728 = vperm.xlu1 %10627, %v6630_v12   ;;  %v13945_v38 = vpop.permute.xlu0 %5937 }
 0x8f2   : > { %9759 = vmatmul.msk.bf16.gmra.mxu0 %vm5411_vm0, %v10150_v3  ;;  %v6230_v31 = vadd.f32 %v5913_v47, %v5518_v59  ;;  %v5918_v56 = vpop.permute.xlu2 %5917  ;;  %v7964_v59 = vld [vmem:[%s16233_s8 + $0x70] sm:$0xff] }
 0x8f3   : > { %9791 = vmatmul.msk.bf16.gmra.mxu1 %vm5411_vm0, %v10150_v3  ;;  %v6231_v9 = vadd.f32 %v5913_v47, %v5687_v22 }
 0x8f4   : > { %10629 = vtanh.f32 %v6230_v31 }
 0x8f5   : > { %10631 = vtanh.f32 %v6231_v9  ;;  %v7963_v9 = vld [vmem:[%s16233_s8 + $0x68] sm:$0xff] }
 0x8f7   : > { %v5519_v41 = vpop.f32.mrf.mxu0 }
 0x8f8   : > { %v5520_v35 = vadd.f32 %v5519_v41, %v17319_v30  ;;  %v5688_v52 = vpop.f32.mrf.mxu1  ;;  %v7965_v30 = vld [vmem:[%s16233_s8 + $0x78] sm:$0xff]  ;;  %8038 = vperm.xlu0 %10626, %v7964_v59   ;;  %v6631_v41 = vld [vmem:[%s16231_s6 + $0x88] sm:$0xff] }
 0x8f9   : > { %v5689_v3 = vadd.f32 %v5688_v52, %v13231_v8  ;;  %6763 = vperm.xlu2 %10628, %v6637_v4   ;;  %v10151_v8 = vld [vmem:[%s16227_s2 + $0x48] sm:$0xff]  ;;  %8043 = vperm.xlu1 %10627, %v7965_v30  }
 0x8fa   : > { %v6232_v2 = vadd.f32 %v5918_v56, %v5520_v35  ;;  %v13956_v35 = vpop.eup %10629 }
 0x8fb   : > { %v6233_v44 = vadd.f32 %v5918_v56, %v5689_v3  ;;  %v17320_v56 = vld [vmem:[#allocation215_spill] sm:$0xff]  ;;  %v13959_v12 = vpop.eup %10631 }
 0x8fc   : > { %10633 = vtanh.f32 %v6232_v2  ;;  %v6634_v2 = vld [vmem:[%s16231_s6 + $0xa0] sm:$0xff] }
 0x8fd   : > { %10635 = vtanh.f32 %v6233_v44  ;;  %v5923_v44 = vpop.permute.xlu0 %5922 }
 0x8ff   : > { %v5522_v52 = vpop.f32.mrf.mxu0 }
 0x900   : > { %v5523_v22 = vadd.f32 %v5522_v52, %v17320_v56  ;;  %v5691_v17 = vpop.f32.mrf.mxu1  ;;  %8033 = vperm.xlu0 %10626, %v7963_v9   ;;  %v17321_v52 = vld [vmem:[#allocation218_spill] sm:$0xff] }
 0x901   : > { %v5692_v47 = vadd.f32 %v5691_v17, %v13238_v58  ;;  %v7960_v58 = vld [vmem:[%s16233_s8 + $0x50] sm:$0xff]  ;;  %6748 = vperm.xlu2 %10628, %v6634_v2  }
 0x902   : > { %v13965_v4 = vpop.eup %10633  ;;  %9760 = vmatmul.msk.bf16.gmra.mxu0 %vm5411_vm0, %v10151_v8  ;;  %v6234_v59 = vadd.f32 %v5923_v44, %v5523_v22  ;;  %8018 = vperm.xlu1 %10627, %v7960_v58   ;;  %v7958_v22 = vld [vmem:[%s16233_s8 + $0x40] sm:$0xff] }
 0x903   : > { %v13968_v31 = vpop.eup %10635  ;;  %9792 = vmatmul.msk.bf16.gmra.mxu1 %vm5411_vm0, %v10151_v8  ;;  %v6235_v30 = vadd.f32 %v5923_v44, %v5692_v47  ;;  %v7959_v47 = vld [vmem:[%s16233_s8 + $0x48] sm:$0xff] }
 0x904   : > { %10637 = vtanh.f32 %v6234_v59 }
 0x905   : > { %10639 = vtanh.f32 %v6235_v30 }
 0x907   : > { %v5524_v8 = vpop.f32.mrf.mxu0 }
 0x908   : > { %v5525_v56 = vadd.f32 %v5524_v8, %v17321_v52  ;;  %v5693_v17 = vpop.f32.mrf.mxu1  ;;  %8008 = vperm.xlu0 %10626, %v7958_v22   ;;  %v7957_v52 = vld [vmem:[%s16233_s8 + $0x38] sm:$0xff] }
 0x909   : > { %v5694_v50 = vadd.f32 %v5693_v17, %v13241_v5  ;;  %6663 = vperm.xlu2 %10628, %v6617_v57   ;;  %v10152_v5 = vld [vmem:[%s16227_s2 + $0x50] sm:$0xff]  ;;  %v6614_v57 = vld [vmem:[%s16231_s6] sm:$0xff] }
 0x90a   : > { %v6236_v2 = vadd.f32 %v13912_v45, %v5525_v56  ;;  %8013 = vperm.xlu1 %10627, %v7959_v47   ;;  %v13997_v58 = vpop.eup %10637  ;;  %v7961_v56 = vld [vmem:[%s16233_s8 + $0x58] sm:$0xff] }
 0x90b   : > { %v6237_v3 = vadd.f32 %v13912_v45, %v5694_v50  ;;  %v17322_v50 = vld [vmem:[#allocation219_spill] sm:$0xff]  ;;  %v14000_v59 = vpop.eup %10639 }
 0x90c   : > { %10641 = vtanh.f32 %v6236_v2 }
 0x90d   : > { %10643 = vtanh.f32 %v6237_v3 }
 0x90f   : > { %v5527_v9 = vpop.f32.mrf.mxu0 }
 0x910   : > { %v5528_v45 = vadd.f32 %v5527_v9, %v17322_v50  ;;  %v5696_v44 = vpop.f32.mrf.mxu1  ;;  %8003 = vperm.xlu0 %10626, %v7957_v52  }
 0x911   : > { %v5697_v30 = vadd.f32 %v5696_v44, %v13248_v49  ;;  %v7954_v49 = vld [vmem:[%s16233_s8 + $0x20] sm:$0xff]  ;;  %6648 = vperm.xlu2 %10628, %v6614_v57  }
 0x912   : > { %v14006_v3 = vpop.eup %10641  ;;  %9761 = vmatmul.msk.bf16.gmra.mxu0 %vm5411_vm0, %v10152_v5  ;;  %v6238_v2 = vadd.f32 %v13869_v51, %v5528_v45  ;;  %7988 = vperm.xlu1 %10627, %v7954_v49   ;;  %v7953_v45 = vld [vmem:[%s16233_s8 + $0x18] sm:$0xff] }
 0x913   : > { %v14009_v8 = vpop.eup %10643  ;;  %9793 = vmatmul.msk.bf16.gmra.mxu1 %vm5411_vm0, %v10152_v5  ;;  %v6239_v22 = vadd.f32 %v13869_v51, %v5697_v30  ;;  %v17323_v5 = vld [vmem:[#allocation222_spill] sm:$0xff] }
 0x914   : > { %10645 = vtanh.f32 %v6238_v2  ;;  %v7952_v51 = vld [vmem:[%s16233_s8 + $0x10] sm:$0xff] }
 0x915   : > { %10647 = vtanh.f32 %v6239_v22 }
 0x917   : > { %v5529_v47 = vpop.f32.mrf.mxu0 }
 0x918   : > { %v5530_v9 = vadd.f32 %v5529_v47, %v17323_v5  ;;  %v5698_v50 = vpop.f32.mrf.mxu1  ;;  %7978 = vperm.xlu0 %10626, %v7952_v51  }
 0x919   : > { %v5699_v44 = vadd.f32 %v5698_v50, %v13251_v7  ;;  %6733 = vperm.xlu2 %10628, %v6631_v41   ;;  %v10153_v7 = vld [vmem:[%s16227_s2 + $0x58] sm:$0xff]  ;;  %v7962_v41 = vld [vmem:[%s16233_s8 + $0x60] sm:$0xff] }
 0x91a   : > { %v6240_v17 = vadd.f32 %v13945_v38, %v5530_v9  ;;  %7983 = vperm.xlu1 %10627, %v7953_v45   ;;  %v14040_v52 = vpop.eup %10645  ;;  %v7951_v9 = vld [vmem:[%s16233_s8 + $0x8] sm:$0xff] }
 0x91b   : > { %v6241_v57 = vadd.f32 %v13945_v38, %v5699_v44  ;;  %v17324_v38 = vld [vmem:[#allocation223_spill] sm:$0xff]  ;;  %v14043_v22 = vpop.eup %10647 }
 0x91c   : > { %10649 = vtanh.f32 %v6240_v17 }
 0x91d   : > { %10651 = vtanh.f32 %v6241_v57 }
 0x91f   : > { %v5532_v30 = vpop.f32.mrf.mxu0 }
 0x920   : > { %v5533_v49 = vadd.f32 %v5532_v30, %v17324_v38  ;;  %v5701_v2 = vpop.f32.mrf.mxu1  ;;  %7973 = vperm.xlu0 %10626, %v7951_v9  }
 0x921   : > { %v5702_v47 = vadd.f32 %v5701_v2, %v13258_v27  ;;  %v8371_v27 = vld [vmem:[%s16235_s10] sm:$0xf]  ;;  %8028 = vperm.xlu2 %10628, %v7962_v41  }
 0x922   : > { %v14049_v17 = vpop.eup %10649  ;;  %9762 = vmatmul.msk.bf16.gmra.mxu0 %vm5411_vm0, %v10153_v7  ;;  %v6242_v57 = vadd.f32 %v13834_v43, %v5533_v49  ;;  %8374 = vperm.xlu1 %10627, %v8371_v27  }
 0x923   : > { %v14052_v5 = vpop.eup %10651  ;;  %9794 = vmatmul.msk.bf16.gmra.mxu1 %vm5411_vm0, %v10153_v7  ;;  %v6243_v51 = vadd.f32 %v13834_v43, %v5702_v47  ;;  %v17325_v7 = vld [vmem:[#allocation226_spill] sm:$0xff]  ;;  %v10154_v43 = vld [vmem:[%s16227_s2 + $0x60] sm:$0xff] }
 0x924   : > { %10653 = vtanh.f32 %v6242_v57 }
 0x925   : > { %10655 = vtanh.f32 %v6243_v51 }
 0x927   : > { %v5534_v45 = vpop.f32.mrf.mxu0 }
 0x928   : > { %v5535_v30 = vadd.f32 %v5534_v45, %v17325_v7  ;;  %v5703_v38 = vpop.f32.mrf.mxu1 }
 0x929   : > { %v5704_v2 = vadd.f32 %v5703_v38, %v13261_v23  ;;  %8023 = vperm.xlu2 %10628, %v7961_v56   ;;  %v17326_v23 = vld [vmem:[#allocation227_spill] sm:$0xff] }
 0x92a   : > { %v6244_v44 = vadd.f32 %v13844_v15, %v5535_v30  ;;  %v14077_v47 = vpop.eup %10653 }
 0x92b   : > { %v6245_v41 = vadd.f32 %v13844_v15, %v5704_v2  ;;  %v14080_v45 = vpop.eup %10655  ;;  %v7956_v15 = vld [vmem:[%s16233_s8 + $0x30] sm:$0xff] }
 0x92c   : > { %10657 = vtanh.f32 %v6244_v44  ;;  %v17327_v2 = vld [vmem:[#allocation230_spill] sm:$0xff] }
 0x92d   : > { %10659 = vtanh.f32 %v6245_v41 }
 0x92f   : > { %v5537_v49 = vpop.f32.mrf.mxu0 }
 0x930   : > { %v5538_v9 = vadd.f32 %v5537_v49, %v17326_v23  ;;  %v5706_v27 = vpop.f32.mrf.mxu1 }
 0x931   : > { %v5707_v57 = vadd.f32 %v5706_v27, %v13268_v24  ;;  %7998 = vperm.xlu2 %10628, %v7956_v15  }
 0x932   : > { %v14086_v56 = vpop.eup %10657  ;;  %9763 = vmatmul.msk.bf16.gmra.mxu0 %vm5411_vm0, %v10154_v43  ;;  %v6246_v24 = vadd.f32 %v13877_v20, %v5538_v9 }
 0x933   : > { %v14089_v44 = vpop.eup %10659  ;;  %9795 = vmatmul.msk.bf16.gmra.mxu1 %vm5411_vm0, %v10154_v43  ;;  %v6247_v30 = vadd.f32 %v13877_v20, %v5707_v57  ;;  %v7955_v43 = vld [vmem:[%s16233_s8 + $0x28] sm:$0xff] }
 0x934   : > { %10661 = vtanh.f32 %v6246_v24  ;;  %v10155_v20 = vld [vmem:[%s16227_s2 + $0x68] sm:$0xff]  ;;  %v7950_v24 = vld [vmem:[%s16233_s8] sm:$0xff] }
 0x935   : > { %10663 = vtanh.f32 %v6247_v30 }
 0x937   : > { %v5539_v38 = vpop.f32.mrf.mxu0 }
 0x938   : > { %v5540_v41 = vadd.f32 %v5539_v38, %v17327_v2  ;;  %v5708_v49 = vpop.f32.mrf.mxu1 }
 0x939   : > { %v5709_v23 = vadd.f32 %v5708_v49, %v13271_v54  ;;  %7993 = vperm.xlu2 %10628, %v7955_v43  }
 0x93a   : > { %v6248_v27 = vadd.f32 %v13807_v33, %v5540_v41  ;;  %v14108_v57 = vpop.eup %10661 }
 0x93b   : > { %v6249_v15 = vadd.f32 %v13807_v33, %v5709_v23  ;;  %v14110_v38 = vpop.eup %10663  ;;  %v17328_v33 = vld [vmem:[#allocation231_spill] sm:$0xff] }
 0x93c   : > { %10665 = vtanh.f32 %v6248_v27 }
 0x93d   : > { %10667 = vtanh.f32 %v6249_v15 }
 0x93f   : > { %v5542_v9 = vpop.f32.mrf.mxu0 }
 0x940   : > { %v5711_v54 = vpop.f32.mrf.mxu1  ;;  %v5543_v2 = vadd.f32 %v5542_v9, %v17328_v33  ;;  %v17329_v33 = vld [vmem:[#allocation234_spill] sm:$0xff] }
 0x941   : > { %v5712_v49 = vadd.f32 %v5711_v54, %v13278_v53  ;;  %7968 = vperm.xlu2 %10628, %v7950_v24   ;;  %v10156_v54 = vld [vmem:[%s16227_s2 + $0x70] sm:$0xff] }
 0x942   : > { %v14115_v30 = vpop.eup %10665  ;;  %9764 = vmatmul.msk.bf16.gmra.mxu0 %vm5411_vm0, %v10155_v20  ;;  %v6250_v27 = vadd.f32 %v13764_v0, %v5543_v2 }
 0x943   : > { %v14119_v41 = vpop.eup %10667  ;;  %9796 = vmatmul.msk.bf16.gmra.mxu1 %vm5411_vm0, %v10155_v20  ;;  %v6251_v15 = vadd.f32 %v13764_v0, %v5712_v49 }
 0x944   : > { %10669 = vtanh.f32 %v6250_v27 }
 0x945   : > { %10671 = vtanh.f32 %v6251_v15 }
 0x947   : > { %v5544_v9 = vpop.f32.mrf.mxu0 }
 0x948   : > { %v5545_v50 = vadd.f32 %v5544_v9, %v17329_v33  ;;  %v5713_v7 = vpop.f32.mrf.mxu1 }
 0x949   : > { %v5714_v51 = vadd.f32 %v5713_v7, %v13281_v42  ;;  %v17330_v42 = vld [vmem:[#allocation235_spill] sm:$0xff] }
 0x94a   : > { %v6252_v53 = vadd.f32 %v13849_v60, %v5545_v50  ;;  %v14136_v0 = vpop.eup %10669 }
 0x94b   : > { %v6253_v20 = vadd.f32 %v13849_v60, %v5714_v51  ;;  %v14138_v49 = vpop.eup %10671 }
 0x94c   : > { %10673 = vtanh.f32 %v6252_v53 }
 0x94d   : > { %10675 = vtanh.f32 %v6253_v20  ;;  %v17331_v20 = vld [vmem:[#allocation238_spill] sm:$0xff] }
 0x94f   : > { %v5547_v24 = vpop.f32.mrf.mxu0 }
 0x950   : > { %v5716_v2 = vpop.f32.mrf.mxu1  ;;  %v5548_v7 = vadd.f32 %v5547_v24, %v17330_v42 }
 0x951   : > { %v5717_v60 = vadd.f32 %v5716_v2, %v13288_v61  ;;  %v10157_v2 = vld [vmem:[%s16227_s2 + $0x78] sm:$0xff] }
 0x952   : > { %v14140_v9 = vpop.eup %10673  ;;  %9765 = vmatmul.msk.bf16.gmra.mxu0 %vm5411_vm0, %v10156_v54  ;;  %v6254_v15 = vadd.f32 %v13716_v29, %v5548_v7 }
 0x953   : > { %v14144_v50 = vpop.eup %10675  ;;  %9797 = vmatmul.msk.bf16.gmra.mxu1 %vm5411_vm0, %v10156_v54  ;;  %v6255_v33 = vadd.f32 %v13716_v29, %v5717_v60 }
 0x954   : > { %10677 = vtanh.f32 %v6254_v15 }
 0x955   : > { %10679 = vtanh.f32 %v6255_v33 }
 0x957   : > { %v5549_v53 = vpop.f32.mrf.mxu0 }
 0x958   : > { %v5550_v24 = vadd.f32 %v5549_v53, %v17331_v20  ;;  %v5718_v42 = vpop.f32.mrf.mxu1  ;;  %v17332_v20 = vld [vmem:[#allocation239_spill] sm:$0xff] }
 0x959   : > { %v5719_v43 = vadd.f32 %v5718_v42, %v13291_v32 }
 0x95a   : > { %v6256_v61 = vadd.f32 %v13735_v62, %v5550_v24  ;;  %v10678_v29 = vpop.eup %10677 }
 0x95b   : > { %v6257_v54 = vadd.f32 %v13735_v62, %v5719_v43  ;;  %v10680_v23 = vpop.eup %10679 }
 0x95c   : > { %10681 = vtanh.f32 %v6256_v61  ;;  %v17333_v61 = vld [vmem:[#allocation242_spill] sm:$0xff] }
 0x95d   : > { %10683 = vtanh.f32 %v6257_v54 }
 0x95f   : > { %v5552_v7 = vpop.f32.mrf.mxu0 }
 0x960   : > { %v5721_v60 = vpop.f32.mrf.mxu1  ;;  %v5553_v27 = vadd.f32 %v5552_v7, %v17332_v20  ;;  %v14170_v20 = vpop.permute.xlu0 %6007 }
 0x961   : > { %v5722_v15 = vadd.f32 %v5721_v60, %v13298_v6 }
 0x962   : > { %v10682_v53 = vpop.eup %10681  ;;  %9766 = vmatmul.msk.bf16.gmra.mxu0 %vm5411_vm0, %v10157_v2  ;;  %v6258_v33 = vadd.f32 %v13773_v46, %v5553_v27 }
 0x963   : > { %v10684_v32 = vpop.eup %10683  ;;  %9798 = vmatmul.msk.bf16.gmra.mxu1 %vm5411_vm0, %v10157_v2  ;;  %v6498_v62 = vpack.c.bf16 %v10682_v53, %v10678_v29  ;;  %v6259_v24 = vadd.f32 %v13773_v46, %v5722_v15  ;;  %v10158_v46 = vld [vmem:[%s16227_s2 + $0x80] sm:$0xff]  ;;  %v17334_v2 = vld [vmem:[#allocation243_spill] sm:$0xff] }
 0x964   : > { %v6499_v43 = vpack.c.bf16 %v10684_v32, %v10680_v23  ;;  %10685 = vtanh.f32 %v6258_v33 }
 0x965   : > { %10687 = vtanh.f32 %v6259_v24 }
 0x967   : > { %v5554_v42 = vpop.f32.mrf.mxu0 }
 0x968   : > { %v5555_v54 = vadd.f32 %v5554_v42, %v17333_v61  ;;  %v5723_v51 = vpop.f32.mrf.mxu1  ;;  %v5993_v15 = vpop.permute.xlu0 %5992  ;;  %v17335_v61 = vld [vmem:[#allocation246_spill] sm:$0xff] }
 0x969   : > { %v5724_v25 = vadd.f32 %v5723_v51, %v13301_v40 }
 0x96a   : > { %v6260_v7 = vadd.f32 %v13795_v63, %v5555_v54  ;;  %v10686_v27 = vpop.eup %10685 }
 0x96b   : > { %v6261_v6 = vadd.f32 %v13795_v63, %v5724_v25  ;;  %v10688_v40 = vpop.eup %10687 }
 0x96c   : > { %10689 = vtanh.f32 %v6260_v7 }
 0x96d   : > { %10691 = vtanh.f32 %v6261_v6  ;;  %v5998_v6 = vpop.permute.xlu1 %5997 }
 0x96f   : > { %v5557_v23 = vpop.f32.mrf.mxu0 }
 0x970   : > { %v5558_v29 = vadd.f32 %v5557_v23, %v17334_v2  ;;  %v5726_v60 = vpop.f32.mrf.mxu1  ;;  %v17337_v2 = vpack.c.bf16 %v14144_v50, %v14138_v49 }
 0x971   : > { %v5727_v51 = vadd.f32 %v5726_v60, %v13308_v19 }
 0x972   : > { %v10690_v53 = vpop.eup %10689  ;;  %9767 = vmatmul.msk.bf16.gmra.mxu0 %vm5411_vm0, %v10158_v46  ;;  %v6262_v33 = vadd.f32 %v5993_v15, %v5558_v29 }
 0x973   : > { %v10692_v32 = vpop.eup %10691  ;;  %9799 = vmatmul.msk.bf16.gmra.mxu1 %vm5411_vm0, %v10158_v46  ;;  %v6500_v25 = vpack.c.bf16 %v10690_v53, %v10686_v27  ;;  %v6263_v24 = vadd.f32 %v5993_v15, %v5727_v51  ;;  %v17336_v27 = vpack.c.bf16 %v14140_v9, %v14136_v0  ;;  %v17339_v0 = vpack.c.bf16 %v14115_v30, %v14108_v57 }
 0x974   : > { %v6501_v63 = vpack.c.bf16 %v10692_v32, %v10688_v40  ;;  %10693 = vtanh.f32 %v6262_v33  ;;  %v17340_v9 = vpack.c.bf16 %v14119_v41, %v14110_v38  ;;  %v17341_v57 = vpack.c.bf16 %v14086_v56, %v14077_v47  ;;  %v17375_v32 = vld [vmem:[#allocation280_spill] sm:$0xff] }
 0x975   : > { %7126 = vmatpush.bf16.msra.mxu2 %v6500_v25  ;;  %10695 = vtanh.f32 %v6263_v24  ;;  %v17342_v38 = vpack.c.bf16 %v14089_v44, %v14080_v45  ;;  %v17345_v56 = vpack.c.bf16 %v14052_v5, %v14043_v22  ;;  %v17346_v45 = vpack.c.bf16 %v14006_v3, %v13997_v58  ;;  %v10432_v44 = vld [vmem:[#allocation8 + $0xc] sm:$0xf0] }
 0x976   : > { %7482 = vmatpush.bf16.msrb.mxu0 %v6501_v63  ;;  %v17343_v63 = vld [vmem:[#allocation250_spill] sm:$0xff] }
 0x977   : > { %v5559_v42 = vpop.f32.mrf.mxu0  ;;  %v10160_v22 = vld [vmem:[%s16227_s2 + $0x90] sm:$0xff] }
 0x978   : > { %v5560_v54 = vadd.f32 %v5559_v42, %v17335_v61  ;;  %v5728_v7 = vpop.f32.mrf.mxu1  ;;  %v17344_v42 = vpack.c.bf16 %v14049_v17, %v14040_v52  ;;  %v17347_v52 = vpack.c.bf16 %v14009_v8, %v14000_v59  ;;  %v17349_v59 = vpack.c.bf16 %v13965_v4, %v13956_v35 }
 0x979   : > { %v5729_v19 = vadd.f32 %v5728_v7, %v13311_v1  ;;  %7127 = vmatpush.bf16.msra.mxu2 %v6498_v62  ;;  %v10159_v1 = vld [vmem:[%s16227_s2 + $0x88] sm:$0xff] }
 0x97a   : > { %v6264_v23 = vadd.f32 %v5998_v6, %v5560_v54  ;;  %7483 = vmatpush.bf16.msrb.mxu0 %v6499_v43  ;;  %v14191_v62 = vpop.eup %10693  ;;  %v17338_v43 = vld [vmem:[#allocation247_spill] sm:$0xff] }
 0x97b   : > { %v6265_v46 = vadd.f32 %v5998_v6, %v5729_v19  ;;  %v14194_v51 = vpop.eup %10695  ;;  %v17350_v6 = vpack.c.bf16 %v13968_v31, %v13959_v12  ;;  %v17351_v31 = vld [vmem:[#allocation256_spill] sm:$0xff] }
 0x97c   : > { %10697 = vtanh.f32 %v6264_v23  ;;  %v17376_v23 = vld [vmem:[#allocation72_spill] sm:$0xff] }
 0x97d   : > { %10699 = vtanh.f32 %v6265_v46  ;;  %7128 = vmatpush.bf16.msra.mxu2 %v17336_v27 }
 0x97e   : > { %7484 = vmatpush.bf16.msrb.mxu0 %v17337_v2 }
 0x97f   : > { %v5562_v29 = vpop.f32.mrf.mxu0 }
 0x980   : > { %v5563_v60 = vadd.f32 %v5562_v29, %v17338_v43  ;;  %v5731_v40 = vpop.f32.mrf.mxu1 }
 0x981   : > { %v5732_v53 = vadd.f32 %v5731_v40, %v13318_v26  ;;  %7129 = vmatpush.bf16.msra.mxu2 %v17339_v0  ;;  %v10436_v40 = vld [vmem:[#allocation8 + $0x2c] sm:$0xf0]  ;;  %v10161_v0 = vld [vmem:[%s16227_s2 + $0x98] sm:$0xff] }
 0x982   : > { %v14200_v49 = vpop.eup %10697  ;;  %7485 = vmatpush.bf16.msrb.mxu0 %v17340_v9  ;;  %v6266_v30 = vadd.f32 %v13923_v13, %v5563_v60  ;;  %v9833_v60 = vld [vmem:[#allocation8 + $0x20] sm:$0xf] }
 0x983   : > { %v14205_v50 = vpop.eup %10699  ;;  %9768 = vmatmul.msk.bf16.gmra.mxu0 %vm5411_vm0, %v10159_v1  ;;  %9800 = vmatmul.msk.bf16.gmra.mxu1 %vm5411_vm0, %v10159_v1  ;;  %v6267_v41 = vadd.f32 %v13923_v13, %v5732_v53  ;;  %v14270_v1 = vpop.permute.xlu0 %6147  ;;  %v17353_v9 = vld [vmem:[#allocation257_spill] sm:$0xff]  ;;  %v17373_v26 = vld [vmem:[#allocation124_spill] sm:$0xff] }
 0x984   : > { %10701 = vtanh.f32 %v6266_v30  ;;  %v14273_v53 = vpop.permute.xlu1 %6222 }
 0x985   : > { %7130 = vmatpush.bf16.msra.mxu2 %v17341_v57  ;;  %10703 = vtanh.f32 %v6267_v41  ;;  %17352 = vst [vmem:[#allocation139_spill] sm:$0xff] %v14273_v53 }
 0x986   : > { %7486 = vmatpush.bf16.msrb.mxu0 %v17342_v38  ;;  %v14281_v38 = vor.u32 %v10436_v40, %v9833_v60  ;;  %v17357_v40 = vld [vmem:[#allocation268_spill] sm:$0xff] }
 0x987   : > { %v5564_v25 = vpop.f32.mrf.mxu0 }
 0x988   : > { %v5565_v15 = vadd.f32 %v5564_v25, %v17343_v63  ;;  %v5733_v33 = vpop.f32.mrf.mxu1 }
 0x989   : > { %v5734_v24 = vadd.f32 %v5733_v33, %v13321_v48  ;;  %7131 = vmatpush.bf16.msra.mxu2 %v17344_v42  ;;  %v9817_v48 = vld [vmem:[#allocation8] sm:$0xf] }
 0x98a   : > { %v6268_v47 = vadd.f32 %v14170_v20, %v5565_v15  ;;  %7487 = vmatpush.bf16.msrb.mxu0 %v17345_v56  ;;  %v14240_v5 = vpop.eup %10701  ;;  %v14243_v7 = vor.u32 %v10432_v44, %v9817_v48  ;;  %v17354_v56 = vld [vmem:[#allocation262_spill] sm:$0xff]  ;;  %v17377_v15 = vld [vmem:[#allocation116_spill] sm:$0xff] }
 0x98b   : > { %v6269_v13 = vadd.f32 %v14170_v20, %v5734_v24  ;;  %v17348_v20 = vld [vmem:[#allocation251_spill] sm:$0xff]  ;;  %v14245_v58 = vpop.eup %10703  ;;  %v14297_v24 = vpop.permute.xlu0 %6132 }
 0x98c   : > { %10705 = vtanh.f32 %v6268_v47  ;;  %v14302_v48 = vpop.permute.xlu1 %6137 }
 0x98d   : > { %10707 = vtanh.f32 %v6269_v13  ;;  %7132 = vmatpush.bf16.msra.mxu2 %v17346_v45 }
 0x98e   : > { %7488 = vmatpush.bf16.msrb.mxu0 %v17347_v52 }
 0x98f   : > { %v5567_v17 = vpop.f32.mrf.mxu0 }
 0x990   : > { %v5568_v61 = vadd.f32 %v5567_v17, %v17348_v20  ;;  %v5736_v54 = vpop.f32.mrf.mxu1  ;;  %v10440_v20 = vld [vmem:[#allocation8 + $0x4c] sm:$0xf0] }
 0x991   : > { %v5737_v3 = vadd.f32 %v5736_v54, %v13328_v18  ;;  %7133 = vmatpush.bf16.msra.mxu2 %v17349_v59  ;;  %v10162_v54 = vld [vmem:[%s16227_s2 + $0xa0] sm:$0xff] }
 0x992   : > { %v14251_v8 = vpop.eup %10705  ;;  %7489 = vmatpush.bf16.msrb.mxu0 %v17350_v6  ;;  %v6270_v35 = vadd.f32 %v13887_v36, %v5568_v61 }
 0x993   : > { %v14256_v19 = vpop.eup %10707  ;;  %9769 = vmatmul.msk.bf16.gmra.mxu0 %vm5411_vm0, %v10160_v22  ;;  %9801 = vmatmul.msk.bf16.gmra.mxu1 %vm5411_vm0, %v10160_v22  ;;  %v6271_v4 = vadd.f32 %v13887_v36, %v5737_v3  ;;  %v9849_v22 = vld [vmem:[#allocation8 + $0x40] sm:$0xf]  ;;  %v14307_v61 = vpop.permute.xlu0 %6217 }
 0x994   : > { %7134 = vmatmul.bf16.vlgmr.msra.gmra.mxu2 %v14243_v7  ;;  %10709 = vtanh.f32 %v6270_v35  ;;  %17355 = vst [vmem:[#allocation140_spill] sm:$0xff] %v14307_v61  ;;  %v14315_v35 = vor.u32 %v10440_v20, %v9849_v22 }
 0x995   : > { %10711 = vtanh.f32 %v6271_v4 }
 0x997   : > { %v5569_v12 = vpop.f32.mrf.mxu0 }
 0x998   : > { %v5570_v46 = vadd.f32 %v5569_v12, %v17351_v31  ;;  %v5738_v27 = vpop.f32.mrf.mxu1 }
 0x999   : > { %v5739_v2 = vadd.f32 %v5738_v27, %v13331_v34 }
 0x99a   : > { %v6272_v29 = vadd.f32 %v13900_v10, %v5570_v46  ;;  %v14278_v34 = vpop.eup %10709  ;;  %v14324_v46 = vpop.permute.xlu1 %6122 }
 0x99b   : > { %v6273_v43 = vadd.f32 %v13900_v10, %v5739_v2  ;;  %v14283_v41 = vpop.eup %10711 }
 0x99c   : > { %10713 = vtanh.f32 %v6272_v29  ;;  %v14333_v29 = vpop.permute.xlu2 %6142 }
 0x99d   : > { %10715 = vtanh.f32 %v6273_v43 }
 0x99f   : > { %v5572_v36 = vpop.f32.mrf.mxu0 }
 0x9a0   : > { %v5573_v57 = vadd.f32 %v5572_v36, %v17353_v9  ;;  %v5741_v30 = vpop.f32.mrf.mxu1  ;;  %v14338_v9 = vpop.permute.xlu0 %6202 }
 0x9a1   : > { %v5742_v10 = vadd.f32 %v5741_v30, %v13338_v14  ;;  %17358 = vst [vmem:[#allocation141_spill] sm:$0xff] %v14338_v9 }
 0x9a2   : > { %v14286_v25 = vpop.eup %10713  ;;  %v6274_v14 = vadd.f32 %v13926_v37, %v5573_v57 }
 0x9a3   : > { %v14288_v63 = vpop.eup %10715  ;;  %9770 = vmatmul.msk.bf16.gmra.mxu0 %vm5411_vm0, %v10161_v0  ;;  %9802 = vmatmul.msk.bf16.gmra.mxu1 %vm5411_vm0, %v10161_v0  ;;  %v6275_v42 = vadd.f32 %v13926_v37, %v5742_v10 }
 0x9a4   : > { %7139 = vmatmul.bf16.gmra.mxu2 %v14281_v38  ;;  %10717 = vtanh.f32 %v6274_v14  ;;  %v14343_v14 = vpop.permute.xlu1 %6207 }
 0x9a5   : > { %10719 = vtanh.f32 %v6275_v42  ;;  %17359 = vst [vmem:[#allocation142_spill] sm:$0xff] %v14343_v14  ;;  %v9865_v42 = vld [vmem:[#allocation8 + $0x60] sm:$0xf] }
 0x9a7   : > { %v5574_v47 = vpop.f32.mrf.mxu0 }
 0x9a8   : > { %v5575_v13 = vadd.f32 %v5574_v47, %v17354_v56  ;;  %v5743_v45 = vpop.f32.mrf.mxu1  ;;  %v10163_v56 = vld [vmem:[%s16227_s2 + $0xa8] sm:$0xff] }
 0x9a9   : > { %v5744_v44 = vadd.f32 %v5743_v45, %v13341_v16  ;;  %v17356_v16 = vld [vmem:[#allocation263_spill] sm:$0xff] }
 0x9aa   : > { %v6276_v52 = vadd.f32 %v13859_v55, %v5575_v13  ;;  %v14312_v3 = vpop.eup %10717 }
 0x9ab   : > { %v6277_v17 = vadd.f32 %v13859_v55, %v5744_v44  ;;  %v14317_v4 = vpop.eup %10719 }
 0x9ac   : > { %10721 = vtanh.f32 %v6276_v52 }
 0x9ad   : > { %10723 = vtanh.f32 %v6277_v17  ;;  %v17362_v17 = vld [vmem:[#allocation269_spill] sm:$0xff] }
 0x9af   : > { %v5577_v37 = vpop.f32.mrf.mxu0 }
 0x9b0   : > { %v5578_v59 = vadd.f32 %v5577_v37, %v17356_v16  ;;  %v5746_v6 = vpop.f32.mrf.mxu1  ;;  %v14361_v37 = vpop.permute.xlu0 %6117 }
 0x9b1   : > { %v5747_v55 = vadd.f32 %v5746_v6, %v13348_v39 }
 0x9b2   : > { %v14320_v12 = vpop.eup %10721  ;;  %v6278_v39 = vadd.f32 %v13816_v11, %v5578_v59  ;;  %v10452_v59 = vld [vmem:[#allocation8 + $0xac] sm:$0xf0] }
 0x9b3   : > { %v14322_v31 = vpop.eup %10723  ;;  %9771 = vmatmul.msk.bf16.gmra.mxu0 %vm5411_vm0, %v10162_v54  ;;  %9803 = vmatmul.msk.bf16.gmra.mxu1 %vm5411_vm0, %v10162_v54  ;;  %v6279_v43 = vadd.f32 %v13816_v11, %v5747_v55  ;;  %v10444_v11 = vld [vmem:[#allocation8 + $0x6c] sm:$0xf0]  ;;  %v17363_v54 = vld [vmem:[#allocation69_spill] sm:$0xff] }
 0x9b4   : > { %7144 = vmatmul.bf16.gmra.mxu2 %v14315_v35  ;;  %10725 = vtanh.f32 %v6278_v39  ;;  %v14352_v44 = vor.u32 %v10444_v11, %v9865_v42  ;;  %v17364_v55 = vld [vmem:[#allocation118_spill] sm:$0xff]  ;;  %v17369_v11 = vld [vmem:[#allocation121_spill] sm:$0xff] }
 0x9b5   : > { %10727 = vtanh.f32 %v6279_v43  ;;  %v14372_v43 = vpop.permute.xlu1 %6192 }
 0x9b6   : > { %17361 = vst [vmem:[#allocation146_spill] sm:$0xff] %v14352_v44 }
 0x9b7   : > { %v5579_v60 = vpop.f32.mrf.mxu0  ;;  %17365 = vst [vmem:[#allocation147_spill] sm:$0xff] %v14372_v43 }
 0x9b8   : > { %v5580_v36 = vadd.f32 %v5579_v60, %v17357_v40  ;;  %v5748_v0 = vpop.f32.mrf.mxu1 }
 0x9b9   : > { %v5749_v57 = vadd.f32 %v5748_v0, %v13351_v28  ;;  %v14350_v28 = vpop.permute.xlu2 %6227 }
 0x9ba   : > { %v6280_v30 = vadd.f32 %v13902_v21, %v5580_v36  ;;  %v14348_v13 = vpop.eup %10725  ;;  %17360 = vst [vmem:[#allocation145_spill] sm:$0xff] %v14350_v28  ;;  %v17366_v36 = vld [vmem:[#allocation274_spill] sm:$0xff] }
 0x9bb   : > { %v6281_v10 = vadd.f32 %v13902_v21, %v5749_v57  ;;  %v14354_v52 = vpop.eup %10727 }
 0x9bc   : > { %10729 = vtanh.f32 %v6280_v30  ;;  %v17367_v30 = vld [vmem:[#allocation70_spill] sm:$0xff] }
 0x9bd   : > { %10731 = vtanh.f32 %v6281_v10 }
 0x9bf   : > { %v5582_v47 = vpop.f32.mrf.mxu0 }
 0x9c0   : > { %v5751_v45 = vpop.f32.mrf.mxu1  ;;  %v5583_v22 = vadd.f32 %v5582_v47, %v17362_v17  ;;  %v9881_v17 = vld [vmem:[#allocation8 + $0x80] sm:$0xf] }
 0x9c1   : > { %v5752_v16 = vadd.f32 %v5751_v45, %v17363_v54  ;;  %v14377_v42 = vpop.permute.xlu2 %6212  ;;  %v14381_v45 = vpop.permute.xlu0 %6102 }
 0x9c2   : > { %v14356_v21 = vpop.eup %10729  ;;  %v6282_v39 = vadd.f32 %v17364_v55, %v5583_v22  ;;  %17368 = vst [vmem:[#allocation148_spill] sm:$0xff] %v14377_v42  ;;  %v10448_v22 = vld [vmem:[#allocation8 + $0x8c] sm:$0xf0] }
 0x9c3   : > { %v14359_v20 = vpop.eup %10731  ;;  %9772 = vmatmul.msk.bf16.gmra.mxu0 %vm5411_vm0, %v10163_v56  ;;  %9804 = vmatmul.msk.bf16.gmra.mxu1 %vm5411_vm0, %v10163_v56  ;;  %v6283_v60 = vadd.f32 %v17364_v55, %v5752_v16  ;;  %v10164_v16 = vld [vmem:[%s16227_s2 + $0xb0] sm:$0xff] }
 0x9c4   : > { %7149 = vmatmul.bf16.gmra.mxu2 %v14352_v44  ;;  %10733 = vtanh.f32 %v6282_v39  ;;  %v14388_v39 = vor.u32 %v10448_v22, %v9881_v17 }
 0x9c5   : > { %10735 = vtanh.f32 %v6283_v60  ;;  %v14392_v60 = vpop.permute.xlu1 %6107 }
 0x9c6   : > { %17370 = vst [vmem:[#allocation151_spill] sm:$0xff] %v14388_v39 }
 0x9c7   : > { %v5584_v40 = vpop.f32.mrf.mxu0 }
 0x9c8   : > { %v5585_v0 = vadd.f32 %v5584_v40, %v17366_v36  ;;  %v5753_v57 = vpop.f32.mrf.mxu1 }
 0x9c9   : > { %v5754_v10 = vadd.f32 %v5753_v57, %v17367_v30  ;;  %v17371_v57 = vld [vmem:[#allocation275_spill] sm:$0xff]  ;;  %v14404_v17 = vpop.permute.xlu2 %6127 }
 0x9ca   : > { %v6284_v47 = vadd.f32 %v17369_v11, %v5585_v0  ;;  %v14386_v55 = vpop.eup %10733 }
 0x9cb   : > { %v6285_v56 = vadd.f32 %v17369_v11, %v5754_v10  ;;  %v14390_v36 = vpop.eup %10735  ;;  %v17372_v11 = vld [vmem:[#allocation71_spill] sm:$0xff] }
 0x9cc   : > { %10737 = vtanh.f32 %v6284_v47 }
 0x9cd   : > { %10739 = vtanh.f32 %v6285_v56  ;;  %v14416_v27 = vpop.permute.xlu1 %6092 }
 0x9cf   : > { %v5587_v54 = vpop.f32.mrf.mxu0 }
 0x9d0   : > { %v5756_v40 = vpop.f32.mrf.mxu1  ;;  %v5588_v30 = vadd.f32 %v5587_v54, %v17371_v57  ;;  %v14410_v57 = vpop.permute.xlu0 %6187 }
 0x9d1   : > { %v5757_v47 = vadd.f32 %v5756_v40, %v17372_v11  ;;  %17374 = vst [vmem:[#allocation152_spill] sm:$0xff] %v14410_v57  ;;  %v14419_v22 = vpop.permute.xlu2 %6112 }
 0x9d2   : > { %v14394_v0 = vpop.eup %10737  ;;  %v6286_v54 = vadd.f32 %v17373_v26, %v5588_v30  ;;  %v9897_v30 = vld [vmem:[#allocation8 + $0xa0] sm:$0xf] }
 0x9d3   : > { %v14397_v10 = vpop.eup %10739  ;;  %9773 = vmatmul.msk.bf16.gmra.mxu0 %vm5411_vm0, %v10164_v16  ;;  %9805 = vmatmul.msk.bf16.gmra.mxu1 %vm5411_vm0, %v10164_v16  ;;  %v6287_v40 = vadd.f32 %v17373_v26, %v5757_v47 }
 0x9d4   : > { %7154 = vmatmul.bf16.gmra.mxu2 %v14388_v39  ;;  %10741 = vtanh.f32 %v6286_v54  ;;  %v14424_v54 = vor.u32 %v10452_v59, %v9897_v30  ;;  %v17382_v59 = vld [vmem:[#allocation109_spill] sm:$0xff] }
 0x9d5   : > { %10743 = vtanh.f32 %v6287_v40  ;;  %v14433_v53 = vpop.permute.xlu1 %6177 }
 0x9d6   : > { %17378 = vst [vmem:[#allocation153_spill] sm:$0xff] %v14424_v54 }
 0x9d7   : > { %v5589_v11 = vpop.f32.mrf.mxu0  ;;  %17381 = vst [vmem:[#allocation154_spill] sm:$0xff] %v14433_v53 }
 0x9d8   : > { %v5590_v18 = vadd.f32 %v5589_v11, %v17375_v32  ;;  %v5758_v16 = vpop.f32.mrf.mxu1  ;;  %v10165_v32 = vld [vmem:[%s16227_s2 + $0xb8] sm:$0xff]  ;;  %v14426_v11 = vpop.permute.xlu0 %6172 }
 0x9d9   : > { %v5759_v33 = vadd.f32 %v5758_v16, %v17376_v23  ;;  %v14437_v14 = vpop.permute.xlu2 %6197 }
 0x9da   : > { %v6288_v2 = vadd.f32 %v17377_v15, %v5590_v18  ;;  %v10742_v23 = vpop.eup %10741  ;;  %17383 = vst [vmem:[#allocation157_spill] sm:$0xff] %v14437_v14 }
 0x9db   : > { %v6289_v6 = vadd.f32 %v17377_v15, %v5759_v33  ;;  %v10744_v18 = vpop.eup %10743  ;;  %v17379_v15 = vld [vmem:[#allocation281_spill] sm:$0xff] }
 0x9dc   : > { %10745 = vtanh.f32 %v6288_v2 }
 0x9dd   : > { %10747 = vtanh.f32 %v6289_v6  ;;  %v17380_v6 = vld [vmem:[#allocation73_spill] sm:$0xff] }
 0x9df   : > { %v5592_v26 = vpop.f32.mrf.mxu0 }
 0x9e0   : > { %v5761_v47 = vpop.f32.mrf.mxu1  ;;  %v5593_v33 = vadd.f32 %v5592_v26, %v17379_v15  ;;  %v17384_v26 = vld [vmem:[#allocation286_spill] sm:$0xff] }
 0x9e1   : > { %v5762_v16 = vadd.f32 %v5761_v47, %v17380_v6  ;;  %v17385_v6 = vld [vmem:[#allocation74_spill] sm:$0xff] }
 0x9e2   : > { %v10746_v40 = vpop.eup %10745  ;;  %v6290_v30 = vadd.f32 %v17382_v59, %v5593_v33  ;;  %v9913_v33 = vld [vmem:[#allocation8 + $0xc0] sm:$0xf] }
 0x9e3   : > { %v10748_v2 = vpop.eup %10747  ;;  %9774 = vmatmul.msk.bf16.gmra.mxu0 %vm5411_vm0, %v10165_v32  ;;  %9806 = vmatmul.msk.bf16.gmra.mxu1 %vm5411_vm0, %v10165_v32  ;;  %v6514_v56 = vpack.c.bf16 %v10746_v40, %v10742_v23  ;;  %v6291_v61 = vadd.f32 %v17382_v59, %v5762_v16  ;;  %v17386_v32 = vld [vmem:[#allocation112_spill] sm:$0xff]  ;;  %v14442_v40 = vpop.permute.xlu0 %6087 }
 0x9e4   : > { %7159 = vmatmul.bf16.gmra.mxu2 %v14424_v54  ;;  %v6515_v28 = vpack.c.bf16 %v10748_v2, %v10744_v18  ;;  %10749 = vtanh.f32 %v6290_v30  ;;  %v10456_v2 = vld [vmem:[#allocation8 + $0xcc] sm:$0xf0]  ;;  %v14445_v16 = vpop.permute.xlu1 %6162 }
 0x9e5   : > { %10751 = vtanh.f32 %v6291_v61  ;;  %v17387_v30 = vld [vmem:[#allocation131_spill] sm:$0xff] }
 0x9e6   : > { %v17389_v54 = vld [vmem:[#allocation75_spill] sm:$0xff] }
 0x9e7   : > { %v5594_v42 = vpop.f32.mrf.mxu0 }
 0x9e8   : > { %v5595_v15 = vadd.f32 %v5594_v42, %v17384_v26  ;;  %v5763_v47 = vpop.f32.mrf.mxu1  ;;  %v10166_v42 = vld [vmem:[%s16227_s2 + $0xc0] sm:$0xff] }
 0x9e9   : > { %v5764_v9 = vadd.f32 %v5763_v47, %v17385_v6  ;;  %v14451_v6 = vor.u32 %v10456_v2, %v9913_v33 }
 0x9ea   : > { %v6292_v23 = vadd.f32 %v17386_v32, %v5595_v15  ;;  %v10750_v26 = vpop.eup %10749 }
 0x9eb   : > { %v6293_v18 = vadd.f32 %v17386_v32, %v5764_v9  ;;  %17388 = vst [vmem:[#allocation158_spill] sm:$0xff] %v14451_v6  ;;  %v10752_v61 = vpop.eup %10751  ;;  %v6073_v39 = vpop.permute.xlu0 %6072 }
 0x9ec   : > { %10753 = vtanh.f32 %v6292_v23  ;;  %v14454_v23 = vpop.permute.xlu2 %6182  ;;  %v6078_v57 = vpop.permute.xlu1 %6077 }
 0x9ed   : > { %10755 = vtanh.f32 %v6293_v18  ;;  %17390 = vst [vmem:[#allocation159_spill] sm:$0xff] %v14454_v23  ;;  %v17392_v23 = vld [vmem:[#allocation76_spill] sm:$0xff] }
 0x9ef   : > { %v5597_v59 = vpop.f32.mrf.mxu0 }
 0x9f0   : > { %v5598_v47 = vadd.f32 %v5597_v59, %v17387_v30  ;;  %v5766_v15 = vpop.f32.mrf.mxu1  ;;  %v17391_v30 = vld [vmem:[#allocation290_spill] sm:$0xff] }
 0x9f1   : > { %v5767_v9 = vadd.f32 %v5766_v15, %v17389_v54 }
 0x9f2   : > { %v10754_v32 = vpop.eup %10753  ;;  %v6294_v59 = vadd.f32 %v6073_v39, %v5598_v47  ;;  %v17394_v47 = vpack.c.bf16 %v14397_v10, %v14390_v36  ;;  %v17398_v36 = vpack.c.bf16 %v14356_v21, %v14348_v13  ;;  %v17400_v21 = vpack.c.bf16 %v14320_v12, %v14312_v3 }
 0x9f3   : > { %v10756_v18 = vpop.eup %10755  ;;  %9775 = vmatmul.msk.bf16.gmra.mxu0 %vm5411_vm0, %v10166_v42  ;;  %9807 = vmatmul.msk.bf16.gmra.mxu1 %vm5411_vm0, %v10166_v42  ;;  %v6516_v14 = vpack.c.bf16 %v10754_v32, %v10750_v26  ;;  %v6295_v33 = vadd.f32 %v6073_v39, %v5767_v9  ;;  %v10460_v39 = vld [vmem:[#allocation8 + $0xec] sm:$0xf0]  ;;  %v17397_v9 = vld [vmem:[#allocation77_spill] sm:$0xff]  ;;  %v17405_v3 = vpack.c.bf16 %v14288_v63, %v14283_v41 }
 0x9f4   : > { %7164 = vmatmul.bf16.gmra.mxu2 %v14451_v6  ;;  %v6517_v43 = vpack.c.bf16 %v10756_v18, %v10752_v61  ;;  %10757 = vtanh.f32 %v6294_v59  ;;  %v14461_v26 = vpop.permute.xlu2 %6097  ;;  %v17407_v41 = vpack.c.bf16 %v14256_v19, %v14245_v58  ;;  %v10168_v63 = vld [vmem:[%s16227_s2 + $0xd0] sm:$0xff]  ;;  %v17412_v58 = vpack.c.bf16 %v14200_v49, %v14191_v62  ;;  %v10442_v59 = vld [vmem:[#allocation8 + $0x64] sm:$0xf] }
 0x9f5   : > { %7215 = vmatpush.bf16.msra.mxu3 %v6516_v14  ;;  %10759 = vtanh.f32 %v6295_v33  ;;  %v17393_v14 = vpack.c.bf16 %v14394_v0, %v14386_v55  ;;  %v17396_v55 = vld [vmem:[#allocation137_spill] sm:$0xff] }
 0x9f6   : > { %7571 = vmatpush.bf16.msrb.mxu1 %v6517_v43  ;;  %v9929_v43 = vld [vmem:[#allocation8 + $0xe0] sm:$0xf] }
 0x9f7   : > { %v5599_v2 = vpop.f32.mrf.mxu0  ;;  %v17434_v62 = vld [vmem:[#allocation89_spill] sm:$0xff] }
 0x9f8   : > { %v5600_v54 = vadd.f32 %v5599_v2, %v17391_v30  ;;  %v5768_v15 = vpop.f32.mrf.mxu1 }
 0x9f9   : > { %v5769_v44 = vadd.f32 %v5768_v15, %v17392_v23  ;;  %7216 = vmatpush.bf16.msra.mxu3 %v6514_v56  ;;  %v17399_v23 = vpack.c.bf16 %v14359_v20, %v14354_v52  ;;  %v17401_v20 = vpack.c.bf16 %v14322_v31, %v14317_v4  ;;  %v17402_v15 = vld [vmem:[#allocation294_spill] sm:$0xff]  ;;  %v9945_v31 = vld [vmem:[#allocation8 + $0x100] sm:$0xf] }
 0x9fa   : > { %v6296_v53 = vadd.f32 %v6078_v57, %v5600_v54  ;;  %7572 = vmatpush.bf16.msrb.mxu1 %v6515_v28  ;;  %v10167_v28 = vld [vmem:[%s16227_s2 + $0xc8] sm:$0xff]  ;;  %v14472_v56 = vpop.eup %10757 }
 0x9fb   : > { %v6297_v42 = vadd.f32 %v6078_v57, %v5769_v44  ;;  %v14476_v61 = vpop.eup %10759 }
 0x9fc   : > { %10761 = vtanh.f32 %v6296_v53  ;;  %v14474_v53 = vor.u32 %v10460_v39, %v9929_v43  ;;  %v6083_v52 = vpop.permute.xlu2 %6082  ;;  %v17404_v39 = vpack.c.bf16 %v14286_v25, %v14278_v34  ;;  %v9819_v34 = vld [vmem:[#allocation8 + $0x10] sm:$0xf0]  ;;  %v14519_v25 = vpop.f32.mrf.mxu2 }
 0x9fd   : > { %10763 = vtanh.f32 %v6297_v42  ;;  %7217 = vmatpush.bf16.msra.mxu3 %v17393_v14  ;;  %v17403_v14 = vld [vmem:[#allocation78_spill] sm:$0xff]  ;;  %17408 = vst [vmem:[#allocation161_spill] sm:$0xff] %v14519_v25 }
 0x9fe   : > { %7573 = vmatpush.bf16.msrb.mxu1 %v17394_v47  ;;  %17395 = vst [vmem:[#allocation160_spill] sm:$0xff] %v14474_v53  ;;  %v17406_v47 = vpack.c.bf16 %v14251_v8, %v14240_v5 }
 0xa00   : > { %v5602_v44 = vpop.f32.mrf.mxu0  ;;  %v5771_v57 = vpop.f32.mrf.mxu1 }
 0xa01   : > { %v5603_v0 = vadd.f32 %v5602_v44, %v17396_v55  ;;  %v5772_v32 = vadd.f32 %v5771_v57, %v17397_v9  ;;  %7218 = vmatpush.bf16.msra.mxu3 %v17398_v36  ;;  %v10430_v44 = vld [vmem:[#allocation8 + $0x4] sm:$0xf] }
 0xa02   : > { %v14483_v10 = vpop.eup %10761  ;;  %7574 = vmatpush.bf16.msrb.mxu1 %v17399_v23  ;;  %v14526_v5 = vor.u32 %v10430_v44, %v9819_v34  ;;  %v17413_v23 = vpack.c.bf16 %v14205_v50, %v14194_v51 }
 0xa03   : > { %v14488_v18 = vpop.eup %10763  ;;  %9776 = vmatmul.msk.bf16.gmra.mxu0 %vm5411_vm0, %v10167_v28  ;;  %9808 = vmatmul.msk.bf16.gmra.mxu1 %vm5411_vm0, %v10167_v28  ;;  %v6298_v33 = vadd.f32 %v6083_v52, %v5603_v0  ;;  %v6299_v2 = vadd.f32 %v6083_v52, %v5772_v32  ;;  %v10464_v28 = vld [vmem:[#allocation8 + $0x10c] sm:$0xf0] }
 0xa04   : > { %7169 = vmatmul.bf16.gmra.mxu2 %v14474_v53  ;;  %v14524_v55 = vor.u32 %v10464_v28, %v9945_v31  ;;  %v17410_v0 = vld [vmem:[#allocation143_spill] sm:$0xff]  ;;  %v17448_v53 = vld [vmem:[#allocation313_spill] sm:$0xff] }
 0xa05   : > { %7219 = vmatpush.bf16.msra.mxu3 %v17400_v21  ;;  %10765 = vtanh.f32 %v6298_v33  ;;  %v17411_v32 = vld [vmem:[#allocation79_spill] sm:$0xff] }
 0xa06   : > { %7575 = vmatpush.bf16.msrb.mxu1 %v17401_v20  ;;  %10767 = vtanh.f32 %v6299_v2  ;;  %17409 = vst [vmem:[#allocation162_spill] sm:$0xff] %v14524_v55 }
 0xa08   : > { %v5604_v30 = vpop.f32.mrf.mxu0  ;;  %v5773_v54 = vpop.f32.mrf.mxu1 }
 0xa09   : > { %v5605_v42 = vadd.f32 %v5604_v30, %v17402_v15  ;;  %v5774_v43 = vadd.f32 %v5773_v54, %v17403_v14  ;;  %7220 = vmatpush.bf16.msra.mxu3 %v17404_v39  ;;  %v17414_v30 = vld [vmem:[#allocation298_spill] sm:$0xff]  ;;  %v17415_v15 = vld [vmem:[#allocation80_spill] sm:$0xff] }
 0xa0a   : > { %7576 = vmatpush.bf16.msrb.mxu1 %v17405_v3  ;;  %v9961_v39 = vld [vmem:[#allocation8 + $0x120] sm:$0xf]  ;;  %v10468_v3 = vld [vmem:[#allocation8 + $0x12c] sm:$0xf0] }
 0xa0b   : > { %v6300_v4 = vadd.f32 %v14442_v40, %v5605_v42  ;;  %v6301_v12 = vadd.f32 %v14442_v40, %v5774_v43  ;;  %v14528_v8 = vpop.eup %10765  ;;  %v14565_v44 = vor.u32 %v10468_v3, %v9961_v39  ;;  %v9977_v3 = vld [vmem:[#allocation8 + $0x140] sm:$0xf] }
 0xa0c   : > { %v14535_v19 = vpop.eup %10767 }
 0xa0d   : > { %10769 = vtanh.f32 %v6300_v4  ;;  %7221 = vmatpush.bf16.msra.mxu3 %v17406_v47  ;;  %v10434_v4 = vld [vmem:[#allocation8 + $0x24] sm:$0xf]  ;;  %17416 = vst [vmem:[#allocation163_spill] sm:$0xff] %v14565_v44 }
 0xa0e   : > { %10771 = vtanh.f32 %v6301_v12  ;;  %7577 = vmatpush.bf16.msrb.mxu1 %v17407_v41  ;;  %v9835_v12 = vld [vmem:[#allocation8 + $0x30] sm:$0xf0]  ;;  %v17417_v41 = vld [vmem:[#allocation149_spill] sm:$0xff] }
 0xa0f   : > { %v14567_v34 = vor.u32 %v10434_v4, %v9835_v12  ;;  %v10472_v4 = vld [vmem:[#allocation8 + $0x14c] sm:$0xf0]  ;;  %v10438_v12 = vld [vmem:[#allocation8 + $0x44] sm:$0xf] }
 0xa10   : > { %v5607_v40 = vpop.f32.mrf.mxu0  ;;  %v5776_v57 = vpop.f32.mrf.mxu1 }
 0xa11   : > { %v5608_v9 = vadd.f32 %v5607_v40, %v17410_v0  ;;  %v5777_v36 = vadd.f32 %v5776_v57, %v17411_v32  ;;  %7222 = vmatpush.bf16.msra.mxu3 %v17412_v58  ;;  %v17418_v40 = vld [vmem:[#allocation81_spill] sm:$0xff] }
 0xa12   : > { %7578 = vmatpush.bf16.msrb.mxu1 %v17413_v23  ;;  %v14587_v23 = vpop.permute.xlu2 %6167 }
 0xa13   : > { %v14540_v21 = vpop.eup %10769  ;;  %9777 = vmatmul.msk.bf16.gmra.mxu0 %vm5411_vm0, %v10168_v63  ;;  %9809 = vmatmul.msk.bf16.gmra.mxu1 %vm5411_vm0, %v10168_v63  ;;  %v6302_v51 = vadd.f32 %v14416_v27, %v5608_v9  ;;  %v6303_v20 = vadd.f32 %v14416_v27, %v5777_v36  ;;  %v10169_v27 = vld [vmem:[%s16227_s2 + $0xd8] sm:$0xff] }
 0xa14   : > { %v14544_v52 = vpop.eup %10771  ;;  %7174 = vmatmul.bf16.gmra.mxu2 %v14524_v55  ;;  %7223 = vmatmul.bf16.vlgmr.msra.gmra.mxu3 %v14526_v5 }
 0xa15   : > { %10773 = vtanh.f32 %v6302_v51 }
 0xa16   : > { %10775 = vtanh.f32 %v6303_v20 }
 0xa17   : > { %v14553_v50 = vpop.f32.mrf.mxu2 }
 0xa18   : > { %v5609_v33 = vpop.f32.mrf.mxu0  ;;  %v5778_v2 = vpop.f32.mrf.mxu1 }
 0xa19   : > { %v5610_v54 = vadd.f32 %v5609_v33, %v17414_v30  ;;  %v5779_v42 = vadd.f32 %v5778_v2, %v17415_v15 }
 0xa1b   : > { %v6304_v14 = vadd.f32 %v14461_v26, %v5610_v54  ;;  %v6305_v43 = vadd.f32 %v14461_v26, %v5779_v42  ;;  %v14569_v26 = vpop.eup %10773  ;;  %v17419_v54 = vld [vmem:[#allocation302_spill] sm:$0xff] }
 0xa1c   : > { %v14573_v0 = vpop.eup %10775  ;;  %v17420_v42 = vld [vmem:[#allocation82_spill] sm:$0xff] }
 0xa1d   : > { %10777 = vtanh.f32 %v6304_v14 }
 0xa1e   : > { %10779 = vtanh.f32 %v6305_v43 }
 0xa1f   : > { %v14560_v31 = vpop.f32.mrf.mxu2 }
 0xa20   : > { %v5612_v47 = vpop.f32.mrf.mxu0  ;;  %v5781_v28 = vpop.f32.mrf.mxu1 }
 0xa21   : > { %v5613_v63 = vadd.f32 %v5612_v47, %v17417_v41  ;;  %v5782_v57 = vadd.f32 %v5781_v28, %v17418_v40 }
 0xa23   : > { %v14575_v9 = vpop.eup %10777  ;;  %9778 = vmatmul.msk.bf16.gmra.mxu0 %vm5411_vm0, %v10169_v27  ;;  %9810 = vmatmul.msk.bf16.gmra.mxu1 %vm5411_vm0, %v10169_v27  ;;  %v6306_v51 = vadd.f32 %v14381_v45, %v5613_v63  ;;  %v6307_v33 = vadd.f32 %v14381_v45, %v5782_v57  ;;  %v9851_v27 = vld [vmem:[#allocation8 + $0x50] sm:$0xf0]  ;;  %v10170_v45 = vld [vmem:[%s16227_s2 + $0xe0] sm:$0xff]  ;;  %v14602_v63 = vor.u32 %v10472_v4, %v9977_v3  ;;  %v14608_v57 = vpop.permute.xlu2 %6152 }
 0xa24   : > { %v14579_v32 = vpop.eup %10779  ;;  %7179 = vmatmul.bf16.gmra.mxu2 %v14565_v44  ;;  %7228 = vmatmul.bf16.gmra.mxu3 %v14567_v34  ;;  %v14604_v40 = vor.u32 %v10438_v12, %v9851_v27  ;;  %v17426_v12 = vld [vmem:[#allocation86_spill] sm:$0xff] }
 0xa25   : > { %10781 = vtanh.f32 %v6306_v51  ;;  %17421 = vst [vmem:[#allocation164_spill] sm:$0xff] %v14602_v63  ;;  %v17422_v51 = vld [vmem:[#allocation155_spill] sm:$0xff] }
 0xa26   : > { %10783 = vtanh.f32 %v6307_v33 }
 0xa27   : > { %v14590_v20 = vpop.f32.mrf.mxu2 }
 0xa28   : > { %v5614_v2 = vpop.f32.mrf.mxu0  ;;  %v5783_v30 = vpop.f32.mrf.mxu1 }
 0xa29   : > { %v5615_v15 = vadd.f32 %v5614_v2, %v17419_v54  ;;  %v5784_v14 = vadd.f32 %v5783_v30, %v17420_v42  ;;  %v17423_v2 = vld [vmem:[#allocation83_spill] sm:$0xff]  ;;  %v17424_v42 = vld [vmem:[#allocation84_spill] sm:$0xff] }
 0xa2b   : > { %v6308_v43 = vadd.f32 %v14392_v60, %v5615_v15  ;;  %v6309_v39 = vadd.f32 %v14392_v60, %v5784_v14  ;;  %v14606_v60 = vpop.eup %10781  ;;  %v17425_v14 = vld [vmem:[#allocation85_spill] sm:$0xff]  ;;  %v14636_v58 = vpop.permute.xlu2 %6723 }
 0xa2c   : > { %v14612_v54 = vpop.eup %10783  ;;  %17429 = vst [vmem:[#allocation166_spill] sm:$0xff] %v14636_v58 }
 0xa2d   : > { %10785 = vtanh.f32 %v6308_v43  ;;  %v5025_v43 = vadd.f32 %v17425_v14, %v17424_v42  ;;  %v14633_v42 = vpop.permute.xlu0 %6157  ;;  %v17428_v14 = vld [vmem:[#allocation306_spill] sm:$0xff] }
 0xa2e   : > { %10787 = vtanh.f32 %v6309_v39 }
 0xa2f   : > { %v14597_v47 = vpop.f32.mrf.mxu2  ;;  %v5194_v27 = vadd.f32 %v17426_v12, %v5025_v43  ;;  %v10476_v12 = vld [vmem:[#allocation8 + $0x16c] sm:$0xf0] }
 0xa30   : > { %v5617_v28 = vpop.f32.mrf.mxu0  ;;  %v5786_v41 = vpop.f32.mrf.mxu1 }
 0xa31   : > { %v5618_v33 = vadd.f32 %v5617_v28, %v17422_v51  ;;  %v5787_v30 = vadd.f32 %v5786_v41, %v17423_v2 }
 0xa33   : > { %v14614_v15 = vpop.eup %10785  ;;  %9779 = vmatmul.msk.bf16.gmra.mxu0 %vm5411_vm0, %v10170_v45  ;;  %9811 = vmatmul.msk.bf16.gmra.mxu1 %vm5411_vm0, %v10170_v45  ;;  %v6310_v28 = vadd.f32 %v14419_v22, %v5618_v33  ;;  %v6311_v45 = vadd.f32 %v14419_v22, %v5787_v30  ;;  %v9993_v33 = vld [vmem:[#allocation8 + $0x160] sm:$0xf]  ;;  %v9867_v22 = vld [vmem:[#allocation8 + $0x70] sm:$0xf0] }
 0xa34   : > { %v14620_v39 = vpop.eup %10787  ;;  %7184 = vmatmul.bf16.gmra.mxu2 %v14602_v63  ;;  %7233 = vmatmul.bf16.gmra.mxu3 %v14604_v40  ;;  %v17436_v63 = vld [vmem:[#allocation307_spill] sm:$0xff] }
 0xa35   : > { %10789 = vtanh.f32 %v6310_v28  ;;  %v14645_v28 = vor.u32 %v10476_v12, %v9993_v33  ;;  %v14658_v3 = vpop.permute.xlu0 %6798 }
 0xa36   : > { %10791 = vtanh.f32 %v6311_v45  ;;  %17435 = vst [vmem:[#allocation169_spill] sm:$0xff] %v14658_v3 }
 0xa37   : > { %v14630_v41 = vpop.f32.mrf.mxu2  ;;  %17431 = vst [vmem:[#allocation168_spill] sm:$0xff] %v14645_v28 }
 0xa38   : > { %17427 = vst [vmem:[#allocation165_spill] sm:$0xff] %v14630_v41  ;;  %v5619_v51 = vpop.f32.mrf.mxu0  ;;  %v5788_v2 = vpop.f32.mrf.mxu1 }
 0xa39   : > { %v5620_v13 = vadd.f32 %v5619_v51, %v17428_v14  ;;  %v5789_v49 = vadd.f32 %v5788_v2, %v5194_v27  ;;  %v10171_v27 = vld [vmem:[%s16227_s2 + $0xe8] sm:$0xff] }
 0xa3b   : > { %v6312_v4 = vadd.f32 %v14361_v37, %v5620_v13  ;;  %v6313_v43 = vadd.f32 %v14361_v37, %v5789_v49  ;;  %v14647_v13 = vor.u32 %v10442_v59, %v9867_v22  ;;  %v14649_v37 = vpop.eup %10789  ;;  %v17432_v49 = vld [vmem:[#allocation87_spill] sm:$0xff]  ;;  %v17438_v22 = vld [vmem:[#allocation90_spill] sm:$0xff] }
 0xa3c   : > { %v14652_v45 = vpop.eup %10791 }
 0xa3d   : > { %10793 = vtanh.f32 %v6312_v4  ;;  %v14681_v55 = vpop.permute.xlu0 %6713 }
 0xa3e   : > { %10795 = vtanh.f32 %v6313_v43  ;;  %v17433_v43 = vld [vmem:[#allocation88_spill] sm:$0xff]  ;;  %17441 = vst [vmem:[#allocation172_spill] sm:$0xff] %v14681_v55 }
 0xa3f   : > { %v14640_v30 = vpop.f32.mrf.mxu2  ;;  %v5030_v36 = vadd.f32 %v17434_v62, %v17433_v43  ;;  %v14670_v62 = vpop.permute.xlu2 %6708  ;;  %v17440_v43 = vld [vmem:[#allocation312_spill] sm:$0xff] }
 0xa40   : > { %17430 = vst [vmem:[#allocation167_spill] sm:$0xff] %v14640_v30  ;;  %v5622_v51 = vpop.f32.mrf.mxu0  ;;  %v5791_v2 = vpop.f32.mrf.mxu1  ;;  %v17464_v30 = vld [vmem:[#allocation319_spill] sm:$0xff] }
 0xa41   : > { %v5792_v4 = vadd.f32 %v5791_v2, %v17432_v49  ;;  %v5623_v58 = vadd.f32 %v5622_v51, %v17436_v63  ;;  %17437 = vst [vmem:[#allocation170_spill] sm:$0xff] %v14670_v62  ;;  %v5199_v51 = vadd.f32 %v17438_v22, %v5030_v36  ;;  %v10009_v62 = vld [vmem:[#allocation8 + $0x180] sm:$0xf]  ;;  %v10480_v36 = vld [vmem:[#allocation8 + $0x18c] sm:$0xf0] }
 0xa42   : > { %v10446_v22 = vld [vmem:[#allocation8 + $0x84] sm:$0xf] }
 0xa43   : > { %v14654_v14 = vpop.eup %10793  ;;  %v6315_v33 = vadd.f32 %v14324_v46, %v5792_v4  ;;  %9780 = vmatmul.msk.bf16.gmra.mxu0 %vm5411_vm0, %v10171_v27  ;;  %9812 = vmatmul.msk.bf16.gmra.mxu1 %vm5411_vm0, %v10171_v27  ;;  %v6314_v2 = vadd.f32 %v14324_v46, %v5623_v58  ;;  %v9883_v46 = vld [vmem:[#allocation8 + $0x90] sm:$0xf0] }
 0xa44   : > { %v14664_v59 = vpop.eup %10795  ;;  %7189 = vmatmul.bf16.gmra.mxu2 %v14645_v28  ;;  %7238 = vmatmul.bf16.gmra.mxu3 %v14647_v13 }
 0xa45   : > { %10797 = vtanh.f32 %v6314_v2 }
 0xa46   : > { %10799 = vtanh.f32 %v6315_v33 }
 0xa47   : > { %v14676_v49 = vpop.f32.mrf.mxu2  ;;  %v14683_v58 = vpop.permute.xlu2 %6793 }
 0xa48   : > { %17439 = vst [vmem:[#allocation171_spill] sm:$0xff] %v14676_v49  ;;  %v5624_v27 = vpop.f32.mrf.mxu0  ;;  %v5793_v4 = vpop.f32.mrf.mxu1 }
 0xa49   : > { %v5625_v3 = vadd.f32 %v5624_v27, %v17440_v43  ;;  %v5794_v28 = vadd.f32 %v5793_v4, %v5199_v51  ;;  %17442 = vst [vmem:[#allocation173_spill] sm:$0xff] %v14683_v58  ;;  %v10172_v51 = vld [vmem:[%s16227_s2 + $0xf0] sm:$0xff]  ;;  %v17446_v43 = vld [vmem:[#allocation92_spill] sm:$0xff]  ;;  %v17447_v58 = vld [vmem:[#allocation93_spill] sm:$0xff] }
 0xa4a   : > { %v5035_v55 = vadd.f32 %v17447_v58, %v17446_v43 }
 0xa4b   : > { %v6316_v44 = vadd.f32 %v14404_v17, %v5625_v3  ;;  %v6317_v12 = vadd.f32 %v14404_v17, %v5794_v28  ;;  %v14690_v17 = vor.u32 %v10480_v36, %v10009_v62  ;;  %v14692_v28 = vor.u32 %v10446_v22, %v9883_v46  ;;  %v14694_v33 = vpop.eup %10797  ;;  %v14713_v22 = vpop.permute.xlu1 %6718  ;;  %v17450_v46 = vld [vmem:[#allocation94_spill] sm:$0xff] }
 0xa4c   : > { %v14697_v4 = vpop.eup %10799  ;;  %17449 = vst [vmem:[#allocation176_spill] sm:$0xff] %v14713_v22  ;;  %v5204_v58 = vadd.f32 %v17450_v46, %v5035_v55  ;;  %v10025_v55 = vld [vmem:[#allocation8 + $0x1a0] sm:$0xf]  ;;  %v10484_v46 = vld [vmem:[#allocation8 + $0x1ac] sm:$0xf0] }
 0xa4d   : > { %10801 = vtanh.f32 %v6316_v44  ;;  %17444 = vst [vmem:[#allocation175_spill] sm:$0xff] %v14690_v17  ;;  %v17445_v44 = vld [vmem:[#allocation91_spill] sm:$0xff] }
 0xa4e   : > { %10803 = vtanh.f32 %v6317_v12 }
 0xa4f   : > { %v14685_v63 = vpop.f32.mrf.mxu2  ;;  %v14723_v43 = vpop.permute.xlu2 %6778 }
 0xa50   : > { %17443 = vst [vmem:[#allocation174_spill] sm:$0xff] %v14685_v63  ;;  %v5627_v3 = vpop.f32.mrf.mxu0  ;;  %v5796_v2 = vpop.f32.mrf.mxu1 }
 0xa51   : > { %v5797_v27 = vadd.f32 %v5796_v2, %v17445_v44  ;;  %v5628_v25 = vadd.f32 %v5627_v3, %v17448_v53  ;;  %v14718_v3 = vpop.permute.xlu0 %6698  ;;  %17453 = vst [vmem:[#allocation179_spill] sm:$0xff] %v14723_v43  ;;  %v17462_v43 = vld [vmem:[#allocation97_spill] sm:$0xff] }
 0xa52   : > { %17451 = vst [vmem:[#allocation177_spill] sm:$0xff] %v14718_v3  ;;  %v10450_v3 = vld [vmem:[#allocation8 + $0xa4] sm:$0xf] }
 0xa53   : > { %v14699_v12 = vpop.eup %10801  ;;  %v6319_v6 = vadd.f32 %v14297_v24, %v5797_v27  ;;  %9781 = vmatmul.msk.bf16.gmra.mxu0 %vm5411_vm0, %v10172_v51  ;;  %9813 = vmatmul.msk.bf16.gmra.mxu1 %vm5411_vm0, %v10172_v51  ;;  %v6318_v51 = vadd.f32 %v14297_v24, %v5628_v25  ;;  %v9899_v24 = vld [vmem:[#allocation8 + $0xb0] sm:$0xf0]  ;;  %v14728_v25 = vpop.permute.xlu1 %6803 }
 0xa54   : > { %v14707_v62 = vpop.eup %10803  ;;  %7194 = vmatmul.bf16.gmra.mxu2 %v14690_v17  ;;  %7243 = vmatmul.bf16.gmra.mxu3 %v14692_v28  ;;  %v17454_v17 = vld [vmem:[#allocation318_spill] sm:$0xff]  ;;  %17455 = vst [vmem:[#allocation180_spill] sm:$0xff] %v14728_v25  ;;  %v17461_v25 = vld [vmem:[#allocation96_spill] sm:$0xff] }
 0xa55   : > { %10805 = vtanh.f32 %v6318_v51 }
 0xa56   : > { %10807 = vtanh.f32 %v6319_v6 }
 0xa57   : > { %v14721_v2 = vpop.f32.mrf.mxu2  ;;  %v14748_v49 = vpop.permute.xlu2 %6693 }
 0xa58   : > { %17452 = vst [vmem:[#allocation178_spill] sm:$0xff] %v14721_v2  ;;  %v5629_v44 = vpop.f32.mrf.mxu0  ;;  %v5798_v27 = vpop.f32.mrf.mxu1 }
 0xa59   : > { %v5630_v63 = vadd.f32 %v5629_v44, %v17454_v17  ;;  %v5799_v36 = vadd.f32 %v5798_v27, %v5204_v58  ;;  %v10173_v17 = vld [vmem:[%s16227_s2 + $0xf8] sm:$0xff]  ;;  %17463 = vst [vmem:[#allocation189_spill] sm:$0xff] %v14748_v49 }
 0xa5b   : > { %v6320_v22 = vadd.f32 %v14302_v48, %v5630_v63  ;;  %v6321_v53 = vadd.f32 %v14302_v48, %v5799_v36  ;;  %v14735_v63 = vor.u32 %v10484_v46, %v10025_v55  ;;  %v14737_v48 = vor.u32 %v10450_v3, %v9899_v24  ;;  %v14739_v6 = vpop.eup %10805  ;;  %v14741_v36 = vpop.permute.xlu0 %6783  ;;  %v17465_v24 = vld [vmem:[#allocation98_spill] sm:$0xff] }
 0xa5c   : > { %17459 = vst [vmem:[#allocation186_spill] sm:$0xff] %v14741_v36  ;;  %v14744_v44 = vpop.eup %10807 }
 0xa5d   : > { %10809 = vtanh.f32 %v6320_v22  ;;  %17457 = vst [vmem:[#allocation184_spill] sm:$0xff] %v14735_v63  ;;  %v17460_v22 = vld [vmem:[#allocation95_spill] sm:$0xff] }
 0xa5e   : > { %10811 = vtanh.f32 %v6321_v53  ;;  %17458 = vst [vmem:[#allocation185_spill] sm:$0xff] %v14737_v48 }
 0xa5f   : > { %v14730_v2 = vpop.f32.mrf.mxu2 }
 0xa60   : > { %17456 = vst [vmem:[#allocation183_spill] sm:$0xff] %v14730_v2  ;;  %v5632_v58 = vpop.f32.mrf.mxu0  ;;  %v5801_v51 = vpop.f32.mrf.mxu1  ;;  %v5040_v2 = vadd.f32 %v17462_v43, %v17461_v25  ;;  %v9915_v43 = vld [vmem:[#allocation8 + $0xd0] sm:$0xf0] }
 0xa61   : > { %v5802_v53 = vadd.f32 %v5801_v51, %v17460_v22  ;;  %v5633_v41 = vadd.f32 %v5632_v58, %v17464_v30 }
 0xa62   : > { %v5209_v25 = vadd.f32 %v17465_v24, %v5040_v2  ;;  %v10041_v2 = vld [vmem:[#allocation8 + $0x1c0] sm:$0xf]  ;;  %v14772_v24 = vpop.permute.xlu2 %6678 }
 0xa63   : > { %v10810_v27 = vpop.eup %10809  ;;  %v6323_v55 = vadd.f32 %v14333_v29, %v5802_v53  ;;  %9782 = vmatmul.msk.bf16.gmra.mxu0 %vm5411_vm0, %v10173_v17  ;;  %9814 = vmatmul.msk.bf16.gmra.mxu1 %vm5411_vm0, %v10173_v17  ;;  %v6322_v30 = vadd.f32 %v14333_v29, %v5633_v41  ;;  %v14765_v17 = vpop.permute.xlu1 %6788  ;;  %v17468_v53 = vld [vmem:[#allocation320_spill] sm:$0xff]  ;;  %17470 = vst [vmem:[#allocation195_spill] sm:$0xff] %v14772_v24  ;;  %v10488_v29 = vld [vmem:[#allocation8 + $0x1cc] sm:$0xf0]  ;;  %v10454_v41 = vld [vmem:[#allocation8 + $0xc4] sm:$0xf] }
 0xa64   : > { %v14754_v3 = vpop.eup %10811  ;;  %7199 = vmatmul.bf16.gmra.mxu2 %v14735_v63  ;;  %7248 = vmatmul.bf16.gmra.mxu3 %v14737_v48  ;;  %v6530_v46 = vpack.c.bf16 %v10810_v27, %v14739_v6  ;;  %17467 = vst [vmem:[#allocation191_spill] sm:$0xff] %v14765_v17  ;;  %v14768_v49 = vpop.permute.xlu0 %6768  ;;  %v17475_v24 = vld [vmem:[#allocation101_spill] sm:$0xff] }
 0xa65   : > { %17469 = vst [vmem:[#allocation192_spill] sm:$0xff] %v14768_v49  ;;  %10813 = vtanh.f32 %v6322_v30  ;;  %v14778_v30 = vor.u32 %v10454_v41, %v9915_v43 }
 0xa66   : > { %10815 = vtanh.f32 %v6323_v55 }
 0xa67   : > { %v14763_v58 = vpop.f32.mrf.mxu2 }
 0xa68   : > { %17466 = vst [vmem:[#allocation190_spill] sm:$0xff] %v14763_v58  ;;  %v5634_v51 = vpop.f32.mrf.mxu0  ;;  %v5803_v22 = vpop.f32.mrf.mxu1  ;;  %v17474_v58 = vld [vmem:[#allocation100_spill] sm:$0xff] }
 0xa69   : > { %v5635_v36 = vadd.f32 %v5634_v51, %v17468_v53  ;;  %v5804_v63 = vadd.f32 %v5803_v22, %v5209_v25  ;;  %v14776_v22 = vor.u32 %v10488_v29, %v10041_v2  ;;  %v17472_v53 = vld [vmem:[#allocation27_spill] sm:$0xff]  ;;  %v5045_v48 = vadd.f32 %v17475_v24, %v17474_v58  ;;  %v17478_v58 = vld [vmem:[#allocation102_spill] sm:$0xff] }
 0xa6b   : > { %v6324_v6 = vadd.f32 %v14270_v1, %v5635_v36  ;;  %v6325_v27 = vadd.f32 %v14270_v1, %v5804_v63  ;;  %17471 = vst [vmem:[#allocation196_spill] sm:$0xff] %v14776_v22  ;;  %v10814_v36 = vpop.eup %10813  ;;  %v17473_v63 = vld [vmem:[#allocation99_spill] sm:$0xff]  ;;  %v5214_v24 = vadd.f32 %v17478_v58, %v5045_v48  ;;  %v10057_v48 = vld [vmem:[#allocation8 + $0x1e0] sm:$0xf] }
 0xa6c   : > { %v14782_v49 = vpop.eup %10815  ;;  %v14794_v29 = vpop.permute.xlu0 %6683 }
 0xa6d   : > { %10817 = vtanh.f32 %v6324_v6  ;;  %17477 = vst [vmem:[#allocation198_spill] sm:$0xff] %v14794_v29 }
 0xa6e   : > { %10819 = vtanh.f32 %v6325_v27  ;;  %v14786_v27 = vpop.permute.xlu1 %6703 }
 0xa6f   : > { %v14774_v17 = vpop.f32.mrf.mxu2  ;;  %17476 = vst [vmem:[#allocation197_spill] sm:$0xff] %v14786_v27 }
 0xa70   : > { %v5637_v51 = vpop.f32.mrf.mxu0  ;;  %v5806_v25 = vpop.f32.mrf.mxu1 }
 0xa71   : > { %v5638_v1 = vadd.f32 %v5637_v51, %v17472_v53  ;;  %v5807_v55 = vadd.f32 %v5806_v25, %v17473_v63  ;;  %v14799_v51 = vpop.permute.xlu2 %6763 }
 0xa72   : > { %17479 = vst [vmem:[#allocation201_spill] sm:$0xff] %v14799_v51  ;;  %v10458_v51 = vld [vmem:[#allocation8 + $0xe4] sm:$0xf] }
 0xa73   : > { %v10818_v6 = vpop.eup %10817  ;;  %7490 = vmatmul.bf16.vlgmr.msrb.gmra.mxu0 %v14243_v7  ;;  %7579 = vmatmul.bf16.vlgmr.msrb.gmra.mxu1 %v14526_v5  ;;  %v6326_v7 = vadd.f32 %v14608_v57, %v5638_v1  ;;  %v6327_v25 = vadd.f32 %v14608_v57, %v5807_v55  ;;  %v10492_v1 = vld [vmem:[#allocation8 + $0x1ec] sm:$0xf0]  ;;  %v17483_v57 = vpack.c.bf16 %v14699_v12, %v14694_v33 }
 0xa74   : > { %v14790_v2 = vpop.eup %10819  ;;  %7204 = vmatmul.bf16.gmra.mxu2 %v14776_v22  ;;  %7253 = vmatmul.bf16.gmra.mxu3 %v14778_v30  ;;  %v6532_v43 = vpack.c.bf16 %v10818_v6, %v10814_v36  ;;  %v17481_v22 = vld [vmem:[#allocation28_spill] sm:$0xff]  ;;  %v17489_v12 = vpack.c.bf16 %v14654_v14, %v14649_v37  ;;  %v17493_v14 = vpack.c.bf16 %v14614_v15, %v14606_v60 }
 0xa75   : > { %10821 = vtanh.f32 %v6326_v7  ;;  %v17498_v60 = vpack.c.bf16 %v14575_v9, %v14569_v26  ;;  %v14869_v26 = vpop.f32.mrf.mxu3 }
 0xa76   : > { %7304 = vmatpush.bf16.msrb.mxu2 %v6532_v43  ;;  %10823 = vtanh.f32 %v6327_v25  ;;  %v14808_v58 = vpop.permute.xlu1 %6688 }
 0xa77   : > { %v14802_v5 = vpop.f32.mrf.mxu2  ;;  %17482 = vst [vmem:[#allocation203_spill] sm:$0xff] %v14808_v58 }
 0xa78   : > { %17480 = vst [vmem:[#allocation202_spill] sm:$0xff] %v14802_v5  ;;  %v5639_v53 = vpop.f32.mrf.mxu0  ;;  %v5808_v63 = vpop.f32.mrf.mxu1  ;;  %v9931_v5 = vld [vmem:[#allocation8 + $0xf0] sm:$0xf0] }
 0xa79   : > { %v5640_v36 = vadd.f32 %v5639_v53, %v17481_v22  ;;  %v5809_v6 = vadd.f32 %v5808_v63, %v5214_v24  ;;  %v14813_v22 = vpop.permute.xlu0 %6668  ;;  %v14819_v7 = vor.u32 %v10458_v51, %v9931_v5  ;;  %v17486_v53 = vld [vmem:[#allocation29_spill] sm:$0xff] }
 0xa7a   : > { %7305 = vmatpush.bf16.msrb.mxu2 %v6530_v46 }
 0xa7b   : > { %v6328_v41 = vadd.f32 %v14633_v42, %v5640_v36  ;;  %v6329_v43 = vadd.f32 %v14633_v42, %v5809_v6  ;;  %v14817_v42 = vor.u32 %v10492_v1, %v10057_v48  ;;  %v14821_v25 = vpop.eup %10821  ;;  %v17487_v36 = vld [vmem:[#allocation103_spill] sm:$0xff]  ;;  %v17490_v48 = vld [vmem:[#allocation104_spill] sm:$0xff]  ;;  %v17491_v1 = vld [vmem:[#allocation105_spill] sm:$0xff] }
 0xa7c   : > { %v14827_v33 = vpop.eup %10823  ;;  %v5050_v51 = vadd.f32 %v17491_v1, %v17490_v48 }
 0xa7d   : > { %10825 = vtanh.f32 %v6328_v41  ;;  %17484 = vst [vmem:[#allocation204_spill] sm:$0xff] %v14817_v42  ;;  %v14823_v41 = vpop.permute.xlu2 %6748 }
 0xa7e   : > { %10827 = vtanh.f32 %v6329_v43  ;;  %7306 = vmatpush.bf16.msrb.mxu2 %v17483_v57  ;;  %17485 = vst [vmem:[#allocation207_spill] sm:$0xff] %v14823_v41  ;;  %v17497_v57 = vld [vmem:[#allocation30_spill] sm:$0xff] }
 0xa7f   : > { %v14815_v46 = vpop.f32.mrf.mxu2  ;;  %17488 = vst [vmem:[#allocation208_spill] sm:$0xff] %v14827_v33 }
 0xa80   : > { %v5642_v55 = vpop.f32.mrf.mxu0  ;;  %v5811_v24 = vpop.f32.mrf.mxu1 }
 0xa81   : > { %v5643_v63 = vadd.f32 %v5642_v55, %v17486_v53  ;;  %v5812_v6 = vadd.f32 %v5811_v24, %v17487_v36  ;;  %v17494_v55 = vld [vmem:[#allocation106_spill] sm:$0xff]  ;;  %v14850_v24 = vpop.permute.xlu1 %6773  ;;  %v14856_v1 = vpop.permute.xlu0 %6753 }
 0xa82   : > { %7307 = vmatpush.bf16.msrb.mxu2 %v17489_v12  ;;  %17495 = vst [vmem:[#allocation210_spill] sm:$0xff] %v14850_v24 }
 0xa83   : > { %v14832_v43 = vpop.eup %10825  ;;  %7495 = vmatmul.bf16.gmra.mxu0 %v14281_v38  ;;  %7584 = vmatmul.bf16.gmra.mxu1 %v14567_v34  ;;  %v5219_v38 = vadd.f32 %v17494_v55, %v5050_v51  ;;  %v6330_v34 = vadd.f32 %v14445_v16, %v5643_v63  ;;  %v6331_v36 = vadd.f32 %v14445_v16, %v5812_v6  ;;  %v10462_v16 = vld [vmem:[#allocation8 + $0x104] sm:$0xf]  ;;  %v9947_v6 = vld [vmem:[#allocation8 + $0x110] sm:$0xf0]  ;;  %v10433_v55 = vld [vmem:[#allocation8 + $0x14] sm:$0xf0] }
 0xa84   : > { %v14838_v5 = vpop.eup %10827  ;;  %7209 = vmatmul.bf16.gmra.mxu2 %v14817_v42  ;;  %7258 = vmatmul.bf16.gmra.mxu3 %v14819_v7  ;;  %17496 = vst [vmem:[#allocation212_spill] sm:$0xff] %v14856_v1 }
 0xa85   : > { %17492 = vst [vmem:[#allocation209_spill] sm:$0xff] %v14838_v5  ;;  %v14862_v15 = vpop.permute.xlu2 %6663  ;;  %10829 = vtanh.f32 %v6330_v34 }
 0xa86   : > { %7308 = vmatpush.bf16.msrb.mxu2 %v17493_v14  ;;  %10831 = vtanh.f32 %v6331_v36  ;;  %v9825_v14 = vld [vmem:[#allocation8 + $0x8] sm:$0xf]  ;;  %v17501_v36 = vld [vmem:[#allocation31_spill] sm:$0xff] }
 0xa87   : > { %v14853_v53 = vpop.f32.mrf.mxu2 }
 0xa88   : > { %v5644_v12 = vpop.f32.mrf.mxu0  ;;  %v5813_v48 = vpop.f32.mrf.mxu1 }
 0xa89   : > { %v5645_v37 = vadd.f32 %v5644_v12, %v17497_v57  ;;  %v5814_v42 = vadd.f32 %v5813_v48, %v5219_v38  ;;  %v17499_v57 = vpack.c.bf16 %v14540_v21, %v14528_v8  ;;  %v17502_v48 = vld [vmem:[#allocation107_spill] sm:$0xff]  ;;  %v14881_v8 = vor.u32 %v10433_v55, %v9825_v14  ;;  %v14892_v24 = vpop.permute.xlu0 %6738 }
 0xa8a   : > { %7309 = vmatpush.bf16.msrb.mxu2 %v17498_v60 }
 0xa8b   : > { %v6332_v63 = vadd.f32 %v14587_v23, %v5645_v37  ;;  %v6333_v51 = vadd.f32 %v14587_v23, %v5814_v42  ;;  %v14873_v37 = vor.u32 %v10462_v16, %v9947_v6  ;;  %v14875_v23 = vpop.eup %10829  ;;  %v14877_v42 = vpop.permute.xlu1 %6758  ;;  %17503 = vst [vmem:[#allocation216_spill] sm:$0xff] %v14881_v8  ;;  %v17506_v16 = vld [vmem:[#allocation108_spill] sm:$0xff]  ;;  %v17507_v6 = vld [vmem:[#allocation110_spill] sm:$0xff] }
 0xa8c   : > { %17500 = vst [vmem:[#allocation213_spill] sm:$0xff] %v14877_v42  ;;  %v14883_v21 = vpop.eup %10831  ;;  %v17522_v42 = vld [vmem:[#allocation146_spill] sm:$0xff] }
 0xa8d   : > { %10833 = vtanh.f32 %v6332_v63  ;;  %17504 = vst [vmem:[#allocation217_spill] sm:$0xff] %v14883_v21  ;;  %v17505_v63 = vpack.c.bf16 %v14483_v10, %v14472_v56  ;;  %v14904_v10 = vpop.permute.xlu2 %6648 }
 0xa8e   : > { %10835 = vtanh.f32 %v6333_v51  ;;  %7310 = vmatpush.bf16.msrb.mxu2 %v17499_v57  ;;  %v5055_v57 = vadd.f32 %v17507_v6, %v17506_v16 }
 0xa8f   : > { %v14871_v9 = vpop.f32.mrf.mxu2 }
 0xa90   : > { %v5647_v38 = vpop.f32.mrf.mxu0  ;;  %v5816_v34 = vpop.f32.mrf.mxu1 }
 0xa91   : > { %v5648_v12 = vadd.f32 %v5647_v38, %v17501_v36  ;;  %v5817_v60 = vadd.f32 %v5816_v34, %v17502_v48  ;;  %v17508_v38 = vpack.c.bf16 %v14790_v2, %v14782_v49  ;;  %v7136_v49 = vadd.f32 %v14553_v50, %v14904_v10  ;;  %v17510_v2 = vld [vmem:[#allocation111_spill] sm:$0xff] }
 0xa92   : > { %7311 = vmatpush.bf16.msrb.mxu2 %v17505_v63  ;;  %v5224_v55 = vadd.f32 %v17510_v2, %v5055_v57  ;;  %v9841_v2 = vld [vmem:[#allocation8 + $0x28] sm:$0xf] }
 0xa93   : > { %v14888_v51 = vpop.eup %10833  ;;  %7500 = vmatmul.bf16.gmra.mxu0 %v14315_v35  ;;  %7589 = vmatmul.bf16.gmra.mxu1 %v14604_v40  ;;  %v6334_v34 = vadd.f32 %v14426_v11, %v5648_v12  ;;  %v17511_v40 = vpack.c.bf16 %v14754_v3, %v14744_v44  ;;  %v6335_v63 = vadd.f32 %v14426_v11, %v5817_v60  ;;  %v17512_v35 = vld [vmem:[#allocation32_spill] sm:$0xff]  ;;  %v17513_v12 = vld [vmem:[#allocation154_spill] sm:$0xff]  ;;  %v14929_v11 = vpop.permute.xlu0 %6653  ;;  %v10466_v60 = vld [vmem:[#allocation8 + $0x124] sm:$0xf] }
 0xa94   : > { %v14898_v14 = vpop.eup %10835  ;;  %7263 = vmatmul.bf16.gmra.mxu3 %v14873_v37  ;;  %v17514_v3 = vpack.c.bf16 %v14707_v62, %v14697_v4 }
 0xa95   : > { %17509 = vst [vmem:[#allocation220_spill] sm:$0xff] %v14898_v14  ;;  %7312 = vmatmul.bf16.vlgmr.msrb.gmra.mxu2 %v14881_v8  ;;  %v14922_v8 = vpop.permute.xlu1 %6673  ;;  %10837 = vtanh.f32 %v6334_v34 }
 0xa96   : > { %7660 = vmatpush.bf16.msra.mxu2 %v17508_v38  ;;  %10839 = vtanh.f32 %v6335_v63 }
 0xa97   : > { %v14916_v36 = vpop.f32.mrf.mxu2  ;;  %v7224_v48 = vpop.f32.mrf.mxu3 }
 0xa98   : > { %v5649_v16 = vpop.f32.mrf.mxu0  ;;  %v5818_v6 = vpop.f32.mrf.mxu1  ;;  %v14919_v38 = vadd.f32 %v7224_v48, %v7136_v49  ;;  %v9963_v49 = vld [vmem:[#allocation8 + $0x130] sm:$0xf0] }
 0xa99   : > { %v5650_v56 = vadd.f32 %v5649_v16, %v17512_v35  ;;  %v5819_v50 = vadd.f32 %v5818_v6, %v5224_v55  ;;  %v7138_v35 = vadd.f32 %v14560_v31, %v14929_v11  ;;  %v10437_v55 = vld [vmem:[#allocation8 + $0x34] sm:$0xf0]  ;;  %v14940_v63 = vor.u32 %v10466_v60, %v9963_v49  ;;  %v17516_v6 = vld [vmem:[#allocation33_spill] sm:$0xff] }
 0xa9a   : > { %7661 = vmatpush.bf16.msra.mxu2 %v17511_v40  ;;  %v17523_v60 = vpack.c.bf16 %v14620_v39, %v14612_v54  ;;  %v17525_v39 = vld [vmem:[#allocation117_spill] sm:$0xff] }
 0xa9b   : > { %v6336_v57 = vadd.f32 %v17513_v12, %v5650_v56  ;;  %v6337_v44 = vadd.f32 %v17513_v12, %v5819_v50  ;;  %v17515_v56 = vpack.c.bf16 %v14664_v59, %v14652_v45  ;;  %v14942_v16 = vpop.eup %10837  ;;  %v17517_v50 = vld [vmem:[#allocation113_spill] sm:$0xff]  ;;  %v17520_v59 = vld [vmem:[#allocation114_spill] sm:$0xff] }
 0xa9d   : > { %10841 = vtanh.f32 %v6336_v57  ;;  %v14946_v57 = vor.u32 %v10437_v55, %v9841_v2  ;;  %v14964_v2 = vpop.permute.xlu1 %6658 }
 0xa9e   : > { %7662 = vmatpush.bf16.msra.mxu2 %v17514_v3  ;;  %10843 = vtanh.f32 %v6337_v44  ;;  %v14948_v44 = vpop.eup %10839  ;;  %v17521_v3 = vld [vmem:[#allocation115_spill] sm:$0xff]  ;;  %v7141_v54 = vadd.f32 %v14590_v20, %v14964_v2 }
 0xa9f   : > { %v14936_v34 = vpop.f32.mrf.mxu2  ;;  %v7226_v4 = vpop.f32.mrf.mxu3  ;;  %17518 = vst [vmem:[#allocation221_spill] sm:$0xff] %v14946_v57 }
 0xaa0   : > { %v5652_v62 = vpop.f32.mrf.mxu0  ;;  %v5821_v40 = vpop.f32.mrf.mxu1  ;;  %v14938_v48 = vadd.f32 %v7226_v4, %v7138_v35  ;;  %17519 = vst [vmem:[#allocation224_spill] sm:$0xff] %v14948_v44  ;;  %v17526_v4 = vld [vmem:[#allocation159_spill] sm:$0xff] }
 0xaa1   : > { %v5653_v31 = vadd.f32 %v5652_v62, %v17516_v6  ;;  %v5822_v12 = vadd.f32 %v5821_v40, %v17517_v50 }
 0xaa2   : > { %7663 = vmatpush.bf16.msra.mxu2 %v17515_v56  ;;  %v5060_v56 = vadd.f32 %v17521_v3, %v17520_v59 }
 0xaa3   : > { %v14950_v45 = vpop.eup %10841  ;;  %7505 = vmatmul.bf16.gmra.mxu0 %v17522_v42  ;;  %7594 = vmatmul.bf16.gmra.mxu1 %v14647_v13  ;;  %v6338_v62 = vadd.f32 %v17526_v4, %v5653_v31  ;;  %v17527_v13 = vpack.c.bf16 %v14579_v32, %v14573_v0  ;;  %v6339_v50 = vadd.f32 %v17526_v4, %v5822_v12  ;;  %v17529_v42 = vld [vmem:[#allocation34_spill] sm:$0xff]  ;;  %v10470_v32 = vld [vmem:[#allocation8 + $0x144] sm:$0xf]  ;;  %v9979_v12 = vld [vmem:[#allocation8 + $0x150] sm:$0xf0] }
 0xaa4   : > { %v14958_v49 = vpop.eup %10843  ;;  %7268 = vmatmul.bf16.gmra.mxu3 %v14940_v63  ;;  %v5229_v55 = vadd.f32 %v17525_v39, %v5060_v56  ;;  %v17530_v56 = vld [vmem:[#allocation152_spill] sm:$0xff]  ;;  %v17531_v0 = vpack.c.bf16 %v14544_v52, %v14535_v19  ;;  %v9857_v4 = vld [vmem:[#allocation8 + $0x48] sm:$0xf] }
 0xaa5   : > { %17524 = vst [vmem:[#allocation225_spill] sm:$0xff] %v14958_v49  ;;  %7317 = vmatmul.bf16.gmra.mxu2 %v14946_v57  ;;  %10845 = vtanh.f32 %v6338_v62 }
 0xaa6   : > { %7664 = vmatpush.bf16.msra.mxu2 %v17523_v60  ;;  %10847 = vtanh.f32 %v6339_v50 }
 0xaa7   : > { %v14976_v40 = vpop.f32.mrf.mxu2  ;;  %v7229_v6 = vpop.f32.mrf.mxu3 }
 0xaa8   : > { %v5654_v59 = vpop.f32.mrf.mxu0  ;;  %v5823_v3 = vpop.f32.mrf.mxu1  ;;  %v14979_v60 = vadd.f32 %v7229_v6, %v7141_v54  ;;  %v7143_v54 = vadd.f32 %v14597_v47, %v14862_v15  ;;  %v14996_v6 = vor.u32 %v10470_v32, %v9979_v12  ;;  %v17547_v12 = vld [vmem:[#allocation157_spill] sm:$0xff] }
 0xaa9   : > { %v5655_v35 = vadd.f32 %v5654_v59, %v17529_v42  ;;  %v5824_v20 = vadd.f32 %v5823_v3, %v5229_v55  ;;  %v10441_v42 = vld [vmem:[#allocation8 + $0x54] sm:$0xf0]  ;;  %v17532_v55 = vpack.c.bf16 %v14488_v18, %v14476_v61 }
 0xaaa   : > { %7665 = vmatpush.bf16.msra.mxu2 %v17527_v13  ;;  %17528 = vst [vmem:[#allocation228_spill] sm:$0xff] %v14979_v60  ;;  %v17535_v59 = vld [vmem:[#allocation35_spill] sm:$0xff]  ;;  %v17538_v18 = vld [vmem:[#allocation120_spill] sm:$0xff] }
 0xaab   : > { %v6340_v39 = vadd.f32 %v17530_v56, %v5655_v35  ;;  %v6341_v31 = vadd.f32 %v17530_v56, %v5824_v20  ;;  %v14998_v50 = vpop.eup %10845  ;;  %v17536_v3 = vld [vmem:[#allocation119_spill] sm:$0xff]  ;;  %v15002_v56 = vor.u32 %v10441_v42, %v9857_v4  ;;  %v17541_v4 = vld [vmem:[#allocation165_spill] sm:$0xff] }
 0xaac   : > { %v7146_v42 = vadd.f32 %v17541_v4, %v14813_v22 }
 0xaad   : > { %10849 = vtanh.f32 %v6340_v39  ;;  %17537 = vst [vmem:[#allocation233_spill] sm:$0xff] %v15002_v56  ;;  %v15004_v39 = vpop.eup %10847 }
 0xaae   : > { %7666 = vmatpush.bf16.msra.mxu2 %v17531_v0  ;;  %10851 = vtanh.f32 %v6341_v31  ;;  %v17539_v31 = vld [vmem:[#allocation122_spill] sm:$0xff] }
 0xaaf   : > { %v14992_v35 = vpop.f32.mrf.mxu2  ;;  %v7231_v62 = vpop.f32.mrf.mxu3  ;;  %v5065_v0 = vadd.f32 %v17539_v31, %v17538_v18 }
 0xab0   : > { %17533 = vst [vmem:[#allocation229_spill] sm:$0xff] %v14992_v35  ;;  %v5657_v13 = vpop.f32.mrf.mxu0  ;;  %v5826_v19 = vpop.f32.mrf.mxu1  ;;  %v14994_v52 = vadd.f32 %v7231_v62, %v7143_v54  ;;  %v17542_v62 = vld [vmem:[#allocation123_spill] sm:$0xff] }
 0xab1   : > { %v5658_v47 = vadd.f32 %v5657_v13, %v17535_v59  ;;  %v5827_v20 = vadd.f32 %v5826_v19, %v17536_v3  ;;  %v5234_v13 = vadd.f32 %v17542_v62, %v5065_v0  ;;  %v17543_v19 = vld [vmem:[#allocation147_spill] sm:$0xff] }
 0xab2   : > { %7667 = vmatpush.bf16.msra.mxu2 %v17532_v55  ;;  %17534 = vst [vmem:[#allocation232_spill] sm:$0xff] %v14994_v52  ;;  %v17540_v55 = vld [vmem:[#allocation151_spill] sm:$0xff] }
 0xab3   : > { %v15006_v61 = vpop.eup %10849  ;;  %7510 = vmatmul.bf16.gmra.mxu0 %v17540_v55  ;;  %7599 = vmatmul.bf16.gmra.mxu1 %v14692_v28  ;;  %v6342_v59 = vadd.f32 %v17543_v19, %v5658_v47  ;;  %v6343_v28 = vadd.f32 %v17543_v19, %v5827_v20  ;;  %v10474_v47 = vld [vmem:[#allocation8 + $0x164] sm:$0xf]  ;;  %v9995_v0 = vld [vmem:[#allocation8 + $0x170] sm:$0xf0]  ;;  %v9873_v20 = vld [vmem:[#allocation8 + $0x68] sm:$0xf] }
 0xab4   : > { %v15011_v54 = vpop.eup %10851  ;;  %7273 = vmatmul.bf16.gmra.mxu3 %v14996_v6  ;;  %v17548_v62 = vld [vmem:[#allocation167_spill] sm:$0xff] }
 0xab5   : > { %7322 = vmatmul.bf16.gmra.mxu2 %v15002_v56  ;;  %v17546_v56 = vld [vmem:[#allocation36_spill] sm:$0xff]  ;;  %10853 = vtanh.f32 %v6342_v59 }
 0xab6   : > { %10855 = vtanh.f32 %v6343_v28  ;;  %v10445_v19 = vld [vmem:[#allocation8 + $0x74] sm:$0xf0] }
 0xab7   : > { %v15024_v3 = vpop.f32.mrf.mxu2  ;;  %v7234_v18 = vpop.f32.mrf.mxu3 }
 0xab8   : > { %17544 = vst [vmem:[#allocation236_spill] sm:$0xff] %v15024_v3  ;;  %v5659_v31 = vpop.f32.mrf.mxu0  ;;  %v5828_v55 = vpop.f32.mrf.mxu1  ;;  %v15027_v32 = vadd.f32 %v7234_v18, %v7146_v42  ;;  %v7148_v3 = vadd.f32 %v17548_v62, %v14922_v8  ;;  %v17554_v62 = vld [vmem:[#allocation37_spill] sm:$0xff] }
 0xab9   : > { %v5660_v57 = vadd.f32 %v5659_v31, %v17546_v56  ;;  %v5829_v1 = vadd.f32 %v5828_v55, %v5234_v13  ;;  %v17552_v31 = vld [vmem:[#allocation126_spill] sm:$0xff]  ;;  %v17553_v55 = vld [vmem:[#allocation127_spill] sm:$0xff] }
 0xaba   : > { %17545 = vst [vmem:[#allocation237_spill] sm:$0xff] %v15027_v32  ;;  %v17555_v32 = vld [vmem:[#allocation153_spill] sm:$0xff] }
 0xabb   : > { %v6344_v41 = vadd.f32 %v17547_v12, %v5660_v57  ;;  %v6345_v4 = vadd.f32 %v17547_v12, %v5829_v1  ;;  %v15038_v57 = vor.u32 %v10474_v47, %v9995_v0  ;;  %v15040_v1 = vpop.eup %10853  ;;  %v17557_v0 = vld [vmem:[#allocation185_spill] sm:$0xff] }
 0xabc   : > { %v15044_v12 = vpop.eup %10855 }
 0xabd   : > { %10857 = vtanh.f32 %v6344_v41  ;;  %v15042_v41 = vor.u32 %v10445_v19, %v9873_v20  ;;  %v17565_v19 = vld [vmem:[#allocation142_spill] sm:$0xff] }
 0xabe   : > { %10859 = vtanh.f32 %v6345_v4  ;;  %v5070_v4 = vadd.f32 %v17553_v55, %v17552_v31 }
 0xabf   : > { %v15034_v42 = vpop.f32.mrf.mxu2  ;;  %v7236_v18 = vpop.f32.mrf.mxu3  ;;  %17551 = vst [vmem:[#allocation244_spill] sm:$0xff] %v15042_v41 }
 0xac0   : > { %17549 = vst [vmem:[#allocation240_spill] sm:$0xff] %v15034_v42  ;;  %v5662_v56 = vpop.f32.mrf.mxu0  ;;  %v5831_v13 = vpop.f32.mrf.mxu1  ;;  %v15036_v59 = vadd.f32 %v7236_v18, %v7148_v3  ;;  %v17556_v3 = vld [vmem:[#allocation125_spill] sm:$0xff]  ;;  %v17558_v18 = vld [vmem:[#allocation195_spill] sm:$0xff] }
 0xac1   : > { %v5663_v42 = vadd.f32 %v5662_v56, %v17554_v62  ;;  %v5832_v47 = vadd.f32 %v5831_v13, %v17556_v3  ;;  %v17559_v56 = vld [vmem:[#allocation171_spill] sm:$0xff]  ;;  %v17561_v62 = vld [vmem:[#allocation141_spill] sm:$0xff] }
 0xac2   : > { %17550 = vst [vmem:[#allocation241_spill] sm:$0xff] %v15036_v59  ;;  %v7151_v31 = vadd.f32 %v17559_v56, %v17558_v18 }
 0xac3   : > { %v15046_v28 = vpop.eup %10857  ;;  %7515 = vmatmul.bf16.gmra.mxu0 %v17555_v32  ;;  %7604 = vmatmul.bf16.gmra.mxu1 %v17557_v0  ;;  %v17560_v32 = vld [vmem:[#allocation128_spill] sm:$0xff]  ;;  %v6346_v59 = vadd.f32 %v17561_v62, %v5663_v42  ;;  %v6347_v0 = vadd.f32 %v17561_v62, %v5832_v47  ;;  %v10478_v42 = vld [vmem:[#allocation8 + $0x184] sm:$0xf]  ;;  %v9889_v47 = vld [vmem:[#allocation8 + $0x88] sm:$0xf] }
 0xac4   : > { %v15052_v52 = vpop.eup %10859  ;;  %7278 = vmatmul.bf16.gmra.mxu3 %v15038_v57  ;;  %v5239_v55 = vadd.f32 %v17560_v32, %v5070_v4  ;;  %v10011_v4 = vld [vmem:[#allocation8 + $0x190] sm:$0xf0]  ;;  %v17566_v32 = vld [vmem:[#allocation174_spill] sm:$0xff]  ;;  %v10449_v62 = vld [vmem:[#allocation8 + $0x94] sm:$0xf0] }
 0xac5   : > { %7327 = vmatmul.bf16.gmra.mxu2 %v15042_v41  ;;  %v17564_v41 = vld [vmem:[#allocation38_spill] sm:$0xff]  ;;  %10861 = vtanh.f32 %v6346_v59 }
 0xac6   : > { %10863 = vtanh.f32 %v6347_v0  ;;  %v17572_v0 = vld [vmem:[#allocation133_spill] sm:$0xff] }
 0xac7   : > { %v15066_v13 = vpop.f32.mrf.mxu2  ;;  %v7239_v3 = vpop.f32.mrf.mxu3 }
 0xac8   : > { %17562 = vst [vmem:[#allocation245_spill] sm:$0xff] %v15066_v13  ;;  %v5664_v33 = vpop.f32.mrf.mxu0  ;;  %v5833_v5 = vpop.f32.mrf.mxu1  ;;  %v15069_v20 = vadd.f32 %v7239_v3, %v7151_v31  ;;  %v7153_v13 = vadd.f32 %v17566_v32, %v14794_v29  ;;  %v17573_v32 = vld [vmem:[#allocation181_spill] sm:$0xff] }
 0xac9   : > { %v5665_v35 = vadd.f32 %v5664_v33, %v17564_v41  ;;  %v5834_v21 = vadd.f32 %v5833_v5, %v5239_v55  ;;  %v17571_v55 = vld [vmem:[#allocation130_spill] sm:$0xff] }
 0xaca   : > { %17563 = vst [vmem:[#allocation248_spill] sm:$0xff] %v15069_v20  ;;  %v17574_v20 = vld [vmem:[#allocation158_spill] sm:$0xff] }
 0xacb   : > { %v6348_v14 = vadd.f32 %v17565_v19, %v5665_v35  ;;  %v6349_v56 = vadd.f32 %v17565_v19, %v5834_v21  ;;  %v15080_v35 = vor.u32 %v10478_v42, %v10011_v4  ;;  %v15082_v21 = vpop.eup %10861 }
 0xacc   : > { %v15086_v41 = vpop.eup %10863 }
 0xacd   : > { %10865 = vtanh.f32 %v6348_v14  ;;  %17569 = vst [vmem:[#allocation253_spill] sm:$0xff] %v15080_v35  ;;  %v15084_v14 = vor.u32 %v10449_v62, %v9889_v47  ;;  %v17576_v62 = vld [vmem:[#allocation178_spill] sm:$0xff]  ;;  %v17582_v47 = vld [vmem:[#allocation140_spill] sm:$0xff] }
 0xace   : > { %10867 = vtanh.f32 %v6349_v56  ;;  %v5075_v56 = vadd.f32 %v17572_v0, %v17571_v55  ;;  %v17578_v55 = vld [vmem:[#allocation148_spill] sm:$0xff] }
 0xacf   : > { %v15076_v31 = vpop.f32.mrf.mxu2  ;;  %v7241_v3 = vpop.f32.mrf.mxu3  ;;  %17570 = vst [vmem:[#allocation254_spill] sm:$0xff] %v15084_v14 }
 0xad0   : > { %17567 = vst [vmem:[#allocation249_spill] sm:$0xff] %v15076_v31  ;;  %v5667_v33 = vpop.f32.mrf.mxu0  ;;  %v5836_v5 = vpop.f32.mrf.mxu1  ;;  %v15078_v59 = vadd.f32 %v7241_v3, %v7153_v13  ;;  %v17575_v13 = vld [vmem:[#allocation129_spill] sm:$0xff]  ;;  %v7156_v3 = vadd.f32 %v17576_v62, %v14808_v58 }
 0xad1   : > { %v5668_v31 = vadd.f32 %v5667_v33, %v17573_v32  ;;  %v5837_v42 = vadd.f32 %v5836_v5, %v17575_v13 }
 0xad2   : > { %17568 = vst [vmem:[#allocation252_spill] sm:$0xff] %v15078_v59 }
 0xad3   : > { %v15088_v19 = vpop.eup %10865  ;;  %7520 = vmatmul.bf16.gmra.mxu0 %v17574_v20  ;;  %7609 = vmatmul.bf16.gmra.mxu1 %v14778_v30  ;;  %v17577_v20 = vld [vmem:[#allocation134_spill] sm:$0xff]  ;;  %v6350_v0 = vadd.f32 %v17578_v55, %v5668_v31  ;;  %v6351_v30 = vadd.f32 %v17578_v55, %v5837_v42  ;;  %v10482_v31 = vld [vmem:[#allocation8 + $0x1a4] sm:$0xf]  ;;  %v10453_v55 = vld [vmem:[#allocation8 + $0xb4] sm:$0xf0] }
 0xad4   : > { %v15094_v29 = vpop.eup %10867  ;;  %7283 = vmatmul.bf16.gmra.mxu3 %v15080_v35  ;;  %v5244_v33 = vadd.f32 %v17577_v20, %v5075_v56  ;;  %v10027_v56 = vld [vmem:[#allocation8 + $0x1b0] sm:$0xf0]  ;;  %v17583_v20 = vld [vmem:[#allocation189_spill] sm:$0xff] }
 0xad5   : > { %7332 = vmatmul.bf16.gmra.mxu2 %v15084_v14  ;;  %v17581_v14 = vld [vmem:[#allocation182_spill] sm:$0xff]  ;;  %10869 = vtanh.f32 %v6350_v0 }
 0xad6   : > { %10871 = vtanh.f32 %v6351_v30  ;;  %v9905_v42 = vld [vmem:[#allocation8 + $0xa8] sm:$0xf] }
 0xad7   : > { %v15108_v5 = vpop.f32.mrf.mxu2  ;;  %v7244_v32 = vpop.f32.mrf.mxu3  ;;  %v17590_v30 = vld [vmem:[#allocation161_spill] sm:$0xff] }
 0xad8   : > { %17579 = vst [vmem:[#allocation255_spill] sm:$0xff] %v15108_v5  ;;  %v5669_v13 = vpop.f32.mrf.mxu0  ;;  %v5838_v59 = vpop.f32.mrf.mxu1  ;;  %v15111_v4 = vadd.f32 %v7244_v32, %v7156_v3  ;;  %v17584_v5 = vld [vmem:[#allocation183_spill] sm:$0xff] }
 0xad9   : > { %v5670_v35 = vadd.f32 %v5669_v13, %v17581_v14  ;;  %v5839_v60 = vadd.f32 %v5838_v59, %v5244_v33  ;;  %v7158_v58 = vadd.f32 %v17584_v5, %v17583_v20  ;;  %v17589_v5 = vld [vmem:[#allocation136_spill] sm:$0xff] }
 0xada   : > { %17580 = vst [vmem:[#allocation41_spill] sm:$0xff] %v15111_v4  ;;  %v5080_v13 = vadd.f32 %v17590_v30, %v17589_v5  ;;  %v17596_v5 = vld [vmem:[#allocation139_spill] sm:$0xff] }
 0xadb   : > { %v6352_v44 = vadd.f32 %v17582_v47, %v5670_v35  ;;  %v6353_v62 = vadd.f32 %v17582_v47, %v5839_v60  ;;  %v15122_v35 = vor.u32 %v10482_v31, %v10027_v56  ;;  %v15124_v60 = vpop.eup %10869  ;;  %v17598_v56 = vld [vmem:[#allocation145_spill] sm:$0xff] }
 0xadc   : > { %v15128_v47 = vpop.eup %10871 }
 0xadd   : > { %10873 = vtanh.f32 %v6352_v44  ;;  %17587 = vst [vmem:[#allocation259_spill] sm:$0xff] %v15122_v35  ;;  %v15126_v44 = vor.u32 %v10453_v55, %v9905_v42  ;;  %v17594_v42 = vld [vmem:[#allocation177_spill] sm:$0xff]  ;;  %v17595_v55 = vld [vmem:[#allocation190_spill] sm:$0xff] }
 0xade   : > { %10875 = vtanh.f32 %v6353_v62  ;;  %v17591_v62 = vld [vmem:[#allocation39_spill] sm:$0xff] }
 0xadf   : > { %v15118_v3 = vpop.f32.mrf.mxu2  ;;  %v7246_v32 = vpop.f32.mrf.mxu3  ;;  %17588 = vst [vmem:[#allocation260_spill] sm:$0xff] %v15126_v44 }
 0xae0   : > { %17585 = vst [vmem:[#allocation42_spill] sm:$0xff] %v15118_v3  ;;  %v5672_v14 = vpop.f32.mrf.mxu0  ;;  %v5841_v59 = vpop.f32.mrf.mxu1  ;;  %v15120_v33 = vadd.f32 %v7246_v32, %v7158_v58  ;;  %v17592_v3 = vld [vmem:[#allocation160_spill] sm:$0xff]  ;;  %v17593_v58 = vld [vmem:[#allocation135_spill] sm:$0xff] }
 0xae1   : > { %v5673_v20 = vadd.f32 %v5672_v14, %v17591_v62  ;;  %v5842_v32 = vadd.f32 %v5841_v59, %v17593_v58  ;;  %v7161_v14 = vadd.f32 %v17595_v55, %v17594_v42 }
 0xae2   : > { %17586 = vst [vmem:[#allocation258_spill] sm:$0xff] %v15120_v33 }
 0xae3   : > { %v10874_v0 = vpop.eup %10873  ;;  %7525 = vmatmul.bf16.gmra.mxu0 %v17592_v3  ;;  %7614 = vmatmul.bf16.gmra.mxu1 %v14819_v7  ;;  %v5249_v3 = vadd.f32 %v14869_v26, %v5080_v13  ;;  %v6354_v30 = vadd.f32 %v17596_v5, %v5673_v20  ;;  %v6355_v58 = vadd.f32 %v17596_v5, %v5842_v32  ;;  %v10486_v26 = vld [vmem:[#allocation8 + $0x1c4] sm:$0xf]  ;;  %v10043_v20 = vld [vmem:[#allocation8 + $0x1d0] sm:$0xf0]  ;;  %v9921_v32 = vld [vmem:[#allocation8 + $0xc8] sm:$0xf] }
 0xae4   : > { %v15134_v4 = vpop.eup %10875  ;;  %7288 = vmatmul.bf16.gmra.mxu3 %v15122_v35  ;;  %v6546_v31 = vpack.c.bf16 %v10874_v0, %v15124_v60  ;;  %v17597_v0 = vld [vmem:[#allocation40_spill] sm:$0xff]  ;;  %v7163_v13 = vadd.f32 %v14774_v17, %v14786_v27 }
 0xae5   : > { %7337 = vmatmul.bf16.gmra.mxu2 %v15126_v44  ;;  %10877 = vtanh.f32 %v6354_v30  ;;  %v10457_v5 = vld [vmem:[#allocation8 + $0xd4] sm:$0xf0] }
 0xae6   : > { %10879 = vtanh.f32 %v6355_v58  ;;  %v17603_v27 = vld [vmem:[#allocation172_spill] sm:$0xff] }
 0xae7   : > { %v15147_v62 = vpop.f32.mrf.mxu2  ;;  %v7249_v59 = vpop.f32.mrf.mxu3 }
 0xae8   : > { %v5674_v7 = vpop.f32.mrf.mxu0  ;;  %v5843_v33 = vpop.f32.mrf.mxu1  ;;  %v15150_v60 = vadd.f32 %v7249_v59, %v7161_v14 }
 0xae9   : > { %v5675_v44 = vadd.f32 %v5674_v7, %v17597_v0  ;;  %v5844_v35 = vadd.f32 %v5843_v33, %v5249_v3  ;;  %v17600_v0 = vld [vmem:[#allocation162_spill] sm:$0xff] }
 0xaeb   : > { %v6356_v49 = vadd.f32 %v17598_v56, %v5675_v44  ;;  %v6357_v55 = vadd.f32 %v17598_v56, %v5844_v35  ;;  %v15161_v44 = vor.u32 %v10486_v26, %v10043_v20  ;;  %v10878_v35 = vpop.eup %10877  ;;  %v15164_v56 = vor.u32 %v10457_v5, %v9921_v32  ;;  %v17601_v20 = vld [vmem:[#allocation170_spill] sm:$0xff] }
 0xaec   : > { %v15166_v30 = vpop.eup %10879 }
 0xaed   : > { %10881 = vtanh.f32 %v6356_v49 }
 0xaee   : > { %10883 = vtanh.f32 %v6357_v55 }
 0xaef   : > { %v15157_v14 = vpop.f32.mrf.mxu2  ;;  %v7251_v59 = vpop.f32.mrf.mxu3 }
 0xaf0   : > { %v15159_v7 = vadd.f32 %v7251_v59, %v7163_v13  ;;  %v7491_v33 = vpop.f32.mrf.mxu0  ;;  %v7580_v3 = vpop.f32.mrf.mxu1  ;;  %v17602_v13 = vld [vmem:[#allocation202_spill] sm:$0xff] }
 0xaf1   : > { %v7492_v49 = vadd.f32 %v7491_v33, %v14904_v10  ;;  %v7166_v32 = vadd.f32 %v17602_v13, %v17601_v20  ;;  %v10461_v13 = vld [vmem:[#allocation8 + $0xf4] sm:$0xf0] }
 0xaf3   : > { %v10882_v17 = vpop.eup %10881  ;;  %v15168_v58 = vadd.f32 %v7580_v3, %v7492_v49  ;;  %7530 = vmatmul.bf16.gmra.mxu0 %v17600_v0  ;;  %7619 = vmatmul.bf16.gmra.mxu1 %v14873_v37 }
 0xaf4   : > { %v15171_v55 = vpop.eup %10883  ;;  %7293 = vmatmul.bf16.gmra.mxu3 %v15161_v44  ;;  %v6548_v26 = vpack.c.bf16 %v10882_v17, %v10878_v35  ;;  %v10490_v35 = vld [vmem:[#allocation8 + $0x1e4] sm:$0xf]  ;;  %v10059_v17 = vld [vmem:[#allocation8 + $0x1f0] sm:$0xf0] }
 0xaf5   : > { %17599 = vst [vmem:[#allocation261_spill] sm:$0xff] %v15168_v58  ;;  %7342 = vmatmul.bf16.gmra.mxu2 %v15164_v56  ;;  %v6549_v10 = vpack.c.bf16 %v15171_v55, %v15166_v30  ;;  %v7168_v30 = vadd.f32 %v14815_v46, %v17603_v27  ;;  %v17604_v55 = vpack.c.bf16 %v15088_v19, %v15082_v21  ;;  %v17606_v19 = vld [vmem:[#allocation163_spill] sm:$0xff] }
 0xaf6   : > { %7393 = vmatpush.bf16.msrb.mxu3 %v6548_v26  ;;  %v9937_v26 = vld [vmem:[#allocation8 + $0xe8] sm:$0xf]  ;;  %v17605_v46 = vpack.c.bf16 %v15046_v28, %v15040_v1 }
 0xaf7   : > { %v15180_v5 = vpop.f32.mrf.mxu2  ;;  %v7254_v59 = vpop.f32.mrf.mxu3 }
 0xaf8   : > { %v15182_v33 = vadd.f32 %v7254_v59, %v7166_v32  ;;  %v7493_v3 = vpop.f32.mrf.mxu0  ;;  %v7582_v49 = vpop.f32.mrf.mxu1 }
 0xaf9   : > { %v7494_v0 = vadd.f32 %v7493_v3, %v14929_v11  ;;  %v15196_v3 = vor.u32 %v10490_v35, %v10059_v17  ;;  %v17607_v35 = vld [vmem:[#allocation176_spill] sm:$0xff] }
 0xafa   : > { %7394 = vmatpush.bf16.msrb.mxu3 %v6546_v31  ;;  %v7171_v17 = vadd.f32 %v14853_v53, %v17607_v35 }
 0xafb   : > { %v15185_v37 = vadd.f32 %v7582_v49, %v7494_v0  ;;  %v15199_v0 = vor.u32 %v10461_v13, %v9937_v26 }
 0xafe   : > { %7395 = vmatpush.bf16.msrb.mxu3 %v17604_v55 }
 0xaff   : > { %v15192_v32 = vpop.f32.mrf.mxu2  ;;  %v7256_v59 = vpop.f32.mrf.mxu3 }
 0xb00   : > { %v15194_v58 = vadd.f32 %v7256_v59, %v7168_v30  ;;  %v7496_v11 = vpop.f32.mrf.mxu0  ;;  %v7585_v31 = vpop.f32.mrf.mxu1 }
 0xb01   : > { %v7497_v49 = vadd.f32 %v7496_v11, %v14964_v2  ;;  %v17608_v2 = vpack.c.bf16 %v15006_v61, %v14998_v50  ;;  %v15223_v59 = vpop.permute.xlu1 %6743  ;;  %v9953_v11 = vld [vmem:[#allocation8 + $0x108] sm:$0xf] }
 0xb02   : > { %7396 = vmatpush.bf16.msrb.mxu3 %v17605_v46  ;;  %17610 = vst [vmem:[#allocation187_spill] sm:$0xff] %v15223_v59  ;;  %v17612_v50 = vld [vmem:[#allocation166_spill] sm:$0xff] }
 0xb03   : > { %v15204_v21 = vadd.f32 %v7585_v31, %v7497_v49  ;;  %7535 = vmatmul.bf16.gmra.mxu0 %v17606_v19  ;;  %7624 = vmatmul.bf16.gmra.mxu1 %v14940_v63  ;;  %v17609_v63 = vpack.c.bf16 %v14950_v45, %v14942_v16  ;;  %v7173_v61 = vadd.f32 %v14871_v9, %v17612_v50  ;;  %v10465_v49 = vld [vmem:[#allocation8 + $0x114] sm:$0xf0]  ;;  %v10431_v46 = vld [vmem:[#allocation8 + $0xc] sm:$0xf]  ;;  %v9827_v19 = vld [vmem:[#allocation8 + $0x18] sm:$0xf0] }
 0xb04   : > { %7298 = vmatmul.bf16.gmra.mxu3 %v15196_v3  ;;  %v17613_v31 = vpack.c.bf16 %v14888_v51, %v14875_v23  ;;  %v17614_v9 = vpack.c.bf16 %v14832_v43, %v14821_v25  ;;  %v17616_v51 = vld [vmem:[#allocation164_spill] sm:$0xff]  ;;  %v17617_v25 = vpack.c.bf16 %v15134_v4, %v15128_v47  ;;  %v9969_v4 = vld [vmem:[#allocation8 + $0x128] sm:$0xf] }
 0xb05   : > { %7347 = vmatmul.bf16.gmra.mxu2 %v15199_v0 }
 0xb06   : > { %7397 = vmatpush.bf16.msrb.mxu3 %v17608_v2 }
 0xb07   : > { %v15215_v30 = vpop.f32.mrf.mxu2  ;;  %v7259_v1 = vpop.f32.mrf.mxu3 }
 0xb08   : > { %v15217_v28 = vadd.f32 %v7259_v1, %v7171_v17  ;;  %v7498_v55 = vpop.f32.mrf.mxu0  ;;  %v7587_v26 = vpop.f32.mrf.mxu1 }
 0xb09   : > { %v7499_v13 = vadd.f32 %v7498_v55, %v14862_v15  ;;  %v15237_v55 = vor.u32 %v10465_v49, %v9953_v11 }
 0xb0a   : > { %7398 = vmatpush.bf16.msrb.mxu3 %v17609_v63 }
 0xb0b   : > { %v15225_v53 = vadd.f32 %v7587_v26, %v7499_v13  ;;  %v15239_v26 = vor.u32 %v10431_v46, %v9827_v19  ;;  %v15248_v13 = vpop.permute.xlu1 %6728  ;;  %v15268_v46 = vpop.permute.xlu2 %6733  ;;  %v10469_v19 = vld [vmem:[#allocation8 + $0x134] sm:$0xf0] }
 0xb0c   : > { %17620 = vst [vmem:[#allocation266_spill] sm:$0xff] %v15268_v46  ;;  %v7178_v47 = vadd.f32 %v14936_v34, %v15268_v46 }
 0xb0d   : > { %17611 = vst [vmem:[#allocation188_spill] sm:$0xff] %v15225_v53 }
 0xb0e   : > { %7399 = vmatpush.bf16.msrb.mxu3 %v17613_v31 }
 0xb0f   : > { %v15232_v15 = vpop.f32.mrf.mxu2  ;;  %v7261_v17 = vpop.f32.mrf.mxu3 }
 0xb10   : > { %v15234_v16 = vadd.f32 %v7261_v17, %v7173_v61  ;;  %v7501_v45 = vpop.f32.mrf.mxu0  ;;  %v7590_v1 = vpop.f32.mrf.mxu1  ;;  %v10435_v17 = vld [vmem:[#allocation8 + $0x2c] sm:$0xf] }
 0xb11   : > { %v7502_v2 = vadd.f32 %v7501_v45, %v14813_v22  ;;  %v7176_v22 = vadd.f32 %v14916_v36, %v15248_v13  ;;  %v17619_v36 = vpack.c.bf16 %v15094_v29, %v15086_v41  ;;  %v9843_v45 = vld [vmem:[#allocation8 + $0x38] sm:$0xf0] }
 0xb12   : > { %7400 = vmatpush.bf16.msrb.mxu3 %v17614_v9  ;;  %v15283_v34 = vor.u32 %v10435_v17, %v9843_v45  ;;  %v17631_v17 = vld [vmem:[#allocation220_spill] sm:$0xff]  ;;  %v17632_v45 = vld [vmem:[#allocation217_spill] sm:$0xff] }
 0xb13   : > { %v15244_v23 = vadd.f32 %v7590_v1, %v7502_v2  ;;  %7540 = vmatmul.bf16.gmra.mxu0 %v17616_v51  ;;  %7629 = vmatmul.bf16.gmra.mxu1 %v14996_v6 }
 0xb15   : > { %17615 = vst [vmem:[#allocation264_spill] sm:$0xff] %v15244_v23  ;;  %7352 = vmatmul.bf16.gmra.mxu2 %v15237_v55  ;;  %7401 = vmatmul.bf16.vlgmr.msrb.gmra.mxu3 %v15239_v26  ;;  %v17677_v23 = vld [vmem:[#allocation258_spill] sm:$0xff] }
 0xb16   : > { %7749 = vmatpush.bf16.msra.mxu3 %v6549_v10 }
 0xb17   : > { %v7264_v43 = vpop.f32.mrf.mxu3 }
 0xb18   : > { %v15257_v63 = vadd.f32 %v7264_v43, %v7176_v22  ;;  %v7313_v11 = vpop.f32.mrf.mxu2  ;;  %v7503_v10 = vpop.f32.mrf.mxu0  ;;  %v15281_v22 = vor.u32 %v10469_v19, %v9969_v4  ;;  %v17623_v43 = vld [vmem:[#allocation168_spill] sm:$0xff] }
 0xb19   : > { %v15260_v6 = vadd.f32 %v7313_v11, %v14919_v38  ;;  %v7504_v61 = vadd.f32 %v7503_v10, %v14922_v8  ;;  %v7592_v31 = vpop.f32.mrf.mxu1  ;;  %v17621_v38 = vpack.c.bf16 %v15052_v52, %v15044_v12  ;;  %v17624_v52 = vpack.c.bf16 %v15011_v54, %v15004_v39  ;;  %v17625_v12 = vld [vmem:[#allocation225_spill] sm:$0xff]  ;;  %v17628_v39 = vld [vmem:[#allocation228_spill] sm:$0xff] }
 0xb1a   : > { %7750 = vmatpush.bf16.msra.mxu3 %v17617_v25 }
 0xb1b   : > { %v15263_v49 = vadd.f32 %v7592_v31, %v7504_v61 }
 0xb1d   : > { %17618 = vst [vmem:[#allocation265_spill] sm:$0xff] %v15263_v49 }
 0xb1e   : > { %7751 = vmatpush.bf16.msra.mxu3 %v17619_v36 }
 0xb1f   : > { %v7266_v8 = vpop.f32.mrf.mxu3 }
 0xb20   : > { %v15275_v2 = vadd.f32 %v7266_v8, %v7178_v47  ;;  %v7315_v1 = vpop.f32.mrf.mxu2  ;;  %v7506_v9 = vpop.f32.mrf.mxu0  ;;  %v17634_v8 = vld [vmem:[#allocation229_spill] sm:$0xff] }
 0xb21   : > { %v15278_v29 = vadd.f32 %v7315_v1, %v14938_v48  ;;  %v7507_v41 = vadd.f32 %v7506_v9, %v17558_v18  ;;  %v7595_v51 = vpop.f32.mrf.mxu1  ;;  %v7181_v48 = vadd.f32 %v14976_v40, %v14892_v24  ;;  %v17626_v18 = vld [vmem:[#allocation224_spill] sm:$0xff]  ;;  %v17633_v40 = vpack.c.bf16 %v17631_v17, %v17632_v45 }
 0xb22   : > { %7752 = vmatpush.bf16.msra.mxu3 %v17621_v38  ;;  %v17627_v11 = vpack.c.bf16 %v17625_v12, %v17626_v18  ;;  %v9985_v38 = vld [vmem:[#allocation8 + $0x148] sm:$0xf]  ;;  %v7183_v1 = vadd.f32 %v17634_v8, %v15223_v59  ;;  %v10473_v9 = vld [vmem:[#allocation8 + $0x154] sm:$0xf0] }
 0xb23   : > { %v15285_v25 = vadd.f32 %v7595_v51, %v7507_v41  ;;  %7545 = vmatmul.bf16.gmra.mxu0 %v17623_v43  ;;  %7634 = vmatmul.bf16.gmra.mxu1 %v15038_v57  ;;  %v17629_v57 = vld [vmem:[#allocation198_spill] sm:$0xff]  ;;  %v9859_v51 = vld [vmem:[#allocation8 + $0x58] sm:$0xf0]  ;;  %v17635_v43 = vld [vmem:[#allocation209_spill] sm:$0xff] }
 0xb24   : > { %v10439_v41 = vld [vmem:[#allocation8 + $0x4c] sm:$0xf]  ;;  %v17644_v8 = vld [vmem:[#allocation253_spill] sm:$0xff] }
 0xb25   : > { %17622 = vst [vmem:[#allocation267_spill] sm:$0xff] %v15285_v25  ;;  %7357 = vmatmul.bf16.gmra.mxu2 %v15281_v22  ;;  %7406 = vmatmul.bf16.gmra.mxu3 %v15283_v34  ;;  %v15323_v17 = vor.u32 %v10439_v41, %v9859_v51  ;;  %v17648_v41 = vld [vmem:[#allocation237_spill] sm:$0xff] }
 0xb26   : > { %7753 = vmatpush.bf16.msra.mxu3 %v17624_v52  ;;  %v17636_v52 = vld [vmem:[#allocation208_spill] sm:$0xff]  ;;  %v17652_v59 = vld [vmem:[#allocation241_spill] sm:$0xff] }
 0xb27   : > { %v7269_v10 = vpop.f32.mrf.mxu3  ;;  %17641 = vst [vmem:[#allocation270_spill] sm:$0xff] %v15323_v17 }
 0xb28   : > { %v15299_v61 = vadd.f32 %v7269_v10, %v7181_v48  ;;  %v7318_v31 = vpop.f32.mrf.mxu2  ;;  %v7508_v36 = vpop.f32.mrf.mxu0  ;;  %v17637_v48 = vpack.c.bf16 %v17635_v43, %v17636_v52  ;;  %v17646_v43 = vld [vmem:[#allocation236_spill] sm:$0xff] }
 0xb29   : > { %v15302_v54 = vadd.f32 %v7318_v31, %v17628_v39  ;;  %v7509_v4 = vadd.f32 %v7508_v36, %v17629_v57  ;;  %v7597_v47 = vpop.f32.mrf.mxu1  ;;  %v17638_v31 = vld [vmem:[#allocation232_spill] sm:$0xff]  ;;  %v17639_v39 = vld [vmem:[#allocation203_spill] sm:$0xff] }
 0xb2a   : > { %7754 = vmatpush.bf16.msra.mxu3 %v17627_v11 }
 0xb2b   : > { %v15305_v19 = vadd.f32 %v7597_v47, %v7509_v4  ;;  %v15321_v47 = vor.u32 %v10473_v9, %v9985_v38 }
 0xb2d   : > { %17630 = vst [vmem:[#allocation43_spill] sm:$0xff] %v15305_v19  ;;  %v9891_v19 = vld [vmem:[#allocation8 + $0x98] sm:$0xf0] }
 0xb2e   : > { %7755 = vmatpush.bf16.msra.mxu3 %v17633_v40  ;;  %17640 = vst [vmem:[#allocation44_spill] sm:$0xff] %v15321_v47  ;;  %v17643_v40 = vld [vmem:[#allocation175_spill] sm:$0xff] }
 0xb2f   : > { %v7271_v12 = vpop.f32.mrf.mxu3 }
 0xb30   : > { %v15315_v18 = vadd.f32 %v7271_v12, %v7183_v1  ;;  %v7320_v11 = vpop.f32.mrf.mxu2  ;;  %v7511_v10 = vpop.f32.mrf.mxu0  ;;  %v17645_v1 = vld [vmem:[#allocation207_spill] sm:$0xff] }
 0xb31   : > { %v15318_v36 = vadd.f32 %v7320_v11, %v17638_v31  ;;  %v7512_v57 = vadd.f32 %v7511_v10, %v17639_v39  ;;  %v7600_v4 = vpop.f32.mrf.mxu1  ;;  %v7186_v52 = vadd.f32 %v17646_v43, %v17645_v1  ;;  %v10001_v10 = vld [vmem:[#allocation8 + $0x168] sm:$0xf]  ;;  %v17650_v31 = vld [vmem:[#allocation212_spill] sm:$0xff] }
 0xb32   : > { %7756 = vmatpush.bf16.msra.mxu3 %v17637_v48  ;;  %v17651_v39 = vld [vmem:[#allocation240_spill] sm:$0xff] }
 0xb33   : > { %v15325_v45 = vadd.f32 %v7600_v4, %v7512_v57  ;;  %7550 = vmatmul.bf16.gmra.mxu0 %v17643_v40  ;;  %7639 = vmatmul.bf16.gmra.mxu1 %v17644_v8  ;;  %v7188_v57 = vadd.f32 %v17651_v39, %v17650_v31  ;;  %v10477_v4 = vld [vmem:[#allocation8 + $0x174] sm:$0xf0]  ;;  %v10443_v40 = vld [vmem:[#allocation8 + $0x6c] sm:$0xf]  ;;  %v9875_v8 = vld [vmem:[#allocation8 + $0x78] sm:$0xf0] }
 0xb34   : > { %v17656_v39 = vld [vmem:[#allocation184_spill] sm:$0xff]  ;;  %v17657_v31 = vld [vmem:[#allocation259_spill] sm:$0xff] }
 0xb35   : > { %17642 = vst [vmem:[#allocation271_spill] sm:$0xff] %v15325_v45  ;;  %7362 = vmatmul.bf16.gmra.mxu2 %v15321_v47  ;;  %7411 = vmatmul.bf16.gmra.mxu3 %v15323_v17  ;;  %v10447_v45 = vld [vmem:[#allocation8 + $0x8c] sm:$0xf] }
 0xb37   : > { %v7274_v48 = vpop.f32.mrf.mxu3 }
 0xb38   : > { %v15333_v12 = vadd.f32 %v7274_v48, %v7186_v52  ;;  %v7323_v38 = vpop.f32.mrf.mxu2  ;;  %v15335_v9 = vpop.f32.mrf.mxu0 }
 0xb39   : > { %17647 = vst [vmem:[#allocation272_spill] sm:$0xff] %v15335_v9  ;;  %v15338_v51 = vadd.f32 %v7323_v38, %v17648_v41  ;;  %v15340_v11 = vpop.f32.mrf.mxu1  ;;  %v15350_v9 = vor.u32 %v10477_v4, %v10001_v10 }
 0xb3a   : > { %17649 = vst [vmem:[#allocation273_spill] sm:$0xff] %v15340_v11  ;;  %v15352_v11 = vor.u32 %v10443_v40, %v9875_v8  ;;  %v17661_v40 = vld [vmem:[#allocation248_spill] sm:$0xff] }
 0xb3b   : > { %17653 = vst [vmem:[#allocation45_spill] sm:$0xff] %v15350_v9 }
 0xb3c   : > { %17654 = vst [vmem:[#allocation46_spill] sm:$0xff] %v15352_v11 }
 0xb3f   : > { %v7276_v46 = vpop.f32.mrf.mxu3 }
 0xb40   : > { %v15344_v43 = vadd.f32 %v7276_v46, %v7188_v57  ;;  %v7325_v52 = vpop.f32.mrf.mxu2  ;;  %v7516_v48 = vpop.f32.mrf.mxu0  ;;  %v17658_v46 = vld [vmem:[#allocation213_spill] sm:$0xff] }
 0xb41   : > { %v15347_v50 = vadd.f32 %v7325_v52, %v17652_v59  ;;  %v7517_v38 = vadd.f32 %v7516_v48, %v17594_v42  ;;  %v7605_v41 = vpop.f32.mrf.mxu1  ;;  %v17659_v59 = vld [vmem:[#allocation245_spill] sm:$0xff] }
 0xb42   : > { %v7191_v57 = vadd.f32 %v17659_v59, %v17658_v46 }
 0xb43   : > { %v15354_v27 = vadd.f32 %v7605_v41, %v7517_v38  ;;  %7555 = vmatmul.bf16.gmra.mxu0 %v17656_v39  ;;  %7644 = vmatmul.bf16.gmra.mxu1 %v17657_v31  ;;  %v10017_v38 = vld [vmem:[#allocation8 + $0x188] sm:$0xf] }
 0xb44   : > { %v17663_v31 = vld [vmem:[#allocation201_spill] sm:$0xff] }
 0xb45   : > { %17655 = vst [vmem:[#allocation276_spill] sm:$0xff] %v15354_v27  ;;  %7367 = vmatmul.bf16.gmra.mxu2 %v15350_v9  ;;  %7416 = vmatmul.bf16.gmra.mxu3 %v15352_v11  ;;  %v17664_v41 = vld [vmem:[#allocation249_spill] sm:$0xff]  ;;  %v10481_v27 = vld [vmem:[#allocation8 + $0x194] sm:$0xf0] }
 0xb46   : > { %v7193_v39 = vadd.f32 %v17664_v41, %v17663_v31  ;;  %v17665_v11 = vld [vmem:[#allocation252_spill] sm:$0xff] }
 0xb47   : > { %v7279_v52 = vpop.f32.mrf.mxu3  ;;  %v17669_v41 = vld [vmem:[#allocation196_spill] sm:$0xff] }
 0xb48   : > { %v15362_v42 = vadd.f32 %v7279_v52, %v7191_v57  ;;  %v7328_v10 = vpop.f32.mrf.mxu2  ;;  %v15364_v4 = vpop.f32.mrf.mxu0  ;;  %v10485_v31 = vld [vmem:[#allocation8 + $0x1b4] sm:$0xf0] }
 0xb49   : > { %17660 = vst [vmem:[#allocation277_spill] sm:$0xff] %v15364_v4  ;;  %v15367_v8 = vadd.f32 %v7328_v10, %v17661_v40  ;;  %v15369_v48 = vpop.f32.mrf.mxu1  ;;  %v15379_v4 = vor.u32 %v10481_v27, %v10017_v38 }
 0xb4a   : > { %17662 = vst [vmem:[#allocation278_spill] sm:$0xff] %v15369_v48  ;;  %v15381_v48 = vor.u32 %v10447_v45, %v9891_v19  ;;  %v17673_v19 = vld [vmem:[#allocation41_spill] sm:$0xff] }
 0xb4b   : > { %17666 = vst [vmem:[#allocation279_spill] sm:$0xff] %v15379_v4 }
 0xb4c   : > { %17667 = vst [vmem:[#allocation193_spill] sm:$0xff] %v15381_v48 }
 0xb4f   : > { %v7281_v25 = vpop.f32.mrf.mxu3 }
 0xb50   : > { %v15373_v59 = vadd.f32 %v7281_v25, %v7193_v39  ;;  %v7330_v57 = vpop.f32.mrf.mxu2  ;;  %v7521_v52 = vpop.f32.mrf.mxu0  ;;  %v17670_v25 = vld [vmem:[#allocation192_spill] sm:$0xff] }
 0xb51   : > { %v15376_v9 = vadd.f32 %v7330_v57, %v17665_v11  ;;  %v7522_v10 = vadd.f32 %v7521_v52, %v17601_v20  ;;  %v7610_v40 = vpop.f32.mrf.mxu1  ;;  %v17671_v11 = vld [vmem:[#allocation255_spill] sm:$0xff] }
 0xb52   : > { %v7196_v39 = vadd.f32 %v17671_v11, %v17670_v25 }
 0xb53   : > { %v15383_v49 = vadd.f32 %v7610_v40, %v7522_v10  ;;  %7560 = vmatmul.bf16.gmra.mxu0 %v17669_v41  ;;  %7649 = vmatmul.bf16.gmra.mxu1 %v15161_v44  ;;  %v10033_v10 = vld [vmem:[#allocation8 + $0x1a8] sm:$0xf] }
 0xb54   : > { %v17675_v44 = vld [vmem:[#allocation210_spill] sm:$0xff] }
 0xb55   : > { %17668 = vst [vmem:[#allocation194_spill] sm:$0xff] %v15383_v49  ;;  %7372 = vmatmul.bf16.gmra.mxu2 %v15379_v4  ;;  %7421 = vmatmul.bf16.gmra.mxu3 %v15381_v48  ;;  %v17676_v40 = vld [vmem:[#allocation42_spill] sm:$0xff]  ;;  %v9907_v48 = vld [vmem:[#allocation8 + $0xb8] sm:$0xf0] }
 0xb56   : > { %v7198_v41 = vadd.f32 %v17676_v40, %v17675_v44  ;;  %v10451_v49 = vld [vmem:[#allocation8 + $0xac] sm:$0xf]  ;;  %v17681_v40 = vld [vmem:[#allocation204_spill] sm:$0xff] }
 0xb57   : > { %v7284_v57 = vpop.f32.mrf.mxu3 }
 0xb58   : > { %v15391_v20 = vadd.f32 %v7284_v57, %v7196_v39  ;;  %v7333_v27 = vpop.f32.mrf.mxu2  ;;  %v15393_v38 = vpop.f32.mrf.mxu0 }
 0xb59   : > { %17672 = vst [vmem:[#allocation282_spill] sm:$0xff] %v15393_v38  ;;  %v15396_v45 = vadd.f32 %v7333_v27, %v17673_v19  ;;  %v15398_v52 = vpop.f32.mrf.mxu1  ;;  %v15408_v38 = vor.u32 %v10485_v31, %v10033_v10 }
 0xb5a   : > { %17674 = vst [vmem:[#allocation283_spill] sm:$0xff] %v15398_v52  ;;  %v15410_v52 = vor.u32 %v10451_v49, %v9907_v48 }
 0xb5b   : > { %17678 = vst [vmem:[#allocation284_spill] sm:$0xff] %v15408_v38 }
 0xb5c   : > { %17679 = vst [vmem:[#allocation285_spill] sm:$0xff] %v15410_v52 }
 0xb5f   : > { %v7286_v4 = vpop.f32.mrf.mxu3 }
 0xb60   : > { %v15402_v11 = vadd.f32 %v7286_v4, %v7198_v41  ;;  %v7335_v39 = vpop.f32.mrf.mxu2  ;;  %v7526_v57 = vpop.f32.mrf.mxu0  ;;  %v17682_v4 = vld [vmem:[#allocation179_spill] sm:$0xff] }
 0xb61   : > { %v15405_v17 = vadd.f32 %v7335_v39, %v17677_v23  ;;  %v7527_v27 = vadd.f32 %v7526_v57, %v17607_v35  ;;  %v7615_v19 = vpop.f32.mrf.mxu1  ;;  %v7201_v23 = vadd.f32 %v15147_v62, %v17682_v4  ;;  %v10049_v39 = vld [vmem:[#allocation8 + $0x1c8] sm:$0xf] }
 0xb63   : > { %v15412_v47 = vadd.f32 %v7615_v19, %v7527_v27  ;;  %7565 = vmatmul.bf16.gmra.mxu0 %v17681_v40  ;;  %7654 = vmatmul.bf16.gmra.mxu1 %v15196_v3  ;;  %v17685_v3 = vld [vmem:[#allocation186_spill] sm:$0xff]  ;;  %v10489_v27 = vld [vmem:[#allocation8 + $0x1d4] sm:$0xf0]  ;;  %v9923_v40 = vld [vmem:[#allocation8 + $0xd8] sm:$0xf0] }
 0xb64   : > { %v7203_v57 = vadd.f32 %v15157_v14, %v17685_v3  ;;  %v10455_v19 = vld [vmem:[#allocation8 + $0xcc] sm:$0xf]  ;;  %v17689_v14 = vld [vmem:[#allocation191_spill] sm:$0xff] }
 0xb65   : > { %17680 = vst [vmem:[#allocation47_spill] sm:$0xff] %v15412_v47  ;;  %7377 = vmatmul.bf16.gmra.mxu2 %v15408_v38  ;;  %7426 = vmatmul.bf16.gmra.mxu3 %v15410_v52 }
 0xb67   : > { %v7289_v41 = vpop.f32.mrf.mxu3 }
 0xb68   : > { %v15420_v35 = vadd.f32 %v7289_v41, %v7201_v23  ;;  %v7338_v31 = vpop.f32.mrf.mxu2  ;;  %v15422_v10 = vpop.f32.mrf.mxu0 }
 0xb69   : > { %17683 = vst [vmem:[#allocation48_spill] sm:$0xff] %v15422_v10  ;;  %v15425_v49 = vadd.f32 %v7338_v31, %v15150_v60  ;;  %v15427_v48 = vpop.f32.mrf.mxu1  ;;  %v15437_v10 = vor.u32 %v10489_v27, %v10049_v39  ;;  %v10065_v27 = vld [vmem:[#allocation8 + $0x1e8] sm:$0xf] }
 0xb6a   : > { %17684 = vst [vmem:[#allocation287_spill] sm:$0xff] %v15427_v48  ;;  %v15439_v48 = vor.u32 %v10455_v19, %v9923_v40  ;;  %v17692_v19 = vld [vmem:[#allocation173_spill] sm:$0xff] }
 0xb6b   : > { %17686 = vst [vmem:[#allocation288_spill] sm:$0xff] %v15437_v10  ;;  %v7208_v40 = vadd.f32 %v15192_v32, %v17692_v19  ;;  %v17694_v32 = vld [vmem:[#allocation169_spill] sm:$0xff] }
 0xb6c   : > { %17687 = vst [vmem:[#allocation289_spill] sm:$0xff] %v15439_v48 }
 0xb6f   : > { %v7291_v44 = vpop.f32.mrf.mxu3 }
 0xb70   : > { %v15431_v62 = vadd.f32 %v7291_v44, %v7203_v57  ;;  %v7340_v23 = vpop.f32.mrf.mxu2  ;;  %v7531_v41 = vpop.f32.mrf.mxu0  ;;  %v7206_v44 = vadd.f32 %v15180_v5, %v17689_v14 }
 0xb71   : > { %v15434_v47 = vadd.f32 %v7340_v23, %v15159_v7  ;;  %v7532_v60 = vadd.f32 %v7531_v41, %v15248_v13  ;;  %v7620_v31 = vpop.f32.mrf.mxu1  ;;  %v10493_v41 = vld [vmem:[#allocation8 + $0x1f4] sm:$0xf0] }
 0xb73   : > { %v15441_v52 = vadd.f32 %v7620_v31, %v7532_v60  ;;  %v10459_v60 = vld [vmem:[#allocation8 + $0xec] sm:$0xf]  ;;  %v9939_v31 = vld [vmem:[#allocation8 + $0xf8] sm:$0xf0] }
 0xb75   : > { %17688 = vst [vmem:[#allocation132_spill] sm:$0xff] %v15441_v52  ;;  %7382 = vmatmul.bf16.gmra.mxu2 %v15437_v10  ;;  %7431 = vmatmul.bf16.gmra.mxu3 %v15439_v48 }
 0xb77   : > { %v7294_v57 = vpop.f32.mrf.mxu3 }
 0xb78   : > { %v15447_v38 = vadd.f32 %v7294_v57, %v7206_v44  ;;  %v7343_v7 = vpop.f32.mrf.mxu2  ;;  %v15449_v23 = vpop.f32.mrf.mxu0 }
 0xb79   : > { %17690 = vst [vmem:[#allocation49_spill] sm:$0xff] %v15449_v23  ;;  %v15452_v13 = vadd.f32 %v7343_v7, %v15182_v33  ;;  %v15454_v39 = vpop.f32.mrf.mxu1  ;;  %v15464_v23 = vor.u32 %v10493_v41, %v10065_v27  ;;  %v17697_v41 = vld [vmem:[#allocation180_spill] sm:$0xff] }
 0xb7a   : > { %17691 = vst [vmem:[#allocation50_spill] sm:$0xff] %v15454_v39  ;;  %v15466_v39 = vor.u32 %v10459_v60, %v9939_v31  ;;  %v7213_v60 = vadd.f32 %v15232_v15, %v17697_v41  ;;  %v10463_v31 = vld [vmem:[#allocation8 + $0x10c] sm:$0xf]  ;;  %v17700_v15 = vld [vmem:[#allocation216_spill] sm:$0xff] }
 0xb7f   : > { %v7296_v52 = vpop.f32.mrf.mxu3 }
 0xb80   : > { %v15458_v5 = vadd.f32 %v7296_v52, %v7208_v40  ;;  %v7345_v44 = vpop.f32.mrf.mxu2  ;;  %v7536_v57 = vpop.f32.mrf.mxu0  ;;  %v7211_v52 = vadd.f32 %v15215_v30, %v17694_v32 }
 0xb81   : > { %v15461_v48 = vadd.f32 %v7345_v44, %v15194_v58  ;;  %v7537_v33 = vadd.f32 %v7536_v57, %v14892_v24  ;;  %v7625_v7 = vpop.f32.mrf.mxu1  ;;  %v9955_v57 = vld [vmem:[#allocation8 + $0x118] sm:$0xf0] }
 0xb83   : > { %v15468_v10 = vadd.f32 %v7625_v7, %v7537_v33 }
 0xb85   : > { %17693 = vst [vmem:[#allocation291_spill] sm:$0xff] %v15468_v10  ;;  %7387 = vmatmul.bf16.gmra.mxu2 %v15464_v23  ;;  %7436 = vmatmul.bf16.gmra.mxu3 %v15466_v39 }
 0xb87   : > { %v7299_v40 = vpop.f32.mrf.mxu3 }
 0xb88   : > { %v15474_v53 = vadd.f32 %v7299_v40, %v7211_v52  ;;  %v7348_v58 = vpop.f32.mrf.mxu2  ;;  %v15476_v44 = vpop.f32.mrf.mxu0 }
 0xb89   : > { %17695 = vst [vmem:[#allocation292_spill] sm:$0xff] %v15476_v44  ;;  %v15479_v24 = vadd.f32 %v7348_v58, %v15217_v28  ;;  %v15481_v27 = vpop.f32.mrf.mxu1  ;;  %v15491_v28 = vor.u32 %v10463_v31, %v9955_v57 }
 0xb8a   : > { %17696 = vst [vmem:[#allocation293_spill] sm:$0xff] %v15481_v27 }
 0xb8b   : > { %17698 = vst [vmem:[#allocation138_spill] sm:$0xff] %v15491_v28 }
 0xb8f   : > { %v7301_v33 = vpop.f32.mrf.mxu3 }
 0xb90   : > { %v15485_v7 = vadd.f32 %v7301_v33, %v7213_v60  ;;  %v7350_v30 = vpop.f32.mrf.mxu2  ;;  %v7541_v10 = vpop.f32.mrf.mxu0 }
 0xb91   : > { %v15488_v52 = vadd.f32 %v7350_v30, %v15234_v16  ;;  %v7542_v40 = vadd.f32 %v7541_v10, %v17645_v1  ;;  %v7630_v44 = vpop.f32.mrf.mxu1  ;;  %v10467_v1 = vld [vmem:[#allocation8 + $0x12c] sm:$0xf]  ;;  %v9971_v10 = vld [vmem:[#allocation8 + $0x138] sm:$0xf0] }
 0xb93   : > { %v15493_v58 = vadd.f32 %v7630_v44, %v7542_v40 }
 0xb95   : > { %17699 = vst [vmem:[#allocation199_spill] sm:$0xff] %v15493_v58  ;;  %7441 = vmatmul.bf16.gmra.mxu3 %v15491_v28  ;;  %7668 = vmatmul.bf16.vlgmr.msra.gmra.mxu2 %v17700_v15  ;;  %v15509_v28 = vor.u32 %v10467_v1, %v9971_v10  ;;  %v10471_v10 = vld [vmem:[#allocation8 + $0x14c] sm:$0xf] }
 0xb98   : > { %v7353_v27 = vpop.f32.mrf.mxu2  ;;  %v7402_v41 = vpop.f32.mrf.mxu3 }
 0xb99   : > { %v15498_v60 = vadd.f32 %v7353_v27, %v15257_v63  ;;  %v7403_v33 = vadd.f32 %v7402_v41, %v15260_v6  ;;  %v15501_v16 = vpop.f32.mrf.mxu0  ;;  %v15503_v30 = vpop.f32.mrf.mxu1  ;;  %v17703_v27 = vld [vmem:[#allocation221_spill] sm:$0xff] }
 0xb9a   : > { %17701 = vst [vmem:[#allocation200_spill] sm:$0xff] %v15501_v16 }
 0xb9b   : > { %17702 = vst [vmem:[#allocation295_spill] sm:$0xff] %v15503_v30  ;;  %10885 = vtanh.f32 %v7403_v33 }
 0xba0   : > { %v7355_v31 = vpop.f32.mrf.mxu2  ;;  %v7404_v44 = vpop.f32.mrf.mxu3 }
 0xba1   : > { %v15506_v57 = vadd.f32 %v7355_v31, %v15275_v2  ;;  %v7405_v40 = vadd.f32 %v7404_v44, %v15278_v29  ;;  %v7546_v15 = vpop.f32.mrf.mxu0  ;;  %v7635_v58 = vpop.f32.mrf.mxu1  ;;  %v9987_v44 = vld [vmem:[#allocation8 + $0x158] sm:$0xf0] }
 0xba2   : > { %v7547_v63 = vadd.f32 %v7546_v15, %v17658_v46  ;;  %v15516_v41 = vpop.eup %10885  ;;  %v15534_v16 = vor.u32 %v10471_v10, %v9987_v44  ;;  %v17711_v44 = vld [vmem:[#allocation244_spill] sm:$0xff] }
 0xba3   : > { %10887 = vtanh.f32 %v7405_v40 }
 0xba4   : > { %v15512_v6 = vadd.f32 %v7635_v58, %v7547_v63  ;;  %v17707_v58 = vld [vmem:[#allocation233_spill] sm:$0xff] }
 0xba5   : > { %7446 = vmatmul.bf16.gmra.mxu3 %v15509_v28  ;;  %7673 = vmatmul.bf16.gmra.mxu2 %v17703_v27 }
 0xba8   : > { %v7358_v2 = vpop.f32.mrf.mxu2  ;;  %v7407_v31 = vpop.f32.mrf.mxu3 }
 0xba9   : > { %v15518_v30 = vpop.eup %10887  ;;  %v15521_v29 = vadd.f32 %v7358_v2, %v15299_v61  ;;  %v7408_v33 = vadd.f32 %v7407_v31, %v15302_v54  ;;  %v15524_v1 = vpop.f32.mrf.mxu0 }
 0xbaa   : > { %17704 = vst [vmem:[#allocation296_spill] sm:$0xff] %v15524_v1  ;;  %v15526_v46 = vpop.f32.mrf.mxu1 }
 0xbab   : > { %17705 = vst [vmem:[#allocation297_spill] sm:$0xff] %v15526_v46  ;;  %10889 = vtanh.f32 %v7408_v33 }
 0xbb0   : > { %v7360_v40 = vpop.f32.mrf.mxu2  ;;  %v7409_v15 = vpop.f32.mrf.mxu3 }
 0xbb1   : > { %v15531_v63 = vadd.f32 %v7360_v40, %v15315_v18  ;;  %v7410_v27 = vadd.f32 %v7409_v15, %v15318_v36  ;;  %v7551_v61 = vpop.f32.mrf.mxu0  ;;  %v15541_v46 = vpop.eup %10889  ;;  %v10475_v15 = vld [vmem:[#allocation8 + $0x16c] sm:$0xf] }
 0xbb2   : > { %v7640_v2 = vpop.f32.mrf.mxu1  ;;  %v7552_v54 = vadd.f32 %v7551_v61, %v17670_v25 }
 0xbb3   : > { %10891 = vtanh.f32 %v7410_v27 }
 0xbb4   : > { %v15537_v31 = vadd.f32 %v7640_v2, %v7552_v54 }
 0xbb5   : > { %7451 = vmatmul.bf16.gmra.mxu3 %v15534_v16  ;;  %7678 = vmatmul.bf16.gmra.mxu2 %v17707_v58  ;;  %v10003_v58 = vld [vmem:[#allocation8 + $0x178] sm:$0xf0] }
 0xbb6   : > { %17706 = vst [vmem:[#allocation144_spill] sm:$0xff] %v15537_v31  ;;  %v15559_v31 = vor.u32 %v10475_v15, %v10003_v58 }
 0xbb8   : > { %v7363_v18 = vpop.f32.mrf.mxu2  ;;  %v7412_v40 = vpop.f32.mrf.mxu3 }
 0xbb9   : > { %v15543_v1 = vpop.eup %10891  ;;  %v15546_v36 = vadd.f32 %v7363_v18, %v15333_v12  ;;  %v7413_v33 = vadd.f32 %v7412_v40, %v15338_v51  ;;  %v15549_v10 = vpop.f32.mrf.mxu0 }
 0xbba   : > { %17708 = vst [vmem:[#allocation51_spill] sm:$0xff] %v15549_v10  ;;  %v15551_v25 = vpop.f32.mrf.mxu1 }
 0xbbb   : > { %17709 = vst [vmem:[#allocation52_spill] sm:$0xff] %v15551_v25  ;;  %10893 = vtanh.f32 %v7413_v33 }
 0xbc0   : > { %v7365_v27 = vpop.f32.mrf.mxu2  ;;  %v7414_v61 = vpop.f32.mrf.mxu3 }
 0xbc1   : > { %v15556_v2 = vadd.f32 %v7365_v27, %v15344_v43  ;;  %v7415_v54 = vadd.f32 %v7414_v61, %v15347_v50  ;;  %v7556_v12 = vpop.f32.mrf.mxu0  ;;  %v15566_v25 = vpop.eup %10893 }
 0xbc2   : > { %v7645_v18 = vpop.f32.mrf.mxu1  ;;  %v7557_v51 = vadd.f32 %v7556_v12, %v17682_v4  ;;  %v10019_v12 = vld [vmem:[#allocation8 + $0x198] sm:$0xf0] }
 0xbc3   : > { %10895 = vtanh.f32 %v7415_v54 }
 0xbc4   : > { %v15562_v40 = vadd.f32 %v7645_v18, %v7557_v51 }
 0xbc5   : > { %7456 = vmatmul.bf16.gmra.mxu3 %v15559_v31  ;;  %7683 = vmatmul.bf16.gmra.mxu2 %v17711_v44  ;;  %v10479_v44 = vld [vmem:[#allocation8 + $0x18c] sm:$0xf] }
 0xbc6   : > { %17710 = vst [vmem:[#allocation299_spill] sm:$0xff] %v15562_v40 }
 0xbc8   : > { %v7368_v43 = vpop.f32.mrf.mxu2  ;;  %v7417_v27 = vpop.f32.mrf.mxu3 }
 0xbc9   : > { %v15568_v10 = vpop.eup %10895  ;;  %v15571_v50 = vadd.f32 %v7368_v43, %v15362_v42  ;;  %v7418_v33 = vadd.f32 %v7417_v27, %v15367_v8  ;;  %v7558_v15 = vpop.f32.mrf.mxu0  ;;  %v15583_v27 = vor.u32 %v10479_v44, %v10019_v12 }
 0xbca   : > { %v7647_v4 = vpop.f32.mrf.mxu1  ;;  %v7559_v58 = vadd.f32 %v7558_v15, %v17685_v3 }
 0xbcb   : > { %10897 = vtanh.f32 %v7418_v33 }
 0xbcc   : > { %v15577_v54 = vadd.f32 %v7647_v4, %v7559_v58  ;;  %v17713_v4 = vld [vmem:[#allocation254_spill] sm:$0xff] }
 0xbd0   : > { %v7370_v18 = vpop.f32.mrf.mxu2  ;;  %v7419_v51 = vpop.f32.mrf.mxu3 }
 0xbd1   : > { %v15580_v40 = vadd.f32 %v7370_v18, %v15373_v59  ;;  %v7420_v42 = vadd.f32 %v7419_v51, %v15376_v9  ;;  %v7561_v43 = vpop.f32.mrf.mxu0  ;;  %v15590_v58 = vpop.eup %10897 }
 0xbd2   : > { %v7650_v8 = vpop.f32.mrf.mxu1  ;;  %v7562_v3 = vadd.f32 %v7561_v43, %v17689_v14  ;;  %v10483_v43 = vld [vmem:[#allocation8 + $0x1ac] sm:$0xf] }
 0xbd3   : > { %10899 = vtanh.f32 %v7420_v42 }
 0xbd4   : > { %v15586_v15 = vadd.f32 %v7650_v8, %v7562_v3  ;;  %v10035_v8 = vld [vmem:[#allocation8 + $0x1b8] sm:$0xf0] }
 0xbd5   : > { %7461 = vmatmul.bf16.gmra.mxu3 %v15583_v27  ;;  %7688 = vmatmul.bf16.gmra.mxu2 %v17713_v4 }
 0xbd6   : > { %17712 = vst [vmem:[#allocation300_spill] sm:$0xff] %v15586_v15 }
 0xbd8   : > { %v7373_v59 = vpop.f32.mrf.mxu2  ;;  %v7422_v18 = vpop.f32.mrf.mxu3 }
 0xbd9   : > { %v15592_v61 = vpop.eup %10899  ;;  %v15595_v9 = vadd.f32 %v7373_v59, %v15391_v20  ;;  %v7423_v33 = vadd.f32 %v7422_v18, %v15396_v45  ;;  %v7563_v44 = vpop.f32.mrf.mxu0  ;;  %v15607_v18 = vor.u32 %v10483_v43, %v10035_v8  ;;  %v10487_v43 = vld [vmem:[#allocation8 + $0x1cc] sm:$0xf]  ;;  %v10051_v8 = vld [vmem:[#allocation8 + $0x1d8] sm:$0xf0] }
 0xbda   : > { %v7652_v14 = vpop.f32.mrf.mxu1  ;;  %v7564_v12 = vadd.f32 %v7563_v44, %v17692_v19 }
 0xbdb   : > { %10901 = vtanh.f32 %v7423_v33 }
 0xbdc   : > { %v15601_v42 = vadd.f32 %v7652_v14, %v7564_v12  ;;  %v17714_v14 = vld [vmem:[#allocation260_spill] sm:$0xff] }
 0xbe0   : > { %v7375_v3 = vpop.f32.mrf.mxu2  ;;  %v7424_v4 = vpop.f32.mrf.mxu3 }
 0xbe1   : > { %v15604_v15 = vadd.f32 %v7375_v3, %v15402_v11  ;;  %v7425_v20 = vadd.f32 %v7424_v4, %v15405_v17  ;;  %v7566_v59 = vpop.f32.mrf.mxu0  ;;  %v15614_v12 = vpop.eup %10901 }
 0xbe2   : > { %v7655_v45 = vpop.f32.mrf.mxu1  ;;  %v7567_v19 = vadd.f32 %v7566_v59, %v17694_v32 }
 0xbe3   : > { %10903 = vtanh.f32 %v7425_v20 }
 0xbe4   : > { %v15610_v44 = vadd.f32 %v7655_v45, %v7567_v19  ;;  %v15628_v19 = vor.u32 %v10487_v43, %v10051_v8 }
 0xbe5   : > { %7466 = vmatmul.bf16.gmra.mxu3 %v15607_v18  ;;  %7693 = vmatmul.bf16.gmra.mxu2 %v17714_v14 }
 0xbe8   : > { %v7378_v11 = vpop.f32.mrf.mxu2  ;;  %v7427_v3 = vpop.f32.mrf.mxu3 }
 0xbe9   : > { %v15616_v51 = vpop.eup %10903  ;;  %v15619_v17 = vadd.f32 %v7378_v11, %v15420_v35  ;;  %v7428_v32 = vadd.f32 %v7427_v3, %v15425_v49 }
 0xbeb   : > { %10905 = vtanh.f32 %v7428_v32 }
 0xbf0   : > { %v7380_v4 = vpop.f32.mrf.mxu2  ;;  %v7429_v20 = vpop.f32.mrf.mxu3 }
 0xbf1   : > { %v15625_v59 = vadd.f32 %v7380_v4, %v15431_v62  ;;  %v7430_v45 = vadd.f32 %v7429_v20, %v15434_v47  ;;  %v10906_v35 = vpop.eup %10905  ;;  %v10491_v4 = vld [vmem:[#allocation8 + $0x1ec] sm:$0xf]  ;;  %v10067_v47 = vld [vmem:[#allocation8 + $0x1f8] sm:$0xf0] }
 0xbf3   : > { %10907 = vtanh.f32 %v7430_v45 }
 0xbf5   : > { %7471 = vmatmul.bf16.gmra.mxu3 %v15628_v19  ;;  %7698 = vmatmul.bf16.gmra.mxu2 %v15164_v56  ;;  %v15640_v56 = vor.u32 %v10491_v4, %v10067_v47 }
 0xbf8   : > { %v7383_v14 = vpop.f32.mrf.mxu2  ;;  %v7432_v49 = vpop.f32.mrf.mxu3 }
 0xbf9   : > { %v10908_v11 = vpop.eup %10907  ;;  %v15633_v3 = vadd.f32 %v7383_v14, %v15447_v38  ;;  %v7433_v62 = vadd.f32 %v7432_v49, %v15452_v13 }
 0xbfa   : > { %v7912_v33 = vpack.c.bf16 %v10908_v11, %v10906_v35 }
 0xbfb   : > { %10909 = vtanh.f32 %v7433_v62 }
 0xc00   : > { %v7385_v43 = vpop.f32.mrf.mxu2  ;;  %v7434_v8 = vpop.f32.mrf.mxu3 }
 0xc01   : > { %v15637_v32 = vadd.f32 %v7385_v43, %v15458_v5  ;;  %v7435_v20 = vadd.f32 %v7434_v8, %v15461_v48  ;;  %v10910_v38 = vpop.eup %10909 }
 0xc03   : > { %10911 = vtanh.f32 %v7435_v20 }
 0xc05   : > { %7476 = vmatmul.bf16.gmra.mxu3 %v15640_v56  ;;  %7703 = vmatmul.bf16.gmra.mxu2 %v15199_v0 }
 0xc08   : > { %v7388_v45 = vpop.f32.mrf.mxu2  ;;  %v7437_v13 = vpop.f32.mrf.mxu3 }
 0xc09   : > { %v10912_v35 = vpop.eup %10911  ;;  %v15645_v14 = vadd.f32 %v7388_v45, %v15474_v53  ;;  %v7438_v5 = vadd.f32 %v7437_v13, %v15479_v24  ;;  %v17715_v24 = vld [vmem:[#allocation261_spill] sm:$0xff] }
 0xc0a   : > { %v7914_v49 = vpack.c.bf16 %v10912_v35, %v10910_v38  ;;  %v17716_v35 = vpack.c.bf16 %v15616_v51, %v15614_v12  ;;  %v17718_v51 = vpack.c.bf16 %v15568_v10, %v15566_v25 }
 0xc0b   : > { %10913 = vtanh.f32 %v7438_v5 }
 0xc10   : > { %v7390_v11 = vpop.f32.mrf.mxu2  ;;  %v7439_v48 = vpop.f32.mrf.mxu3 }
 0xc11   : > { %v15649_v4 = vadd.f32 %v7390_v11, %v15485_v7  ;;  %v7440_v62 = vadd.f32 %v7439_v48, %v15488_v52  ;;  %v10914_v0 = vpop.eup %10913  ;;  %v17719_v11 = vld [vmem:[#allocation188_spill] sm:$0xff] }
 0xc12   : > { %v10073_v48 = vld [vmem:[#allocation10] sm:$0xf] }
 0xc13   : > { %10915 = vtanh.f32 %v7440_v62  ;;  %v17722_v62 = vld [vmem:[#allocation270_spill] sm:$0xff] }
 0xc15   : > { %7708 = vmatmul.bf16.gmra.mxu2 %v15237_v55  ;;  %7757 = vmatmul.bf16.vlgmr.msra.gmra.mxu3 %v15239_v26 }
 0xc18   : > { %v7442_v47 = vpop.f32.mrf.mxu3  ;;  %v7669_v53 = vpop.f32.mrf.mxu2 }
 0xc19   : > { %v10916_v43 = vpop.eup %10915  ;;  %v7443_v8 = vadd.f32 %v7442_v47, %v15498_v60  ;;  %v15656_v20 = vadd.f32 %v7669_v53, %v17715_v24  ;;  %v17723_v47 = vpack.c.bf16 %v15518_v30, %v15516_v41  ;;  %v10081_v30 = vld [vmem:[#allocation10 + $0x10] sm:$0xf]  ;;  %v10497_v41 = vld [vmem:[#allocation10 + $0x14] sm:$0xf0] }
 0xc1a   : > { %v7916_v38 = vpack.c.bf16 %v10916_v43, %v10914_v0 }
 0xc1b   : > { %10917 = vtanh.f32 %v7443_v8 }
 0xc1c   : > { %8126 = vmatpush.bf16.msra.mxu0 %v7916_v38 }
 0xc20   : > { %v7444_v7 = vpop.f32.mrf.mxu3  ;;  %v7671_v45 = vpop.f32.mrf.mxu2  ;;  %8127 = vmatpush.bf16.msra.mxu0 %v7914_v49 }
 0xc21   : > { %v7445_v52 = vadd.f32 %v7444_v7, %v15506_v57  ;;  %v15660_v55 = vadd.f32 %v7671_v45, %v15185_v37  ;;  %v15664_v26 = vpop.eup %10917  ;;  %v17725_v45 = vld [vmem:[#allocation265_spill] sm:$0xff] }
 0xc23   : > { %10919 = vtanh.f32 %v7445_v52 }
 0xc24   : > { %8128 = vmatpush.bf16.msra.mxu0 %v7912_v33 }
 0xc25   : > { %7713 = vmatmul.bf16.gmra.mxu2 %v15281_v22  ;;  %7762 = vmatmul.bf16.gmra.mxu3 %v15283_v34  ;;  %v17717_v34 = vpack.c.bf16 %v15592_v61, %v15590_v58  ;;  %v10495_v61 = vld [vmem:[#allocation10 + $0x4] sm:$0xf0]  ;;  %v17721_v58 = vld [vmem:[#allocation44_spill] sm:$0xff] }
 0xc26   : > { %v15692_v0 = vor.u32 %v10495_v61, %v10073_v48  ;;  %v17729_v61 = vld [vmem:[#allocation43_spill] sm:$0xff]  ;;  %v17738_v22 = vld [vmem:[#allocation132_spill] sm:$0xff] }
 0xc28   : > { %v7447_v60 = vpop.f32.mrf.mxu3  ;;  %v7674_v13 = vpop.f32.mrf.mxu2  ;;  %8129 = vmatpush.bf16.msra.mxu0 %v17716_v35 }
 0xc29   : > { %v15669_v49 = vpop.eup %10919  ;;  %v7448_v37 = vadd.f32 %v7447_v60, %v15521_v29  ;;  %v15673_v57 = vadd.f32 %v7674_v13, %v15204_v21  ;;  %v17720_v21 = vpack.c.bf16 %v15543_v1, %v15541_v46  ;;  %v17724_v46 = vld [vmem:[#allocation264_spill] sm:$0xff]  ;;  %v17727_v60 = vld [vmem:[#allocation46_spill] sm:$0xff]  ;;  %v15714_v13 = vor.u32 %v10497_v41, %v10081_v30 }
 0xc2b   : > { %10921 = vtanh.f32 %v7448_v37 }
 0xc2c   : > { %8130 = vmatpush.bf16.msra.mxu0 %v17717_v34 }
 0xc30   : > { %v7449_v33 = vpop.f32.mrf.mxu3  ;;  %v7676_v5 = vpop.f32.mrf.mxu2  ;;  %8131 = vmatpush.bf16.msra.mxu0 %v17718_v51 }
 0xc31   : > { %v7450_v12 = vadd.f32 %v7449_v33, %v15531_v63  ;;  %v15685_v29 = vadd.f32 %v7676_v5, %v17719_v11  ;;  %v15694_v10 = vpop.eup %10921  ;;  %v17728_v5 = vld [vmem:[#allocation267_spill] sm:$0xff] }
 0xc33   : > { %10923 = vtanh.f32 %v7450_v12 }
 0xc34   : > { %8132 = vmatpush.bf16.msra.mxu0 %v17720_v21 }
 0xc35   : > { %7718 = vmatmul.bf16.gmra.mxu2 %v17721_v58  ;;  %7767 = vmatmul.bf16.gmra.mxu3 %v17722_v62  ;;  %v10089_v62 = vld [vmem:[#allocation10 + $0x20] sm:$0xf] }
 0xc38   : > { %v7452_v63 = vpop.f32.mrf.mxu3  ;;  %v7679_v25 = vpop.f32.mrf.mxu2  ;;  %8133 = vmatpush.bf16.msra.mxu0 %v17723_v47 }
 0xc39   : > { %v15699_v53 = vpop.eup %10923  ;;  %v7453_v1 = vadd.f32 %v7452_v63, %v15546_v36  ;;  %v15703_v43 = vadd.f32 %v7679_v25, %v17724_v46  ;;  %v17726_v36 = vld [vmem:[#allocation45_spill] sm:$0xff] }
 0xc3a   : > { %v10499_v63 = vld [vmem:[#allocation10 + $0x24] sm:$0xf0] }
 0xc3b   : > { %8134 = vmatmul.bf16.vlgmr.msra.gmra.mxu0 %v15692_v0  ;;  %10925 = vtanh.f32 %v7453_v1  ;;  %v17731_v25 = vld [vmem:[#allocation193_spill] sm:$0xff]  ;;  %v15733_v47 = vor.u32 %v10499_v63, %v10089_v62 }
 0xc40   : > { %v7454_v24 = vpop.f32.mrf.mxu3  ;;  %v7681_v38 = vpop.f32.mrf.mxu2 }
 0xc41   : > { %v7455_v7 = vadd.f32 %v7454_v24, %v15556_v2  ;;  %v15710_v52 = vadd.f32 %v7681_v38, %v17725_v45  ;;  %v15716_v35 = vpop.eup %10925 }
 0xc43   : > { %10927 = vtanh.f32 %v7455_v7  ;;  %v17732_v7 = vld [vmem:[#allocation271_spill] sm:$0xff] }
 0xc45   : > { %7723 = vmatmul.bf16.gmra.mxu2 %v17726_v36  ;;  %7772 = vmatmul.bf16.gmra.mxu3 %v17727_v60 }
 0xc48   : > { %v7457_v37 = vpop.f32.mrf.mxu3  ;;  %v7684_v34 = vpop.f32.mrf.mxu2 }
 0xc49   : > { %v15718_v33 = vpop.eup %10927  ;;  %v7458_v2 = vadd.f32 %v7457_v37, %v15571_v50  ;;  %v15722_v51 = vadd.f32 %v7684_v34, %v17728_v5  ;;  %v17730_v50 = vld [vmem:[#allocation279_spill] sm:$0xff] }
 0xc4a   : > { %v7922_v12 = vpack.c.bf16 %v15718_v33, %v15716_v35  ;;  %v10097_v37 = vld [vmem:[#allocation10 + $0x30] sm:$0xf]  ;;  %v10501_v34 = vld [vmem:[#allocation10 + $0x34] sm:$0xf0]  ;;  %v17741_v35 = vpack.c.bf16 %v15669_v49, %v15664_v26  ;;  %v10496_v26 = vld [vmem:[#allocation10 + $0x14] sm:$0xf] }
 0xc4b   : > { %8139 = vmatmul.bf16.gmra.mxu0 %v15714_v13  ;;  %10929 = vtanh.f32 %v7458_v2  ;;  %v17733_v2 = vld [vmem:[#allocation284_spill] sm:$0xff]  ;;  %v15751_v5 = vor.u32 %v10501_v34, %v10097_v37  ;;  %v17742_v33 = vld [vmem:[#allocation199_spill] sm:$0xff] }
 0xc4c   : > { %v10083_v49 = vld [vmem:[#allocation10 + $0x18] sm:$0xf0] }
 0xc50   : > { %v7459_v11 = vpop.f32.mrf.mxu3  ;;  %v7686_v21 = vpop.f32.mrf.mxu2 }
 0xc51   : > { %v7460_v48 = vadd.f32 %v7459_v11, %v15580_v40  ;;  %v15729_v58 = vadd.f32 %v7686_v21, %v17729_v61  ;;  %v15735_v1 = vpop.eup %10929 }
 0xc53   : > { %10931 = vtanh.f32 %v7460_v48 }
 0xc55   : > { %7728 = vmatmul.bf16.gmra.mxu2 %v17730_v50  ;;  %7777 = vmatmul.bf16.gmra.mxu3 %v17731_v25 }
 0xc58   : > { %v7462_v46 = vpop.f32.mrf.mxu3  ;;  %v7689_v24 = vpop.f32.mrf.mxu2 }
 0xc59   : > { %v15737_v38 = vpop.eup %10931  ;;  %v7463_v40 = vadd.f32 %v7462_v46, %v15595_v9  ;;  %v15741_v45 = vadd.f32 %v7689_v24, %v17732_v7  ;;  %v17734_v9 = vld [vmem:[#allocation285_spill] sm:$0xff] }
 0xc5a   : > { %v7924_v30 = vpack.c.bf16 %v15737_v38, %v15735_v1  ;;  %v10105_v46 = vld [vmem:[#allocation10 + $0x40] sm:$0xf]  ;;  %v10503_v24 = vld [vmem:[#allocation10 + $0x44] sm:$0xf0] }
 0xc5b   : > { %8144 = vmatmul.bf16.gmra.mxu0 %v15733_v47  ;;  %10933 = vtanh.f32 %v7463_v40  ;;  %v17735_v40 = vld [vmem:[#allocation288_spill] sm:$0xff]  ;;  %v17736_v7 = vld [vmem:[#allocation289_spill] sm:$0xff] }
 0xc60   : > { %v7464_v41 = vpop.f32.mrf.mxu3  ;;  %v15746_v36 = vpop.f32.mrf.mxu2 }
 0xc61   : > { %v7465_v60 = vadd.f32 %v7464_v41, %v15604_v15  ;;  %v15753_v11 = vpop.eup %10933  ;;  %v15768_v41 = vor.u32 %v10503_v24, %v10105_v46 }
 0xc63   : > { %10935 = vtanh.f32 %v7465_v60 }
 0xc65   : > { %7733 = vmatmul.bf16.gmra.mxu2 %v17733_v2  ;;  %7782 = vmatmul.bf16.gmra.mxu3 %v17734_v9 }
 0xc68   : > { %v7467_v21 = vpop.f32.mrf.mxu3  ;;  %v15755_v48 = vpop.f32.mrf.mxu2 }
 0xc69   : > { %v15757_v61 = vpop.eup %10935  ;;  %v7468_v62 = vadd.f32 %v7467_v21, %v15619_v17 }
 0xc6a   : > { %v7926_v15 = vpack.c.bf16 %v15757_v61, %v15753_v11 }
 0xc6b   : > { %8149 = vmatmul.bf16.gmra.mxu0 %v15751_v5  ;;  %10937 = vtanh.f32 %v7468_v62 }
 0xc70   : > { %v7469_v63 = vpop.f32.mrf.mxu3  ;;  %v15763_v50 = vpop.f32.mrf.mxu2 }
 0xc71   : > { %v7470_v25 = vadd.f32 %v7469_v63, %v15625_v59  ;;  %v10938_v60 = vpop.eup %10937  ;;  %v10113_v63 = vld [vmem:[#allocation10 + $0x50] sm:$0xf] }
 0xc73   : > { %10939 = vtanh.f32 %v7470_v25  ;;  %v10505_v25 = vld [vmem:[#allocation10 + $0x54] sm:$0xf0] }
 0xc74   : > { %v15779_v46 = vor.u32 %v10505_v25, %v10113_v63 }
 0xc75   : > { %7738 = vmatmul.bf16.gmra.mxu2 %v17735_v40  ;;  %7787 = vmatmul.bf16.gmra.mxu3 %v17736_v7 }
 0xc78   : > { %v7472_v37 = vpop.f32.mrf.mxu3  ;;  %v15770_v34 = vpop.f32.mrf.mxu2 }
 0xc79   : > { %v10940_v17 = vpop.eup %10939  ;;  %v7473_v59 = vadd.f32 %v7472_v37, %v15633_v3 }
 0xc7a   : > { %v7928_v2 = vpack.c.bf16 %v10940_v17, %v10938_v60 }
 0xc7b   : > { %8154 = vmatmul.bf16.gmra.mxu0 %v15768_v41  ;;  %10941 = vtanh.f32 %v7473_v59 }
 0xc80   : > { %v7474_v9 = vpop.f32.mrf.mxu3  ;;  %v15774_v21 = vpop.f32.mrf.mxu2 }
 0xc81   : > { %v7475_v62 = vadd.f32 %v7474_v9, %v15637_v32  ;;  %v10942_v24 = vpop.eup %10941  ;;  %v17737_v9 = vld [vmem:[#allocation138_spill] sm:$0xff] }
 0xc83   : > { %10943 = vtanh.f32 %v7475_v62 }
 0xc85   : > { %7743 = vmatmul.bf16.gmra.mxu2 %v15464_v23  ;;  %7792 = vmatmul.bf16.gmra.mxu3 %v15466_v39  ;;  %v10121_v23 = vld [vmem:[#allocation10 + $0x60] sm:$0xf]  ;;  %v10507_v39 = vld [vmem:[#allocation10 + $0x64] sm:$0xf0] }
 0xc86   : > { %v15789_v62 = vor.u32 %v10507_v39, %v10121_v23  ;;  %v10509_v23 = vld [vmem:[#allocation10 + $0x74] sm:$0xf0] }
 0xc88   : > { %v7477_v40 = vpop.f32.mrf.mxu3  ;;  %v15781_v7 = vpop.f32.mrf.mxu2 }
 0xc89   : > { %v10944_v3 = vpop.eup %10943  ;;  %v7478_v32 = vadd.f32 %v7477_v40, %v15645_v14 }
 0xc8a   : > { %v7930_v60 = vpack.c.bf16 %v10944_v3, %v10942_v24 }
 0xc8b   : > { %8159 = vmatmul.bf16.gmra.mxu0 %v15779_v46  ;;  %10945 = vtanh.f32 %v7478_v32 }
 0xc90   : > { %v7479_v37 = vpop.f32.mrf.mxu3  ;;  %v15785_v17 = vpop.f32.mrf.mxu2 }
 0xc91   : > { %v7480_v59 = vadd.f32 %v7479_v37, %v15649_v4  ;;  %v10946_v63 = vpop.eup %10945 }
 0xc93   : > { %10947 = vtanh.f32 %v7480_v59  ;;  %v10129_v59 = vld [vmem:[#allocation10 + $0x70] sm:$0xf] }
 0xc95   : > { %7797 = vmatmul.bf16.gmra.mxu3 %v17737_v9 }
 0xc98   : > { %v7709_v25 = vpop.f32.mrf.mxu2  ;;  %v7758_v24 = vpop.f32.mrf.mxu3 }
 0xc99   : > { %v10948_v3 = vpop.eup %10947  ;;  %v15792_v8 = vadd.f32 %v7709_v25, %v17738_v22  ;;  %v7759_v14 = vadd.f32 %v7758_v24, %v15656_v20  ;;  %v15800_v22 = vor.u32 %v10509_v23, %v10129_v59  ;;  %v10075_v24 = vld [vmem:[#allocation10 + $0x8] sm:$0xf0] }
 0xc9a   : > { %v7932_v40 = vpack.c.bf16 %v10948_v3, %v10946_v63 }
 0xc9b   : > { %8164 = vmatmul.bf16.gmra.mxu0 %v15789_v62  ;;  %10949 = vtanh.f32 %v7759_v14 }
 0xc9c   : > { %8175 = vmatpush.bf16.msra.mxu1 %v7932_v40 }
 0xca0   : > { %v15796_v4 = vpop.f32.mrf.mxu2  ;;  %v7760_v32 = vpop.f32.mrf.mxu3  ;;  %8176 = vmatpush.bf16.msra.mxu1 %v7930_v60 }
 0xca1   : > { %v7761_v37 = vadd.f32 %v7760_v32, %v15660_v55  ;;  %v15802_v20 = vpop.eup %10949  ;;  %v17739_v55 = vld [vmem:[#allocation291_spill] sm:$0xff]  ;;  %v15849_v32 = vor.u32 %v10496_v26, %v10083_v49  ;;  %v10502_v49 = vld [vmem:[#allocation10 + $0x44] sm:$0xf] }
 0xca3   : > { %10951 = vtanh.f32 %v7761_v37  ;;  %17743 = vst [vmem:[#allocation301_spill] sm:$0xff] %v15849_v32 }
 0xca4   : > { %8177 = vmatpush.bf16.msra.mxu1 %v7928_v2 }
 0xca5   : > { %7802 = vmatmul.bf16.gmra.mxu3 %v15509_v28  ;;  %v17754_v28 = vld [vmem:[#allocation197_spill] sm:$0xff] }
 0xca8   : > { %v7714_v39 = vpop.f32.mrf.mxu2  ;;  %v7763_v9 = vpop.f32.mrf.mxu3  ;;  %8178 = vmatpush.bf16.msra.mxu1 %v7926_v15  ;;  %v10494_v15 = vld [vmem:[#allocation10 + $0x4] sm:$0xf] }
 0xca9   : > { %v15807_v60 = vpop.eup %10951  ;;  %v15810_v63 = vadd.f32 %v7714_v39, %v17739_v55  ;;  %v7764_v2 = vadd.f32 %v7763_v9, %v15673_v57  ;;  %v17740_v57 = vpack.c.bf16 %v15699_v53, %v15694_v10  ;;  %v15829_v1 = vor.u32 %v10494_v15, %v10075_v24 }
 0xcab   : > { %8169 = vmatmul.bf16.gmra.mxu0 %v15800_v22  ;;  %10953 = vtanh.f32 %v7764_v2 }
 0xcac   : > { %8179 = vmatpush.bf16.msra.mxu1 %v7924_v30 }
 0xcb0   : > { %v15819_v25 = vpop.f32.mrf.mxu2  ;;  %v7765_v11 = vpop.f32.mrf.mxu3  ;;  %8180 = vmatpush.bf16.msra.mxu1 %v7922_v12 }
 0xcb1   : > { %v7766_v61 = vadd.f32 %v7765_v11, %v15685_v29  ;;  %v15831_v38 = vpop.eup %10953  ;;  %v10498_v11 = vld [vmem:[#allocation10 + $0x24] sm:$0xf] }
 0xcb3   : > { %10955 = vtanh.f32 %v7766_v61  ;;  %v10091_v61 = vld [vmem:[#allocation10 + $0x28] sm:$0xf0] }
 0xcb4   : > { %8181 = vmatpush.bf16.msra.mxu1 %v17740_v57 }
 0xcb5   : > { %7807 = vmatmul.bf16.gmra.mxu3 %v15534_v16  ;;  %v17755_v16 = vld [vmem:[#allocation277_spill] sm:$0xff] }
 0xcb8   : > { %v7719_v30 = vpop.f32.mrf.mxu2  ;;  %v7768_v3 = vpop.f32.mrf.mxu3  ;;  %8182 = vmatpush.bf16.msra.mxu1 %v17741_v35 }
 0xcb9   : > { %v15836_v29 = vpop.eup %10955  ;;  %v15839_v12 = vadd.f32 %v7719_v30, %v17742_v33  ;;  %v7769_v10 = vadd.f32 %v7768_v3, %v15703_v43  ;;  %v17745_v30 = vld [vmem:[#allocation144_spill] sm:$0xff]  ;;  %v10500_v33 = vld [vmem:[#allocation10 + $0x34] sm:$0xf] }
 0xcbb   : > { %8183 = vmatmul.bf16.vlgmr.msra.gmra.mxu1 %v15829_v1  ;;  %10957 = vtanh.f32 %v7769_v10  ;;  %v10099_v10 = vld [vmem:[#allocation10 + $0x38] sm:$0xf0] }
 0xcc0   : > { %v15845_v53 = vpop.f32.mrf.mxu2  ;;  %v7770_v14 = vpop.f32.mrf.mxu3 }
 0xcc1   : > { %v7771_v40 = vadd.f32 %v7770_v14, %v15710_v52  ;;  %v15851_v37 = vpop.eup %10957  ;;  %v15882_v14 = vor.u32 %v10500_v33, %v10099_v10  ;;  %v17752_v33 = vld [vmem:[#allocation48_spill] sm:$0xff]  ;;  %v7519_v52 = vadd.f32 %v17755_v16, %v17754_v28  ;;  %v17761_v28 = vld [vmem:[#allocation194_spill] sm:$0xff] }
 0xcc2   : > { %v7700_v16 = vadd.f32 %v15770_v34, %v17761_v28 }
 0xcc3   : > { %10959 = vtanh.f32 %v7771_v40  ;;  %17746 = vst [vmem:[#allocation53_spill] sm:$0xff] %v15882_v14 }
 0xcc5   : > { %7812 = vmatmul.bf16.gmra.mxu3 %v15559_v31 }
 0xcc8   : > { %v7724_v43 = vpop.f32.mrf.mxu2  ;;  %v7773_v59 = vpop.f32.mrf.mxu3 }
 0xcc9   : > { %v15853_v23 = vpop.eup %10959  ;;  %v15856_v39 = vadd.f32 %v7724_v43, %v15512_v6  ;;  %v7774_v9 = vadd.f32 %v7773_v59, %v15722_v51  ;;  %v15866_v6 = vor.u32 %v10498_v11, %v10091_v61  ;;  %v10107_v43 = vld [vmem:[#allocation10 + $0x48] sm:$0xf0]  ;;  %v17749_v61 = vld [vmem:[#allocation172_spill] sm:$0xff] }
 0xccb   : > { %8188 = vmatmul.bf16.gmra.mxu1 %v15849_v32  ;;  %10961 = vtanh.f32 %v7774_v9  ;;  %17744 = vst [vmem:[#allocation150_spill] sm:$0xff] %v15866_v6 }
 0xcd0   : > { %v15862_v55 = vpop.f32.mrf.mxu2  ;;  %v7775_v31 = vpop.f32.mrf.mxu3 }
 0xcd1   : > { %v7776_v2 = vadd.f32 %v7775_v31, %v15729_v58  ;;  %v15868_v57 = vpop.eup %10961  ;;  %v10504_v31 = vld [vmem:[#allocation10 + $0x54] sm:$0xf] }
 0xcd3   : > { %10963 = vtanh.f32 %v7776_v2  ;;  %v10115_v2 = vld [vmem:[#allocation10 + $0x58] sm:$0xf0] }
 0xcd5   : > { %7817 = vmatmul.bf16.gmra.mxu3 %v15583_v27 }
 0xcd8   : > { %v7729_v51 = vpop.f32.mrf.mxu2  ;;  %v7778_v15 = vpop.f32.mrf.mxu3 }
 0xcd9   : > { %v15870_v24 = vpop.eup %10963  ;;  %v15873_v3 = vadd.f32 %v7729_v51, %v17745_v30  ;;  %v15876_v35 = vadd.f32 %v7778_v15, %v15741_v45  ;;  %v15886_v45 = vor.u32 %v10502_v49, %v10107_v43  ;;  %v17750_v51 = vld [vmem:[#allocation282_spill] sm:$0xff]  ;;  %v17753_v49 = vld [vmem:[#allocation47_spill] sm:$0xff] }
 0xcda   : > { %v7524_v15 = vadd.f32 %v17750_v51, %v17749_v61  ;;  %v17751_v30 = vld [vmem:[#allocation166_spill] sm:$0xff]  ;;  %v7705_v43 = vadd.f32 %v15781_v7, %v17753_v49  ;;  %v15907_v61 = vpop.permute.xlu2 %8028 }
 0xcdb   : > { %8193 = vmatmul.bf16.gmra.mxu1 %v15866_v6  ;;  %17747 = vst [vmem:[#allocation54_spill] sm:$0xff] %v15886_v45  ;;  %v7529_v10 = vadd.f32 %v17752_v33, %v17751_v30  ;;  %v17760_v49 = vld [vmem:[#allocation278_spill] sm:$0xff] }
 0xcdc   : > { %v7608_v32 = vadd.f32 %v17760_v49, %v7519_v52 }
 0xce0   : > { %v7780_v27 = vpop.f32.mrf.mxu3 }
 0xce5   : > { %7822 = vmatmul.bf16.gmra.mxu3 %v15607_v18  ;;  %v15890_v18 = vor.u32 %v10504_v31, %v10115_v2  ;;  %v17757_v2 = vld [vmem:[#allocation287_spill] sm:$0xff] }
 0xce6   : > { %v7618_v58 = vadd.f32 %v17757_v2, %v7529_v10 }
 0xce7   : > { %17748 = vst [vmem:[#allocation303_spill] sm:$0xff] %v15890_v18 }
 0xce8   : > { %v7783_v40 = vpop.f32.mrf.mxu3  ;;  %v7707_v33 = vadd.f32 %v15785_v17, %v7618_v58  ;;  %v17763_v58 = vld [vmem:[#allocation276_spill] sm:$0xff] }
 0xceb   : > { %8198 = vmatmul.bf16.gmra.mxu1 %v15882_v14  ;;  %v17759_v14 = vld [vmem:[#allocation272_spill] sm:$0xff] }
 0xcf0   : > { %v7785_v26 = vpop.f32.mrf.mxu3 }
 0xcf5   : > { %7827 = vmatmul.bf16.gmra.mxu3 %v15628_v19  ;;  %v15897_v19 = vpop.permute.xlu0 %8038 }
 0xcf8   : > { %v7788_v59 = vpop.f32.mrf.mxu3 }
 0xcf9   : > { %v7789_v2 = vadd.f32 %v7788_v59, %v7700_v16 }
 0xcfb   : > { %8203 = vmatmul.bf16.gmra.mxu1 %v15886_v45  ;;  %v15905_v45 = vpop.f32.mrf.mxu0 }
 0xcfd   : > { %v15920_v52 = vpop.permute.xlu0 %8033 }
 0xd00   : > { %v7790_v9 = vpop.f32.mrf.mxu3 }
 0xd05   : > { %7832 = vmatmul.bf16.gmra.mxu3 %v15640_v56  ;;  %v17756_v56 = vld [vmem:[#allocation283_spill] sm:$0xff]  ;;  %v15932_v28 = vpop.permute.xlu0 %8008 }
 0xd06   : > { %v7613_v31 = vadd.f32 %v17756_v56, %v7524_v15  ;;  %v7697_v56 = vadd.f32 %v15763_v50, %v7608_v32  ;;  %v15925_v32 = vpop.permute.xlu2 %8023  ;;  %17765 = vst [vmem:[#allocation305_spill] sm:$0xff] %v15932_v28 }
 0xd08   : > { %v7793_v11 = vpop.f32.mrf.mxu3  ;;  %v7702_v30 = vadd.f32 %v15774_v21, %v7613_v31  ;;  %v10123_v21 = vld [vmem:[#allocation10 + $0x68] sm:$0xf0]  ;;  %v7786_v31 = vadd.f32 %v7785_v26, %v7697_v56  ;;  %v10508_v56 = vld [vmem:[#allocation10 + $0x74] sm:$0xf] }
 0xd09   : > { %v7794_v51 = vadd.f32 %v7793_v11, %v7705_v43  ;;  %v10506_v11 = vld [vmem:[#allocation10 + $0x64] sm:$0xf] }
 0xd0a   : > { %v7791_v15 = vadd.f32 %v7790_v9, %v7702_v30  ;;  %v17762_v43 = vld [vmem:[#allocation273_spill] sm:$0xff] }
 0xd0b   : > { %8208 = vmatmul.bf16.gmra.mxu1 %v15890_v18  ;;  %v17758_v18 = vld [vmem:[#allocation189_spill] sm:$0xff]  ;;  %10965 = vtanh.f32 %v7794_v51  ;;  %v15923_v51 = vor.u32 %v10506_v11, %v10123_v21  ;;  %v15938_v21 = vpop.permute.xlu1 %8043 }
 0xd0c   : > { %v7514_v6 = vadd.f32 %v17759_v14, %v17758_v18  ;;  %v7695_v14 = vadd.f32 %v15755_v48, %v17763_v58  ;;  %v8135_v18 = vpop.f32.mrf.mxu0 }
 0xd0d   : > { %17764 = vst [vmem:[#allocation304_spill] sm:$0xff] %v15923_v51 }
 0xd0e   : > { %v7603_v17 = vadd.f32 %v17762_v43, %v7514_v6  ;;  %v7784_v9 = vadd.f32 %v7783_v40, %v7695_v14  ;;  %v15936_v16 = vpop.permute.xlu2 %7998 }
 0xd0f   : > { %17766 = vst [vmem:[#allocation156_spill] sm:$0xff] %v15936_v16 }
 0xd10   : > { %v7795_v7 = vpop.f32.mrf.mxu3  ;;  %v7692_v34 = vadd.f32 %v15746_v36, %v7603_v17 }
 0xd11   : > { %v7796_v10 = vadd.f32 %v7795_v7, %v7707_v33  ;;  %v10966_v50 = vpop.eup %10965 }
 0xd12   : > { %v7781_v6 = vadd.f32 %v7780_v27, %v7692_v34 }
 0xd13   : > { %10967 = vtanh.f32 %v7796_v10 }
 0xd14   : > { %10969 = vtanh.f32 %v7791_v15  ;;  %v8137_v49 = vpop.f32.mrf.mxu0 }
 0xd15   : > { %10971 = vtanh.f32 %v7789_v2  ;;  %v10131_v2 = vld [vmem:[#allocation10 + $0x78] sm:$0xf0] }
 0xd16   : > { %10973 = vtanh.f32 %v7786_v31  ;;  %v15940_v17 = vor.u32 %v10508_v56, %v10131_v2  ;;  %v15945_v31 = vpop.permute.xlu0 %8003  ;;  %v15948_v34 = vpop.permute.xlu2 %7993 }
 0xd17   : > { %10975 = vtanh.f32 %v7784_v9  ;;  %17768 = vst [vmem:[#allocation309_spill] sm:$0xff] %v15945_v31  ;;  %v17770_v9 = vpack.c.bf16 %v15870_v24, %v15868_v57 }
 0xd18   : > { %v7798_v59 = vpop.f32.mrf.mxu3  ;;  %10977 = vtanh.f32 %v7781_v6  ;;  %17767 = vst [vmem:[#allocation308_spill] sm:$0xff] %v15940_v17 }
 0xd19   : > { %v10968_v30 = vpop.eup %10967  ;;  %v15928_v48 = vadd.f32 %v7798_v59, %v15792_v8  ;;  %10979 = vtanh.f32 %v15876_v35  ;;  %17769 = vst [vmem:[#allocation310_spill] sm:$0xff] %v15948_v34  ;;  %v15955_v59 = vpop.f32.mrf.mxu1 }
 0xd1a   : > { %v7917_v26 = vpack.c.bf16 %v10968_v30, %v10966_v50  ;;  %v10970_v33 = vpop.eup %10969  ;;  %v15953_v50 = vpop.permute.xlu1 %8018 }
 0xd1b   : > { %8213 = vmatmul.bf16.gmra.mxu1 %v15923_v51  ;;  %v10972_v36 = vpop.eup %10971  ;;  %v17789_v51 = vld [vmem:[#allocation297_spill] sm:$0xff] }
 0xd1c   : > { %8224 = vmatpush.bf16.msrb.mxu2 %v7917_v26  ;;  %v7915_v40 = vpack.c.bf16 %v10970_v33, %v10972_v36  ;;  %v10974_v7 = vpop.eup %10973  ;;  %v8140_v58 = vpop.f32.mrf.mxu0  ;;  %v17773_v33 = vpack.c.bf16 %v15836_v29, %v15831_v38 }
 0xd1d   : > { %v10976_v8 = vpop.eup %10975 }
 0xd1e   : > { %v7913_v15 = vpack.c.bf16 %v10974_v7, %v10976_v8  ;;  %v10978_v10 = vpop.eup %10977  ;;  %v15962_v26 = vpop.permute.xlu0 %7978  ;;  %v17775_v7 = vpack.c.bf16 %v15807_v60, %v15802_v20 }
 0xd1f   : > { %v10980_v11 = vpop.eup %10979  ;;  %17772 = vst [vmem:[#allocation311_spill] sm:$0xff] %v15962_v26  ;;  %v15967_v36 = vpop.permute.xlu2 %7968  ;;  %v8141_v60 = vadd.f32 %v8140_v58, %v15962_v26  ;;  %v17782_v26 = vld [vmem:[#allocation210_spill] sm:$0xff] }
 0xd20   : > { %v15934_v27 = vpop.f32.mrf.mxu3  ;;  %8225 = vmatpush.bf16.msrb.mxu2 %v7915_v40  ;;  %v7911_v43 = vpack.c.bf16 %v10978_v10, %v10980_v11  ;;  %17774 = vst [vmem:[#allocation205_spill] sm:$0xff] %v15967_v36  ;;  %v8136_v57 = vadd.f32 %v8135_v18, %v15967_v36 }
 0xd22   : > { %v15976_v8 = vpop.permute.xlu1 %8013 }
 0xd24   : > { %8226 = vmatpush.bf16.msrb.mxu2 %v7913_v15  ;;  %v8142_v6 = vpop.f32.mrf.mxu0 }
 0xd26   : > { %v15979_v29 = vpop.permute.xlu0 %7973 }
 0xd27   : > { %17776 = vst [vmem:[#allocation314_spill] sm:$0xff] %v15979_v29  ;;  %v8138_v15 = vadd.f32 %v8137_v49, %v15979_v29  ;;  %v17783_v29 = vld [vmem:[#allocation51_spill] sm:$0xff] }
 0xd28   : > { %v7803_v35 = vpop.f32.mrf.mxu3  ;;  %8227 = vmatpush.bf16.msrb.mxu2 %v7911_v43  ;;  %v7554_v36 = vadd.f32 %v17783_v29, %v17782_v26 }
 0xd29   : > { %v15943_v14 = vadd.f32 %v7803_v35, %v15810_v63  ;;  %v17771_v63 = vpack.c.bf16 %v15853_v23, %v15851_v37 }
 0xd2a   : > { %v15984_v20 = vpop.permute.xlu1 %7988 }
 0xd2b   : > { %8218 = vmatmul.bf16.gmra.mxu1 %v15940_v17  ;;  %17777 = vst [vmem:[#allocation315_spill] sm:$0xff] %v15984_v20 }
 0xd2c   : > { %8228 = vmatpush.bf16.msrb.mxu2 %v17770_v9  ;;  %v8145_v38 = vpop.f32.mrf.mxu0 }
 0xd30   : > { %v15957_v30 = vpop.f32.mrf.mxu3  ;;  %8229 = vmatpush.bf16.msrb.mxu2 %v17771_v63 }
 0xd32   : > { %v15997_v63 = vpop.permute.xlu1 %7983 }
 0xd33   : > { %17778 = vst [vmem:[#allocation316_spill] sm:$0xff] %v15997_v63  ;;  %v8143_v58 = vadd.f32 %v8142_v6, %v15997_v63 }
 0xd34   : > { %8230 = vmatpush.bf16.msrb.mxu2 %v17773_v33  ;;  %v16000_v33 = vpop.f32.mrf.mxu2 }
 0xd38   : > { %v7808_v24 = vpop.f32.mrf.mxu3  ;;  %v8184_v40 = vpop.f32.mrf.mxu1  ;;  %8231 = vmatpush.bf16.msrb.mxu2 %v17775_v7  ;;  %v8146_v7 = vadd.f32 %v8145_v38, %v15984_v20 }
 0xd39   : > { %v15974_v37 = vadd.f32 %v7808_v24, %v15839_v12  ;;  %v8185_v23 = vadd.f32 %v8184_v40, %v8136_v57  ;;  %v8147_v12 = vpop.f32.mrf.mxu0 }
 0xd3b   : > { %8232 = vmatmul.bf16.vlgmr.msrb.gmra.mxu2 %v15692_v0  ;;  %10981 = vtanh.f32 %v8185_v23 }
 0xd40   : > { %v15982_v18 = vpop.f32.mrf.mxu3  ;;  %v8186_v10 = vpop.f32.mrf.mxu1 }
 0xd41   : > { %v8187_v56 = vadd.f32 %v8186_v10, %v8138_v15  ;;  %v15987_v43 = vpop.eup %10981  ;;  %v8150_v40 = vpop.f32.mrf.mxu0 }
 0xd42   : > { %v7734_v10 = vpop.f32.mrf.mxu2 }
 0xd43   : > { %10983 = vtanh.f32 %v8187_v56 }
 0xd48   : > { %v7813_v2 = vpop.f32.mrf.mxu3  ;;  %v8189_v11 = vpop.f32.mrf.mxu1 }
 0xd49   : > { %v15990_v0 = vadd.f32 %v7813_v2, %v15856_v39  ;;  %v8190_v35 = vadd.f32 %v8189_v11, %v8141_v60  ;;  %v15992_v49 = vpop.eup %10983  ;;  %v8152_v2 = vpop.f32.mrf.mxu0  ;;  %v17779_v11 = vld [vmem:[#allocation299_spill] sm:$0xff] }
 0xd4a   : > { %v7735_v63 = vadd.f32 %v7734_v10, %v17779_v11 }
 0xd4b   : > { %8237 = vmatmul.bf16.gmra.mxu2 %v15714_v13  ;;  %10985 = vtanh.f32 %v8190_v35  ;;  %v8148_v35 = vadd.f32 %v8147_v12, %v15948_v34 }
 0xd50   : > { %v16002_v57 = vpop.f32.mrf.mxu3  ;;  %v8191_v24 = vpop.f32.mrf.mxu1 }
 0xd51   : > { %v8192_v39 = vadd.f32 %v8191_v24, %v8143_v58  ;;  %v16005_v15 = vpop.eup %10985 }
 0xd53   : > { %10987 = vtanh.f32 %v8192_v39  ;;  %v7736_v39 = vpop.f32.mrf.mxu2 }
 0xd58   : > { %v7818_v23 = vpop.f32.mrf.mxu3  ;;  %v8194_v13 = vpop.f32.mrf.mxu1 }
 0xd59   : > { %v16008_v56 = vadd.f32 %v7818_v23, %v15873_v3  ;;  %v8195_v6 = vadd.f32 %v8194_v13, %v8146_v7  ;;  %v16010_v60 = vpop.eup %10987  ;;  %v8155_v3 = vpop.f32.mrf.mxu0  ;;  %v8151_v7 = vadd.f32 %v8150_v40, %v15936_v16  ;;  %v8153_v40 = vadd.f32 %v8152_v2, %v15945_v31 }
 0xd5a   : > { %v8156_v10 = vadd.f32 %v8155_v3, %v15932_v28  ;;  %v17781_v3 = vld [vmem:[#allocation180_spill] sm:$0xff] }
 0xd5b   : > { %8242 = vmatmul.bf16.gmra.mxu2 %v15733_v47  ;;  %10989 = vtanh.f32 %v8195_v6 }
 0xd60   : > { %v16016_v38 = vpop.f32.mrf.mxu3  ;;  %v8196_v58 = vpop.f32.mrf.mxu1 }
 0xd61   : > { %v8197_v24 = vadd.f32 %v8196_v58, %v8148_v35  ;;  %v16019_v9 = vpop.eup %10989  ;;  %v7739_v35 = vpop.f32.mrf.mxu2  ;;  %v7737_v58 = vadd.f32 %v7736_v39, %v15577_v54 }
 0xd63   : > { %10991 = vtanh.f32 %v8197_v24  ;;  %v16029_v24 = vpop.f32.mrf.mxu0 }
 0xd68   : > { %v7823_v23 = vpop.f32.mrf.mxu3  ;;  %v8199_v13 = vpop.f32.mrf.mxu1 }
 0xd69   : > { %v8200_v47 = vadd.f32 %v8199_v13, %v8151_v7  ;;  %v16021_v20 = vpop.eup %10991  ;;  %v7824_v6 = vadd.f32 %v7823_v23, %v7735_v63  ;;  %v7741_v11 = vpop.f32.mrf.mxu2 }
 0xd6b   : > { %8247 = vmatmul.bf16.gmra.mxu2 %v15751_v5  ;;  %10993 = vtanh.f32 %v7824_v6 }
 0xd6c   : > { %10995 = vtanh.f32 %v8200_v47  ;;  %v17780_v47 = vld [vmem:[#allocation300_spill] sm:$0xff] }
 0xd6d   : > { %v7740_v6 = vadd.f32 %v7739_v35, %v17780_v47  ;;  %v7569_v35 = vadd.f32 %v15905_v45, %v17781_v3  ;;  %v17784_v45 = vld [vmem:[#allocation201_spill] sm:$0xff] }
 0xd6f   : > { %v7658_v47 = vadd.f32 %v15955_v59, %v7569_v35 }
 0xd70   : > { %v7825_v16 = vpop.f32.mrf.mxu3  ;;  %v8201_v34 = vpop.f32.mrf.mxu1 }
 0xd71   : > { %v7826_v7 = vadd.f32 %v7825_v16, %v7737_v58  ;;  %v8202_v13 = vadd.f32 %v8201_v34, %v8153_v40  ;;  %v16031_v5 = vpop.eup %10993  ;;  %v16042_v16 = vpop.f32.mrf.mxu0  ;;  %v7742_v40 = vadd.f32 %v7741_v11, %v15601_v42 }
 0xd72   : > { %v16034_v63 = vpop.eup %10995 }
 0xd73   : > { %10997 = vtanh.f32 %v7826_v7 }
 0xd74   : > { %10999 = vtanh.f32 %v8202_v13 }
 0xd78   : > { %v7828_v54 = vpop.f32.mrf.mxu3  ;;  %v8204_v39 = vpop.f32.mrf.mxu1 }
 0xd79   : > { %v16036_v2 = vpop.eup %10997  ;;  %v16038_v23 = vadd.f32 %v8204_v39, %v8156_v10  ;;  %v7829_v58 = vadd.f32 %v7828_v54, %v7740_v6  ;;  %v7744_v39 = vpop.f32.mrf.mxu2 }
 0xd7a   : > { %v16040_v12 = vpop.eup %10999  ;;  %v7929_v34 = vpack.c.bf16 %v16036_v2, %v16031_v5  ;;  %v16053_v28 = vpop.f32.mrf.mxu0  ;;  %v7745_v42 = vadd.f32 %v7744_v39, %v15610_v44  ;;  %v17786_v44 = vld [vmem:[#allocation52_spill] sm:$0xff] }
 0xd7b   : > { %8252 = vmatmul.bf16.gmra.mxu2 %v15768_v41  ;;  %11001 = vtanh.f32 %v7829_v58  ;;  %v7643_v3 = vadd.f32 %v17786_v44, %v7554_v36  ;;  %v17790_v36 = vld [vmem:[#allocation187_spill] sm:$0xff] }
 0xd7d   : > { %v7732_v59 = vadd.f32 %v16000_v33, %v7643_v3  ;;  %v17791_v33 = vld [vmem:[#allocation292_spill] sm:$0xff]  ;;  %v17795_v3 = vld [vmem:[#allocation293_spill] sm:$0xff] }
 0xd7f   : > { %v7821_v29 = vadd.f32 %v16016_v38, %v7732_v59  ;;  %v17793_v38 = vld [vmem:[#allocation266_spill] sm:$0xff] }
 0xd80   : > { %v7830_v7 = vpop.f32.mrf.mxu3  ;;  %v16051_v13 = vpop.f32.mrf.mxu1 }
 0xd81   : > { %v7831_v10 = vadd.f32 %v7830_v7, %v7742_v40  ;;  %v11002_v5 = vpop.eup %11001  ;;  %v7746_v11 = vpop.f32.mrf.mxu2 }
 0xd82   : > { %v16062_v6 = vpop.f32.mrf.mxu0  ;;  %v7747_v40 = vadd.f32 %v7746_v11, %v7658_v47  ;;  %v17788_v11 = vld [vmem:[#allocation200_spill] sm:$0xff] }
 0xd83   : > { %11003 = vtanh.f32 %v7831_v10 }
 0xd88   : > { %v7833_v2 = vpop.f32.mrf.mxu3  ;;  %v16055_v41 = vpop.f32.mrf.mxu1 }
 0xd89   : > { %v11004_v31 = vpop.eup %11003  ;;  %v7834_v58 = vadd.f32 %v7833_v2, %v7745_v42  ;;  %v17787_v42 = vld [vmem:[#allocation212_spill] sm:$0xff] }
 0xd8a   : > { %v7931_v54 = vpack.c.bf16 %v11004_v31, %v11002_v5  ;;  %v8167_v5 = vpop.f32.mrf.mxu0  ;;  %v7544_v47 = vadd.f32 %v17788_v11, %v17787_v42 }
 0xd8b   : > { %8257 = vmatmul.bf16.gmra.mxu2 %v15779_v46  ;;  %11005 = vtanh.f32 %v7834_v58  ;;  %v17785_v46 = vld [vmem:[#allocation296_spill] sm:$0xff] }
 0xd8c   : > { %v7549_v31 = vadd.f32 %v17785_v46, %v17784_v45 }
 0xd8e   : > { %v7638_v26 = vadd.f32 %v17789_v51, %v7549_v31  ;;  %v17794_v31 = vld [vmem:[#allocation49_spill] sm:$0xff] }
 0xd90   : > { %v7835_v7 = vpop.f32.mrf.mxu3  ;;  %v16064_v10 = vpop.f32.mrf.mxu1  ;;  %v7727_v58 = vadd.f32 %v15862_v55, %v7638_v26  ;;  %v7534_v55 = vadd.f32 %v17794_v31, %v17793_v38  ;;  %v8163_v38 = vadd.f32 %v16053_v28, %v15925_v32  ;;  %v8161_v31 = vadd.f32 %v16042_v16, %v15953_v50 }
 0xd91   : > { %v7836_v17 = vadd.f32 %v7835_v7, %v7747_v40  ;;  %v11006_v39 = vpop.eup %11005  ;;  %v7539_v40 = vadd.f32 %v17791_v33, %v17790_v36  ;;  %v17792_v7 = vld [vmem:[#allocation295_spill] sm:$0xff] }
 0xd92   : > { %v7633_v45 = vadd.f32 %v17792_v7, %v7544_v47  ;;  %v7816_v46 = vadd.f32 %v16002_v57, %v7727_v58  ;;  %v17796_v57 = vld [vmem:[#allocation50_spill] sm:$0xff] }
 0xd93   : > { %11007 = vtanh.f32 %v7836_v17 }
 0xd94   : > { %11009 = vtanh.f32 %v7821_v29  ;;  %v7722_v44 = vadd.f32 %v15845_v53, %v7633_v45 }
 0xd95   : > { %11011 = vtanh.f32 %v16008_v56  ;;  %v7623_v56 = vadd.f32 %v17796_v57, %v7534_v55  ;;  %v8212_v55 = vadd.f32 %v16064_v10, %v8163_v38  ;;  %v17797_v57 = vld [vmem:[#allocation301_spill] sm:$0xff] }
 0xd96   : > { %v7811_v59 = vadd.f32 %v15982_v18, %v7722_v44  ;;  %11013 = vtanh.f32 %v7816_v46 }
 0xd97   : > { %11015 = vtanh.f32 %v15990_v0  ;;  %v7712_v26 = vadd.f32 %v15796_v4, %v7623_v56  ;;  %v17799_v56 = vpack.c.bf16 %v16021_v20, %v16019_v9  ;;  %v17805_v20 = vld [vmem:[#allocation303_spill] sm:$0xff]  ;;  %v17806_v9 = vld [vmem:[#allocation304_spill] sm:$0xff] }
 0xd98   : > { %v16072_v2 = vpop.f32.mrf.mxu1  ;;  %11017 = vtanh.f32 %v7811_v59 }
 0xd99   : > { %v11008_v35 = vpop.eup %11007  ;;  %11019 = vtanh.f32 %v15974_v37 }
 0xd9a   : > { %v7933_v17 = vpack.c.bf16 %v11008_v35, %v11006_v39  ;;  %v8170_v39 = vpop.f32.mrf.mxu0  ;;  %v11010_v35 = vpop.eup %11009 }
 0xd9b   : > { %8262 = vmatmul.bf16.gmra.mxu2 %v15789_v62  ;;  %v7628_v62 = vadd.f32 %v17795_v3, %v7539_v40  ;;  %v11012_v53 = vpop.eup %11011  ;;  %v8210_v3 = vadd.f32 %v16055_v41, %v8161_v31  ;;  %v17812_v31 = vld [vmem:[#allocation315_spill] sm:$0xff] }
 0xd9c   : > { %8273 = vmatpush.bf16.msrb.mxu3 %v7933_v17  ;;  %v7927_v11 = vpack.c.bf16 %v11010_v35, %v11012_v53  ;;  %v11014_v47 = vpop.eup %11013 }
 0xd9d   : > { %v7717_v42 = vadd.f32 %v15819_v25, %v7628_v62  ;;  %v11016_v29 = vpop.eup %11015  ;;  %v7801_v25 = vadd.f32 %v15934_v27, %v7712_v26  ;;  %v8168_v27 = vadd.f32 %v8167_v5, %v15920_v52  ;;  %v17807_v26 = vld [vmem:[#allocation308_spill] sm:$0xff] }
 0xd9e   : > { %v7925_v0 = vpack.c.bf16 %v11014_v47, %v11016_v29  ;;  %v17802_v47 = vld [vmem:[#allocation150_spill] sm:$0xff] }
 0xda0   : > { %v8216_v51 = vpop.f32.mrf.mxu1  ;;  %8274 = vmatpush.bf16.msrb.mxu3 %v7931_v54  ;;  %v7806_v54 = vadd.f32 %v15957_v30, %v7717_v42  ;;  %v8171_v30 = vadd.f32 %v8170_v39, %v15897_v19 }
 0xda1   : > { %v8217_v7 = vadd.f32 %v8216_v51, %v8168_v27  ;;  %v8158_v51 = vadd.f32 %v16029_v24, %v15976_v8 }
 0xda2   : > { %11021 = vtanh.f32 %v7806_v54  ;;  %v8172_v17 = vpop.f32.mrf.mxu0  ;;  %v17801_v54 = vpack.c.bf16 %v15992_v49, %v15987_v43 }
 0xda3   : > { %11023 = vtanh.f32 %v15943_v14  ;;  %v8173_v33 = vadd.f32 %v8172_v17, %v15938_v21 }
 0xda4   : > { %8275 = vmatpush.bf16.msrb.mxu3 %v7929_v34  ;;  %v11018_v34 = vpop.eup %11017  ;;  %11025 = vtanh.f32 %v7801_v25 }
 0xda5   : > { %v11020_v58 = vpop.eup %11019  ;;  %11027 = vtanh.f32 %v15928_v48 }
 0xda6   : > { %v7923_v37 = vpack.c.bf16 %v11018_v34, %v11020_v58 }
 0xda8   : > { %v8219_v18 = vpop.f32.mrf.mxu1  ;;  %8276 = vmatpush.bf16.msrb.mxu3 %v7927_v11  ;;  %v11022_v36 = vpop.eup %11021  ;;  %v16130_v11 = vld [vmem:[#allocation11] sm:$0x3] }
 0xda9   : > { %v8220_v4 = vadd.f32 %v8219_v18, %v8171_v30  ;;  %v11024_v14 = vpop.eup %11023  ;;  %v17808_v18 = vld [vmem:[#allocation205_spill] sm:$0xff]  ;;  %v17809_v30 = vld [vmem:[#allocation314_spill] sm:$0xff] }
 0xdaa   : > { %v7921_v46 = vpack.c.bf16 %v11022_v36, %v11024_v14  ;;  %v11026_v44 = vpop.eup %11025 }
 0xdab   : > { %8267 = vmatmul.bf16.gmra.mxu2 %v15800_v22  ;;  %v8166_v22 = vadd.f32 %v16062_v6, %v15907_v61  ;;  %11029 = vtanh.f32 %v8220_v4  ;;  %v11028_v5 = vpop.eup %11027 }
 0xdac   : > { %8277 = vmatpush.bf16.msrb.mxu3 %v7925_v0  ;;  %v7919_v6 = vpack.c.bf16 %v11026_v44, %v11028_v5 }
 0xdad   : > { %v8215_v48 = vadd.f32 %v16072_v2, %v8166_v22  ;;  %v8207_v2 = vadd.f32 %v16051_v13, %v8158_v51 }
 0xdb0   : > { %v8221_v40 = vpop.f32.mrf.mxu1  ;;  %8278 = vmatpush.bf16.msrb.mxu3 %v7923_v37  ;;  %v17810_v37 = vld [vmem:[#allocation311_spill] sm:$0xff] }
 0xdb1   : > { %v8222_v45 = vadd.f32 %v8221_v40, %v8173_v33  ;;  %v11030_v62 = vpop.eup %11029 }
 0xdb3   : > { %11031 = vtanh.f32 %v8222_v45  ;;  %v17811_v45 = vld [vmem:[#allocation316_spill] sm:$0xff] }
 0xdb4   : > { %8279 = vmatpush.bf16.msrb.mxu3 %v7921_v46  ;;  %11033 = vtanh.f32 %v8217_v7 }
 0xdb5   : > { %11035 = vtanh.f32 %v8215_v48 }
 0xdb6   : > { %11037 = vtanh.f32 %v8212_v55 }
 0xdb7   : > { %11039 = vtanh.f32 %v8210_v3 }
 0xdb8   : > { %8280 = vmatpush.bf16.msrb.mxu3 %v7919_v6  ;;  %11041 = vtanh.f32 %v8207_v2 }
 0xdb9   : > { %v11032_v28 = vpop.eup %11031  ;;  %11043 = vtanh.f32 %v16038_v23  ;;  %v17800_v23 = vpack.c.bf16 %v16010_v60, %v16005_v15 }
 0xdba   : > { %v8368_v59 = vpack.c.bf16 %v11032_v28, %v11030_v62  ;;  %v11034_v39 = vpop.eup %11033 }
 0xdbb   : > { %8281 = vmatmul.bf16.vlgmr.msrb.gmra.mxu3 %v15829_v1  ;;  %v11036_v16 = vpop.eup %11035  ;;  %v17798_v1 = vpack.c.bf16 %v16040_v12, %v16034_v63  ;;  %v17803_v12 = vld [vmem:[#allocation53_spill] sm:$0xff]  ;;  %v17804_v63 = vld [vmem:[#allocation54_spill] sm:$0xff] }
 0xdbc   : > { %8377 = vmatpush.bf16.msrb.mxu0 %v8368_v59  ;;  %v8366_v10 = vpack.c.bf16 %v11034_v39, %v11036_v16  ;;  %v11038_v35 = vpop.eup %11037  ;;  %v17813_v39 = vld [vmem:[#allocation310_spill] sm:$0xff] }
 0xdbd   : > { %v11040_v24 = vpop.eup %11039 }
 0xdbe   : > { %v8364_v41 = vpack.c.bf16 %v11038_v35, %v11040_v24  ;;  %v11042_v42 = vpop.eup %11041  ;;  %v8233_v15 = vpop.f32.mrf.mxu2 }
 0xdbf   : > { %v11044_v53 = vpop.eup %11043  ;;  %v8234_v29 = vadd.f32 %v8233_v15, %v17808_v18 }
 0xdc0   : > { %8378 = vmatpush.bf16.msrb.mxu0 %v8366_v10  ;;  %v8362_v13 = vpack.c.bf16 %v11042_v42, %v11044_v53 }
 0xdc4   : > { %8379 = vmatpush.bf16.msrb.mxu0 %v8364_v41  ;;  %v17814_v41 = vld [vmem:[#allocation156_spill] sm:$0xff] }
 0xdc6   : > { %v8235_v60 = vpop.f32.mrf.mxu2 }
 0xdc7   : > { %v8236_v17 = vadd.f32 %v8235_v60, %v17809_v30 }
 0xdc8   : > { %8380 = vmatpush.bf16.msrb.mxu0 %v8362_v13 }
 0xdcb   : > { %8286 = vmatmul.bf16.gmra.mxu3 %v17797_v57 }
 0xdcc   : > { %8381 = vmatpush.bf16.msrb.mxu0 %v17798_v1 }
 0xdce   : > { %v8238_v43 = vpop.f32.mrf.mxu2 }
 0xdcf   : > { %v8239_v36 = vadd.f32 %v8238_v43, %v17810_v37 }
 0xdd0   : > { %8382 = vmatpush.bf16.msrb.mxu0 %v17799_v56 }
 0xdd4   : > { %8383 = vmatpush.bf16.msrb.mxu0 %v17800_v23  ;;  %v17815_v23 = vld [vmem:[#allocation309_spill] sm:$0xff] }
 0xdd6   : > { %v8240_v49 = vpop.f32.mrf.mxu2 }
 0xdd7   : > { %v8241_v46 = vadd.f32 %v8240_v49, %v17811_v45 }
 0xdd8   : > { %8384 = vmatpush.bf16.msrb.mxu0 %v17801_v54 }
 0xddb   : > { %8291 = vmatmul.bf16.gmra.mxu3 %v17802_v47  ;;  %8385 = vmatmul.bf16.vlgmr.msrb.gmra.mxu0 %v16130_v11 }
 0xdde   : > { %v8243_v34 = vpop.f32.mrf.mxu2 }
 0xddf   : > { %v8244_v55 = vadd.f32 %v8243_v34, %v17812_v31 }
 0xde6   : > { %v8245_v33 = vpop.f32.mrf.mxu2 }
 0xde7   : > { %v8246_v16 = vadd.f32 %v8245_v33, %v17813_v39 }
 0xdeb   : > { %8296 = vmatmul.bf16.gmra.mxu3 %v17803_v12 }
 0xdee   : > { %v8248_v48 = vpop.f32.mrf.mxu2 }
 0xdef   : > { %v8249_v42 = vadd.f32 %v8248_v48, %v17814_v41 }
 0xdf6   : > { %v8250_v59 = vpop.f32.mrf.mxu2 }
 0xdf7   : > { %v8251_v54 = vadd.f32 %v8250_v59, %v17815_v23 }
 0xdfb   : > { %8301 = vmatmul.bf16.gmra.mxu3 %v17804_v63 }
 0xdfe   : > { %v8253_v24 = vpop.f32.mrf.mxu2 }
 0xe06   : > { %v8255_v47 = vpop.f32.mrf.mxu2 }
 0xe0b   : > { %8306 = vmatmul.bf16.gmra.mxu3 %v17805_v20  ;;  %v17816_v20 = vld [vmem:[#allocation305_spill] sm:$0xff] }
 0xe0e   : > { %v8258_v49 = vpop.f32.mrf.mxu2 }
 0xe1b   : > { %8311 = vmatmul.bf16.gmra.mxu3 %v17806_v9  ;;  %v8254_v9 = vadd.f32 %v8253_v24, %v17816_v20 }
 0xe2b   : > { %8316 = vmatmul.bf16.gmra.mxu3 %v17807_v26 }
 0xe3e   : > { %v8282_v25 = vpop.f32.mrf.mxu3 }
 0xe3f   : > { %v8283_v0 = vadd.f32 %v8282_v25, %v8234_v29  ;;  %v8260_v25 = vpop.f32.mrf.mxu2 }
 0xe41   : > { %11045 = vtanh.f32 %v8283_v0 }
 0xe46   : > { %v8284_v58 = vpop.f32.mrf.mxu3 }
 0xe47   : > { %v8285_v4 = vadd.f32 %v8284_v58, %v8236_v17  ;;  %v16142_v27 = vpop.eup %11045  ;;  %v8263_v34 = vpop.f32.mrf.mxu2 }
 0xe49   : > { %11047 = vtanh.f32 %v8285_v4 }
 0xe4e   : > { %v8287_v40 = vpop.f32.mrf.mxu3 }
 0xe4f   : > { %v16144_v14 = vpop.eup %11047  ;;  %v8288_v22 = vadd.f32 %v8287_v40, %v8239_v36  ;;  %v8265_v17 = vpop.f32.mrf.mxu2 }
 0xe50   : > { %v8355_v7 = vpack.c.bf16 %v16144_v14, %v16142_v27  ;;  %v8266_v45 = vadd.f32 %v8265_v17, %v15920_v52 }
 0xe51   : > { %11049 = vtanh.f32 %v8288_v22 }
 0xe56   : > { %v8289_v44 = vpop.f32.mrf.mxu3 }
 0xe57   : > { %v8290_v38 = vadd.f32 %v8289_v44, %v8241_v46  ;;  %v16152_v6 = vpop.eup %11049  ;;  %v8268_v37 = vpop.f32.mrf.mxu2 }
 0xe58   : > { %v16149_v5 = vpop.f32.mrf.mxu0  ;;  %v8269_v33 = vadd.f32 %v8268_v37, %v15897_v19  ;;  %v8256_v19 = vadd.f32 %v8255_v47, %v15976_v8 }
 0xe59   : > { %11051 = vtanh.f32 %v8290_v38  ;;  %v8264_v38 = vadd.f32 %v8263_v34, %v15907_v61 }
 0xe5e   : > { %v8292_v51 = vpop.f32.mrf.mxu3 }
 0xe5f   : > { %v16154_v3 = vpop.eup %11051  ;;  %v8293_v62 = vadd.f32 %v8292_v51, %v8244_v55  ;;  %v8270_v40 = vpop.f32.mrf.mxu2  ;;  %v8261_v55 = vadd.f32 %v8260_v25, %v15925_v32 }
 0xe60   : > { %v8357_v28 = vpack.c.bf16 %v16154_v3, %v16152_v6  ;;  %v8388_v2 = vpop.f32.mrf.mxu0  ;;  %v8271_v46 = vadd.f32 %v8270_v40, %v15938_v21 }
 0xe61   : > { %11053 = vtanh.f32 %v8293_v62  ;;  %v8259_v62 = vadd.f32 %v8258_v49, %v15953_v50 }
 0xe66   : > { %v8294_v10 = vpop.f32.mrf.mxu3 }
 0xe67   : > { %v8295_v35 = vadd.f32 %v8294_v10, %v8246_v16  ;;  %v16160_v53 = vpop.eup %11053 }
 0xe69   : > { %11055 = vtanh.f32 %v8295_v35 }
 0xe6e   : > { %v8297_v13 = vpop.f32.mrf.mxu3 }
 0xe6f   : > { %v16162_v57 = vpop.eup %11055  ;;  %v8298_v1 = vadd.f32 %v8297_v13, %v8249_v42  ;;  %v8375_v13 = vpop.permute.xlu1 %8374 }
 0xe70   : > { %v8359_v56 = vpack.c.bf16 %v16162_v57, %v16160_v53  ;;  %v8387_v27 = vadd.f32 %v16149_v5, %v8375_v13 }
 0xe71   : > { %11057 = vtanh.f32 %v8298_v1 }
 0xe76   : > { %v8299_v12 = vpop.f32.mrf.mxu3 }
 0xe77   : > { %v8300_v63 = vadd.f32 %v8299_v12, %v8251_v54  ;;  %v11058_v15 = vpop.eup %11057 }
 0xe79   : > { %11059 = vtanh.f32 %v8300_v63 }
 0xe7e   : > { %v8302_v60 = vpop.f32.mrf.mxu3 }
 0xe7f   : > { %v11060_v26 = vpop.eup %11059  ;;  %v8303_v43 = vadd.f32 %v8302_v60, %v8254_v9 }
 0xe80   : > { %v8361_v18 = vpack.c.bf16 %v11060_v26, %v11058_v15 }
 0xe86   : > { %v8304_v29 = vpop.f32.mrf.mxu3 }
 0xe87   : > { %v8305_v39 = vadd.f32 %v8304_v29, %v8256_v19 }
 0xe8e   : > { %v8307_v0 = vpop.f32.mrf.mxu3 }
 0xe8f   : > { %v8308_v59 = vadd.f32 %v8307_v0, %v8259_v62 }
 0xe96   : > { %v8309_v30 = vpop.f32.mrf.mxu3 }
 0xe97   : > { %v8310_v2 = vadd.f32 %v8309_v30, %v8261_v55 }
 0xe9e   : > { %v8312_v58 = vpop.f32.mrf.mxu3 }
 0xe9f   : > { %v8313_v51 = vadd.f32 %v8312_v58, %v8264_v38 }
 0xea6   : > { %v8314_v4 = vpop.f32.mrf.mxu3 }
 0xea7   : > { %v8315_v48 = vadd.f32 %v8314_v4, %v8266_v45 }
 0xeae   : > { %v8317_v36 = vpop.f32.mrf.mxu3 }
 0xeaf   : > { %v8318_v22 = vadd.f32 %v8317_v36, %v8269_v33 }
 0xeb1   : > { %11061 = vtanh.f32 %v8318_v22 }
 0xeb6   : > { %v8319_v44 = vpop.f32.mrf.mxu3 }
 0xeb7   : > { %v8320_v31 = vadd.f32 %v8319_v44, %v8271_v46  ;;  %v11062_v52 = vpop.eup %11061 }
 0xeb9   : > { %11063 = vtanh.f32 %v8320_v31 }
 0xeba   : > { %11065 = vtanh.f32 %v8315_v48 }
 0xebb   : > { %11067 = vtanh.f32 %v8313_v51 }
 0xebc   : > { %11069 = vtanh.f32 %v8310_v2 }
 0xebd   : > { %11071 = vtanh.f32 %v8308_v59 }
 0xebe   : > { %11073 = vtanh.f32 %v8305_v39 }
 0xebf   : > { %v11064_v21 = vpop.eup %11063  ;;  %11075 = vtanh.f32 %v8303_v43 }
 0xec0   : > { %v8369_v61 = vpack.c.bf16 %v11064_v21, %v11062_v52  ;;  %v11066_v16 = vpop.eup %11065 }
 0xec1   : > { %v11068_v10 = vpop.eup %11067 }
 0xec2   : > { %8390 = vmatpush.bf16.msrb.mxu1 %v8369_v61  ;;  %v8367_v32 = vpack.c.bf16 %v11066_v16, %v11068_v10  ;;  %v11070_v35 = vpop.eup %11069 }
 0xec3   : > { %v11072_v50 = vpop.eup %11071 }
 0xec4   : > { %v8365_v8 = vpack.c.bf16 %v11070_v35, %v11072_v50  ;;  %v11074_v24 = vpop.eup %11073 }
 0xec5   : > { %v11076_v41 = vpop.eup %11075 }
 0xec6   : > { %8391 = vmatpush.bf16.msrb.mxu1 %v8367_v32  ;;  %v8363_v42 = vpack.c.bf16 %v11074_v24, %v11076_v41 }
 0xeca   : > { %8392 = vmatpush.bf16.msrb.mxu1 %v8365_v8 }
 0xece   : > { %8393 = vmatpush.bf16.msrb.mxu1 %v8363_v42 }
 0xed2   : > { %8394 = vmatpush.bf16.msrb.mxu1 %v8361_v18 }
 0xed6   : > { %8395 = vmatpush.bf16.msrb.mxu1 %v8359_v56 }
 0xeda   : > { %8396 = vmatpush.bf16.msrb.mxu1 %v8357_v28 }
 0xede   : > { %8397 = vmatpush.bf16.msrb.mxu1 %v8355_v7 }
 0xee1   : > { %8398 = vmatmul.bf16.vlgmr.msrb.gmra.mxu1 %v16130_v11 }
 0xf5e   : > { %v8399_v53 = vpop.f32.mrf.mxu1 }
 0xf5f   : > { %v8400_v57 = vadd.f32 %v8399_v53, %v8375_v13 }
 0xf61   : > { %v8405_v14 = vrot.slane %v8400_v57, 4 }
 0xf63   : > { %v8407_v11 = vsel %vm8406_vm1, %v8387_v27, %v8405_v14 }
 0xf64   : > { %8409 = vst [vmem:[%s534_s25] sm:$0xff] %v8407_v11 }
 0xf65   : > { %11284 = shalt.err (!%p11281_p0)
}
 0xf66   : > { %10531 = dma.vmem_to_hbm [thread:$0]  (%p11528_p7), %s8427_s13, 128, %s8429_s12, %s8411_s24   ;;  %v8401_v7 = vpop.f32.mrf.mxu1 }
 0xf67 PF: > { %s17821_s7 = sld [smem:[#allocation20_spill]]  ;;  %p10554_p3 = pnand %p8584_p11, %p11473_p6 }
 0xf69   : > { %p10555_p5 = pneg %p10554_p3 }
 0xf6d   : > { %s8440_s26 = sand.u32 1, %s17821_s7  }
 0xf6e   : > { %s8441_s16 = scalar_lea.sflag [#allocation4], %s8440_s26 }
 0xf6f   : > { %11330 = dma.done.wait (%p10555_p5), %s8441_s16, 128  }
 0xf70   : > { %11332 = vsyncadd (%p10555_p5), %s8441_s16, 4294967168  ;;  %s32_s22 = sadd.s32 1, %s11355_s22   ;;  %s17823_s9 = sld [smem:[#allocation21_spill]] }
 0xf71   : > { %p29_p9 = scmp.ge.s32.totalorder %s32_s22, 4   ;;  %s17824_s19 = sld [smem:[#allocation26_spill]] }
 0xf72   : > { %s17825_s23 = sld [smem:[#allocation24_spill]]  ;;  %s17826_s17 = smov %s11339_s18 }
 0xf73   : > { %s17828_s20 = smov %s11351_s21 }
 0xf74   :  { %31 = sbr.rel (!%p29_p9) target bundleno = 16 (0x10), region = 138 }
 0xf76   : > { %s17827_s18 = smov %s17823_s9 }
 0xf78   : > { %s17829_s21 = smov %s17825_s23 }
 0xf79   :  { %8447 = vsyncpa [#allocation3], 1 }
 0xf7a   :  { %8449 = vsyncpa [#allocation3 + $0x1], 1 }
 0xf7b   :  { %8450 = vsyncpa [#allocation6], 1 }
 0xf7c   :  { %8452 = vsyncpa [#allocation6 + $0x1], 1 }
 0xf7d   :  { %8453 = vsyncpa [#allocation9], 1 }
 0xf7e   :  { %8454 = vsyncpa [#allocation12], 1 }
 0xf7f   :  { %8455 = vsyncpa [#allocation4], 1 }
 0xf80   :  { %8457 = vsyncpa [#allocation4 + $0x1], 1 }

</bundles_post_ra>
